<compile_context>
chip_gen: v7x
topology: tpu7x:2x2x1
jax: 0.10.0
libtpu: 0.0.40
codegen_flags: <defaults>
</compile_context>

<pallas_src>
import functools

import jax
import jax.numpy as jnp
from jax.experimental import pallas as pl
from jax.experimental.pallas import tpu as pltpu


def _round_up(x, m):
    return ((x + m - 1) // m) * m


# ----------------------------- Pallas kernels ------------------------------

def _matmul_bias_kernel(a_ref, b_ref, bias_ref, o_ref):
    # Single MXU pass over the full (unsplit) K dimension; bias add fused into
    # the f32 epilogue store.  a/b are bf16, accumulation is f32.
    o_ref[...] = (
        jnp.dot(a_ref[...], b_ref[...], preferred_element_type=jnp.float32)
        + bias_ref[...]
    )


def matmul_bias(a, b, bias):
    """(M,K) @ (K,N) + bias[N] as a single-pass Pallas MXU matmul.

    - K is kept whole inside the block (K <= 576 in this model) -> no reduction
      grid axis, no accumulator scratch, no zero-K padding (only to mult-of-8).
    - M is padded to a multiple of 8 only; large M is split into two 'parallel'
      blocks so both v7x TensorCores get work (whole operand set fits in VMEM).
    - N is padded to a multiple of 128 for lane-dense (unmasked) output stores.
    - A/B are fed to the MXU in bf16; bias/accumulation/output stay f32.
    """
    M, K = a.shape
    K2, N = b.shape
    assert K == K2
    Mp = _round_up(M, 8)
    Kp = _round_up(K, 8)          # tiny safety pad for degenerate K (1, 9)
    Np = _round_up(N, 128)

    # Two M blocks when the problem is large enough (v7x second core), else one.
    if Mp >= 1024 and Mp % 16 == 0:
        tm = Mp // 2
    else:
        tm = Mp

    a_p = a.astype(jnp.bfloat16)
    if Mp != M or Kp != K:
        a_p = jnp.pad(a_p, ((0, Mp - M), (0, Kp - K)))
    b_p = b.astype(jnp.bfloat16)
    if Kp != K or Np != N:
        b_p = jnp.pad(b_p, ((0, Kp - K), (0, Np - N)))
    bias_p = bias.astype(jnp.float32)
    if Np != N:
        bias_p = jnp.pad(bias_p, (0, Np - N))
    bias_p = bias_p.reshape(1, Np)

    out = pl.pallas_call(
        _matmul_bias_kernel,
        out_shape=jax.ShapeDtypeStruct((Mp, Np), jnp.float32),
        grid_spec=pltpu.PrefetchScalarGridSpec(
            num_scalar_prefetch=0,
            grid=(Mp // tm,),
            in_specs=[
                pl.BlockSpec((tm, Kp), lambda i: (i, 0)),
                pl.BlockSpec((Kp, Np), lambda i: (0, 0)),
                pl.BlockSpec((1, Np), lambda i: (0, 0)),
            ],
            out_specs=pl.BlockSpec((tm, Np), lambda i: (i, 0)),
        ),
        compiler_params=pltpu.CompilerParams(
            dimension_semantics=("parallel",),
            vmem_limit_bytes=32 * 1024 * 1024,
        ),
    )(a_p, b_p, bias_p)

    if Mp != M or Np != N:
        out = out[:M, :N]
    return out


def _xt_kernel(x_ref, n_ref, a_ref, b_ref, o_ref):
    # x_t = sqrtab[t] * x + sqrtmab[t] * noise ; a,b are (B,1), broadcast on lanes
    o_ref[...] = a_ref[...] * x_ref[...] + b_ref[...] * n_ref[...]


def diffuse_xt(x, noise, sqrt_ab_t, sqrt_mab_t):
    B, C, H, W = x.shape
    x_f = x.reshape(B, C * H * W).astype(jnp.float32)
    n_f = noise.reshape(B, C * H * W).astype(jnp.float32)
    a = sqrt_ab_t.reshape(B, 1).astype(jnp.float32)
    b = sqrt_mab_t.reshape(B, 1).astype(jnp.float32)
    out = pl.pallas_call(
        _xt_kernel,
        out_shape=jax.ShapeDtypeStruct((B, C * H * W), jnp.float32),
    )(x_f, n_f, a, b)
    return out.reshape(B, C, H, W)


# ------------------------- layer helpers (JAX glue) -------------------------

def gelu(x):
    return jax.nn.gelu(x, approximate=False)


def conv2d_3x3(x, w, b):
    """x: (B,H,W,Cin) NHWC, w: torch layout (Cout,Cin,3,3). Same padding."""
    B, H, W, Cin = x.shape
    Cout = w.shape[0]
    # Build im2col patches directly in bf16 (halves the intermediate HBM bytes).
    # TODO(synk): move the 9-tap gather/accumulation inside the matmul kernel to
    # avoid materializing the 9*Cin-wide patch tensor in HBM at all.
    xp = jnp.pad(x.astype(jnp.bfloat16), ((0, 0), (1, 1), (1, 1), (0, 0)))
    patches = [xp[:, dy:dy + H, dx:dx + W, :]
               for dy in range(3) for dx in range(3)]          # order (dy, dx, cin)
    p = jnp.concatenate(patches, axis=-1)                      # (B,H,W,9*Cin) bf16
    w_m = jnp.transpose(w, (2, 3, 1, 0)).reshape(9 * Cin, Cout)
    y = matmul_bias(p.reshape(B * H * W, 9 * Cin), w_m, b)
    return y.reshape(B, H, W, Cout)


def conv_transpose_2x2(x, w, b):
    """x: (B,H,W,Cin), w: torch layout (Cin,Cout,2,2), stride 2 (no overlap)."""
    B, H, W, Cin = x.shape
    Cout = w.shape[1]
    y = matmul_bias(x.reshape(B * H * W, Cin), w.reshape(Cin, Cout * 4),
                    jnp.repeat(b, 4))
    y = y.reshape(B, H, W, Cout, 2, 2)
    y = jnp.transpose(y, (0, 1, 4, 2, 5, 3)).reshape(B, 2 * H, 2 * W, Cout)
    return y


def conv_transpose_7x7_from_1x1(h, w, b):
    """h: (B,Cin) (spatial 1x1), w: torch layout (Cin,Cout,7,7), stride 7."""
    B, Cin = h.shape
    Cout = w.shape[1]
    y = matmul_bias(h, w.reshape(Cin, Cout * 49), jnp.repeat(b, 49))
    return jnp.transpose(y.reshape(B, Cout, 7, 7), (0, 2, 3, 1))


def batchnorm2d(x, gamma, beta, eps=1e-5):
    # training-mode BatchNorm2d (batch statistics over N,H,W per channel), f32
    # TODO(synk): fuse the affine+GELU application into the matmul epilogue via a
    # two-pass (stats, then apply) kernel to cut the extra HBM round trips.
    mean = x.mean(axis=(0, 1, 2))
    var = x.var(axis=(0, 1, 2))
    return (x - mean) * jax.lax.rsqrt(var + eps) * gamma + beta


def groupnorm(x, groups, gamma, beta, eps=1e-5):
    B, H, W, C = x.shape
    xg = x.reshape(B, H, W, groups, C // groups)
    mean = xg.mean(axis=(1, 2, 4), keepdims=True)
    var = xg.var(axis=(1, 2, 4), keepdims=True)
    xn = ((xg - mean) * jax.lax.rsqrt(var + eps)).reshape(B, H, W, C)
    return xn * gamma + beta


def maxpool2(x):
    B, H, W, C = x.shape
    return x.reshape(B, H // 2, 2, W // 2, 2, C).max(axis=(2, 4))


def res_block(x, p, is_res=False, same_channels=True):
    x1 = gelu(batchnorm2d(conv2d_3x3(x, *p["conv1"]), *p["bn1"]))
    x2 = gelu(batchnorm2d(conv2d_3x3(x1, *p["conv2"]), *p["bn2"]))
    if is_res:
        out = x + x2 if same_channels else x1 + x2
        return out / 1.414
    return x2


def unet_up(x, skip, p):
    h = jnp.concatenate([x, skip], axis=-1)
    h = conv_transpose_2x2(h, *p["convT"])
    h = res_block(h, p["res1"])
    h = res_block(h, p["res2"])
    return h


def embed_fc(t, p):
    x = t.reshape(-1, 1)
    h = gelu(matmul_bias(x, p["lin1"][0].T, p["lin1"][1]))
    return matmul_bias(h, p["lin2"][0].T, p["lin2"][1])


# ------------------------------- UNet forward -------------------------------

def unet_forward(params, x_nchw, t_norm, in_channels, nf):
    x = jnp.transpose(x_nchw, (0, 2, 3, 1))                    # NCHW -> NHWC
    x0 = res_block(x, params["init_conv"], is_res=True,
                   same_channels=(in_channels == nf))          # (B,28,28,nf)
    d1 = maxpool2(res_block(x0, params["down1"]))              # (B,14,14,nf)
    d2 = maxpool2(res_block(d1, params["down2"]))              # (B,7,7,2nf)
    hidden = gelu(d2.mean(axis=(1, 2)))                        # AvgPool2d(7)+GELU -> (B,2nf)
    B = x.shape[0]
    temb1 = embed_fc(t_norm, params["te1"]).reshape(B, 1, 1, 2 * nf)
    temb2 = embed_fc(t_norm, params["te2"]).reshape(B, 1, 1, nf)
    u1 = conv_transpose_7x7_from_1x1(hidden, *params["up0_convT"])
    u1 = jax.nn.relu(groupnorm(u1, 8, *params["up0_gn"]))      # (B,7,7,2nf)
    u2 = unet_up(temb1 * u1, d2, params["up1"])                # (B,14,14,nf)
    u3 = unet_up(temb2 * u2, d1, params["up2"])                # (B,28,28,nf)
    h = jnp.concatenate([u3, x0], axis=-1)                     # (B,28,28,2nf)
    h = jax.nn.relu(groupnorm(conv2d_3x3(h, *params["out_conv1"]),
                              8, *params["out_gn"]))
    out = conv2d_3x3(h, *params["out_conv2"])                  # (B,28,28,in_channels)
    return jnp.transpose(out, (0, 3, 1, 2))                    # back to NCHW


# --------------------------- schedules & parameters --------------------------

def ddpm_schedules(beta1, beta2, T):
    beta_t = (beta2 - beta1) * jnp.arange(0, T + 1, dtype=jnp.float32) / T + beta1
    alpha_t = 1.0 - beta_t
    alphabar_t = jnp.exp(jnp.cumsum(jnp.log(alpha_t)))
    return {"sqrtab": jnp.sqrt(alphabar_t), "sqrtmab": jnp.sqrt(1.0 - alphabar_t)}


def init_params(key, in_channels=1, nf=32):
    keys = iter(jax.random.split(key, 64))

    def conv_p(cin, cout, k=3):
        w = jax.random.normal(next(keys), (cout, cin, k, k), jnp.float32) / jnp.sqrt(cin * k * k)
        b = 0.01 * jax.random.normal(next(keys), (cout,), jnp.float32)
        return (w, b)

    def convT_p(cin, cout, k):
        w = jax.random.normal(next(keys), (cin, cout, k, k), jnp.float32) / jnp.sqrt(cin * k * k)
        b = 0.01 * jax.random.normal(next(keys), (cout,), jnp.float32)
        return (w, b)

    def lin_p(din, dout):
        w = jax.random.normal(next(keys), (dout, din), jnp.float32) / jnp.sqrt(din)
        b = 0.01 * jax.random.normal(next(keys), (dout,), jnp.float32)
        return (w, b)

    def norm_p(c):
        return (jnp.ones((c,), jnp.float32), jnp.zeros((c,), jnp.float32))

    def res_p(cin, cout):
        return {"conv1": conv_p(cin, cout), "bn1": norm_p(cout),
                "conv2": conv_p(cout, cout), "bn2": norm_p(cout)}

    return {
        "init_conv": res_p(in_channels, nf),
        "down1": res_p(nf, nf),
        "down2": res_p(nf, 2 * nf),
        "te1": {"lin1": lin_p(1, 2 * nf), "lin2": lin_p(2 * nf, 2 * nf)},
        "te2": {"lin1": lin_p(1, nf), "lin2": lin_p(nf, nf)},
        "up0_convT": convT_p(2 * nf, 2 * nf, 7),
        "up0_gn": norm_p(2 * nf),
        "up1": {"convT": convT_p(4 * nf, nf, 2), "res1": res_p(nf, nf), "res2": res_p(nf, nf)},
        "up2": {"convT": convT_p(2 * nf, nf, 2), "res1": res_p(nf, nf), "res2": res_p(nf, nf)},
        "out_conv1": conv_p(2 * nf, nf),
        "out_gn": norm_p(nf),
        "out_conv2": conv_p(nf, in_channels),
    }


# ------------------------- MNISTDiffusion.forward ---------------------------

def mnist_diffusion_forward(params, sched, x, t, noise, n_T, in_channels, nf):
    # x_t = sqrtab[t,None,None,None]*x + sqrtmab[t,None,None,None]*noise  (Pallas)
    x_t = diffuse_xt(x, noise, sched["sqrtab"][t], sched["sqrtmab"][t])
    pred = unet_forward(params, x_t, t.astype(jnp.float32) / n_T, in_channels, nf)
    return x_t, noise, pred


# ---------------------------------- main ------------------------------------

if __name__ == "__main__":
    in_channels, nf, n_T, B = 1, 32, 400, 2
    key = jax.random.PRNGKey(0)
    k_param, k_x, k_t, k_noise = jax.random.split(key, 4)

    params = init_params(k_param, in_channels, nf)
    sched = ddpm_schedules(1e-4, 0.02, n_T)

    x = jax.random.normal(k_x, (B, in_channels, 28, 28), jnp.float32)
    t = jax.random.randint(k_t, (B,), 1, n_T + 1)           # t in [1, n_T]
    noise = jax.random.normal(k_noise, x.shape, jnp.float32)

    fwd = jax.jit(functools.partial(mnist_diffusion_forward,
                                    n_T=n_T, in_channels=in_channels, nf=nf))
    x_t, noise_out, pred = fwd(params, sched, x, t, noise)
    jax.block_until_ready((x_t, noise_out, pred))

    assert x_t.shape == (B, in_channels, 28, 28)
    assert noise_out.shape == (B, in_channels, 28, 28)
    assert pred.shape == (B, in_channels, 28, 28)
    assert bool(jnp.all(jnp.isfinite(pred)))
    print("KERNEL_OK")
</pallas_src>

<mosaic_0001>
module attributes {stable_mosaic.version = 11 : i64} {
  func.func @_xt_kernel(%arg0: memref<2x784xf32, #tpu.memory_space<vmem>>, %arg1: memref<2x784xf32, #tpu.memory_space<vmem>>, %arg2: memref<2x1xf32, #tpu.memory_space<vmem>>, %arg3: memref<2x1xf32, #tpu.memory_space<vmem>>, %arg4: memref<2x784xf32, #tpu.memory_space<vmem>>) attributes {dimension_semantics = [], scalar_prefetch = 0 : i64, scratch_operands = 0 : i64, tpu.core_type = #tpu.core_type<tc>} {
    %c0 = arith.constant 0 : index
    %c0_0 = arith.constant 0 : index
    %0 = vector.load %arg2[%c0, %c0_0] : memref<2x1xf32, #tpu.memory_space<vmem>>, vector<2x1xf32>
    %c0_1 = arith.constant 0 : index
    %c0_2 = arith.constant 0 : index
    %1 = vector.load %arg0[%c0_1, %c0_2] : memref<2x784xf32, #tpu.memory_space<vmem>>, vector<2x784xf32>
    %2 = vector.broadcast %0 : vector<2x1xf32> to vector<2x784xf32>
    %3 = arith.mulf %2, %1 : vector<2x784xf32>
    %c0_3 = arith.constant 0 : index
    %c0_4 = arith.constant 0 : index
    %4 = vector.load %arg3[%c0_3, %c0_4] : memref<2x1xf32, #tpu.memory_space<vmem>>, vector<2x1xf32>
    %c0_5 = arith.constant 0 : index
    %c0_6 = arith.constant 0 : index
    %5 = vector.load %arg1[%c0_5, %c0_6] : memref<2x784xf32, #tpu.memory_space<vmem>>, vector<2x784xf32>
    %6 = vector.broadcast %4 : vector<2x1xf32> to vector<2x784xf32>
    %7 = arith.mulf %6, %5 : vector<2x784xf32>
    %8 = arith.addf %3, %7 : vector<2x784xf32>
    %c0_7 = arith.constant 0 : index
    %c0_8 = arith.constant 0 : index
    %9 = vector.load %arg4[%c0_7, %c0_8] : memref<2x784xf32, #tpu.memory_space<vmem>>, vector<2x784xf32>
    tpu.vector_store %arg4[%c0_7, %c0_8], %8 {strides = array<i32>} : memref<2x784xf32, #tpu.memory_space<vmem>>, vector<2x784xf32>,
    return
  }
}

module attributes {stable_mosaic.version = 11 : i64} {
  func.func @_matmul_bias_kernel(%arg0: i32, %arg1: memref<784x16xbf16, #tpu.memory_space<vmem>>, %arg2: memref<16x128xbf16, #tpu.memory_space<vmem>>, %arg3: memref<1x128xf32, #tpu.memory_space<vmem>>, %arg4: memref<784x128xf32, #tpu.memory_space<vmem>>) attributes {dimension_semantics = [#tpu.dimension_semantics<parallel>], iteration_bounds = array<i64: 2>, scalar_prefetch = 0 : i64, scratch_operands = 0 : i64, tpu.core_type = #tpu.core_type<tc>, window_params = [{transform_indices = @transform_0, window_bounds = array<i64: 784, 16>}, {pipeline_mode = #tpu.pipeline_mode<synchronous>, transform_indices = @transform_1, window_bounds = array<i64: 16, 128>}, {pipeline_mode = #tpu.pipeline_mode<synchronous>, transform_indices = @transform_2, window_bounds = array<i64: 1, 128>}, {transform_indices = @transform_3, window_bounds = array<i64: 784, 128>}]} {
    %c0 = arith.constant 0 : index
    %c0_0 = arith.constant 0 : index
    %0 = vector.load %arg1[%c0, %c0_0] : memref<784x16xbf16, #tpu.memory_space<vmem>>, vector<784x16xbf16>
    %c0_1 = arith.constant 0 : index
    %c0_2 = arith.constant 0 : index
    %1 = vector.load %arg2[%c0_1, %c0_2] : memref<16x128xbf16, #tpu.memory_space<vmem>>, vector<16x128xbf16>
    %cst = arith.constant dense<0.000000e+00> : vector<784x128xf32>
    %2 = tpu.matmul %0, %1, %cst {dimension_numbers = #tpu.dot_dimension_numbers<[1], [0], [0], [1], [0, 0, 1, 1], [], []>} : vector<784x16xbf16>, vector<16x128xbf16>, vector<784x128xf32> -> vector<784x128xf32>
    %c0_3 = arith.constant 0 : index
    %c0_4 = arith.constant 0 : index
    %3 = vector.load %arg3[%c0_3, %c0_4] : memref<1x128xf32, #tpu.memory_space<vmem>>, vector<1x128xf32>
    %4 = vector.broadcast %3 : vector<1x128xf32> to vector<784x128xf32>
    %5 = arith.addf %2, %4 : vector<784x128xf32>
    %c0_5 = arith.constant 0 : index
    %c0_6 = arith.constant 0 : index
    %6 = vector.load %arg4[%c0_5, %c0_6] : memref<784x128xf32, #tpu.memory_space<vmem>>, vector<784x128xf32>
    tpu.vector_store %arg4[%c0_5, %c0_6], %5 {strides = array<i32>} : memref<784x128xf32, #tpu.memory_space<vmem>>, vector<784x128xf32>,
    return
  }
  func.func @transform_0(%arg0: i32) -> (i32, i32) {
    %c0_i32 = arith.constant 0 : i32
    %c0_i32_0 = arith.constant 0 : i32
    return %arg0, %c0_i32 : i32, i32
  }
  func.func @transform_1(%arg0: i32) -> (i32, i32) {
    %c0_i32 = arith.constant 0 : i32
    %c0_i32_0 = arith.constant 0 : i32
    %c0_i32_1 = arith.constant 0 : i32
    return %c0_i32, %c0_i32_0 : i32, i32
  }
  func.func @transform_2(%arg0: i32) -> (i32, i32) {
    %c0_i32 = arith.constant 0 : i32
    %c0_i32_0 = arith.constant 0 : i32
    %c0_i32_1 = arith.constant 0 : i32
    return %c0_i32, %c0_i32_0 : i32, i32
  }
  func.func @transform_3(%arg0: i32) -> (i32, i32) {
    %c0_i32 = arith.constant 0 : i32
    %c0_i32_0 = arith.constant 0 : i32
    return %arg0, %c0_i32 : i32, i32
  }
}

module attributes {stable_mosaic.version = 11 : i64} {
  func.func @_matmul_bias_kernel(%arg0: i32, %arg1: memref<784x288xbf16, #tpu.memory_space<vmem>>, %arg2: memref<288x128xbf16, #tpu.memory_space<vmem>>, %arg3: memref<1x128xf32, #tpu.memory_space<vmem>>, %arg4: memref<784x128xf32, #tpu.memory_space<vmem>>) attributes {dimension_semantics = [#tpu.dimension_semantics<parallel>], iteration_bounds = array<i64: 2>, scalar_prefetch = 0 : i64, scratch_operands = 0 : i64, tpu.core_type = #tpu.core_type<tc>, window_params = [{transform_indices = @transform_0, window_bounds = array<i64: 784, 288>}, {pipeline_mode = #tpu.pipeline_mode<synchronous>, transform_indices = @transform_1, window_bounds = array<i64: 288, 128>}, {pipeline_mode = #tpu.pipeline_mode<synchronous>, transform_indices = @transform_2, window_bounds = array<i64: 1, 128>}, {transform_indices = @transform_3, window_bounds = array<i64: 784, 128>}]} {
    %c0 = arith.constant 0 : index
    %c0_0 = arith.constant 0 : index
    %0 = vector.load %arg1[%c0, %c0_0] : memref<784x288xbf16, #tpu.memory_space<vmem>>, vector<784x288xbf16>
    %c0_1 = arith.constant 0 : index
    %c0_2 = arith.constant 0 : index
    %1 = vector.load %arg2[%c0_1, %c0_2] : memref<288x128xbf16, #tpu.memory_space<vmem>>, vector<288x128xbf16>
    %cst = arith.constant dense<0.000000e+00> : vector<784x128xf32>
    %2 = tpu.matmul %0, %1, %cst {dimension_numbers = #tpu.dot_dimension_numbers<[1], [0], [0], [1], [0, 0, 1, 1], [], []>} : vector<784x288xbf16>, vector<288x128xbf16>, vector<784x128xf32> -> vector<784x128xf32>
    %c0_3 = arith.constant 0 : index
    %c0_4 = arith.constant 0 : index
    %3 = vector.load %arg3[%c0_3, %c0_4] : memref<1x128xf32, #tpu.memory_space<vmem>>, vector<1x128xf32>
    %4 = vector.broadcast %3 : vector<1x128xf32> to vector<784x128xf32>
    %5 = arith.addf %2, %4 : vector<784x128xf32>
    %c0_5 = arith.constant 0 : index
    %c0_6 = arith.constant 0 : index
    %6 = vector.load %arg4[%c0_5, %c0_6] : memref<784x128xf32, #tpu.memory_space<vmem>>, vector<784x128xf32>
    tpu.vector_store %arg4[%c0_5, %c0_6], %5 {strides = array<i32>} : memref<784x128xf32, #tpu.memory_space<vmem>>, vector<784x128xf32>,
    return
  }
  func.func @transform_0(%arg0: i32) -> (i32, i32) {
    %c0_i32 = arith.constant 0 : i32
    %c0_i32_0 = arith.constant 0 : i32
    return %arg0, %c0_i32 : i32, i32
  }
  func.func @transform_1(%arg0: i32) -> (i32, i32) {
    %c0_i32 = arith.constant 0 : i32
    %c0_i32_0 = arith.constant 0 : i32
    %c0_i32_1 = arith.constant 0 : i32
    return %c0_i32, %c0_i32_0 : i32, i32
  }
  func.func @transform_2(%arg0: i32) -> (i32, i32) {
    %c0_i32 = arith.constant 0 : i32
    %c0_i32_0 = arith.constant 0 : i32
    %c0_i32_1 = arith.constant 0 : i32
    return %c0_i32, %c0_i32_0 : i32, i32
  }
  func.func @transform_3(%arg0: i32) -> (i32, i32) {
    %c0_i32 = arith.constant 0 : i32
    %c0_i32_0 = arith.constant 0 : i32
    return %arg0, %c0_i32 : i32, i32
  }
}

module attributes {stable_mosaic.version = 11 : i64} {
  func.func @_matmul_bias_kernel(%arg0: i32, %arg1: memref<8x8xbf16, #tpu.memory_space<vmem>>, %arg2: memref<8x128xbf16, #tpu.memory_space<vmem>>, %arg3: memref<1x128xf32, #tpu.memory_space<vmem>>, %arg4: memref<8x128xf32, #tpu.memory_space<vmem>>) attributes {dimension_semantics = [#tpu.dimension_semantics<parallel>], iteration_bounds = array<i64: 1>, scalar_prefetch = 0 : i64, scratch_operands = 0 : i64, tpu.core_type = #tpu.core_type<tc>, window_params = [{transform_indices = @transform_0, window_bounds = array<i64: 8, 8>}, {pipeline_mode = #tpu.pipeline_mode<synchronous>, transform_indices = @transform_1, window_bounds = array<i64: 8, 128>}, {pipeline_mode = #tpu.pipeline_mode<synchronous>, transform_indices = @transform_2, window_bounds = array<i64: 1, 128>}, {transform_indices = @transform_3, window_bounds = array<i64: 8, 128>}]} {
    %c0 = arith.constant 0 : index
    %c0_0 = arith.constant 0 : index
    %0 = vector.load %arg1[%c0, %c0_0] : memref<8x8xbf16, #tpu.memory_space<vmem>>, vector<8x8xbf16>
    %c0_1 = arith.constant 0 : index
    %c0_2 = arith.constant 0 : index
    %1 = vector.load %arg2[%c0_1, %c0_2] : memref<8x128xbf16, #tpu.memory_space<vmem>>, vector<8x128xbf16>
    %cst = arith.constant dense<0.000000e+00> : vector<8x128xf32>
    %2 = tpu.matmul %0, %1, %cst {dimension_numbers = #tpu.dot_dimension_numbers<[1], [0], [0], [1], [0, 0, 1, 1], [], []>} : vector<8x8xbf16>, vector<8x128xbf16>, vector<8x128xf32> -> vector<8x128xf32>
    %c0_3 = arith.constant 0 : index
    %c0_4 = arith.constant 0 : index
    %3 = vector.load %arg3[%c0_3, %c0_4] : memref<1x128xf32, #tpu.memory_space<vmem>>, vector<1x128xf32>
    %4 = vector.broadcast %3 : vector<1x128xf32> to vector<8x128xf32>
    %5 = arith.addf %2, %4 : vector<8x128xf32>
    %c0_5 = arith.constant 0 : index
    %c0_6 = arith.constant 0 : index
    %6 = vector.load %arg4[%c0_5, %c0_6] : memref<8x128xf32, #tpu.memory_space<vmem>>, vector<8x128xf32>
    tpu.vector_store %arg4[%c0_5, %c0_6], %5 {strides = array<i32>} : memref<8x128xf32, #tpu.memory_space<vmem>>, vector<8x128xf32>,
    return
  }
  func.func @transform_0(%arg0: i32) -> (i32, i32) {
    %c0_i32 = arith.constant 0 : i32
    %c0_i32_0 = arith.constant 0 : i32
    return %arg0, %c0_i32 : i32, i32
  }
  func.func @transform_1(%arg0: i32) -> (i32, i32) {
    %c0_i32 = arith.constant 0 : i32
    %c0_i32_0 = arith.constant 0 : i32
    %c0_i32_1 = arith.constant 0 : i32
    return %c0_i32, %c0_i32_0 : i32, i32
  }
  func.func @transform_2(%arg0: i32) -> (i32, i32) {
    %c0_i32 = arith.constant 0 : i32
    %c0_i32_0 = arith.constant 0 : i32
    %c0_i32_1 = arith.constant 0 : i32
    return %c0_i32, %c0_i32_0 : i32, i32
  }
  func.func @transform_3(%arg0: i32) -> (i32, i32) {
    %c0_i32 = arith.constant 0 : i32
    %c0_i32_0 = arith.constant 0 : i32
    return %arg0, %c0_i32 : i32, i32
  }
}

module attributes {stable_mosaic.version = 11 : i64} {
  func.func @_matmul_bias_kernel(%arg0: i32, %arg1: memref<8x32xbf16, #tpu.memory_space<vmem>>, %arg2: memref<32x128xbf16, #tpu.memory_space<vmem>>, %arg3: memref<1x128xf32, #tpu.memory_space<vmem>>, %arg4: memref<8x128xf32, #tpu.memory_space<vmem>>) attributes {dimension_semantics = [#tpu.dimension_semantics<parallel>], iteration_bounds = array<i64: 1>, scalar_prefetch = 0 : i64, scratch_operands = 0 : i64, tpu.core_type = #tpu.core_type<tc>, window_params = [{transform_indices = @transform_0, window_bounds = array<i64: 8, 32>}, {pipeline_mode = #tpu.pipeline_mode<synchronous>, transform_indices = @transform_1, window_bounds = array<i64: 32, 128>}, {pipeline_mode = #tpu.pipeline_mode<synchronous>, transform_indices = @transform_2, window_bounds = array<i64: 1, 128>}, {transform_indices = @transform_3, window_bounds = array<i64: 8, 128>}]} {
    %c0 = arith.constant 0 : index
    %c0_0 = arith.constant 0 : index
    %0 = vector.load %arg1[%c0, %c0_0] : memref<8x32xbf16, #tpu.memory_space<vmem>>, vector<8x32xbf16>
    %c0_1 = arith.constant 0 : index
    %c0_2 = arith.constant 0 : index
    %1 = vector.load %arg2[%c0_1, %c0_2] : memref<32x128xbf16, #tpu.memory_space<vmem>>, vector<32x128xbf16>
    %cst = arith.constant dense<0.000000e+00> : vector<8x128xf32>
    %2 = tpu.matmul %0, %1, %cst {dimension_numbers = #tpu.dot_dimension_numbers<[1], [0], [0], [1], [0, 0, 1, 1], [], []>} : vector<8x32xbf16>, vector<32x128xbf16>, vector<8x128xf32> -> vector<8x128xf32>
    %c0_3 = arith.constant 0 : index
    %c0_4 = arith.constant 0 : index
    %3 = vector.load %arg3[%c0_3, %c0_4] : memref<1x128xf32, #tpu.memory_space<vmem>>, vector<1x128xf32>
    %4 = vector.broadcast %3 : vector<1x128xf32> to vector<8x128xf32>
    %5 = arith.addf %2, %4 : vector<8x128xf32>
    %c0_5 = arith.constant 0 : index
    %c0_6 = arith.constant 0 : index
    %6 = vector.load %arg4[%c0_5, %c0_6] : memref<8x128xf32, #tpu.memory_space<vmem>>, vector<8x128xf32>
    tpu.vector_store %arg4[%c0_5, %c0_6], %5 {strides = array<i32>} : memref<8x128xf32, #tpu.memory_space<vmem>>, vector<8x128xf32>,
    return
  }
  func.func @transform_0(%arg0: i32) -> (i32, i32) {
    %c0_i32 = arith.constant 0 : i32
    %c0_i32_0 = arith.constant 0 : i32
    return %arg0, %c0_i32 : i32, i32
  }
  func.func @transform_1(%arg0: i32) -> (i32, i32) {
    %c0_i32 = arith.constant 0 : i32
    %c0_i32_0 = arith.constant 0 : i32
    %c0_i32_1 = arith.constant 0 : i32
    return %c0_i32, %c0_i32_0 : i32, i32
  }
  func.func @transform_2(%arg0: i32) -> (i32, i32) {
    %c0_i32 = arith.constant 0 : i32
    %c0_i32_0 = arith.constant 0 : i32
    %c0_i32_1 = arith.constant 0 : i32
    return %c0_i32, %c0_i32_0 : i32, i32
  }
  func.func @transform_3(%arg0: i32) -> (i32, i32) {
    %c0_i32 = arith.constant 0 : i32
    %c0_i32_0 = arith.constant 0 : i32
    return %arg0, %c0_i32 : i32, i32
  }
}

module attributes {stable_mosaic.version = 11 : i64} {
  func.func @_matmul_bias_kernel(%arg0: i32, %arg1: memref<392x288xbf16, #tpu.memory_space<vmem>>, %arg2: memref<288x128xbf16, #tpu.memory_space<vmem>>, %arg3: memref<1x128xf32, #tpu.memory_space<vmem>>, %arg4: memref<392x128xf32, #tpu.memory_space<vmem>>) attributes {dimension_semantics = [#tpu.dimension_semantics<parallel>], iteration_bounds = array<i64: 1>, scalar_prefetch = 0 : i64, scratch_operands = 0 : i64, tpu.core_type = #tpu.core_type<tc>, window_params = [{transform_indices = @transform_0, window_bounds = array<i64: 392, 288>}, {pipeline_mode = #tpu.pipeline_mode<synchronous>, transform_indices = @transform_1, window_bounds = array<i64: 288, 128>}, {pipeline_mode = #tpu.pipeline_mode<synchronous>, transform_indices = @transform_2, window_bounds = array<i64: 1, 128>}, {transform_indices = @transform_3, window_bounds = array<i64: 392, 128>}]} {
    %c0 = arith.constant 0 : index
    %c0_0 = arith.constant 0 : index
    %0 = vector.load %arg1[%c0, %c0_0] : memref<392x288xbf16, #tpu.memory_space<vmem>>, vector<392x288xbf16>
    %c0_1 = arith.constant 0 : index
    %c0_2 = arith.constant 0 : index
    %1 = vector.load %arg2[%c0_1, %c0_2] : memref<288x128xbf16, #tpu.memory_space<vmem>>, vector<288x128xbf16>
    %cst = arith.constant dense<0.000000e+00> : vector<392x128xf32>
    %2 = tpu.matmul %0, %1, %cst {dimension_numbers = #tpu.dot_dimension_numbers<[1], [0], [0], [1], [0, 0, 1, 1], [], []>} : vector<392x288xbf16>, vector<288x128xbf16>, vector<392x128xf32> -> vector<392x128xf32>
    %c0_3 = arith.constant 0 : index
    %c0_4 = arith.constant 0 : index
    %3 = vector.load %arg3[%c0_3, %c0_4] : memref<1x128xf32, #tpu.memory_space<vmem>>, vector<1x128xf32>
    %4 = vector.broadcast %3 : vector<1x128xf32> to vector<392x128xf32>
    %5 = arith.addf %2, %4 : vector<392x128xf32>
    %c0_5 = arith.constant 0 : index
    %c0_6 = arith.constant 0 : index
    %6 = vector.load %arg4[%c0_5, %c0_6] : memref<392x128xf32, #tpu.memory_space<vmem>>, vector<392x128xf32>
    tpu.vector_store %arg4[%c0_5, %c0_6], %5 {strides = array<i32>} : memref<392x128xf32, #tpu.memory_space<vmem>>, vector<392x128xf32>,
    return
  }
  func.func @transform_0(%arg0: i32) -> (i32, i32) {
    %c0_i32 = arith.constant 0 : i32
    %c0_i32_0 = arith.constant 0 : i32
    return %arg0, %c0_i32 : i32, i32
  }
  func.func @transform_1(%arg0: i32) -> (i32, i32) {
    %c0_i32 = arith.constant 0 : i32
    %c0_i32_0 = arith.constant 0 : i32
    %c0_i32_1 = arith.constant 0 : i32
    return %c0_i32, %c0_i32_0 : i32, i32
  }
  func.func @transform_2(%arg0: i32) -> (i32, i32) {
    %c0_i32 = arith.constant 0 : i32
    %c0_i32_0 = arith.constant 0 : i32
    %c0_i32_1 = arith.constant 0 : i32
    return %c0_i32, %c0_i32_0 : i32, i32
  }
  func.func @transform_3(%arg0: i32) -> (i32, i32) {
    %c0_i32 = arith.constant 0 : i32
    %c0_i32_0 = arith.constant 0 : i32
    return %arg0, %c0_i32 : i32, i32
  }
}

module attributes {stable_mosaic.version = 11 : i64} {
  func.func @_matmul_bias_kernel(%arg0: i32, %arg1: memref<392x576xbf16, #tpu.memory_space<vmem>>, %arg2: memref<576x128xbf16, #tpu.memory_space<vmem>>, %arg3: memref<1x128xf32, #tpu.memory_space<vmem>>, %arg4: memref<392x128xf32, #tpu.memory_space<vmem>>) attributes {dimension_semantics = [#tpu.dimension_semantics<parallel>], iteration_bounds = array<i64: 1>, scalar_prefetch = 0 : i64, scratch_operands = 0 : i64, tpu.core_type = #tpu.core_type<tc>, window_params = [{transform_indices = @transform_0, window_bounds = array<i64: 392, 576>}, {pipeline_mode = #tpu.pipeline_mode<synchronous>, transform_indices = @transform_1, window_bounds = array<i64: 576, 128>}, {pipeline_mode = #tpu.pipeline_mode<synchronous>, transform_indices = @transform_2, window_bounds = array<i64: 1, 128>}, {transform_indices = @transform_3, window_bounds = array<i64: 392, 128>}]} {
    %c0 = arith.constant 0 : index
    %c0_0 = arith.constant 0 : index
    %0 = vector.load %arg1[%c0, %c0_0] : memref<392x576xbf16, #tpu.memory_space<vmem>>, vector<392x576xbf16>
    %c0_1 = arith.constant 0 : index
    %c0_2 = arith.constant 0 : index
    %1 = vector.load %arg2[%c0_1, %c0_2] : memref<576x128xbf16, #tpu.memory_space<vmem>>, vector<576x128xbf16>
    %cst = arith.constant dense<0.000000e+00> : vector<392x128xf32>
    %2 = tpu.matmul %0, %1, %cst {dimension_numbers = #tpu.dot_dimension_numbers<[1], [0], [0], [1], [0, 0, 1, 1], [], []>} : vector<392x576xbf16>, vector<576x128xbf16>, vector<392x128xf32> -> vector<392x128xf32>
    %c0_3 = arith.constant 0 : index
    %c0_4 = arith.constant 0 : index
    %3 = vector.load %arg3[%c0_3, %c0_4] : memref<1x128xf32, #tpu.memory_space<vmem>>, vector<1x128xf32>
    %4 = vector.broadcast %3 : vector<1x128xf32> to vector<392x128xf32>
    %5 = arith.addf %2, %4 : vector<392x128xf32>
    %c0_5 = arith.constant 0 : index
    %c0_6 = arith.constant 0 : index
    %6 = vector.load %arg4[%c0_5, %c0_6] : memref<392x128xf32, #tpu.memory_space<vmem>>, vector<392x128xf32>
    tpu.vector_store %arg4[%c0_5, %c0_6], %5 {strides = array<i32>} : memref<392x128xf32, #tpu.memory_space<vmem>>, vector<392x128xf32>,
    return
  }
  func.func @transform_0(%arg0: i32) -> (i32, i32) {
    %c0_i32 = arith.constant 0 : i32
    %c0_i32_0 = arith.constant 0 : i32
    return %arg0, %c0_i32 : i32, i32
  }
  func.func @transform_1(%arg0: i32) -> (i32, i32) {
    %c0_i32 = arith.constant 0 : i32
    %c0_i32_0 = arith.constant 0 : i32
    %c0_i32_1 = arith.constant 0 : i32
    return %c0_i32, %c0_i32_0 : i32, i32
  }
  func.func @transform_2(%arg0: i32) -> (i32, i32) {
    %c0_i32 = arith.constant 0 : i32
    %c0_i32_0 = arith.constant 0 : i32
    %c0_i32_1 = arith.constant 0 : i32
    return %c0_i32, %c0_i32_0 : i32, i32
  }
  func.func @transform_3(%arg0: i32) -> (i32, i32) {
    %c0_i32 = arith.constant 0 : i32
    %c0_i32_0 = arith.constant 0 : i32
    return %arg0, %c0_i32 : i32, i32
  }
}

module attributes {stable_mosaic.version = 11 : i64} {
  func.func @_matmul_bias_kernel(%arg0: i32, %arg1: memref<8x64xbf16, #tpu.memory_space<vmem>>, %arg2: memref<64x3200xbf16, #tpu.memory_space<vmem>>, %arg3: memref<1x3200xf32, #tpu.memory_space<vmem>>, %arg4: memref<8x3200xf32, #tpu.memory_space<vmem>>) attributes {dimension_semantics = [#tpu.dimension_semantics<parallel>], iteration_bounds = array<i64: 1>, scalar_prefetch = 0 : i64, scratch_operands = 0 : i64, tpu.core_type = #tpu.core_type<tc>, window_params = [{transform_indices = @transform_0, window_bounds = array<i64: 8, 64>}, {pipeline_mode = #tpu.pipeline_mode<synchronous>, transform_indices = @transform_1, window_bounds = array<i64: 64, 3200>}, {pipeline_mode = #tpu.pipeline_mode<synchronous>, transform_indices = @transform_2, window_bounds = array<i64: 1, 3200>}, {transform_indices = @transform_3, window_bounds = array<i64: 8, 3200>}]} {
    %c0 = arith.constant 0 : index
    %c0_0 = arith.constant 0 : index
    %0 = vector.load %arg1[%c0, %c0_0] : memref<8x64xbf16, #tpu.memory_space<vmem>>, vector<8x64xbf16>
    %c0_1 = arith.constant 0 : index
    %c0_2 = arith.constant 0 : index
    %1 = vector.load %arg2[%c0_1, %c0_2] : memref<64x3200xbf16, #tpu.memory_space<vmem>>, vector<64x3200xbf16>
    %cst = arith.constant dense<0.000000e+00> : vector<8x3200xf32>
    %2 = tpu.matmul %0, %1, %cst {dimension_numbers = #tpu.dot_dimension_numbers<[1], [0], [0], [1], [0, 0, 1, 1], [], []>} : vector<8x64xbf16>, vector<64x3200xbf16>, vector<8x3200xf32> -> vector<8x3200xf32>
    %c0_3 = arith.constant 0 : index
    %c0_4 = arith.constant 0 : index
    %3 = vector.load %arg3[%c0_3, %c0_4] : memref<1x3200xf32, #tpu.memory_space<vmem>>, vector<1x3200xf32>
    %4 = vector.broadcast %3 : vector<1x3200xf32> to vector<8x3200xf32>
    %5 = arith.addf %2, %4 : vector<8x3200xf32>
    %c0_5 = arith.constant 0 : index
    %c0_6 = arith.constant 0 : index
    %6 = vector.load %arg4[%c0_5, %c0_6] : memref<8x3200xf32, #tpu.memory_space<vmem>>, vector<8x3200xf32>
    tpu.vector_store %arg4[%c0_5, %c0_6], %5 {strides = array<i32>} : memref<8x3200xf32, #tpu.memory_space<vmem>>, vector<8x3200xf32>,
    return
  }
  func.func @transform_0(%arg0: i32) -> (i32, i32) {
    %c0_i32 = arith.constant 0 : i32
    %c0_i32_0 = arith.constant 0 : i32
    return %arg0, %c0_i32 : i32, i32
  }
  func.func @transform_1(%arg0: i32) -> (i32, i32) {
    %c0_i32 = arith.constant 0 : i32
    %c0_i32_0 = arith.constant 0 : i32
    %c0_i32_1 = arith.constant 0 : i32
    return %c0_i32, %c0_i32_0 : i32, i32
  }
  func.func @transform_2(%arg0: i32) -> (i32, i32) {
    %c0_i32 = arith.constant 0 : i32
    %c0_i32_0 = arith.constant 0 : i32
    %c0_i32_1 = arith.constant 0 : i32
    return %c0_i32, %c0_i32_0 : i32, i32
  }
  func.func @transform_3(%arg0: i32) -> (i32, i32) {
    %c0_i32 = arith.constant 0 : i32
    %c0_i32_0 = arith.constant 0 : i32
    return %arg0, %c0_i32 : i32, i32
  }
}

module attributes {stable_mosaic.version = 11 : i64} {
  func.func @_matmul_bias_kernel(%arg0: i32, %arg1: memref<8x64xbf16, #tpu.memory_space<vmem>>, %arg2: memref<64x128xbf16, #tpu.memory_space<vmem>>, %arg3: memref<1x128xf32, #tpu.memory_space<vmem>>, %arg4: memref<8x128xf32, #tpu.memory_space<vmem>>) attributes {dimension_semantics = [#tpu.dimension_semantics<parallel>], iteration_bounds = array<i64: 1>, scalar_prefetch = 0 : i64, scratch_operands = 0 : i64, tpu.core_type = #tpu.core_type<tc>, window_params = [{transform_indices = @transform_0, window_bounds = array<i64: 8, 64>}, {pipeline_mode = #tpu.pipeline_mode<synchronous>, transform_indices = @transform_1, window_bounds = array<i64: 64, 128>}, {pipeline_mode = #tpu.pipeline_mode<synchronous>, transform_indices = @transform_2, window_bounds = array<i64: 1, 128>}, {transform_indices = @transform_3, window_bounds = array<i64: 8, 128>}]} {
    %c0 = arith.constant 0 : index
    %c0_0 = arith.constant 0 : index
    %0 = vector.load %arg1[%c0, %c0_0] : memref<8x64xbf16, #tpu.memory_space<vmem>>, vector<8x64xbf16>
    %c0_1 = arith.constant 0 : index
    %c0_2 = arith.constant 0 : index
    %1 = vector.load %arg2[%c0_1, %c0_2] : memref<64x128xbf16, #tpu.memory_space<vmem>>, vector<64x128xbf16>
    %cst = arith.constant dense<0.000000e+00> : vector<8x128xf32>
    %2 = tpu.matmul %0, %1, %cst {dimension_numbers = #tpu.dot_dimension_numbers<[1], [0], [0], [1], [0, 0, 1, 1], [], []>} : vector<8x64xbf16>, vector<64x128xbf16>, vector<8x128xf32> -> vector<8x128xf32>
    %c0_3 = arith.constant 0 : index
    %c0_4 = arith.constant 0 : index
    %3 = vector.load %arg3[%c0_3, %c0_4] : memref<1x128xf32, #tpu.memory_space<vmem>>, vector<1x128xf32>
    %4 = vector.broadcast %3 : vector<1x128xf32> to vector<8x128xf32>
    %5 = arith.addf %2, %4 : vector<8x128xf32>
    %c0_5 = arith.constant 0 : index
    %c0_6 = arith.constant 0 : index
    %6 = vector.load %arg4[%c0_5, %c0_6] : memref<8x128xf32, #tpu.memory_space<vmem>>, vector<8x128xf32>
    tpu.vector_store %arg4[%c0_5, %c0_6], %5 {strides = array<i32>} : memref<8x128xf32, #tpu.memory_space<vmem>>, vector<8x128xf32>,
    return
  }
  func.func @transform_0(%arg0: i32) -> (i32, i32) {
    %c0_i32 = arith.constant 0 : i32
    %c0_i32_0 = arith.constant 0 : i32
    return %arg0, %c0_i32 : i32, i32
  }
  func.func @transform_1(%arg0: i32) -> (i32, i32) {
    %c0_i32 = arith.constant 0 : i32
    %c0_i32_0 = arith.constant 0 : i32
    %c0_i32_1 = arith.constant 0 : i32
    return %c0_i32, %c0_i32_0 : i32, i32
  }
  func.func @transform_2(%arg0: i32) -> (i32, i32) {
    %c0_i32 = arith.constant 0 : i32
    %c0_i32_0 = arith.constant 0 : i32
    %c0_i32_1 = arith.constant 0 : i32
    return %c0_i32, %c0_i32_0 : i32, i32
  }
  func.func @transform_3(%arg0: i32) -> (i32, i32) {
    %c0_i32 = arith.constant 0 : i32
    %c0_i32_0 = arith.constant 0 : i32
    return %arg0, %c0_i32 : i32, i32
  }
}

module attributes {stable_mosaic.version = 11 : i64} {
  func.func @_matmul_bias_kernel(%arg0: i32, %arg1: memref<104x128xbf16, #tpu.memory_space<vmem>>, %arg2: memref<128x128xbf16, #tpu.memory_space<vmem>>, %arg3: memref<1x128xf32, #tpu.memory_space<vmem>>, %arg4: memref<104x128xf32, #tpu.memory_space<vmem>>) attributes {dimension_semantics = [#tpu.dimension_semantics<parallel>], iteration_bounds = array<i64: 1>, scalar_prefetch = 0 : i64, scratch_operands = 0 : i64, tpu.core_type = #tpu.core_type<tc>, window_params = [{transform_indices = @transform_0, window_bounds = array<i64: 104, 128>}, {pipeline_mode = #tpu.pipeline_mode<synchronous>, transform_indices = @transform_1, window_bounds = array<i64: 128, 128>}, {pipeline_mode = #tpu.pipeline_mode<synchronous>, transform_indices = @transform_2, window_bounds = array<i64: 1, 128>}, {transform_indices = @transform_3, window_bounds = array<i64: 104, 128>}]} {
    %c0 = arith.constant 0 : index
    %c0_0 = arith.constant 0 : index
    %0 = vector.load %arg1[%c0, %c0_0] : memref<104x128xbf16, #tpu.memory_space<vmem>>, vector<104x128xbf16>
    %c0_1 = arith.constant 0 : index
    %c0_2 = arith.constant 0 : index
    %1 = vector.load %arg2[%c0_1, %c0_2] : memref<128x128xbf16, #tpu.memory_space<vmem>>, vector<128x128xbf16>
    %cst = arith.constant dense<0.000000e+00> : vector<104x128xf32>
    %2 = tpu.matmul %0, %1, %cst {dimension_numbers = #tpu.dot_dimension_numbers<[1], [0], [0], [1], [0, 0, 1, 1], [], []>} : vector<104x128xbf16>, vector<128x128xbf16>, vector<104x128xf32> -> vector<104x128xf32>
    %c0_3 = arith.constant 0 : index
    %c0_4 = arith.constant 0 : index
    %3 = vector.load %arg3[%c0_3, %c0_4] : memref<1x128xf32, #tpu.memory_space<vmem>>, vector<1x128xf32>
    %4 = vector.broadcast %3 : vector<1x128xf32> to vector<104x128xf32>
    %5 = arith.addf %2, %4 : vector<104x128xf32>
    %c0_5 = arith.constant 0 : index
    %c0_6 = arith.constant 0 : index
    %6 = vector.load %arg4[%c0_5, %c0_6] : memref<104x128xf32, #tpu.memory_space<vmem>>, vector<104x128xf32>
    tpu.vector_store %arg4[%c0_5, %c0_6], %5 {strides = array<i32>} : memref<104x128xf32, #tpu.memory_space<vmem>>, vector<104x128xf32>,
    return
  }
  func.func @transform_0(%arg0: i32) -> (i32, i32) {
    %c0_i32 = arith.constant 0 : i32
    %c0_i32_0 = arith.constant 0 : i32
    return %arg0, %c0_i32 : i32, i32
  }
  func.func @transform_1(%arg0: i32) -> (i32, i32) {
    %c0_i32 = arith.constant 0 : i32
    %c0_i32_0 = arith.constant 0 : i32
    %c0_i32_1 = arith.constant 0 : i32
    return %c0_i32, %c0_i32_0 : i32, i32
  }
  func.func @transform_2(%arg0: i32) -> (i32, i32) {
    %c0_i32 = arith.constant 0 : i32
    %c0_i32_0 = arith.constant 0 : i32
    %c0_i32_1 = arith.constant 0 : i32
    return %c0_i32, %c0_i32_0 : i32, i32
  }
  func.func @transform_3(%arg0: i32) -> (i32, i32) {
    %c0_i32 = arith.constant 0 : i32
    %c0_i32_0 = arith.constant 0 : i32
    return %arg0, %c0_i32 : i32, i32
  }
}

module attributes {stable_mosaic.version = 11 : i64} {
  func.func @_matmul_bias_kernel(%arg0: i32, %arg1: memref<392x64xbf16, #tpu.memory_space<vmem>>, %arg2: memref<64x128xbf16, #tpu.memory_space<vmem>>, %arg3: memref<1x128xf32, #tpu.memory_space<vmem>>, %arg4: memref<392x128xf32, #tpu.memory_space<vmem>>) attributes {dimension_semantics = [#tpu.dimension_semantics<parallel>], iteration_bounds = array<i64: 1>, scalar_prefetch = 0 : i64, scratch_operands = 0 : i64, tpu.core_type = #tpu.core_type<tc>, window_params = [{transform_indices = @transform_0, window_bounds = array<i64: 392, 64>}, {pipeline_mode = #tpu.pipeline_mode<synchronous>, transform_indices = @transform_1, window_bounds = array<i64: 64, 128>}, {pipeline_mode = #tpu.pipeline_mode<synchronous>, transform_indices = @transform_2, window_bounds = array<i64: 1, 128>}, {transform_indices = @transform_3, window_bounds = array<i64: 392, 128>}]} {
    %c0 = arith.constant 0 : index
    %c0_0 = arith.constant 0 : index
    %0 = vector.load %arg1[%c0, %c0_0] : memref<392x64xbf16, #tpu.memory_space<vmem>>, vector<392x64xbf16>
    %c0_1 = arith.constant 0 : index
    %c0_2 = arith.constant 0 : index
    %1 = vector.load %arg2[%c0_1, %c0_2] : memref<64x128xbf16, #tpu.memory_space<vmem>>, vector<64x128xbf16>
    %cst = arith.constant dense<0.000000e+00> : vector<392x128xf32>
    %2 = tpu.matmul %0, %1, %cst {dimension_numbers = #tpu.dot_dimension_numbers<[1], [0], [0], [1], [0, 0, 1, 1], [], []>} : vector<392x64xbf16>, vector<64x128xbf16>, vector<392x128xf32> -> vector<392x128xf32>
    %c0_3 = arith.constant 0 : index
    %c0_4 = arith.constant 0 : index
    %3 = vector.load %arg3[%c0_3, %c0_4] : memref<1x128xf32, #tpu.memory_space<vmem>>, vector<1x128xf32>
    %4 = vector.broadcast %3 : vector<1x128xf32> to vector<392x128xf32>
    %5 = arith.addf %2, %4 : vector<392x128xf32>
    %c0_5 = arith.constant 0 : index
    %c0_6 = arith.constant 0 : index
    %6 = vector.load %arg4[%c0_5, %c0_6] : memref<392x128xf32, #tpu.memory_space<vmem>>, vector<392x128xf32>
    tpu.vector_store %arg4[%c0_5, %c0_6], %5 {strides = array<i32>} : memref<392x128xf32, #tpu.memory_space<vmem>>, vector<392x128xf32>,
    return
  }
  func.func @transform_0(%arg0: i32) -> (i32, i32) {
    %c0_i32 = arith.constant 0 : i32
    %c0_i32_0 = arith.constant 0 : i32
    return %arg0, %c0_i32 : i32, i32
  }
  func.func @transform_1(%arg0: i32) -> (i32, i32) {
    %c0_i32 = arith.constant 0 : i32
    %c0_i32_0 = arith.constant 0 : i32
    %c0_i32_1 = arith.constant 0 : i32
    return %c0_i32, %c0_i32_0 : i32, i32
  }
  func.func @transform_2(%arg0: i32) -> (i32, i32) {
    %c0_i32 = arith.constant 0 : i32
    %c0_i32_0 = arith.constant 0 : i32
    %c0_i32_1 = arith.constant 0 : i32
    return %c0_i32, %c0_i32_0 : i32, i32
  }
  func.func @transform_3(%arg0: i32) -> (i32, i32) {
    %c0_i32 = arith.constant 0 : i32
    %c0_i32_0 = arith.constant 0 : i32
    return %arg0, %c0_i32 : i32, i32
  }
}

module attributes {stable_mosaic.version = 11 : i64} {
  func.func @_matmul_bias_kernel(%arg0: i32, %arg1: memref<784x576xbf16, #tpu.memory_space<vmem>>, %arg2: memref<576x128xbf16, #tpu.memory_space<vmem>>, %arg3: memref<1x128xf32, #tpu.memory_space<vmem>>, %arg4: memref<784x128xf32, #tpu.memory_space<vmem>>) attributes {dimension_semantics = [#tpu.dimension_semantics<parallel>], iteration_bounds = array<i64: 2>, scalar_prefetch = 0 : i64, scratch_operands = 0 : i64, tpu.core_type = #tpu.core_type<tc>, window_params = [{transform_indices = @transform_0, window_bounds = array<i64: 784, 576>}, {pipeline_mode = #tpu.pipeline_mode<synchronous>, transform_indices = @transform_1, window_bounds = array<i64: 576, 128>}, {pipeline_mode = #tpu.pipeline_mode<synchronous>, transform_indices = @transform_2, window_bounds = array<i64: 1, 128>}, {transform_indices = @transform_3, window_bounds = array<i64: 784, 128>}]} {
    %c0 = arith.constant 0 : index
    %c0_0 = arith.constant 0 : index
    %0 = vector.load %arg1[%c0, %c0_0] : memref<784x576xbf16, #tpu.memory_space<vmem>>, vector<784x576xbf16>
    %c0_1 = arith.constant 0 : index
    %c0_2 = arith.constant 0 : index
    %1 = vector.load %arg2[%c0_1, %c0_2] : memref<576x128xbf16, #tpu.memory_space<vmem>>, vector<576x128xbf16>
    %cst = arith.constant dense<0.000000e+00> : vector<784x128xf32>
    %2 = tpu.matmul %0, %1, %cst {dimension_numbers = #tpu.dot_dimension_numbers<[1], [0], [0], [1], [0, 0, 1, 1], [], []>} : vector<784x576xbf16>, vector<576x128xbf16>, vector<784x128xf32> -> vector<784x128xf32>
    %c0_3 = arith.constant 0 : index
    %c0_4 = arith.constant 0 : index
    %3 = vector.load %arg3[%c0_3, %c0_4] : memref<1x128xf32, #tpu.memory_space<vmem>>, vector<1x128xf32>
    %4 = vector.broadcast %3 : vector<1x128xf32> to vector<784x128xf32>
    %5 = arith.addf %2, %4 : vector<784x128xf32>
    %c0_5 = arith.constant 0 : index
    %c0_6 = arith.constant 0 : index
    %6 = vector.load %arg4[%c0_5, %c0_6] : memref<784x128xf32, #tpu.memory_space<vmem>>, vector<784x128xf32>
    tpu.vector_store %arg4[%c0_5, %c0_6], %5 {strides = array<i32>} : memref<784x128xf32, #tpu.memory_space<vmem>>, vector<784x128xf32>,
    return
  }
  func.func @transform_0(%arg0: i32) -> (i32, i32) {
    %c0_i32 = arith.constant 0 : i32
    %c0_i32_0 = arith.constant 0 : i32
    return %arg0, %c0_i32 : i32, i32
  }
  func.func @transform_1(%arg0: i32) -> (i32, i32) {
    %c0_i32 = arith.constant 0 : i32
    %c0_i32_0 = arith.constant 0 : i32
    %c0_i32_1 = arith.constant 0 : i32
    return %c0_i32, %c0_i32_0 : i32, i32
  }
  func.func @transform_2(%arg0: i32) -> (i32, i32) {
    %c0_i32 = arith.constant 0 : i32
    %c0_i32_0 = arith.constant 0 : i32
    %c0_i32_1 = arith.constant 0 : i32
    return %c0_i32, %c0_i32_0 : i32, i32
  }
  func.func @transform_3(%arg0: i32) -> (i32, i32) {
    %c0_i32 = arith.constant 0 : i32
    %c0_i32_0 = arith.constant 0 : i32
    return %arg0, %c0_i32 : i32, i32
  }
}

</mosaic_0001>

<bundles_post_ra>
// kernel: mnist_diffusion_forward.24
= control target key start
LH: loop header
LB: loop body
LE: loop exit
PB: predicated region body
PF: predicated region fallthrough
CT: control target
= control target key end

     0   :  { %v198_v0 = vmov 0   ;;  %v199_v3 = vmov 1983009808   ;;  %v31_v5 = vlaneseq  ;;  %vm181_vm0 = vcmask 1041408   ;;  %s251_s2 = inlined_call_operand.vmem [shape: f32[2,1], index: 2, kind: input, shape index: {}]   ;;  %s252_s3 = inlined_call_operand.vmem [shape: f32[2,1], index: 3, kind: input, shape index: {}]   ;;  %s253_s0 = inlined_call_operand.vmem [shape: f32[2,784], index: 0, kind: input, shape index: {}]   ;;  %s254_s1 = inlined_call_operand.vmem [shape: f32[2,784], index: 1, kind: input, shape index: {}]   ;;  %s255_s4 = inlined_call_operand.vmem [shape: f32[2,784], index: 4, kind: output, shape index: {}]  }
   0x1   :  { %193 = vset.pattern.permute.xlu0 %v198_v0  ;;  %v17_v1 = vld [vmem:[%s251_s2] sm:$0x3]  ;;  %v29_v4 = vunpack.c.l.s4 %v199_v3  ;;  %v19_v12 = vld [vmem:[%s253_s0 + $0x8] sm:$0x3f]  ;;  %vm182_vm1 = vcmask 1043458   ;;  %vm184_vm3 = vcmask 128004  }
   0x2   :  { %22 = vperm.xlu0 %193, %v17_v1   ;;  %v74_v2 = vld [vmem:[%s252_s3] sm:$0x3]  ;;  %v32_v7 = vshrl.u32 %v31_v5, 7  ;;  %v76_v15 = vld [vmem:[%s254_s1 + $0x8] sm:$0x3f]  ;;  %v44_v20 = vcombine.high %v19_v12, %v19_v12  ;;  %vm183_vm2 = vmor %vm182_vm1, %vm181_vm0 }
   0x3   :  { %v30_v6 = vunpack.c.0.s8 %v29_v4  ;;  %v18_v8 = vld [vmem:[%s253_s0] sm:$0xff]  ;;  %v101_v21 = vcombine.high %v76_v15, %v76_v15  ;;  %vm185_vm4 = vmor %vm184_vm3, %vm183_vm2 }
   0x4   :  { %v75_v9 = vld [vmem:[%s254_s1] sm:$0xff]  ;;  %v27_v11 = vcombine.high %v18_v8, %v18_v8 }
   0x5   :  { %v33_v10 = vsub.s32 %v30_v6, %v32_v7  ;;  %v84_v13 = vcombine.high %v75_v9, %v75_v9 }
   0x6   :  { %79 = vperm.xlu0 %193, %v74_v2  }
   0x7   :  { %v34_v14 = vrot.slane %v18_v8, %v33_v10  ;;  %v41_v16 = vrot.slane %v27_v11, %v33_v10  ;;  %v51_v17 = vrot.slane %v19_v12, %v33_v10  ;;  %v91_v18 = vrot.slane %v75_v9, %v33_v10 }
   0x8   :  { %v98_v19 = vrot.slane %v84_v13, %v33_v10  ;;  %v108_v22 = vrot.slane %v76_v15, %v33_v10  ;;  %v58_v29 = vrot.slane %v44_v20, %v33_v10  ;;  %v115_v30 = vrot.slane %v101_v21, %v33_v10 }
   0x9   :  { %v42_v23 = vcombine.high %v34_v14, %v34_v14  ;;  %v43_v25 = vcombine.high %v41_v16, %v41_v16  ;;  %v59_v26 = vcombine.high %v51_v17, %v51_v17  ;;  %v99_v27 = vcombine.high %v91_v18, %v91_v18 }
   0xa   :  { %v100_v28 = vcombine.high %v98_v19, %v98_v19  ;;  %v116_v31 = vcombine.high %v108_v22, %v108_v22 }
  0x81   :  { %v23_v24 = vpop.permute.xlu0 %22 }
  0x82   :  { %v67_v32 = vmul.f32 %v34_v14, %v23_v24  ;;  %v68_v33 = vmul.f32 %v42_v23, %v23_v24  ;;  %v69_v34 = vmul.f32 %v41_v16, %v23_v24  ;;  %v70_v35 = vmul.f32 %v43_v25, %v23_v24 }
  0x83   :  { %v71_v36 = vmul.f32 %v51_v17, %v23_v24  ;;  %v72_v37 = vmul.f32 %v59_v26, %v23_v24  ;;  %v73_v43 = vmul.f32 %v58_v29, %v23_v24 }
  0x85   :  { %v80_v38 = vpop.permute.xlu0 %79 }
  0x86   :  { %v124_v39 = vmul.f32 %v91_v18, %v80_v38  ;;  %v125_v40 = vmul.f32 %v99_v27, %v80_v38  ;;  %v126_v41 = vmul.f32 %v98_v19, %v80_v38  ;;  %v127_v42 = vmul.f32 %v100_v28, %v80_v38 }
  0x87   :  { %v128_v44 = vmul.f32 %v108_v22, %v80_v38  ;;  %v129_v45 = vmul.f32 %v116_v31, %v80_v38  ;;  %v130_v46 = vmul.f32 %v115_v30, %v80_v38 }
  0x88   :  { %v131_v47 = vadd.f32 %v124_v39, %v67_v32  ;;  %v132_v48 = vadd.f32 %v125_v40, %v68_v33  ;;  %v133_v49 = vadd.f32 %v126_v41, %v69_v34  ;;  %v134_v50 = vadd.f32 %v127_v42, %v70_v35 }
  0x89   :  { %v135_v51 = vadd.f32 %v128_v44, %v71_v36  ;;  %v136_v52 = vadd.f32 %v129_v45, %v72_v37  ;;  %v137_v53 = vadd.f32 %v130_v46, %v73_v43 }
  0x8a   :  { %v145_v54 = vcombine.low %v131_v47, %v132_v48  ;;  %v146_v55 = vcombine.low %v133_v49, %v134_v50 }
  0x8b   :  { %v162_v56 = vcombine.low %v135_v51, %v136_v52  ;;  %v176_v60 = vrot.slane %v137_v53, %v33_v10 }
  0x8c   :  { %v153_v57 = vrot.slane %v145_v54, %v33_v10  ;;  %v160_v58 = vrot.slane %v146_v55, %v33_v10 }
  0x8d   :  { %v169_v59 = vrot.slane %v162_v56, %v33_v10 }
  0x8e   :  { %v161_v61 = vcombine.low %v153_v57, %v160_v58 }
  0x8f   :  { %v177_v62 = vcombine.low %v169_v59, %v176_v60 }
  0x90   :  { %180 = vst [vmem:[%s255_s4] sm:$0xff] %v161_v61 }
  0x91   :  { %186 = vst.msk [vmem:[%s255_s4 + $0x8] sm:$0x3f] %vm185_vm4, %v177_v62 }

// kernel: mnist_diffusion_forward.25
= control target key start
LH: loop header
LB: loop body
LE: loop exit
PB: predicated region body
PF: predicated region fallthrough
CT: control target
= control target key end

     0   :  { %s1709_s12 = smov 0   ;;  %s2136_s0 = inlined_call_operand.vmem [shape: bf16[1568,16], index: 0, kind: input, shape index: {}]   ;;  %s2137_s1 = inlined_call_operand.vmem [shape: bf16[16,128], index: 1, kind: input, shape index: {}]   ;;  %s2138_s2 = inlined_call_operand.vmem [shape: f32[1,128], index: 2, kind: input, shape index: {}]   ;;  %s2139_s3 = inlined_call_operand.vmem [shape: f32[1568,128], index: 3, kind: output, shape index: {}]  }
   0x1 LB: > { %s1260_s13 = sadd.s32 4294967295, %s1685_s12   ;;  %p1264_p0 = scmp.ge.s32.totalorder %s1685_s12, 1  ;;  %s1685_s12 = sphi %s1709_s12, %s13_s12  }
   0x2   : > { %p138_p1 = scmp.lt.s32.totalorder %s1685_s12, 3 }
   0x4   : > { %p139_p2 = pnand %p1264_p0, %p138_p1 }
   0x5   : > { %v1629_v0 = vld [vmem:[%s2137_s1] sm:$0xff] (!%p139_p2)   ;;  %v1687_v1 = vmov (!%p139_p2), 0.0   ;;  %s162_s16 = smul.u32 (!%p139_p2), 98, %s1260_s13  ;;  %vm1688_vm0 = vmmov (!%p139_p2), 0   ;;  %vm533_vm1 = vcmask (!%p139_p2), 130048  }
   0x6   : > { %142 = sbr.rel (%p139_p2) target bundleno = 426 (0x1aa), region = 32  ;;  %1419 = vmatprep.subr.bf16.mxu0 (!%p139_p2), %v1687_v1  ;;  %1617 = vmatprep.subr.bf16.mxu1 (!%p139_p2), %v1687_v1  ;;  %v1930_v51 = vld [vmem:[%s2138_s2] ss:$0 sm:$0xff] (!%p139_p2) }
   0x7   : > { %1420 = vmatpush3.bf16.msra.mxu0 (!%p139_p2), %v1629_v0  ;;  %1421 = vmatprep.mubr.msk.bf16.mxu0 (!%p139_p2), %vm1688_vm0, %v1687_v1  ;;  %p163_p3 = scmp.lt.s32.totalorder (!%p139_p2), %s162_s16, 195 }
   0x8   : > { %1618 = vmatpush3.bf16.msra.mxu1 (!%p139_p2), %v1629_v0  ;;  %1521 = vmatprep.mubr.msk.bf16.mxu1 (!%p139_p2), %vm1688_vm0, %v1687_v1 }
   0xd   : > { %s2141_s16 = smov (!%p163_p3, %s162_s16), 195 }
   0xe   : > { %s1265_s17 = sshll.u32 %s2141_s16, 2  ;;  %s1266_s21 = sshll.u32 %s2141_s16, 3 }
   0xf   : > { %s1732_s20 = scalar_lea.vmem %s2136_s0, %s1265_s17  ;;  %s1935_s26 = scalar_lea.vmem %s2139_s3, %s1266_s21 }
  0x10   : > { %v1630_v2 = vld [vmem:[%s1732_s20] sm:$0xff]   ;;  %v1631_v3 = vld [vmem:[%s1732_s20 + $0xc8] sm:$0xff]   ;;  %v1633_v5 = vld [vmem:[%s1732_s20 + $0xd0] sm:$0xff]  }
  0x11   : > { %1422 = vmatmul.mubr.msk.bf16.vlgmr.msra.gmra.mrb[0].mxu0 %vm533_vm1, %v1630_v2  ;;  %1522 = vmatmul.mubr.msk.bf16.vlgmr.msra.gmra.mrb[0].mxu1 %vm533_vm1, %v1631_v3  ;;  %v1632_v4 = vld [vmem:[%s1732_s20 + $0x8] sm:$0xff]   ;;  %v1634_v6 = vld [vmem:[%s1732_s20 + $0x10] sm:$0xff]   ;;  %v1635_v7 = vld [vmem:[%s1732_s20 + $0xd8] sm:$0xff]  }
  0x12   : > { %1425 = vmatprep.mubr.msk.bf16.mxu0 %vm1688_vm0, %v1687_v1  ;;  %1525 = vmatprep.mubr.msk.bf16.mxu1 %vm1688_vm0, %v1687_v1  ;;  %v1636_v8 = vld [vmem:[%s1732_s20 + $0x18] sm:$0xff]   ;;  %v1637_v9 = vld [vmem:[%s1732_s20 + $0xe0] sm:$0xff]   ;;  %v1639_v11 = vld [vmem:[%s1732_s20 + $0xe8] sm:$0xff]  }
  0x13   : > { %v1638_v10 = vld [vmem:[%s1732_s20 + $0x20] sm:$0xff]   ;;  %v1640_v12 = vld [vmem:[%s1732_s20 + $0x28] sm:$0xff]   ;;  %v1641_v13 = vld [vmem:[%s1732_s20 + $0xf0] sm:$0xff]  }
  0x14   : > { %v1642_v14 = vld [vmem:[%s1732_s20 + $0x30] sm:$0xff]   ;;  %v1643_v15 = vld [vmem:[%s1732_s20 + $0xf8] sm:$0xff]   ;;  %v1645_v17 = vld [vmem:[%s1732_s20 + $0x100] sm:$0xff]  }
  0x15   : > { %v1644_v16 = vld [vmem:[%s1732_s20 + $0x38] sm:$0xff]   ;;  %v1646_v18 = vld [vmem:[%s1732_s20 + $0x40] sm:$0xff]   ;;  %v1647_v19 = vld [vmem:[%s1732_s20 + $0x108] sm:$0xff]  }
  0x16   : > { %v1648_v20 = vld [vmem:[%s1732_s20 + $0x48] sm:$0xff]   ;;  %v1649_v21 = vld [vmem:[%s1732_s20 + $0x110] sm:$0xff]   ;;  %v1651_v23 = vld [vmem:[%s1732_s20 + $0x118] sm:$0xff]  }
  0x17   : > { %v1650_v22 = vld [vmem:[%s1732_s20 + $0x50] sm:$0xff]   ;;  %v1652_v24 = vld [vmem:[%s1732_s20 + $0x58] sm:$0xff]   ;;  %v1653_v25 = vld [vmem:[%s1732_s20 + $0x120] sm:$0xff]  }
  0x18   : > { %v1654_v26 = vld [vmem:[%s1732_s20 + $0x60] sm:$0xff]   ;;  %v1655_v27 = vld [vmem:[%s1732_s20 + $0x128] sm:$0xff]   ;;  %v1657_v29 = vld [vmem:[%s1732_s20 + $0x130] sm:$0xff]  }
  0x19   : > { %1426 = vmatmul.mubr.msk.bf16.gmra.mrb[4].mxu0 %vm533_vm1, %v1632_v4  ;;  %1526 = vmatmul.mubr.msk.bf16.gmra.mrb[4].mxu1 %vm533_vm1, %v1633_v5  ;;  %v1656_v28 = vld [vmem:[%s1732_s20 + $0x68] sm:$0xff]   ;;  %v1658_v30 = vld [vmem:[%s1732_s20 + $0x70] sm:$0xff]   ;;  %v1659_v31 = vld [vmem:[%s1732_s20 + $0x138] sm:$0xff]  }
  0x1a   : > { %1429 = vmatprep.mubr.msk.bf16.mxu0 %vm1688_vm0, %v1687_v1  ;;  %1529 = vmatprep.mubr.msk.bf16.mxu1 %vm1688_vm0, %v1687_v1  ;;  %v1660_v32 = vld [vmem:[%s1732_s20 + $0x78] sm:$0xff]   ;;  %v1661_v33 = vld [vmem:[%s1732_s20 + $0x140] sm:$0xff]   ;;  %v1663_v35 = vld [vmem:[%s1732_s20 + $0x148] sm:$0xff]  }
  0x1b   : > { %v1662_v34 = vld [vmem:[%s1732_s20 + $0x80] sm:$0xff]   ;;  %v1664_v36 = vld [vmem:[%s1732_s20 + $0x88] sm:$0xff]   ;;  %v1665_v37 = vld [vmem:[%s1732_s20 + $0x150] sm:$0xff]  }
  0x1c   : > { %v1666_v38 = vld [vmem:[%s1732_s20 + $0x90] sm:$0xff]   ;;  %v1667_v39 = vld [vmem:[%s1732_s20 + $0x158] sm:$0xff]   ;;  %v1669_v41 = vld [vmem:[%s1732_s20 + $0x160] sm:$0xff]  }
  0x1d   : > { %v1668_v40 = vld [vmem:[%s1732_s20 + $0x98] sm:$0xff]   ;;  %v1670_v42 = vld [vmem:[%s1732_s20 + $0xa0] sm:$0xff]   ;;  %v1671_v43 = vld [vmem:[%s1732_s20 + $0x168] sm:$0xff]  }
  0x1e   : > { %v1672_v44 = vld [vmem:[%s1732_s20 + $0xa8] sm:$0xff]   ;;  %v1673_v45 = vld [vmem:[%s1732_s20 + $0x170] sm:$0xff]   ;;  %v1675_v47 = vld [vmem:[%s1732_s20 + $0x178] sm:$0xff]  }
  0x1f   : > { %v1674_v46 = vld [vmem:[%s1732_s20 + $0xb0] sm:$0xff]   ;;  %v1676_v48 = vld [vmem:[%s1732_s20 + $0xb8] sm:$0xff]   ;;  %v1677_v49 = vld [vmem:[%s1732_s20 + $0x180] sm:$0xff]  }
  0x20   : > { %v1678_v50 = vld [vmem:[%s1732_s20 + $0xc0] sm:$0xff]  }
  0x21   : > { %1430 = vmatmul.mubr.msk.bf16.gmra.mrb[8].mxu0 %vm533_vm1, %v1634_v6  ;;  %1530 = vmatmul.mubr.msk.bf16.gmra.mrb[8].mxu1 %vm533_vm1, %v1635_v7 }
  0x22   : > { %1433 = vmatprep.mubr.msk.bf16.mxu0 %vm1688_vm0, %v1687_v1  ;;  %1533 = vmatprep.mubr.msk.bf16.mxu1 %vm1688_vm0, %v1687_v1 }
  0x29   : > { %1434 = vmatmul.mubr.msk.bf16.gmra.mrb[12].mxu0 %vm533_vm1, %v1636_v8  ;;  %1534 = vmatmul.mubr.msk.bf16.gmra.mrb[12].mxu1 %vm533_vm1, %v1637_v9 }
  0x2a   : > { %1437 = vmatprep.mubr.msk.bf16.mxu0 %vm1688_vm0, %v1687_v1  ;;  %1537 = vmatprep.mubr.msk.bf16.mxu1 %vm1688_vm0, %v1687_v1 }
  0x31   : > { %1438 = vmatmul.mubr.msk.bf16.gmra.mrb[16].mxu0 %vm533_vm1, %v1638_v10  ;;  %1538 = vmatmul.mubr.msk.bf16.gmra.mrb[16].mxu1 %vm533_vm1, %v1639_v11 }
  0x32   : > { %1441 = vmatprep.mubr.msk.bf16.mxu0 %vm1688_vm0, %v1687_v1  ;;  %1541 = vmatprep.mubr.msk.bf16.mxu1 %vm1688_vm0, %v1687_v1 }
  0x39   : > { %1442 = vmatmul.mubr.msk.bf16.gmra.mrb[20].mxu0 %vm533_vm1, %v1640_v12  ;;  %1542 = vmatmul.mubr.msk.bf16.gmra.mrb[20].mxu1 %vm533_vm1, %v1641_v13 }
  0x3a   : > { %1445 = vmatprep.mubr.msk.bf16.mxu0 %vm1688_vm0, %v1687_v1  ;;  %1545 = vmatprep.mubr.msk.bf16.mxu1 %vm1688_vm0, %v1687_v1 }
  0x41   : > { %1446 = vmatmul.mubr.msk.bf16.gmra.mrb[24].mxu0 %vm533_vm1, %v1642_v14  ;;  %1546 = vmatmul.mubr.msk.bf16.gmra.mrb[24].mxu1 %vm533_vm1, %v1643_v15 }
  0x42   : > { %1449 = vmatprep.mubr.msk.bf16.mxu0 %vm1688_vm0, %v1687_v1  ;;  %1549 = vmatprep.mubr.msk.bf16.mxu1 %vm1688_vm0, %v1687_v1 }
  0x49   : > { %1450 = vmatmul.mubr.msk.bf16.gmra.mrb[28].mxu0 %vm533_vm1, %v1644_v16  ;;  %1550 = vmatmul.mubr.msk.bf16.gmra.mrb[28].mxu1 %vm533_vm1, %v1645_v17 }
  0x4a   : > { %1453 = vmatprep.mubr.msk.bf16.mxu0 %vm1688_vm0, %v1687_v1  ;;  %1553 = vmatprep.mubr.msk.bf16.mxu1 %vm1688_vm0, %v1687_v1 }
  0x51   : > { %1454 = vmatmul.mubr.msk.bf16.gmra.mrb[32].mxu0 %vm533_vm1, %v1646_v18  ;;  %1554 = vmatmul.mubr.msk.bf16.gmra.mrb[32].mxu1 %vm533_vm1, %v1647_v19 }
  0x52   : > { %1457 = vmatprep.mubr.msk.bf16.mxu0 %vm1688_vm0, %v1687_v1  ;;  %1557 = vmatprep.mubr.msk.bf16.mxu1 %vm1688_vm0, %v1687_v1 }
  0x59   : > { %1458 = vmatmul.mubr.msk.bf16.gmra.mrb[36].mxu0 %vm533_vm1, %v1648_v20  ;;  %1558 = vmatmul.mubr.msk.bf16.gmra.mrb[36].mxu1 %vm533_vm1, %v1649_v21 }
  0x5a   : > { %1461 = vmatprep.mubr.msk.bf16.mxu0 %vm1688_vm0, %v1687_v1  ;;  %1561 = vmatprep.mubr.msk.bf16.mxu1 %vm1688_vm0, %v1687_v1 }
  0x61   : > { %1462 = vmatmul.mubr.msk.bf16.gmra.mrb[40].mxu0 %vm533_vm1, %v1650_v22  ;;  %1562 = vmatmul.mubr.msk.bf16.gmra.mrb[40].mxu1 %vm533_vm1, %v1651_v23 }
  0x62   : > { %1465 = vmatprep.mubr.msk.bf16.mxu0 %vm1688_vm0, %v1687_v1  ;;  %1565 = vmatprep.mubr.msk.bf16.mxu1 %vm1688_vm0, %v1687_v1 }
  0x69   : > { %1466 = vmatmul.mubr.msk.bf16.gmra.mrb[44].mxu0 %vm533_vm1, %v1652_v24  ;;  %1566 = vmatmul.mubr.msk.bf16.gmra.mrb[44].mxu1 %vm533_vm1, %v1653_v25 }
  0x6a   : > { %1469 = vmatprep.mubr.msk.bf16.mxu0 %vm1688_vm0, %v1687_v1  ;;  %1569 = vmatprep.mubr.msk.bf16.mxu1 %vm1688_vm0, %v1687_v1 }
  0x71   : > { %1470 = vmatmul.mubr.msk.bf16.gmra.mrb[48].mxu0 %vm533_vm1, %v1654_v26  ;;  %1570 = vmatmul.mubr.msk.bf16.gmra.mrb[48].mxu1 %vm533_vm1, %v1655_v27 }
  0x72   : > { %1473 = vmatprep.mubr.msk.bf16.mxu0 %vm1688_vm0, %v1687_v1  ;;  %1573 = vmatprep.mubr.msk.bf16.mxu1 %vm1688_vm0, %v1687_v1 }
  0x79   : > { %1474 = vmatmul.mubr.msk.bf16.gmra.mrb[52].mxu0 %vm533_vm1, %v1656_v28  ;;  %1574 = vmatmul.mubr.msk.bf16.gmra.mrb[52].mxu1 %vm533_vm1, %v1657_v29 }
  0x7a   : > { %1477 = vmatprep.mubr.msk.bf16.mxu0 %vm1688_vm0, %v1687_v1  ;;  %1577 = vmatprep.mubr.msk.bf16.mxu1 %vm1688_vm0, %v1687_v1 }
  0x81   : > { %1478 = vmatmul.mubr.msk.bf16.gmra.mrb[56].mxu0 %vm533_vm1, %v1658_v30  ;;  %1578 = vmatmul.mubr.msk.bf16.gmra.mrb[56].mxu1 %vm533_vm1, %v1659_v31 }
  0x82   : > { %1481 = vmatprep.mubr.msk.bf16.mxu0 %vm1688_vm0, %v1687_v1  ;;  %1581 = vmatprep.mubr.msk.bf16.mxu1 %vm1688_vm0, %v1687_v1 }
  0x89   : > { %1482 = vmatmul.mubr.msk.bf16.gmra.mrb[60].mxu0 %vm533_vm1, %v1660_v32  ;;  %1582 = vmatmul.mubr.msk.bf16.gmra.mrb[60].mxu1 %vm533_vm1, %v1661_v33 }
  0x8a   : > { %1485 = vmatprep.mubr.msk.bf16.mxu0 %vm1688_vm0, %v1687_v1  ;;  %1585 = vmatprep.mubr.msk.bf16.mxu1 %vm1688_vm0, %v1687_v1 }
  0x91   : > { %1486 = vmatmul.mubr.msk.bf16.gmra.mrb[64].mxu0 %vm533_vm1, %v1662_v34  ;;  %1586 = vmatmul.mubr.msk.bf16.gmra.mrb[64].mxu1 %vm533_vm1, %v1663_v35 }
  0x92   : > { %1489 = vmatprep.mubr.msk.bf16.mxu0 %vm1688_vm0, %v1687_v1  ;;  %1589 = vmatprep.mubr.msk.bf16.mxu1 %vm1688_vm0, %v1687_v1 }
  0x99   : > { %1490 = vmatmul.mubr.msk.bf16.gmra.mrb[68].mxu0 %vm533_vm1, %v1664_v36  ;;  %1590 = vmatmul.mubr.msk.bf16.gmra.mrb[68].mxu1 %vm533_vm1, %v1665_v37 }
  0x9a   : > { %1493 = vmatprep.mubr.msk.bf16.mxu0 %vm1688_vm0, %v1687_v1  ;;  %1593 = vmatprep.mubr.msk.bf16.mxu1 %vm1688_vm0, %v1687_v1 }
  0xa1   : > { %1494 = vmatmul.mubr.msk.bf16.gmra.mrb[72].mxu0 %vm533_vm1, %v1666_v38  ;;  %1594 = vmatmul.mubr.msk.bf16.gmra.mrb[72].mxu1 %vm533_vm1, %v1667_v39 }
  0xa2   : > { %1497 = vmatprep.mubr.msk.bf16.mxu0 %vm1688_vm0, %v1687_v1  ;;  %1597 = vmatprep.mubr.msk.bf16.mxu1 %vm1688_vm0, %v1687_v1 }
  0xa9   : > { %1498 = vmatmul.mubr.msk.bf16.gmra.mrb[76].mxu0 %vm533_vm1, %v1668_v40  ;;  %1598 = vmatmul.mubr.msk.bf16.gmra.mrb[76].mxu1 %vm533_vm1, %v1669_v41 }
  0xaa   : > { %1501 = vmatprep.mubr.msk.bf16.mxu0 %vm1688_vm0, %v1687_v1  ;;  %1601 = vmatprep.mubr.msk.bf16.mxu1 %vm1688_vm0, %v1687_v1 }
  0xb1   : > { %1502 = vmatmul.mubr.msk.bf16.gmra.mrb[80].mxu0 %vm533_vm1, %v1670_v42  ;;  %1602 = vmatmul.mubr.msk.bf16.gmra.mrb[80].mxu1 %vm533_vm1, %v1671_v43 }
  0xb2   : > { %1505 = vmatprep.mubr.msk.bf16.mxu0 %vm1688_vm0, %v1687_v1  ;;  %1605 = vmatprep.mubr.msk.bf16.mxu1 %vm1688_vm0, %v1687_v1 }
  0xb9   : > { %1506 = vmatmul.mubr.msk.bf16.gmra.mrb[84].mxu0 %vm533_vm1, %v1672_v44  ;;  %1606 = vmatmul.mubr.msk.bf16.gmra.mrb[84].mxu1 %vm533_vm1, %v1673_v45 }
  0xba   : > { %1509 = vmatprep.mubr.msk.bf16.mxu0 %vm1688_vm0, %v1687_v1  ;;  %1609 = vmatprep.mubr.msk.bf16.mxu1 %vm1688_vm0, %v1687_v1 }
  0xc1   : > { %1510 = vmatmul.mubr.msk.bf16.gmra.mrb[88].mxu0 %vm533_vm1, %v1674_v46  ;;  %1610 = vmatmul.mubr.msk.bf16.gmra.mrb[88].mxu1 %vm533_vm1, %v1675_v47 }
  0xc2   : > { %1513 = vmatprep.mubr.msk.bf16.mxu0 %vm1688_vm0, %v1687_v1  ;;  %1613 = vmatprep.mubr.msk.bf16.mxu1 %vm1688_vm0, %v1687_v1 }
  0xc9   : > { %1514 = vmatmul.mubr.msk.bf16.gmra.mrb[92].mxu0 %vm533_vm1, %v1676_v48  ;;  %1614 = vmatmul.mubr.msk.bf16.gmra.mrb[92].mxu1 %vm533_vm1, %v1677_v49 }
  0xca   : > { %1517 = vmatprep.mubr.msk.bf16.mxu0 %vm1688_vm0, %v1687_v1 }
  0xd1   : > { %1518 = vmatmul.mubr.msk.bf16.gmra.mrb[96].mxu0 %vm533_vm1, %v1678_v50 }
  0xe4   : > { %v715_v52 = vpop.f32.mrb[0].mxu0  ;;  %v915_v55 = vpop.f32.mrb[0].mxu1 }
  0xe5   : > { %v716_v53 = vadd.f32 %v1930_v51, %v715_v52  ;;  %v1423_v54 = vpop.f32.mrb[1].mxu0  ;;  %v916_v57 = vadd.f32 %v1930_v51, %v915_v55  ;;  %v1523_v58 = vpop.f32.mrb[1].mxu1 }
  0xe6   : > { %v718_v56 = vpop.f32.mrb[2].mxu0  ;;  %v918_v61 = vpop.f32.mrb[2].mxu1 }
  0xe7   : > { %1106 = vst [vmem:[%s1935_s26] sm:$0xff] %v716_v53  ;;  %v719_v59 = vadd.f32 %v1930_v51, %v718_v56  ;;  %v1424_v60 = vpop.f32.mrb[3].mxu0  ;;  %1156 = vst [vmem:[%s1935_s26 + $0x190] sm:$0xff] %v916_v57  ;;  %v919_v62 = vadd.f32 %v1930_v51, %v918_v61  ;;  %v1524_v63 = vpop.f32.mrb[3].mxu1 }
  0xe9   : > { %1107 = vst [vmem:[%s1935_s26 + $0x8] sm:$0xff] %v719_v59  ;;  %1157 = vst [vmem:[%s1935_s26 + $0x198] sm:$0xff] %v919_v62 }
  0xec   : > { %v723_v0 = vpop.f32.mrb[4].mxu0  ;;  %v923_v3 = vpop.f32.mrb[4].mxu1 }
  0xed   : > { %v724_v1 = vadd.f32 %v1930_v51, %v723_v0  ;;  %v1427_v2 = vpop.f32.mrb[5].mxu0  ;;  %v924_v5 = vadd.f32 %v1930_v51, %v923_v3  ;;  %v1527_v6 = vpop.f32.mrb[5].mxu1 }
  0xee   : > { %v726_v4 = vpop.f32.mrb[6].mxu0  ;;  %v926_v9 = vpop.f32.mrb[6].mxu1 }
  0xef   : > { %1108 = vst [vmem:[%s1935_s26 + $0x10] sm:$0xff] %v724_v1  ;;  %v727_v7 = vadd.f32 %v1930_v51, %v726_v4  ;;  %v1428_v8 = vpop.f32.mrb[7].mxu0  ;;  %1158 = vst [vmem:[%s1935_s26 + $0x1a0] sm:$0xff] %v924_v5  ;;  %v927_v10 = vadd.f32 %v1930_v51, %v926_v9  ;;  %v1528_v11 = vpop.f32.mrb[7].mxu1 }
  0xf1   : > { %1109 = vst [vmem:[%s1935_s26 + $0x18] sm:$0xff] %v727_v7  ;;  %1159 = vst [vmem:[%s1935_s26 + $0x1a8] sm:$0xff] %v927_v10 }
  0xf4   : > { %v731_v12 = vpop.f32.mrb[8].mxu0  ;;  %v931_v15 = vpop.f32.mrb[8].mxu1 }
  0xf5   : > { %v732_v13 = vadd.f32 %v1930_v51, %v731_v12  ;;  %v1431_v14 = vpop.f32.mrb[9].mxu0  ;;  %v932_v17 = vadd.f32 %v1930_v51, %v931_v15  ;;  %v1531_v18 = vpop.f32.mrb[9].mxu1 }
  0xf6   : > { %v734_v16 = vpop.f32.mrb[10].mxu0  ;;  %v934_v21 = vpop.f32.mrb[10].mxu1 }
  0xf7   : > { %1110 = vst [vmem:[%s1935_s26 + $0x20] sm:$0xff] %v732_v13  ;;  %v735_v19 = vadd.f32 %v1930_v51, %v734_v16  ;;  %v1432_v20 = vpop.f32.mrb[11].mxu0  ;;  %1160 = vst [vmem:[%s1935_s26 + $0x1b0] sm:$0xff] %v932_v17  ;;  %v935_v22 = vadd.f32 %v1930_v51, %v934_v21  ;;  %v1532_v23 = vpop.f32.mrb[11].mxu1 }
  0xf9   : > { %1111 = vst [vmem:[%s1935_s26 + $0x28] sm:$0xff] %v735_v19  ;;  %1161 = vst [vmem:[%s1935_s26 + $0x1b8] sm:$0xff] %v935_v22 }
  0xfc   : > { %v739_v24 = vpop.f32.mrb[12].mxu0  ;;  %v939_v27 = vpop.f32.mrb[12].mxu1 }
  0xfd   : > { %v740_v25 = vadd.f32 %v1930_v51, %v739_v24  ;;  %v1435_v26 = vpop.f32.mrb[13].mxu0  ;;  %v940_v29 = vadd.f32 %v1930_v51, %v939_v27  ;;  %v1535_v30 = vpop.f32.mrb[13].mxu1 }
  0xfe   : > { %v742_v28 = vpop.f32.mrb[14].mxu0  ;;  %v942_v33 = vpop.f32.mrb[14].mxu1 }
  0xff   : > { %1112 = vst [vmem:[%s1935_s26 + $0x30] sm:$0xff] %v740_v25  ;;  %v743_v31 = vadd.f32 %v1930_v51, %v742_v28  ;;  %v1436_v32 = vpop.f32.mrb[15].mxu0  ;;  %1162 = vst [vmem:[%s1935_s26 + $0x1c0] sm:$0xff] %v940_v29  ;;  %v943_v34 = vadd.f32 %v1930_v51, %v942_v33  ;;  %v1536_v35 = vpop.f32.mrb[15].mxu1 }
 0x101   : > { %1113 = vst [vmem:[%s1935_s26 + $0x38] sm:$0xff] %v743_v31  ;;  %1163 = vst [vmem:[%s1935_s26 + $0x1c8] sm:$0xff] %v943_v34 }
 0x104   : > { %v747_v36 = vpop.f32.mrb[16].mxu0  ;;  %v947_v39 = vpop.f32.mrb[16].mxu1 }
 0x105   : > { %v748_v37 = vadd.f32 %v1930_v51, %v747_v36  ;;  %v1439_v38 = vpop.f32.mrb[17].mxu0  ;;  %v948_v41 = vadd.f32 %v1930_v51, %v947_v39  ;;  %v1539_v42 = vpop.f32.mrb[17].mxu1 }
 0x106   : > { %v750_v40 = vpop.f32.mrb[18].mxu0  ;;  %v950_v45 = vpop.f32.mrb[18].mxu1 }
 0x107   : > { %1114 = vst [vmem:[%s1935_s26 + $0x40] sm:$0xff] %v748_v37  ;;  %v751_v43 = vadd.f32 %v1930_v51, %v750_v40  ;;  %v1440_v44 = vpop.f32.mrb[19].mxu0  ;;  %1164 = vst [vmem:[%s1935_s26 + $0x1d0] sm:$0xff] %v948_v41  ;;  %v951_v46 = vadd.f32 %v1930_v51, %v950_v45  ;;  %v1540_v47 = vpop.f32.mrb[19].mxu1 }
 0x109   : > { %1115 = vst [vmem:[%s1935_s26 + $0x48] sm:$0xff] %v751_v43  ;;  %1165 = vst [vmem:[%s1935_s26 + $0x1d8] sm:$0xff] %v951_v46 }
 0x10c   : > { %v755_v48 = vpop.f32.mrb[20].mxu0  ;;  %v955_v52 = vpop.f32.mrb[20].mxu1 }
 0x10d   : > { %v756_v49 = vadd.f32 %v1930_v51, %v755_v48  ;;  %v1443_v50 = vpop.f32.mrb[21].mxu0  ;;  %v956_v54 = vadd.f32 %v1930_v51, %v955_v52  ;;  %v1543_v55 = vpop.f32.mrb[21].mxu1 }
 0x10e   : > { %v758_v53 = vpop.f32.mrb[22].mxu0  ;;  %v958_v58 = vpop.f32.mrb[22].mxu1 }
 0x10f   : > { %1116 = vst [vmem:[%s1935_s26 + $0x50] sm:$0xff] %v756_v49  ;;  %v759_v56 = vadd.f32 %v1930_v51, %v758_v53  ;;  %v1444_v57 = vpop.f32.mrb[23].mxu0  ;;  %1166 = vst [vmem:[%s1935_s26 + $0x1e0] sm:$0xff] %v956_v54  ;;  %v959_v59 = vadd.f32 %v1930_v51, %v958_v58  ;;  %v1544_v60 = vpop.f32.mrb[23].mxu1 }
 0x111   : > { %1117 = vst [vmem:[%s1935_s26 + $0x58] sm:$0xff] %v759_v56  ;;  %1167 = vst [vmem:[%s1935_s26 + $0x1e8] sm:$0xff] %v959_v59 }
 0x114   : > { %v763_v61 = vpop.f32.mrb[24].mxu0  ;;  %v963_v0 = vpop.f32.mrb[24].mxu1 }
 0x115   : > { %v764_v62 = vadd.f32 %v1930_v51, %v763_v61  ;;  %v1447_v63 = vpop.f32.mrb[25].mxu0  ;;  %v964_v2 = vadd.f32 %v1930_v51, %v963_v0  ;;  %v1547_v3 = vpop.f32.mrb[25].mxu1 }
 0x116   : > { %v766_v1 = vpop.f32.mrb[26].mxu0  ;;  %v966_v6 = vpop.f32.mrb[26].mxu1 }
 0x117   : > { %1118 = vst [vmem:[%s1935_s26 + $0x60] sm:$0xff] %v764_v62  ;;  %v767_v4 = vadd.f32 %v1930_v51, %v766_v1  ;;  %v1448_v5 = vpop.f32.mrb[27].mxu0  ;;  %1168 = vst [vmem:[%s1935_s26 + $0x1f0] sm:$0xff] %v964_v2  ;;  %v967_v7 = vadd.f32 %v1930_v51, %v966_v6  ;;  %v1548_v8 = vpop.f32.mrb[27].mxu1 }
 0x119   : > { %1119 = vst [vmem:[%s1935_s26 + $0x68] sm:$0xff] %v767_v4  ;;  %1169 = vst [vmem:[%s1935_s26 + $0x1f8] sm:$0xff] %v967_v7 }
 0x11c   : > { %v771_v9 = vpop.f32.mrb[28].mxu0  ;;  %v971_v12 = vpop.f32.mrb[28].mxu1 }
 0x11d   : > { %v772_v10 = vadd.f32 %v1930_v51, %v771_v9  ;;  %v1451_v11 = vpop.f32.mrb[29].mxu0  ;;  %v972_v14 = vadd.f32 %v1930_v51, %v971_v12  ;;  %v1551_v15 = vpop.f32.mrb[29].mxu1 }
 0x11e   : > { %v774_v13 = vpop.f32.mrb[30].mxu0  ;;  %v974_v18 = vpop.f32.mrb[30].mxu1 }
 0x11f   : > { %1120 = vst [vmem:[%s1935_s26 + $0x70] sm:$0xff] %v772_v10  ;;  %v775_v16 = vadd.f32 %v1930_v51, %v774_v13  ;;  %v1452_v17 = vpop.f32.mrb[31].mxu0  ;;  %1170 = vst [vmem:[%s1935_s26 + $0x200] sm:$0xff] %v972_v14  ;;  %v975_v19 = vadd.f32 %v1930_v51, %v974_v18  ;;  %v1552_v20 = vpop.f32.mrb[31].mxu1 }
 0x121   : > { %1121 = vst [vmem:[%s1935_s26 + $0x78] sm:$0xff] %v775_v16  ;;  %1171 = vst [vmem:[%s1935_s26 + $0x208] sm:$0xff] %v975_v19 }
 0x124   : > { %v779_v21 = vpop.f32.mrb[32].mxu0  ;;  %v979_v24 = vpop.f32.mrb[32].mxu1 }
 0x125   : > { %v780_v22 = vadd.f32 %v1930_v51, %v779_v21  ;;  %v1455_v23 = vpop.f32.mrb[33].mxu0  ;;  %v980_v26 = vadd.f32 %v1930_v51, %v979_v24  ;;  %v1555_v27 = vpop.f32.mrb[33].mxu1 }
 0x126   : > { %v782_v25 = vpop.f32.mrb[34].mxu0  ;;  %v982_v30 = vpop.f32.mrb[34].mxu1 }
 0x127   : > { %1122 = vst [vmem:[%s1935_s26 + $0x80] sm:$0xff] %v780_v22  ;;  %v783_v28 = vadd.f32 %v1930_v51, %v782_v25  ;;  %v1456_v29 = vpop.f32.mrb[35].mxu0  ;;  %1172 = vst [vmem:[%s1935_s26 + $0x210] sm:$0xff] %v980_v26  ;;  %v983_v31 = vadd.f32 %v1930_v51, %v982_v30  ;;  %v1556_v32 = vpop.f32.mrb[35].mxu1 }
 0x129   : > { %1123 = vst [vmem:[%s1935_s26 + $0x88] sm:$0xff] %v783_v28  ;;  %1173 = vst [vmem:[%s1935_s26 + $0x218] sm:$0xff] %v983_v31 }
 0x12c   : > { %v787_v33 = vpop.f32.mrb[36].mxu0  ;;  %v987_v36 = vpop.f32.mrb[36].mxu1 }
 0x12d   : > { %v788_v34 = vadd.f32 %v1930_v51, %v787_v33  ;;  %v1459_v35 = vpop.f32.mrb[37].mxu0  ;;  %v988_v38 = vadd.f32 %v1930_v51, %v987_v36  ;;  %v1559_v39 = vpop.f32.mrb[37].mxu1 }
 0x12e   : > { %v790_v37 = vpop.f32.mrb[38].mxu0  ;;  %v990_v42 = vpop.f32.mrb[38].mxu1 }
 0x12f   : > { %1124 = vst [vmem:[%s1935_s26 + $0x90] sm:$0xff] %v788_v34  ;;  %v791_v40 = vadd.f32 %v1930_v51, %v790_v37  ;;  %v1460_v41 = vpop.f32.mrb[39].mxu0  ;;  %1174 = vst [vmem:[%s1935_s26 + $0x220] sm:$0xff] %v988_v38  ;;  %v991_v43 = vadd.f32 %v1930_v51, %v990_v42  ;;  %v1560_v44 = vpop.f32.mrb[39].mxu1 }
 0x131   : > { %1125 = vst [vmem:[%s1935_s26 + $0x98] sm:$0xff] %v791_v40  ;;  %1175 = vst [vmem:[%s1935_s26 + $0x228] sm:$0xff] %v991_v43 }
 0x134   : > { %v795_v45 = vpop.f32.mrb[40].mxu0  ;;  %v995_v48 = vpop.f32.mrb[40].mxu1 }
 0x135   : > { %v796_v46 = vadd.f32 %v1930_v51, %v795_v45  ;;  %v1463_v47 = vpop.f32.mrb[41].mxu0  ;;  %v996_v50 = vadd.f32 %v1930_v51, %v995_v48  ;;  %v1563_v52 = vpop.f32.mrb[41].mxu1 }
 0x136   : > { %v798_v49 = vpop.f32.mrb[42].mxu0  ;;  %v998_v55 = vpop.f32.mrb[42].mxu1 }
 0x137   : > { %1126 = vst [vmem:[%s1935_s26 + $0xa0] sm:$0xff] %v796_v46  ;;  %v799_v53 = vadd.f32 %v1930_v51, %v798_v49  ;;  %v1464_v54 = vpop.f32.mrb[43].mxu0  ;;  %1176 = vst [vmem:[%s1935_s26 + $0x230] sm:$0xff] %v996_v50  ;;  %v999_v56 = vadd.f32 %v1930_v51, %v998_v55  ;;  %v1564_v57 = vpop.f32.mrb[43].mxu1 }
 0x139   : > { %1127 = vst [vmem:[%s1935_s26 + $0xa8] sm:$0xff] %v799_v53  ;;  %1177 = vst [vmem:[%s1935_s26 + $0x238] sm:$0xff] %v999_v56 }
 0x13c   : > { %v803_v58 = vpop.f32.mrb[44].mxu0  ;;  %v1003_v61 = vpop.f32.mrb[44].mxu1 }
 0x13d   : > { %v804_v59 = vadd.f32 %v1930_v51, %v803_v58  ;;  %v1467_v60 = vpop.f32.mrb[45].mxu0  ;;  %v1004_v63 = vadd.f32 %v1930_v51, %v1003_v61  ;;  %v1567_v0 = vpop.f32.mrb[45].mxu1 }
 0x13e   : > { %v806_v62 = vpop.f32.mrb[46].mxu0  ;;  %v1006_v3 = vpop.f32.mrb[46].mxu1 }
 0x13f   : > { %1128 = vst [vmem:[%s1935_s26 + $0xb0] sm:$0xff] %v804_v59  ;;  %v807_v1 = vadd.f32 %v1930_v51, %v806_v62  ;;  %v1468_v2 = vpop.f32.mrb[47].mxu0  ;;  %1178 = vst [vmem:[%s1935_s26 + $0x240] sm:$0xff] %v1004_v63  ;;  %v1007_v4 = vadd.f32 %v1930_v51, %v1006_v3  ;;  %v1568_v5 = vpop.f32.mrb[47].mxu1 }
 0x141   : > { %1129 = vst [vmem:[%s1935_s26 + $0xb8] sm:$0xff] %v807_v1  ;;  %1179 = vst [vmem:[%s1935_s26 + $0x248] sm:$0xff] %v1007_v4 }
 0x144   : > { %v811_v6 = vpop.f32.mrb[48].mxu0  ;;  %v1011_v9 = vpop.f32.mrb[48].mxu1 }
 0x145   : > { %v812_v7 = vadd.f32 %v1930_v51, %v811_v6  ;;  %v1471_v8 = vpop.f32.mrb[49].mxu0  ;;  %v1012_v11 = vadd.f32 %v1930_v51, %v1011_v9  ;;  %v1571_v12 = vpop.f32.mrb[49].mxu1 }
 0x146   : > { %v814_v10 = vpop.f32.mrb[50].mxu0  ;;  %v1014_v15 = vpop.f32.mrb[50].mxu1 }
 0x147   : > { %1130 = vst [vmem:[%s1935_s26 + $0xc0] sm:$0xff] %v812_v7  ;;  %v815_v13 = vadd.f32 %v1930_v51, %v814_v10  ;;  %v1472_v14 = vpop.f32.mrb[51].mxu0  ;;  %1180 = vst [vmem:[%s1935_s26 + $0x250] sm:$0xff] %v1012_v11  ;;  %v1015_v16 = vadd.f32 %v1930_v51, %v1014_v15  ;;  %v1572_v17 = vpop.f32.mrb[51].mxu1 }
 0x149   : > { %1131 = vst [vmem:[%s1935_s26 + $0xc8] sm:$0xff] %v815_v13  ;;  %1181 = vst [vmem:[%s1935_s26 + $0x258] sm:$0xff] %v1015_v16 }
 0x14c   : > { %v819_v18 = vpop.f32.mrb[52].mxu0  ;;  %v1019_v21 = vpop.f32.mrb[52].mxu1 }
 0x14d   : > { %v820_v19 = vadd.f32 %v1930_v51, %v819_v18  ;;  %v1475_v20 = vpop.f32.mrb[53].mxu0  ;;  %v1020_v23 = vadd.f32 %v1930_v51, %v1019_v21  ;;  %v1575_v24 = vpop.f32.mrb[53].mxu1 }
 0x14e   : > { %v822_v22 = vpop.f32.mrb[54].mxu0  ;;  %v1022_v27 = vpop.f32.mrb[54].mxu1 }
 0x14f   : > { %1132 = vst [vmem:[%s1935_s26 + $0xd0] sm:$0xff] %v820_v19  ;;  %v823_v25 = vadd.f32 %v1930_v51, %v822_v22  ;;  %v1476_v26 = vpop.f32.mrb[55].mxu0  ;;  %1182 = vst [vmem:[%s1935_s26 + $0x260] sm:$0xff] %v1020_v23  ;;  %v1023_v28 = vadd.f32 %v1930_v51, %v1022_v27  ;;  %v1576_v29 = vpop.f32.mrb[55].mxu1 }
 0x151   : > { %1133 = vst [vmem:[%s1935_s26 + $0xd8] sm:$0xff] %v823_v25  ;;  %1183 = vst [vmem:[%s1935_s26 + $0x268] sm:$0xff] %v1023_v28 }
 0x154   : > { %v827_v30 = vpop.f32.mrb[56].mxu0  ;;  %v1027_v33 = vpop.f32.mrb[56].mxu1 }
 0x155   : > { %v828_v31 = vadd.f32 %v1930_v51, %v827_v30  ;;  %v1479_v32 = vpop.f32.mrb[57].mxu0  ;;  %v1028_v35 = vadd.f32 %v1930_v51, %v1027_v33  ;;  %v1579_v36 = vpop.f32.mrb[57].mxu1 }
 0x156   : > { %v830_v34 = vpop.f32.mrb[58].mxu0  ;;  %v1030_v39 = vpop.f32.mrb[58].mxu1 }
 0x157   : > { %1134 = vst [vmem:[%s1935_s26 + $0xe0] sm:$0xff] %v828_v31  ;;  %v831_v37 = vadd.f32 %v1930_v51, %v830_v34  ;;  %v1480_v38 = vpop.f32.mrb[59].mxu0  ;;  %1184 = vst [vmem:[%s1935_s26 + $0x270] sm:$0xff] %v1028_v35  ;;  %v1031_v40 = vadd.f32 %v1930_v51, %v1030_v39  ;;  %v1580_v41 = vpop.f32.mrb[59].mxu1 }
 0x159   : > { %1135 = vst [vmem:[%s1935_s26 + $0xe8] sm:$0xff] %v831_v37  ;;  %1185 = vst [vmem:[%s1935_s26 + $0x278] sm:$0xff] %v1031_v40 }
 0x15c   : > { %v835_v42 = vpop.f32.mrb[60].mxu0  ;;  %v1035_v45 = vpop.f32.mrb[60].mxu1 }
 0x15d   : > { %v836_v43 = vadd.f32 %v1930_v51, %v835_v42  ;;  %v1483_v44 = vpop.f32.mrb[61].mxu0  ;;  %v1036_v47 = vadd.f32 %v1930_v51, %v1035_v45  ;;  %v1583_v48 = vpop.f32.mrb[61].mxu1 }
 0x15e   : > { %v838_v46 = vpop.f32.mrb[62].mxu0  ;;  %v1038_v52 = vpop.f32.mrb[62].mxu1 }
 0x15f   : > { %1136 = vst [vmem:[%s1935_s26 + $0xf0] sm:$0xff] %v836_v43  ;;  %v839_v49 = vadd.f32 %v1930_v51, %v838_v46  ;;  %v1484_v50 = vpop.f32.mrb[63].mxu0  ;;  %1186 = vst [vmem:[%s1935_s26 + $0x280] sm:$0xff] %v1036_v47  ;;  %v1039_v53 = vadd.f32 %v1930_v51, %v1038_v52  ;;  %v1584_v54 = vpop.f32.mrb[63].mxu1 }
 0x161   : > { %1137 = vst [vmem:[%s1935_s26 + $0xf8] sm:$0xff] %v839_v49  ;;  %1187 = vst [vmem:[%s1935_s26 + $0x288] sm:$0xff] %v1039_v53 }
 0x164   : > { %v843_v55 = vpop.f32.mrb[64].mxu0  ;;  %v1043_v58 = vpop.f32.mrb[64].mxu1 }
 0x165   : > { %v844_v56 = vadd.f32 %v1930_v51, %v843_v55  ;;  %v1487_v57 = vpop.f32.mrb[65].mxu0  ;;  %v1044_v60 = vadd.f32 %v1930_v51, %v1043_v58  ;;  %v1587_v61 = vpop.f32.mrb[65].mxu1 }
 0x166   : > { %v846_v59 = vpop.f32.mrb[66].mxu0  ;;  %v1046_v0 = vpop.f32.mrb[66].mxu1 }
 0x167   : > { %1138 = vst [vmem:[%s1935_s26 + $0x100] sm:$0xff] %v844_v56  ;;  %v847_v62 = vadd.f32 %v1930_v51, %v846_v59  ;;  %v1488_v63 = vpop.f32.mrb[67].mxu0  ;;  %1188 = vst [vmem:[%s1935_s26 + $0x290] sm:$0xff] %v1044_v60  ;;  %v1047_v1 = vadd.f32 %v1930_v51, %v1046_v0  ;;  %v1588_v2 = vpop.f32.mrb[67].mxu1 }
 0x169   : > { %1139 = vst [vmem:[%s1935_s26 + $0x108] sm:$0xff] %v847_v62  ;;  %1189 = vst [vmem:[%s1935_s26 + $0x298] sm:$0xff] %v1047_v1 }
 0x16c   : > { %v851_v3 = vpop.f32.mrb[68].mxu0  ;;  %v1051_v6 = vpop.f32.mrb[68].mxu1 }
 0x16d   : > { %v852_v4 = vadd.f32 %v1930_v51, %v851_v3  ;;  %v1491_v5 = vpop.f32.mrb[69].mxu0  ;;  %v1052_v8 = vadd.f32 %v1930_v51, %v1051_v6  ;;  %v1591_v9 = vpop.f32.mrb[69].mxu1 }
 0x16e   : > { %v854_v7 = vpop.f32.mrb[70].mxu0  ;;  %v1054_v12 = vpop.f32.mrb[70].mxu1 }
 0x16f   : > { %1140 = vst [vmem:[%s1935_s26 + $0x110] sm:$0xff] %v852_v4  ;;  %v855_v10 = vadd.f32 %v1930_v51, %v854_v7  ;;  %v1492_v11 = vpop.f32.mrb[71].mxu0  ;;  %1190 = vst [vmem:[%s1935_s26 + $0x2a0] sm:$0xff] %v1052_v8  ;;  %v1055_v13 = vadd.f32 %v1930_v51, %v1054_v12  ;;  %v1592_v14 = vpop.f32.mrb[71].mxu1 }
 0x171   : > { %1141 = vst [vmem:[%s1935_s26 + $0x118] sm:$0xff] %v855_v10  ;;  %1191 = vst [vmem:[%s1935_s26 + $0x2a8] sm:$0xff] %v1055_v13 }
 0x174   : > { %v859_v15 = vpop.f32.mrb[72].mxu0  ;;  %v1059_v18 = vpop.f32.mrb[72].mxu1 }
 0x175   : > { %v860_v16 = vadd.f32 %v1930_v51, %v859_v15  ;;  %v1495_v17 = vpop.f32.mrb[73].mxu0  ;;  %v1060_v20 = vadd.f32 %v1930_v51, %v1059_v18  ;;  %v1595_v21 = vpop.f32.mrb[73].mxu1 }
 0x176   : > { %v862_v19 = vpop.f32.mrb[74].mxu0  ;;  %v1062_v24 = vpop.f32.mrb[74].mxu1 }
 0x177   : > { %1142 = vst [vmem:[%s1935_s26 + $0x120] sm:$0xff] %v860_v16  ;;  %v863_v22 = vadd.f32 %v1930_v51, %v862_v19  ;;  %v1496_v23 = vpop.f32.mrb[75].mxu0  ;;  %1192 = vst [vmem:[%s1935_s26 + $0x2b0] sm:$0xff] %v1060_v20  ;;  %v1063_v25 = vadd.f32 %v1930_v51, %v1062_v24  ;;  %v1596_v26 = vpop.f32.mrb[75].mxu1 }
 0x179   : > { %1143 = vst [vmem:[%s1935_s26 + $0x128] sm:$0xff] %v863_v22  ;;  %1193 = vst [vmem:[%s1935_s26 + $0x2b8] sm:$0xff] %v1063_v25 }
 0x17c   : > { %v867_v27 = vpop.f32.mrb[76].mxu0  ;;  %v1067_v30 = vpop.f32.mrb[76].mxu1 }
 0x17d   : > { %v868_v28 = vadd.f32 %v1930_v51, %v867_v27  ;;  %v1499_v29 = vpop.f32.mrb[77].mxu0  ;;  %v1068_v32 = vadd.f32 %v1930_v51, %v1067_v30  ;;  %v1599_v33 = vpop.f32.mrb[77].mxu1 }
 0x17e   : > { %v870_v31 = vpop.f32.mrb[78].mxu0  ;;  %v1070_v36 = vpop.f32.mrb[78].mxu1 }
 0x17f   : > { %1144 = vst [vmem:[%s1935_s26 + $0x130] sm:$0xff] %v868_v28  ;;  %v871_v34 = vadd.f32 %v1930_v51, %v870_v31  ;;  %v1500_v35 = vpop.f32.mrb[79].mxu0  ;;  %1194 = vst [vmem:[%s1935_s26 + $0x2c0] sm:$0xff] %v1068_v32  ;;  %v1071_v37 = vadd.f32 %v1930_v51, %v1070_v36  ;;  %v1600_v38 = vpop.f32.mrb[79].mxu1 }
 0x181   : > { %1145 = vst [vmem:[%s1935_s26 + $0x138] sm:$0xff] %v871_v34  ;;  %1195 = vst [vmem:[%s1935_s26 + $0x2c8] sm:$0xff] %v1071_v37 }
 0x184   : > { %v875_v39 = vpop.f32.mrb[80].mxu0  ;;  %v1075_v42 = vpop.f32.mrb[80].mxu1 }
 0x185   : > { %v876_v40 = vadd.f32 %v1930_v51, %v875_v39  ;;  %v1503_v41 = vpop.f32.mrb[81].mxu0  ;;  %v1076_v44 = vadd.f32 %v1930_v51, %v1075_v42  ;;  %v1603_v45 = vpop.f32.mrb[81].mxu1 }
 0x186   : > { %v878_v43 = vpop.f32.mrb[82].mxu0  ;;  %v1078_v48 = vpop.f32.mrb[82].mxu1 }
 0x187   : > { %1146 = vst [vmem:[%s1935_s26 + $0x140] sm:$0xff] %v876_v40  ;;  %v879_v46 = vadd.f32 %v1930_v51, %v878_v43  ;;  %v1504_v47 = vpop.f32.mrb[83].mxu0  ;;  %1196 = vst [vmem:[%s1935_s26 + $0x2d0] sm:$0xff] %v1076_v44  ;;  %v1079_v49 = vadd.f32 %v1930_v51, %v1078_v48  ;;  %v1604_v50 = vpop.f32.mrb[83].mxu1 }
 0x189   : > { %1147 = vst [vmem:[%s1935_s26 + $0x148] sm:$0xff] %v879_v46  ;;  %1197 = vst [vmem:[%s1935_s26 + $0x2d8] sm:$0xff] %v1079_v49 }
 0x18c   : > { %v883_v52 = vpop.f32.mrb[84].mxu0  ;;  %v1083_v55 = vpop.f32.mrb[84].mxu1 }
 0x18d   : > { %v884_v53 = vadd.f32 %v1930_v51, %v883_v52  ;;  %v1507_v54 = vpop.f32.mrb[85].mxu0  ;;  %v1084_v57 = vadd.f32 %v1930_v51, %v1083_v55  ;;  %v1607_v58 = vpop.f32.mrb[85].mxu1 }
 0x18e   : > { %v886_v56 = vpop.f32.mrb[86].mxu0  ;;  %v1086_v61 = vpop.f32.mrb[86].mxu1 }
 0x18f   : > { %1148 = vst [vmem:[%s1935_s26 + $0x150] sm:$0xff] %v884_v53  ;;  %v887_v59 = vadd.f32 %v1930_v51, %v886_v56  ;;  %v1508_v60 = vpop.f32.mrb[87].mxu0  ;;  %1198 = vst [vmem:[%s1935_s26 + $0x2e0] sm:$0xff] %v1084_v57  ;;  %v1087_v62 = vadd.f32 %v1930_v51, %v1086_v61  ;;  %v1608_v63 = vpop.f32.mrb[87].mxu1 }
 0x191   : > { %1149 = vst [vmem:[%s1935_s26 + $0x158] sm:$0xff] %v887_v59  ;;  %1199 = vst [vmem:[%s1935_s26 + $0x2e8] sm:$0xff] %v1087_v62 }
 0x194   : > { %v891_v0 = vpop.f32.mrb[88].mxu0  ;;  %v1091_v3 = vpop.f32.mrb[88].mxu1 }
 0x195   : > { %v892_v1 = vadd.f32 %v1930_v51, %v891_v0  ;;  %v1511_v2 = vpop.f32.mrb[89].mxu0  ;;  %v1092_v5 = vadd.f32 %v1930_v51, %v1091_v3  ;;  %v1611_v6 = vpop.f32.mrb[89].mxu1 }
 0x196   : > { %v894_v4 = vpop.f32.mrb[90].mxu0  ;;  %v1094_v9 = vpop.f32.mrb[90].mxu1 }
 0x197   : > { %1150 = vst [vmem:[%s1935_s26 + $0x160] sm:$0xff] %v892_v1  ;;  %v895_v7 = vadd.f32 %v1930_v51, %v894_v4  ;;  %v1512_v8 = vpop.f32.mrb[91].mxu0  ;;  %1200 = vst [vmem:[%s1935_s26 + $0x2f0] sm:$0xff] %v1092_v5  ;;  %v1095_v10 = vadd.f32 %v1930_v51, %v1094_v9  ;;  %v1612_v11 = vpop.f32.mrb[91].mxu1 }
 0x199   : > { %1151 = vst [vmem:[%s1935_s26 + $0x168] sm:$0xff] %v895_v7  ;;  %1201 = vst [vmem:[%s1935_s26 + $0x2f8] sm:$0xff] %v1095_v10 }
 0x19c   : > { %v899_v12 = vpop.f32.mrb[92].mxu0  ;;  %v1099_v15 = vpop.f32.mrb[92].mxu1 }
 0x19d   : > { %v900_v13 = vadd.f32 %v1930_v51, %v899_v12  ;;  %v1515_v14 = vpop.f32.mrb[93].mxu0  ;;  %v1100_v17 = vadd.f32 %v1930_v51, %v1099_v15  ;;  %v1615_v18 = vpop.f32.mrb[93].mxu1 }
 0x19e   : > { %v902_v16 = vpop.f32.mrb[94].mxu0  ;;  %v1102_v21 = vpop.f32.mrb[94].mxu1 }
 0x19f   : > { %1152 = vst [vmem:[%s1935_s26 + $0x170] sm:$0xff] %v900_v13  ;;  %v903_v19 = vadd.f32 %v1930_v51, %v902_v16  ;;  %v1516_v20 = vpop.f32.mrb[95].mxu0  ;;  %1202 = vst [vmem:[%s1935_s26 + $0x300] sm:$0xff] %v1100_v17  ;;  %v1103_v22 = vadd.f32 %v1930_v51, %v1102_v21  ;;  %v1616_v23 = vpop.f32.mrb[95].mxu1 }
 0x1a1   : > { %1153 = vst [vmem:[%s1935_s26 + $0x178] sm:$0xff] %v903_v19  ;;  %1203 = vst [vmem:[%s1935_s26 + $0x308] sm:$0xff] %v1103_v22 }
 0x1a4   : > { %v907_v24 = vpop.f32.mrb[96].mxu0 }
 0x1a5   : > { %v908_v25 = vadd.f32 %v1930_v51, %v907_v24  ;;  %v1519_v26 = vpop.f32.mrb[97].mxu0 }
 0x1a6   : > { %v910_v27 = vpop.f32.mrb[98].mxu0 }
 0x1a7   : > { %1154 = vst [vmem:[%s1935_s26 + $0x180] sm:$0xff] %v908_v25  ;;  %v911_v28 = vadd.f32 %v1930_v51, %v910_v27  ;;  %v1520_v29 = vpop.f32.mrb[99].mxu0 }
 0x1a9   : > { %1155 = vst [vmem:[%s1935_s26 + $0x188] sm:$0xff] %v911_v28 }
 0x1aa PF: > { %s13_s12 = sadd.s32 1, %s1685_s12  }
 0x1ab   : > { %p10_p4 = scmp.ge.s32.totalorder %s13_s12, 4  }
 0x1ad   :  { %12 = sbr.rel (!%p10_p4) target bundleno = 1 (0x1), region = 62 }

// kernel: mnist_diffusion_forward.26
= control target key start
LH: loop header
LB: loop body
LE: loop exit
PB: predicated region body
PF: predicated region fallthrough
CT: control target
= control target key end

     0   :  { %s3341_s12 = smov 0   ;;  %s4226_s0 = inlined_call_operand.vmem [shape: bf16[1568,288], index: 0, kind: input, shape index: {}]   ;;  %s4227_s1 = inlined_call_operand.vmem [shape: bf16[288,128], index: 1, kind: input, shape index: {}]   ;;  %s4228_s2 = inlined_call_operand.vmem [shape: f32[1,128], index: 2, kind: input, shape index: {}]   ;;  %s4229_s3 = inlined_call_operand.vmem [shape: f32[1568,128], index: 3, kind: output, shape index: {}]  }
   0x1 LB: > { %s2412_s13 = sadd.s32 4294967295, %s3316_s12   ;;  %p2416_p0 = scmp.ge.s32.totalorder %s3316_s12, 1  ;;  %s3316_s12 = sphi %s3341_s12, %s13_s12  }
   0x2   : > { %p139_p1 = scmp.lt.s32.totalorder %s3316_s12, 3 }
   0x4   : > { %p140_p2 = pnand %p2416_p0, %p139_p1 }
   0x5   : > { %v3095_v0 = vld [vmem:[%s4227_s1] sm:$0xff] (!%p140_p2)   ;;  %v3318_v1 = vmov (!%p140_p2), 0   ;;  %v3096_v2 = vld [vmem:[%s4227_s1 + $0x8] sm:$0xff] (!%p140_p2)   ;;  %v3319_v3 = vmov (!%p140_p2), 0.0   ;;  %vm3320_vm0 = vmmov (!%p140_p2), 0   ;;  %s164_s18 = smul.u32 (!%p140_p2), 98, %s2412_s13 }
   0x6   : > { %143 = sbr.rel (%p140_p2) target bundleno = 673 (0x2a1), region = 32  ;;  %1408 = vmatprep.subr.bf16.mxu1 (!%p140_p2), %v3318_v1  ;;  %2687 = vmatprep.subr.bf16.mxu0 (!%p140_p2), %v3319_v3  ;;  %v3097_v4 = vld [vmem:[%s4227_s1 + $0x10] sm:$0xff] (!%p140_p2)   ;;  %v3098_v5 = vld [vmem:[%s4227_s1 + $0x18] sm:$0xff] (!%p140_p2)   ;;  %v3099_v6 = vld [vmem:[%s4227_s1 + $0x20] sm:$0xff] (!%p140_p2)   ;;  %vm1260_vm1 = vcmask (!%p140_p2), 261120  }
   0x7   : > { %1409 = vmatpush1.bf16.msra.mxu1 (!%p140_p2), %v3095_v0  ;;  %2691 = vmatprep.mubr.msk.bf16.mxu0 (!%p140_p2), %vm3320_vm0, %v3319_v3  ;;  %p165_p3 = scmp.lt.s32.totalorder (!%p140_p2), %s164_s18, 195  ;;  %v3109_v7 = vld [vmem:[%s4227_s1 + $0x80] sm:$0xff] (!%p140_p2)   ;;  %v3111_v8 = vld [vmem:[%s4227_s1 + $0x88] sm:$0xff] (!%p140_p2)   ;;  %v3101_v12 = vld [vmem:[%s4227_s1 + $0x30] sm:$0xff] (!%p140_p2)  }
   0x8   : > { %1410 = vmatprep.subr.bf16.mxu1 (!%p140_p2), %v3318_v1  ;;  %2688 = vmatpush3.bf16.msra.mxu0 (!%p140_p2), %v3109_v7  ;;  %v3100_v9 = vld [vmem:[%s4227_s1 + $0x28] sm:$0xff] (!%p140_p2)   ;;  %v3102_v13 = vld [vmem:[%s4227_s1 + $0x38] sm:$0xff] (!%p140_p2)   ;;  %v3103_v15 = vld [vmem:[%s4227_s1 + $0x40] sm:$0xff] (!%p140_p2)  }
   0x9   : > { %2689 = vmatprep.subr.bf16.mxu0 (!%p140_p2), %v3319_v3  ;;  %v3104_v16 = vld [vmem:[%s4227_s1 + $0x48] sm:$0xff] (!%p140_p2)   ;;  %v3105_v18 = vld [vmem:[%s4227_s1 + $0x50] sm:$0xff] (!%p140_p2)   ;;  %v3106_v19 = vld [vmem:[%s4227_s1 + $0x58] sm:$0xff] (!%p140_p2)  }
   0xa   : > { %v3107_v21 = vld [vmem:[%s4227_s1 + $0x60] sm:$0xff] (!%p140_p2)   ;;  %v3108_v22 = vld [vmem:[%s4227_s1 + $0x68] sm:$0xff] (!%p140_p2)   ;;  %v3110_v24 = vld [vmem:[%s4227_s1 + $0x70] sm:$0xff] (!%p140_p2)  }
   0xb   : > { %1411 = vmatpush1.bf16.msra.mxu1 (!%p140_p2), %v3096_v2  ;;  %v3112_v25 = vld [vmem:[%s4227_s1 + $0x78] sm:$0xff] (!%p140_p2)  }
   0xc   : > { %1412 = vmatprep.subr.bf16.mxu1 (!%p140_p2), %v3318_v1  ;;  %2690 = vmatpush3.bf16.msra.mxu0 (!%p140_p2), %v3111_v8 }
   0xd   : > { %s4231_s18 = smov (!%p165_p3, %s164_s18), 195 }
   0xe   : > { %s3083_s23 = smul.u32 12, %s4231_s18  ;;  %s2418_s6 = sshll.u32 %s4231_s18, 3 }
   0xf   : > { %1413 = vmatpush1.bf16.msra.mxu1 %v3097_v4  ;;  %s3650_s9 = scalar_lea.vmem %s4229_s3, %s2418_s6 }
  0x10   : > { %1414 = vmatprep.subr.bf16.mxu1 %v3318_v1  ;;  %s3384_s5 = scalar_lea.vmem %s4226_s0, %s3083_s23 }
  0x11   : > { %v3115_v10 = vld [vmem:[%s3384_s5 + $0x4] ss:$12 sps:$4 sm:$0xff]   ;;  %v3116_v11 = vld [vmem:[%s3384_s5 + $0x8] ss:$12 sps:$4 sm:$0xff]   ;;  %v3119_v14 = vld [vmem:[%s3384_s5 + $0x20] ss:$12 sps:$4 sm:$0xff]  }
  0x12   : > { %1440 = vmatprep.mubr.bf16.mxu1 %v3115_v10  ;;  %2692 = vmatmul.mubr.msk.bf16.vlgmr.msra.gmra.mrb[0].mxu0 %vm1260_vm1, %v3116_v11  ;;  %v3123_v17 = vld [vmem:[%s3384_s5 + $0x38] ss:$12 sps:$4 sm:$0xff]   ;;  %v3127_v20 = vld [vmem:[%s3384_s5 + $0x50] ss:$12 sps:$4 sm:$0xff]   ;;  %v3131_v23 = vld [vmem:[%s3384_s5 + $0x68] ss:$12 sps:$4 sm:$0xff]  }
  0x13   : > { %1415 = vmatpush1.bf16.msra.mxu1 %v3098_v5  ;;  %2695 = vmatprep.mubr.msk.bf16.mxu0 %vm3320_vm0, %v3319_v3  ;;  %v3135_v26 = vld [vmem:[%s3384_s5 + $0x80] ss:$12 sps:$4 sm:$0xff]   ;;  %v3117_v28 = vld [vmem:[%s3384_s5 + $0x1c] ss:$12 sps:$4 sm:$0xff]   ;;  %v3139_v29 = vld [vmem:[%s3384_s5 + $0x98] ss:$12 sps:$4 sm:$0xff]  }
  0x14   : > { %1416 = vmatprep.subr.bf16.mxu1 %v3318_v1  ;;  %v3113_v27 = vld [vmem:[%s3384_s5] ss:$12 sps:$4 sm:$0xff]   ;;  %v3120_v30 = vld [vmem:[%s3384_s5 + $0x18] ss:$12 sps:$4 sm:$0xff]   ;;  %v3143_v32 = vld [vmem:[%s3384_s5 + $0xb0] ss:$12 sps:$4 sm:$0xff]  }
  0x15   : > { %v3121_v31 = vld [vmem:[%s3384_s5 + $0x34] ss:$12 sps:$4 sm:$0xff]   ;;  %v3124_v33 = vld [vmem:[%s3384_s5 + $0x30] ss:$12 sps:$4 sm:$0xff]   ;;  %v3125_v34 = vld [vmem:[%s3384_s5 + $0x4c] ss:$12 sps:$4 sm:$0xff]  }
  0x16   : > { %v3147_v35 = vld [vmem:[%s3384_s5 + $0xc8] ss:$12 sps:$4 sm:$0xff]   ;;  %v3129_v37 = vld [vmem:[%s3384_s5 + $0x64] ss:$12 sps:$4 sm:$0xff]   ;;  %v3151_v38 = vld [vmem:[%s3384_s5 + $0xe0] ss:$12 sps:$4 sm:$0xff]  }
  0x17   : > { %1417 = vmatpush1.bf16.msra.mxu1 %v3099_v6  ;;  %v3128_v36 = vld [vmem:[%s3384_s5 + $0x48] ss:$12 sps:$4 sm:$0xff]   ;;  %v3132_v39 = vld [vmem:[%s3384_s5 + $0x60] ss:$12 sps:$4 sm:$0xff]   ;;  %v3155_v41 = vld [vmem:[%s3384_s5 + $0xf8] ss:$12 sps:$4 sm:$0xff]  }
  0x18   : > { %1418 = vmatprep.subr.bf16.mxu1 %v3318_v1  ;;  %v3133_v40 = vld [vmem:[%s3384_s5 + $0x7c] ss:$12 sps:$4 sm:$0xff]   ;;  %v3136_v42 = vld [vmem:[%s3384_s5 + $0x78] ss:$12 sps:$4 sm:$0xff]   ;;  %v3137_v43 = vld [vmem:[%s3384_s5 + $0x94] ss:$12 sps:$4 sm:$0xff]  }
  0x19   : > { %v3159_v44 = vld [vmem:[%s3384_s5 + $0x110] ss:$12 sps:$4 sm:$0xff]   ;;  %v3141_v46 = vld [vmem:[%s3384_s5 + $0xac] ss:$12 sps:$4 sm:$0xff]   ;;  %v3163_v47 = vld [vmem:[%s3384_s5 + $0x128] ss:$12 sps:$4 sm:$0xff]  }
  0x1a   : > { %2696 = vmatmul.mubr.msk.bf16.gmra.mrb[4].mxu0 %vm1260_vm1, %v3119_v14  ;;  %v3140_v45 = vld [vmem:[%s3384_s5 + $0x90] ss:$12 sps:$4 sm:$0xff]   ;;  %v3144_v48 = vld [vmem:[%s3384_s5 + $0xa8] ss:$12 sps:$4 sm:$0xff]   ;;  %v3167_v50 = vld [vmem:[%s3384_s5 + $0x140] ss:$12 sps:$4 sm:$0xff]  }
  0x1b   : > { %1419 = vmatpush1.bf16.msra.mxu1 %v3100_v9  ;;  %2699 = vmatprep.mubr.msk.bf16.mxu0 %vm3320_vm0, %v3319_v3  ;;  %v3145_v49 = vld [vmem:[%s3384_s5 + $0xc4] ss:$12 sps:$4 sm:$0xff]   ;;  %v3148_v51 = vld [vmem:[%s3384_s5 + $0xc0] ss:$12 sps:$4 sm:$0xff]   ;;  %v3149_v52 = vld [vmem:[%s3384_s5 + $0xdc] ss:$12 sps:$4 sm:$0xff]  }
  0x1c   : > { %1420 = vmatprep.subr.bf16.mxu1 %v3318_v1  ;;  %v3171_v53 = vld [vmem:[%s3384_s5 + $0x158] ss:$12 sps:$4 sm:$0xff]   ;;  %v3153_v55 = vld [vmem:[%s3384_s5 + $0xf4] ss:$12 sps:$4 sm:$0xff]   ;;  %v3175_v56 = vld [vmem:[%s3384_s5 + $0x170] ss:$12 sps:$4 sm:$0xff]  }
  0x1d   : > { %v3152_v54 = vld [vmem:[%s3384_s5 + $0xd8] ss:$12 sps:$4 sm:$0xff]   ;;  %v3156_v57 = vld [vmem:[%s3384_s5 + $0xf0] ss:$12 sps:$4 sm:$0xff]   ;;  %v3179_v59 = vld [vmem:[%s3384_s5 + $0x188] ss:$12 sps:$4 sm:$0xff]  }
  0x1e   : > { %v3157_v58 = vld [vmem:[%s3384_s5 + $0x10c] ss:$12 sps:$4 sm:$0xff]   ;;  %v3160_v60 = vld [vmem:[%s3384_s5 + $0x108] ss:$12 sps:$4 sm:$0xff]   ;;  %v3161_v61 = vld [vmem:[%s3384_s5 + $0x124] ss:$12 sps:$4 sm:$0xff]  }
  0x1f   : > { %1421 = vmatpush1.bf16.msra.mxu1 %v3101_v12  ;;  %v3183_v62 = vld [vmem:[%s3384_s5 + $0x1a0] ss:$12 sps:$4 sm:$0xff]   ;;  %v3165_v0 = vld [vmem:[%s3384_s5 + $0x13c] ss:$12 sps:$4 sm:$0xff]   ;;  %v3168_v2 = vld [vmem:[%s3384_s5 + $0x138] ss:$12 sps:$4 sm:$0xff]  }
  0x20   : > { %1422 = vmatprep.subr.bf16.mxu1 %v3318_v1  ;;  %v3164_v63 = vld [vmem:[%s3384_s5 + $0x120] ss:$12 sps:$4 sm:$0xff]   ;;  %v3191_v5 = vld [vmem:[%s3384_s5 + $0x1d0] ss:$12 sps:$4 sm:$0xff]   ;;  %v3195_v8 = vld [vmem:[%s3384_s5 + $0x1e8] ss:$12 sps:$4 sm:$0xff]  }
  0x21   : > { %v3169_v4 = vld [vmem:[%s3384_s5 + $0x154] ss:$12 sps:$4 sm:$0xff]   ;;  %v3172_v6 = vld [vmem:[%s3384_s5 + $0x150] ss:$12 sps:$4 sm:$0xff]   ;;  %v3173_v7 = vld [vmem:[%s3384_s5 + $0x16c] ss:$12 sps:$4 sm:$0xff]  }
  0x22   : > { %2700 = vmatmul.mubr.msk.bf16.gmra.mrb[8].mxu0 %vm1260_vm1, %v3123_v17  ;;  %v3176_v9 = vld [vmem:[%s3384_s5 + $0x168] ss:$12 sps:$4 sm:$0xff]   ;;  %v3177_v10 = vld [vmem:[%s3384_s5 + $0x184] ss:$12 sps:$4 sm:$0xff]   ;;  %v3199_v11 = vld [vmem:[%s3384_s5 + $0x200] ss:$12 sps:$4 sm:$0xff]  }
  0x23   : > { %1423 = vmatpush1.bf16.msra.mxu1 %v3102_v13  ;;  %2703 = vmatprep.mubr.msk.bf16.mxu0 %vm3320_vm0, %v3319_v3  ;;  %v3180_v12 = vld [vmem:[%s3384_s5 + $0x180] ss:$12 sps:$4 sm:$0xff]   ;;  %v3181_v13 = vld [vmem:[%s3384_s5 + $0x19c] ss:$12 sps:$4 sm:$0xff]   ;;  %v3203_v14 = vld [vmem:[%s3384_s5 + $0x218] ss:$12 sps:$4 sm:$0xff]  }
  0x24   : > { %1424 = vmatprep.subr.bf16.mxu1 %v3318_v1  ;;  %v3207_v17 = vld [vmem:[%s3384_s5 + $0x230] ss:$12 sps:$4 sm:$0xff]  }
  0x27   : > { %1425 = vmatpush1.bf16.msra.mxu1 %v3103_v15  ;;  %v3184_v15 = vld [vmem:[%s3384_s5 + $0x198] ss:$12 sps:$4 sm:$0xff]  }
  0x28   : > { %1426 = vmatprep.subr.bf16.mxu1 %v3318_v1 }
  0x2a   : > { %2704 = vmatmul.mubr.msk.bf16.gmra.mrb[12].mxu0 %vm1260_vm1, %v3127_v20  ;;  %v3211_v20 = vld [vmem:[%s3384_s5 + $0x248] ss:$12 sps:$4 sm:$0xff]  }
  0x2b   : > { %1427 = vmatpush1.bf16.msra.mxu1 %v3104_v16  ;;  %2707 = vmatprep.mubr.msk.bf16.mxu0 %vm3320_vm0, %v3319_v3  ;;  %v3185_v16 = vld [vmem:[%s3384_s5 + $0x1b4] ss:$12 sps:$4 sm:$0xff]  }
  0x2c   : > { %1428 = vmatprep.subr.bf16.mxu1 %v3318_v1 }
  0x2f   : > { %1429 = vmatpush1.bf16.msra.mxu1 %v3105_v18  ;;  %v3188_v18 = vld [vmem:[%s3384_s5 + $0x1b0] ss:$12 sps:$4 sm:$0xff]  }
  0x30   : > { %1430 = vmatprep.subr.bf16.mxu1 %v3318_v1 }
  0x32   : > { %2708 = vmatmul.mubr.msk.bf16.gmra.mrb[16].mxu0 %vm1260_vm1, %v3131_v23  ;;  %v3215_v23 = vld [vmem:[%s3384_s5 + $0x260] ss:$12 sps:$4 sm:$0xff]  }
  0x33   : > { %1431 = vmatpush1.bf16.msra.mxu1 %v3106_v19  ;;  %2711 = vmatprep.mubr.msk.bf16.mxu0 %vm3320_vm0, %v3319_v3  ;;  %v3189_v19 = vld [vmem:[%s3384_s5 + $0x1cc] ss:$12 sps:$4 sm:$0xff]  }
  0x34   : > { %1432 = vmatprep.subr.bf16.mxu1 %v3318_v1 }
  0x37   : > { %1433 = vmatpush1.bf16.msra.mxu1 %v3107_v21  ;;  %v3192_v21 = vld [vmem:[%s3384_s5 + $0x1c8] ss:$12 sps:$4 sm:$0xff]  }
  0x38   : > { %1434 = vmatprep.subr.bf16.mxu1 %v3318_v1 }
  0x3a   : > { %2712 = vmatmul.mubr.msk.bf16.gmra.mrb[20].mxu0 %vm1260_vm1, %v3135_v26  ;;  %v3219_v26 = vld [vmem:[%s3384_s5 + $0x278] ss:$12 sps:$4 sm:$0xff]  }
  0x3b   : > { %1435 = vmatpush1.bf16.msra.mxu1 %v3108_v22  ;;  %2715 = vmatprep.mubr.msk.bf16.mxu0 %vm3320_vm0, %v3319_v3  ;;  %v3193_v22 = vld [vmem:[%s3384_s5 + $0x1e4] ss:$12 sps:$4 sm:$0xff]  }
  0x3c   : > { %1436 = vmatprep.subr.bf16.mxu1 %v3318_v1 }
  0x3f   : > { %1437 = vmatpush1.bf16.msra.mxu1 %v3110_v24  ;;  %v3196_v24 = vld [vmem:[%s3384_s5 + $0x1e0] ss:$12 sps:$4 sm:$0xff]  }
  0x40   : > { %1438 = vmatprep.subr.bf16.mxu1 %v3318_v1  ;;  %v3187_v1 = vld [vmem:[%s3384_s5 + $0x1b8] ss:$12 sps:$4 sm:$0xff]  }
  0x42   : > { %2716 = vmatmul.mubr.msk.bf16.gmra.mrb[24].mxu0 %vm1260_vm1, %v3139_v29 }
  0x43   : > { %1439 = vmatpush1.bf16.msra.mxu1 %v3112_v25  ;;  %2719 = vmatprep.mubr.msk.bf16.mxu0 %vm3320_vm0, %v3319_v3  ;;  %v3197_v25 = vld [vmem:[%s3384_s5 + $0x1fc] ss:$12 sps:$4 sm:$0xff]  }
  0x46   : > { %1441 = vmatmul.mubr.bf16.vlgmr.msra.gmra.mrb[0].mxu1 %v3113_v27  ;;  %v3200_v27 = vld [vmem:[%s3384_s5 + $0x1f8] ss:$12 sps:$4 sm:$0xff]  }
  0x47   : > { %1448 = vmatprep.mubr.bf16.mxu1 %v3117_v28  ;;  %v3201_v28 = vld [vmem:[%s3384_s5 + $0x214] ss:$12 sps:$4 sm:$0xff]  }
  0x4a   : > { %2720 = vmatmul.mubr.msk.bf16.gmra.mrb[28].mxu0 %vm1260_vm1, %v3143_v32 }
  0x4b   : > { %2723 = vmatprep.mubr.msk.bf16.mxu0 %vm3320_vm0, %v3319_v3 }
  0x4e   : > { %1449 = vmatmul.mubr.bf16.gmra.mrb[4].mxu1 %v3120_v30 }
  0x4f   : > { %1456 = vmatprep.mubr.bf16.mxu1 %v3121_v31  ;;  %v3223_v31 = vld [vmem:[%s3384_s5 + $0x290] ss:$12 sps:$4 sm:$0xff]  }
  0x52   : > { %2724 = vmatmul.mubr.msk.bf16.gmra.mrb[32].mxu0 %vm1260_vm1, %v3147_v35  ;;  %v3205_v35 = vld [vmem:[%s3384_s5 + $0x22c] ss:$12 sps:$4 sm:$0xff]  }
  0x53   : > { %2727 = vmatprep.mubr.msk.bf16.mxu0 %vm3320_vm0, %v3319_v3 }
  0x56   : > { %1457 = vmatmul.mubr.bf16.gmra.mrb[8].mxu1 %v3124_v33  ;;  %v3204_v33 = vld [vmem:[%s3384_s5 + $0x210] ss:$12 sps:$4 sm:$0xff]  }
  0x57   : > { %1464 = vmatprep.mubr.bf16.mxu1 %v3125_v34 }
  0x5a   : > { %2728 = vmatmul.mubr.msk.bf16.gmra.mrb[36].mxu0 %vm1260_vm1, %v3151_v38  ;;  %v3227_v38 = vld [vmem:[%s3384_s5 + $0x2a8] ss:$12 sps:$4 sm:$0xff]  }
  0x5b   : > { %2731 = vmatprep.mubr.msk.bf16.mxu0 %vm3320_vm0, %v3319_v3 }
  0x5e   : > { %1465 = vmatmul.mubr.bf16.gmra.mrb[12].mxu1 %v3128_v36 }
  0x5f   : > { %1472 = vmatprep.mubr.bf16.mxu1 %v3129_v37 }
  0x62   : > { %2732 = vmatmul.mubr.msk.bf16.gmra.mrb[40].mxu0 %vm1260_vm1, %v3155_v41 }
  0x63   : > { %2735 = vmatprep.mubr.msk.bf16.mxu0 %vm3320_vm0, %v3319_v3 }
  0x66   : > { %1473 = vmatmul.mubr.bf16.gmra.mrb[16].mxu1 %v3132_v39 }
  0x67   : > { %1480 = vmatprep.mubr.bf16.mxu1 %v3133_v40  ;;  %v3208_v40 = vld [vmem:[%s3384_s5 + $0x228] ss:$12 sps:$4 sm:$0xff]  }
  0x6a   : > { %2736 = vmatmul.mubr.msk.bf16.gmra.mrb[44].mxu0 %vm1260_vm1, %v3159_v44 }
  0x6b   : > { %2739 = vmatprep.mubr.msk.bf16.mxu0 %vm3320_vm0, %v3319_v3 }
  0x6e   : > { %1481 = vmatmul.mubr.bf16.gmra.mrb[20].mxu1 %v3136_v42  ;;  %v3209_v42 = vld [vmem:[%s3384_s5 + $0x244] ss:$12 sps:$4 sm:$0xff]  }
  0x6f   : > { %1488 = vmatprep.mubr.bf16.mxu1 %v3137_v43 }
  0x72   : > { %2740 = vmatmul.mubr.msk.bf16.gmra.mrb[48].mxu0 %vm1260_vm1, %v3163_v47  ;;  %v3212_v47 = vld [vmem:[%s3384_s5 + $0x240] ss:$12 sps:$4 sm:$0xff]  }
  0x73   : > { %2743 = vmatprep.mubr.msk.bf16.mxu0 %vm3320_vm0, %v3319_v3 }
  0x76   : > { %1489 = vmatmul.mubr.bf16.gmra.mrb[24].mxu1 %v3140_v45  ;;  %v3231_v45 = vld [vmem:[%s3384_s5 + $0x2c0] ss:$12 sps:$4 sm:$0xff]  }
  0x77   : > { %1496 = vmatprep.mubr.bf16.mxu1 %v3141_v46 }
  0x7a   : > { %2744 = vmatmul.mubr.msk.bf16.gmra.mrb[52].mxu0 %vm1260_vm1, %v3167_v50 }
  0x7b   : > { %2747 = vmatprep.mubr.msk.bf16.mxu0 %vm3320_vm0, %v3319_v3 }
  0x7e   : > { %1497 = vmatmul.mubr.bf16.gmra.mrb[28].mxu1 %v3144_v48 }
  0x7f   : > { %1504 = vmatprep.mubr.bf16.mxu1 %v3145_v49  ;;  %v3213_v49 = vld [vmem:[%s3384_s5 + $0x25c] ss:$12 sps:$4 sm:$0xff]  }
  0x82   : > { %2748 = vmatmul.mubr.msk.bf16.gmra.mrb[56].mxu0 %vm1260_vm1, %v3171_v53 }
  0x83   : > { %2751 = vmatprep.mubr.msk.bf16.mxu0 %vm3320_vm0, %v3319_v3 }
  0x86   : > { %1505 = vmatmul.mubr.bf16.gmra.mrb[32].mxu1 %v3148_v51 }
  0x87   : > { %1512 = vmatprep.mubr.bf16.mxu1 %v3149_v52  ;;  %v3235_v52 = vld [vmem:[%s3384_s5 + $0x2d8] ss:$12 sps:$4 sm:$0xff]  }
  0x8a   : > { %2752 = vmatmul.mubr.msk.bf16.gmra.mrb[60].mxu0 %vm1260_vm1, %v3175_v56  ;;  %v3217_v56 = vld [vmem:[%s3384_s5 + $0x274] ss:$12 sps:$4 sm:$0xff]  }
  0x8b   : > { %2755 = vmatprep.mubr.msk.bf16.mxu0 %vm3320_vm0, %v3319_v3 }
  0x8e   : > { %1513 = vmatmul.mubr.bf16.gmra.mrb[36].mxu1 %v3152_v54  ;;  %v3216_v54 = vld [vmem:[%s3384_s5 + $0x258] ss:$12 sps:$4 sm:$0xff]  }
  0x8f   : > { %1520 = vmatprep.mubr.bf16.mxu1 %v3153_v55 }
  0x92   : > { %2756 = vmatmul.mubr.msk.bf16.gmra.mrb[64].mxu0 %vm1260_vm1, %v3179_v59  ;;  %v3239_v59 = vld [vmem:[%s3384_s5 + $0x2f0] ss:$12 sps:$4 sm:$0xff]  }
  0x93   : > { %2759 = vmatprep.mubr.msk.bf16.mxu0 %vm3320_vm0, %v3319_v3 }
  0x96   : > { %1521 = vmatmul.mubr.bf16.gmra.mrb[40].mxu1 %v3156_v57 }
  0x97   : > { %1528 = vmatprep.mubr.bf16.mxu1 %v3157_v58 }
  0x9a   : > { %2760 = vmatmul.mubr.msk.bf16.gmra.mrb[68].mxu0 %vm1260_vm1, %v3183_v62 }
  0x9b   : > { %2763 = vmatprep.mubr.msk.bf16.mxu0 %vm3320_vm0, %v3319_v3 }
  0x9e   : > { %1529 = vmatmul.mubr.bf16.gmra.mrb[44].mxu1 %v3160_v60 }
  0x9f   : > { %1536 = vmatprep.mubr.bf16.mxu1 %v3161_v61  ;;  %v3220_v61 = vld [vmem:[%s3384_s5 + $0x270] ss:$12 sps:$4 sm:$0xff]  }
  0xa2   : > { %2764 = vmatmul.mubr.msk.bf16.gmra.mrb[72].mxu0 %vm1260_vm1, %v3187_v1 }
  0xa3   : > { %2767 = vmatprep.mubr.msk.bf16.mxu0 %vm3320_vm0, %v3319_v3 }
  0xa6   : > { %1537 = vmatmul.mubr.bf16.gmra.mrb[48].mxu1 %v3164_v63  ;;  %v3221_v63 = vld [vmem:[%s3384_s5 + $0x28c] ss:$12 sps:$4 sm:$0xff]  }
  0xa7   : > { %1544 = vmatprep.mubr.bf16.mxu1 %v3165_v0  ;;  %v3637_v0 = vld [vmem:[%s4228_s2] ss:$0 sm:$0xff] }
  0xaa   : > { %2768 = vmatmul.mubr.msk.bf16.gmra.mrb[76].mxu0 %vm1260_vm1, %v3191_v5 }
  0xab   : > { %2771 = vmatprep.mubr.msk.bf16.mxu0 %vm3320_vm0, %v3319_v3 }
  0xae   : > { %1545 = vmatmul.mubr.bf16.gmra.mrb[52].mxu1 %v3168_v2 }
  0xaf   : > { %1552 = vmatprep.mubr.bf16.mxu1 %v3169_v4  ;;  %v3243_v4 = vld [vmem:[%s3384_s5 + $0x308] ss:$12 sps:$4 sm:$0xff]  }
  0xb2   : > { %2772 = vmatmul.mubr.msk.bf16.gmra.mrb[80].mxu0 %vm1260_vm1, %v3195_v8 }
  0xb3   : > { %2775 = vmatprep.mubr.msk.bf16.mxu0 %vm3320_vm0, %v3319_v3 }
  0xb6   : > { %1553 = vmatmul.mubr.bf16.gmra.mrb[56].mxu1 %v3172_v6 }
  0xb7   : > { %1560 = vmatprep.mubr.bf16.mxu1 %v3173_v7 }
  0xba   : > { %2776 = vmatmul.mubr.msk.bf16.gmra.mrb[84].mxu0 %vm1260_vm1, %v3199_v11 }
  0xbb   : > { %2779 = vmatprep.mubr.msk.bf16.mxu0 %vm3320_vm0, %v3319_v3 }
  0xbe   : > { %1561 = vmatmul.mubr.bf16.gmra.mrb[60].mxu1 %v3176_v9  ;;  %v3224_v9 = vld [vmem:[%s3384_s5 + $0x288] ss:$12 sps:$4 sm:$0xff]  }
  0xbf   : > { %1568 = vmatprep.mubr.bf16.mxu1 %v3177_v10 }
  0xc2   : > { %2780 = vmatmul.mubr.msk.bf16.gmra.mrb[88].mxu0 %vm1260_vm1, %v3203_v14 }
  0xc3   : > { %2783 = vmatprep.mubr.msk.bf16.mxu0 %vm3320_vm0, %v3319_v3 }
  0xc6   : > { %1569 = vmatmul.mubr.bf16.gmra.mrb[64].mxu1 %v3180_v12  ;;  %v3225_v12 = vld [vmem:[%s3384_s5 + $0x2a4] ss:$12 sps:$4 sm:$0xff]  }
  0xc7   : > { %1576 = vmatprep.mubr.bf16.mxu1 %v3181_v13 }
  0xca   : > { %2784 = vmatmul.mubr.msk.bf16.gmra.mrb[92].mxu0 %vm1260_vm1, %v3207_v17 }
  0xcb   : > { %2787 = vmatprep.mubr.msk.bf16.mxu0 %vm3320_vm0, %v3319_v3 }
  0xce   : > { %1577 = vmatmul.mubr.bf16.gmra.mrb[68].mxu1 %v3184_v15 }
  0xcf   : > { %1584 = vmatprep.mubr.bf16.mxu1 %v3185_v16 }
  0xd2   : > { %2788 = vmatmul.mubr.msk.bf16.gmra.mrb[96].mxu0 %vm1260_vm1, %v3211_v20 }
  0xd3   : > { %2791 = vmatprep.mubr.msk.bf16.mxu0 %vm3320_vm0, %v3319_v3 }
  0xd6   : > { %1585 = vmatmul.mubr.bf16.gmra.mrb[72].mxu1 %v3188_v18 }
  0xd7   : > { %1592 = vmatprep.mubr.bf16.mxu1 %v3189_v19  ;;  %v3247_v19 = vld [vmem:[%s3384_s5 + $0x320] ss:$12 sps:$4 sm:$0xff]  }
  0xda   : > { %2792 = vmatmul.mubr.msk.bf16.gmra.mrb[100].mxu0 %vm1260_vm1, %v3215_v23 }
  0xdb   : > { %2795 = vmatprep.mubr.msk.bf16.mxu0 %vm3320_vm0, %v3319_v3 }
  0xde   : > { %1593 = vmatmul.mubr.bf16.gmra.mrb[76].mxu1 %v3192_v21 }
  0xdf   : > { %1600 = vmatprep.mubr.bf16.mxu1 %v3193_v22 }
  0xe2   : > { %2796 = vmatmul.mubr.msk.bf16.gmra.mrb[104].mxu0 %vm1260_vm1, %v3219_v26 }
  0xe3   : > { %2799 = vmatprep.mubr.msk.bf16.mxu0 %vm3320_vm0, %v3319_v3 }
  0xe5   : > { %v3584_v29 = vpop.f32.mrb[0].mxu0 }
  0xe6   : > { %1601 = vmatmul.mubr.bf16.gmra.mrb[80].mxu1 %v3196_v24  ;;  %v2693_v30 = vpop.f32.mrb[1].mxu0  ;;  %v3228_v24 = vld [vmem:[%s3384_s5 + $0x2a0] ss:$12 sps:$4 sm:$0xff]  }
  0xe7   : > { %1608 = vmatprep.mubr.bf16.mxu1 %v3197_v25  ;;  %v3587_v32 = vpop.f32.mrb[2].mxu0 }
  0xe8   : > { %v2694_v34 = vpop.f32.mrb[3].mxu0 }
  0xe9   : > { %v3251_v34 = vld [vmem:[%s3384_s5 + $0x338] ss:$12 sps:$4 sm:$0xff]  }
  0xea   : > { %2800 = vmatmul.mubr.msk.bf16.gmra.mrb[108].mxu0 %vm1260_vm1, %v3223_v31 }
  0xeb   : > { %2803 = vmatprep.mubr.msk.bf16.mxu0 %vm3320_vm0, %v3319_v3 }
  0xed   : > { %v3594_v36 = vpop.f32.mrb[4].mxu0 }
  0xee   : > { %1609 = vmatmul.mubr.bf16.gmra.mrb[84].mxu1 %v3200_v27  ;;  %v2697_v37 = vpop.f32.mrb[5].mxu0  ;;  %v3229_v27 = vld [vmem:[%s3384_s5 + $0x2bc] ss:$12 sps:$4 sm:$0xff]  }
  0xef   : > { %1616 = vmatprep.mubr.bf16.mxu1 %v3201_v28  ;;  %v3597_v39 = vpop.f32.mrb[6].mxu0 }
  0xf0   : > { %v2698_v41 = vpop.f32.mrb[7].mxu0 }
  0xf2   : > { %2804 = vmatmul.mubr.msk.bf16.gmra.mrb[112].mxu0 %vm1260_vm1, %v3227_v38 }
  0xf3   : > { %2807 = vmatprep.mubr.msk.bf16.mxu0 %vm3320_vm0, %v3319_v3 }
  0xf5   : > { %v3604_v43 = vpop.f32.mrb[8].mxu0 }
  0xf6   : > { %1617 = vmatmul.mubr.bf16.gmra.mrb[88].mxu1 %v3204_v33  ;;  %v2701_v44 = vpop.f32.mrb[9].mxu0 }
  0xf7   : > { %1624 = vmatprep.mubr.bf16.mxu1 %v3205_v35  ;;  %v3607_v46 = vpop.f32.mrb[10].mxu0 }
  0xf8   : > { %v2702_v48 = vpop.f32.mrb[11].mxu0 }
  0xfa   : > { %2808 = vmatmul.mubr.msk.bf16.gmra.mrb[116].mxu0 %vm1260_vm1, %v3231_v45 }
  0xfb   : > { %2811 = vmatprep.mubr.msk.bf16.mxu0 %vm3320_vm0, %v3319_v3 }
  0xfd   : > { %v3614_v50 = vpop.f32.mrb[12].mxu0 }
  0xfe   : > { %1625 = vmatmul.mubr.bf16.gmra.mrb[92].mxu1 %v3208_v40  ;;  %v2705_v51 = vpop.f32.mrb[13].mxu0  ;;  %v3232_v40 = vld [vmem:[%s3384_s5 + $0x2b8] ss:$12 sps:$4 sm:$0xff]  }
  0xff   : > { %1632 = vmatprep.mubr.bf16.mxu1 %v3209_v42  ;;  %v3617_v53 = vpop.f32.mrb[14].mxu0  ;;  %v3255_v51 = vld [vmem:[%s3384_s5 + $0x350] ss:$12 sps:$4 sm:$0xff]  }
 0x100   : > { %v2706_v55 = vpop.f32.mrb[15].mxu0 }
 0x102   : > { %2812 = vmatmul.mubr.msk.bf16.gmra.mrb[120].mxu0 %vm1260_vm1, %v3235_v52 }
 0x103   : > { %2815 = vmatprep.mubr.msk.bf16.mxu0 %vm3320_vm0, %v3319_v3 }
 0x105   : > { %v3624_v57 = vpop.f32.mrb[16].mxu0 }
 0x106   : > { %1633 = vmatmul.mubr.bf16.gmra.mrb[96].mxu1 %v3212_v47  ;;  %v2709_v58 = vpop.f32.mrb[17].mxu0 }
 0x107   : > { %1640 = vmatprep.mubr.bf16.mxu1 %v3213_v49  ;;  %v3627_v60 = vpop.f32.mrb[18].mxu0  ;;  %v3236_v58 = vld [vmem:[%s3384_s5 + $0x2d0] ss:$12 sps:$4 sm:$0xff]  }
 0x108   : > { %v2710_v62 = vpop.f32.mrb[19].mxu0 }
 0x10a   : > { %2816 = vmatmul.mubr.msk.bf16.gmra.mrb[124].mxu0 %vm1260_vm1, %v3239_v59 }
 0x10b   : > { %2819 = vmatprep.mubr.msk.bf16.mxu0 %vm3320_vm0, %v3319_v3 }
 0x10d   : > { %v3639_v1 = vpop.f32.mrb[20].mxu0 }
 0x10e   : > { %1641 = vmatmul.mubr.bf16.gmra.mrb[100].mxu1 %v3216_v54  ;;  %v2713_v2 = vpop.f32.mrb[21].mxu0 }
 0x10f   : > { %1648 = vmatprep.mubr.bf16.mxu1 %v3217_v56  ;;  %v3643_v6 = vpop.f32.mrb[22].mxu0 }
 0x110   : > { %v2714_v10 = vpop.f32.mrb[23].mxu0 }
 0x112   : > { %2820 = vmatmul.mubr.msk.bf16.gmra.mrb[128].mxu0 %vm1260_vm1, %v3243_v4 }
 0x113   : > { %2823 = vmatprep.mubr.msk.bf16.mxu0 %vm3320_vm0, %v3319_v3 }
 0x115   : > { %v3660_v17 = vpop.f32.mrb[24].mxu0 }
 0x116   : > { %1649 = vmatmul.mubr.bf16.gmra.mrb[104].mxu1 %v3220_v61  ;;  %v2717_v18 = vpop.f32.mrb[25].mxu0 }
 0x117   : > { %1656 = vmatprep.mubr.bf16.mxu1 %v3221_v63  ;;  %v3664_v21 = vpop.f32.mrb[26].mxu0 }
 0x118   : > { %v2718_v25 = vpop.f32.mrb[27].mxu0 }
 0x119   : > { %v1442_v5 = vpop.f32.mrb[0].mxu1 }
 0x11a   : > { %v1443_v7 = vadd.f32 %v3637_v0, %v1442_v5  ;;  %v1444_v8 = vpop.f32.mrb[1].mxu1  ;;  %2824 = vmatmul.mubr.msk.bf16.gmra.mrb[132].mxu0 %vm1260_vm1, %v3247_v19 }
 0x11b   : > { %v1445_v11 = vpop.f32.mrb[2].mxu1  ;;  %2827 = vmatprep.mubr.msk.bf16.mxu0 %vm3320_vm0, %v3319_v3 }
 0x11c   : > { %v1868_v13 = vadd.f32 %v3584_v29, %v1443_v7  ;;  %v1446_v14 = vadd.f32 %v3637_v0, %v1445_v11  ;;  %v1447_v15 = vpop.f32.mrb[3].mxu1  ;;  %v3259_v7 = vld [vmem:[%s3384_s5 + $0x368] ss:$12 sps:$4 sm:$0xff]  }
 0x11e   : > { %2258 = vst [vmem:[%s3650_s9] sm:$0xff] %v1868_v13  ;;  %v1871_v16 = vadd.f32 %v3587_v32, %v1446_v14  ;;  %1657 = vmatmul.mubr.bf16.gmra.mrb[108].mxu1 %v3224_v9  ;;  %v3676_v32 = vpop.f32.mrb[28].mxu0 }
 0x11f   : > { %1664 = vmatprep.mubr.bf16.mxu1 %v3225_v12  ;;  %v2721_v33 = vpop.f32.mrb[29].mxu0  ;;  %v3240_v12 = vld [vmem:[%s3384_s5 + $0x2e8] ss:$12 sps:$4 sm:$0xff]  }
 0x120   : > { %2259 = vst [vmem:[%s3650_s9 + $0x8] sm:$0xff] %v1871_v16 }
 0x121   : > { %v1450_v20 = vpop.f32.mrb[4].mxu1 }
 0x122   : > { %v1451_v22 = vadd.f32 %v3637_v0, %v1450_v20  ;;  %v1452_v23 = vpop.f32.mrb[5].mxu1  ;;  %2828 = vmatmul.mubr.msk.bf16.gmra.mrb[136].mxu0 %vm1260_vm1, %v3251_v34 }
 0x123   : > { %v1453_v26 = vpop.f32.mrb[6].mxu1  ;;  %2831 = vmatprep.mubr.msk.bf16.mxu0 %vm3320_vm0, %v3319_v3 }
 0x124   : > { %v1876_v28 = vadd.f32 %v3594_v36, %v1451_v22  ;;  %v1454_v29 = vadd.f32 %v3637_v0, %v1453_v26  ;;  %v1455_v30 = vpop.f32.mrb[7].mxu1  ;;  %v3680_v36 = vpop.f32.mrb[30].mxu0  ;;  %v3263_v22 = vld [vmem:[%s3384_s5 + $0x380] ss:$12 sps:$4 sm:$0xff]  }
 0x125   : > { %v2722_v41 = vpop.f32.mrb[31].mxu0 }
 0x126   : > { %2260 = vst [vmem:[%s3650_s9 + $0x10] sm:$0xff] %v1876_v28  ;;  %v1879_v31 = vadd.f32 %v3597_v39, %v1454_v29  ;;  %1665 = vmatmul.mubr.bf16.gmra.mrb[112].mxu1 %v3228_v24  ;;  %v3233_v39 = vld [vmem:[%s3384_s5 + $0x2d4] ss:$12 sps:$4 sm:$0xff]   ;;  %v3692_v49 = vpop.f32.mrb[32].mxu0 }
 0x127   : > { %1672 = vmatprep.mubr.bf16.mxu1 %v3229_v27  ;;  %v3244_v27 = vld [vmem:[%s3384_s5 + $0x300] ss:$12 sps:$4 sm:$0xff]  }
 0x128   : > { %2261 = vst [vmem:[%s3650_s9 + $0x18] sm:$0xff] %v1879_v31 }
 0x129   : > { %v1458_v35 = vpop.f32.mrb[8].mxu1 }
 0x12a   : > { %v1459_v37 = vadd.f32 %v3637_v0, %v1458_v35  ;;  %v1460_v38 = vpop.f32.mrb[9].mxu1  ;;  %2832 = vmatmul.mubr.msk.bf16.gmra.mrb[140].mxu0 %vm1260_vm1, %v3255_v51 }
 0x12b   : > { %v1461_v42 = vpop.f32.mrb[10].mxu1  ;;  %2835 = vmatprep.mubr.msk.bf16.mxu0 %vm3320_vm0, %v3319_v3 }
 0x12c   : > { %v1884_v44 = vadd.f32 %v3604_v43, %v1459_v37  ;;  %v1462_v45 = vadd.f32 %v3637_v0, %v1461_v42  ;;  %v1463_v47 = vpop.f32.mrb[11].mxu1  ;;  %v2725_v43 = vpop.f32.mrb[33].mxu0  ;;  %v3267_v37 = vld [vmem:[%s3384_s5 + $0x398] ss:$12 sps:$4 sm:$0xff]  }
 0x12d   : > { %v3696_v54 = vpop.f32.mrb[34].mxu0 }
 0x12e   : > { %2262 = vst [vmem:[%s3650_s9 + $0x20] sm:$0xff] %v1884_v44  ;;  %v1887_v48 = vadd.f32 %v3607_v46, %v1462_v45  ;;  %1673 = vmatmul.mubr.bf16.gmra.mrb[116].mxu1 %v3232_v40  ;;  %v2726_v59 = vpop.f32.mrb[35].mxu0  ;;  %v3237_v46 = vld [vmem:[%s3384_s5 + $0x2ec] ss:$12 sps:$4 sm:$0xff]  }
 0x12f   : > { %1680 = vmatprep.mubr.bf16.mxu1 %v3233_v39  ;;  %v3708_v5 = vpop.f32.mrb[36].mxu0  ;;  %v3248_v39 = vld [vmem:[%s3384_s5 + $0x318] ss:$12 sps:$4 sm:$0xff]  }
 0x130   : > { %2263 = vst [vmem:[%s3650_s9 + $0x28] sm:$0xff] %v1887_v48 }
 0x131   : > { %v1466_v52 = vpop.f32.mrb[12].mxu1 }
 0x132   : > { %v1467_v55 = vadd.f32 %v3637_v0, %v1466_v52  ;;  %v1468_v56 = vpop.f32.mrb[13].mxu1  ;;  %2836 = vmatmul.mubr.msk.bf16.gmra.mrb[144].mxu0 %vm1260_vm1, %v3259_v7 }
 0x133   : > { %v1469_v61 = vpop.f32.mrb[14].mxu1  ;;  %2839 = vmatprep.mubr.msk.bf16.mxu0 %vm3320_vm0, %v3319_v3 }
 0x134   : > { %v1892_v62 = vadd.f32 %v3614_v50, %v1467_v55  ;;  %v1470_v63 = vadd.f32 %v3637_v0, %v1469_v61  ;;  %v1471_v2 = vpop.f32.mrb[15].mxu1  ;;  %v2729_v50 = vpop.f32.mrb[37].mxu0  ;;  %v3271_v55 = vld [vmem:[%s3384_s5 + $0x3b0] ss:$12 sps:$4 sm:$0xff]  }
 0x135   : > { %v3712_v9 = vpop.f32.mrb[38].mxu0 }
 0x136   : > { %2264 = vst [vmem:[%s3650_s9 + $0x30] sm:$0xff] %v1892_v62  ;;  %v1895_v4 = vadd.f32 %v3617_v53, %v1470_v63  ;;  %1681 = vmatmul.mubr.bf16.gmra.mrb[120].mxu1 %v3236_v58  ;;  %v2730_v13 = vpop.f32.mrb[39].mxu0  ;;  %v3241_v53 = vld [vmem:[%s3384_s5 + $0x304] ss:$12 sps:$4 sm:$0xff]  }
 0x137   : > { %1688 = vmatprep.mubr.bf16.mxu1 %v3237_v46  ;;  %v3724_v20 = vpop.f32.mrb[40].mxu0  ;;  %v3252_v46 = vld [vmem:[%s3384_s5 + $0x330] ss:$12 sps:$4 sm:$0xff]  }
 0x138   : > { %2265 = vst [vmem:[%s3650_s9 + $0x38] sm:$0xff] %v1895_v4 }
 0x139   : > { %v1474_v8 = vpop.f32.mrb[16].mxu1 }
 0x13a   : > { %v1475_v10 = vadd.f32 %v3637_v0, %v1474_v8  ;;  %v1476_v11 = vpop.f32.mrb[17].mxu1  ;;  %2840 = vmatmul.mubr.msk.bf16.gmra.mrb[148].mxu0 %vm1260_vm1, %v3263_v22 }
 0x13b   : > { %v1477_v14 = vpop.f32.mrb[18].mxu1  ;;  %2843 = vmatprep.mubr.msk.bf16.mxu0 %vm3320_vm0, %v3319_v3 }
 0x13c   : > { %v1900_v15 = vadd.f32 %v3624_v57, %v1475_v10  ;;  %v1478_v16 = vadd.f32 %v3637_v0, %v1477_v14  ;;  %v1479_v18 = vpop.f32.mrb[19].mxu1  ;;  %v2733_v57 = vpop.f32.mrb[41].mxu0  ;;  %v3275_v10 = vld [vmem:[%s3384_s5 + $0x3c8] ss:$12 sps:$4 sm:$0xff]  }
 0x13d   : > { %v3728_v24 = vpop.f32.mrb[42].mxu0 }
 0x13e   : > { %2266 = vst [vmem:[%s3650_s9 + $0x40] sm:$0xff] %v1900_v15  ;;  %v1903_v19 = vadd.f32 %v3627_v60, %v1478_v16  ;;  %1689 = vmatmul.mubr.bf16.gmra.mrb[124].mxu1 %v3240_v12  ;;  %v2734_v28 = vpop.f32.mrb[43].mxu0  ;;  %v3245_v60 = vld [vmem:[%s3384_s5 + $0x31c] ss:$12 sps:$4 sm:$0xff]  }
 0x13f   : > { %1696 = vmatprep.mubr.bf16.mxu1 %v3241_v53  ;;  %v3740_v35 = vpop.f32.mrb[44].mxu0  ;;  %v3256_v53 = vld [vmem:[%s3384_s5 + $0x348] ss:$12 sps:$4 sm:$0xff]  }
 0x140   : > { %2267 = vst [vmem:[%s3650_s9 + $0x48] sm:$0xff] %v1903_v19 }
 0x141   : > { %v1482_v23 = vpop.f32.mrb[20].mxu1 }
 0x142   : > { %v1483_v25 = vadd.f32 %v3637_v0, %v1482_v23  ;;  %v1484_v26 = vpop.f32.mrb[21].mxu1  ;;  %2844 = vmatmul.mubr.msk.bf16.gmra.mrb[152].mxu0 %vm1260_vm1, %v3267_v37 }
 0x143   : > { %v1485_v29 = vpop.f32.mrb[22].mxu1  ;;  %2847 = vmatprep.mubr.msk.bf16.mxu0 %vm3320_vm0, %v3319_v3 }
 0x144   : > { %v1908_v30 = vadd.f32 %v3639_v1, %v1483_v25  ;;  %v1486_v31 = vadd.f32 %v3637_v0, %v1485_v29  ;;  %v1487_v33 = vpop.f32.mrb[23].mxu1  ;;  %v2737_v1 = vpop.f32.mrb[45].mxu0  ;;  %v3279_v25 = vld [vmem:[%s3384_s5 + $0x3e0] ss:$12 sps:$4 sm:$0xff]  }
 0x145   : > { %v3744_v40 = vpop.f32.mrb[46].mxu0 }
 0x146   : > { %2268 = vst [vmem:[%s3650_s9 + $0x50] sm:$0xff] %v1908_v30  ;;  %v1911_v34 = vadd.f32 %v3643_v6, %v1486_v31  ;;  %1697 = vmatmul.mubr.bf16.gmra.mrb[128].mxu1 %v3244_v27  ;;  %v2738_v44 = vpop.f32.mrb[47].mxu0  ;;  %v3249_v6 = vld [vmem:[%s3384_s5 + $0x334] ss:$12 sps:$4 sm:$0xff]  }
 0x147   : > { %1704 = vmatprep.mubr.bf16.mxu1 %v3245_v60  ;;  %v3756_v52 = vpop.f32.mrb[48].mxu0  ;;  %v3260_v60 = vld [vmem:[%s3384_s5 + $0x360] ss:$12 sps:$4 sm:$0xff]  }
 0x148   : > { %2269 = vst [vmem:[%s3650_s9 + $0x58] sm:$0xff] %v1911_v34 }
 0x149   : > { %v1490_v38 = vpop.f32.mrb[24].mxu1 }
 0x14a   : > { %v1491_v41 = vadd.f32 %v3637_v0, %v1490_v38  ;;  %v1492_v42 = vpop.f32.mrb[25].mxu1  ;;  %2848 = vmatmul.mubr.msk.bf16.gmra.mrb[156].mxu0 %vm1260_vm1, %v3271_v55 }
 0x14b   : > { %v1493_v45 = vpop.f32.mrb[26].mxu1  ;;  %2851 = vmatprep.mubr.msk.bf16.mxu0 %vm3320_vm0, %v3319_v3 }
 0x14c   : > { %v1916_v47 = vadd.f32 %v3660_v17, %v1491_v41  ;;  %v1494_v48 = vadd.f32 %v3637_v0, %v1493_v45  ;;  %v1495_v43 = vpop.f32.mrb[27].mxu1  ;;  %v2741_v17 = vpop.f32.mrb[49].mxu0  ;;  %v3283_v41 = vld [vmem:[%s3384_s5 + $0x3f8] ss:$12 sps:$4 sm:$0xff]  }
 0x14d   : > { %v3760_v58 = vpop.f32.mrb[50].mxu0 }
 0x14e   : > { %2270 = vst [vmem:[%s3650_s9 + $0x60] sm:$0xff] %v1916_v47  ;;  %v1919_v51 = vadd.f32 %v3664_v21, %v1494_v48  ;;  %1705 = vmatmul.mubr.bf16.gmra.mrb[132].mxu1 %v3248_v39  ;;  %v2742_v62 = vpop.f32.mrb[51].mxu0  ;;  %v3253_v21 = vld [vmem:[%s3384_s5 + $0x34c] ss:$12 sps:$4 sm:$0xff]  }
 0x14f   : > { %1712 = vmatprep.mubr.bf16.mxu1 %v3249_v6  ;;  %v3772_v8 = vpop.f32.mrb[52].mxu0  ;;  %v3264_v6 = vld [vmem:[%s3384_s5 + $0x378] ss:$12 sps:$4 sm:$0xff]  }
 0x150   : > { %2271 = vst [vmem:[%s3650_s9 + $0x68] sm:$0xff] %v1919_v51 }
 0x151   : > { %v1498_v56 = vpop.f32.mrb[28].mxu1 }
 0x152   : > { %v1499_v59 = vadd.f32 %v3637_v0, %v1498_v56  ;;  %v1500_v61 = vpop.f32.mrb[29].mxu1  ;;  %2852 = vmatmul.mubr.msk.bf16.gmra.mrb[160].mxu0 %vm1260_vm1, %v3275_v10 }
 0x153   : > { %v1501_v63 = vpop.f32.mrb[30].mxu1  ;;  %2855 = vmatprep.mubr.msk.bf16.mxu0 %vm3320_vm0, %v3319_v3 }
 0x154   : > { %v1924_v2 = vadd.f32 %v3676_v32, %v1499_v59  ;;  %v1502_v4 = vadd.f32 %v3637_v0, %v1501_v63  ;;  %v1503_v50 = vpop.f32.mrb[31].mxu1  ;;  %v2745_v32 = vpop.f32.mrb[53].mxu0  ;;  %v3287_v59 = vld [vmem:[%s3384_s5 + $0x410] ss:$12 sps:$4 sm:$0xff]  }
 0x155   : > { %v3776_v12 = vpop.f32.mrb[54].mxu0 }
 0x156   : > { %2272 = vst [vmem:[%s3650_s9 + $0x70] sm:$0xff] %v1924_v2  ;;  %v1927_v7 = vadd.f32 %v3680_v36, %v1502_v4  ;;  %1713 = vmatmul.mubr.bf16.gmra.mrb[136].mxu1 %v3252_v46  ;;  %v2746_v15 = vpop.f32.mrb[55].mxu0  ;;  %v3257_v36 = vld [vmem:[%s3384_s5 + $0x364] ss:$12 sps:$4 sm:$0xff]  }
 0x157   : > { %1720 = vmatprep.mubr.bf16.mxu1 %v3253_v21  ;;  %v3788_v23 = vpop.f32.mrb[56].mxu0  ;;  %v3268_v21 = vld [vmem:[%s3384_s5 + $0x390] ss:$12 sps:$4 sm:$0xff]  }
 0x158   : > { %2273 = vst [vmem:[%s3650_s9 + $0x78] sm:$0xff] %v1927_v7 }
 0x159   : > { %v1506_v11 = vpop.f32.mrb[32].mxu1 }
 0x15a   : > { %v1507_v13 = vadd.f32 %v3637_v0, %v1506_v11  ;;  %v1508_v14 = vpop.f32.mrb[33].mxu1  ;;  %2856 = vmatmul.mubr.msk.bf16.gmra.mrb[164].mxu0 %vm1260_vm1, %v3279_v25 }
 0x15b   : > { %v1509_v16 = vpop.f32.mrb[34].mxu1  ;;  %2859 = vmatprep.mubr.msk.bf16.mxu0 %vm3320_vm0, %v3319_v3 }
 0x15c   : > { %v1932_v18 = vadd.f32 %v3692_v49, %v1507_v13  ;;  %v1510_v19 = vadd.f32 %v3637_v0, %v1509_v16  ;;  %v1511_v57 = vpop.f32.mrb[35].mxu1  ;;  %v2749_v49 = vpop.f32.mrb[57].mxu0  ;;  %v3291_v13 = vld [vmem:[%s3384_s5 + $0x428] ss:$12 sps:$4 sm:$0xff]  }
 0x15d   : > { %v3792_v27 = vpop.f32.mrb[58].mxu0 }
 0x15e   : > { %2274 = vst [vmem:[%s3650_s9 + $0x80] sm:$0xff] %v1932_v18  ;;  %v1935_v22 = vadd.f32 %v3696_v54, %v1510_v19  ;;  %1721 = vmatmul.mubr.bf16.gmra.mrb[140].mxu1 %v3256_v53  ;;  %v2750_v30 = vpop.f32.mrb[59].mxu0  ;;  %v3261_v54 = vld [vmem:[%s3384_s5 + $0x37c] ss:$12 sps:$4 sm:$0xff]  }
 0x15f   : > { %1728 = vmatprep.mubr.bf16.mxu1 %v3257_v36  ;;  %v3804_v38 = vpop.f32.mrb[60].mxu0  ;;  %v3272_v36 = vld [vmem:[%s3384_s5 + $0x3a8] ss:$12 sps:$4 sm:$0xff]  }
 0x160   : > { %2275 = vst [vmem:[%s3650_s9 + $0x88] sm:$0xff] %v1935_v22 }
 0x161   : > { %v1514_v26 = vpop.f32.mrb[36].mxu1 }
 0x162   : > { %v1515_v28 = vadd.f32 %v3637_v0, %v1514_v26  ;;  %v1516_v29 = vpop.f32.mrb[37].mxu1  ;;  %2860 = vmatmul.mubr.msk.bf16.gmra.mrb[168].mxu0 %vm1260_vm1, %v3283_v41 }
 0x163   : > { %v1517_v31 = vpop.f32.mrb[38].mxu1  ;;  %2863 = vmatprep.mubr.msk.bf16.mxu0 %vm3320_vm0, %v3319_v3 }
 0x164   : > { %v1940_v33 = vadd.f32 %v3708_v5, %v1515_v28  ;;  %v1518_v34 = vadd.f32 %v3637_v0, %v1517_v31  ;;  %v1519_v1 = vpop.f32.mrb[39].mxu1  ;;  %v2753_v5 = vpop.f32.mrb[61].mxu0  ;;  %v3295_v28 = vld [vmem:[%s3384_s5 + $0x440] ss:$12 sps:$4 sm:$0xff]  }
 0x165   : > { %v3808_v39 = vpop.f32.mrb[62].mxu0 }
 0x166   : > { %2276 = vst [vmem:[%s3650_s9 + $0x90] sm:$0xff] %v1940_v33  ;;  %v1943_v37 = vadd.f32 %v3712_v9, %v1518_v34  ;;  %1729 = vmatmul.mubr.bf16.gmra.mrb[144].mxu1 %v3260_v60  ;;  %v2754_v47 = vpop.f32.mrb[63].mxu0  ;;  %v3265_v9 = vld [vmem:[%s3384_s5 + $0x394] ss:$12 sps:$4 sm:$0xff]  }
 0x167   : > { %1736 = vmatprep.mubr.bf16.mxu1 %v3261_v54  ;;  %v3820_v56 = vpop.f32.mrb[64].mxu0  ;;  %v3276_v54 = vld [vmem:[%s3384_s5 + $0x3c0] ss:$12 sps:$4 sm:$0xff]  }
 0x168   : > { %2277 = vst [vmem:[%s3650_s9 + $0x98] sm:$0xff] %v1943_v37 }
 0x169   : > { %v1522_v42 = vpop.f32.mrb[40].mxu1 }
 0x16a   : > { %v1523_v44 = vadd.f32 %v3637_v0, %v1522_v42  ;;  %v1524_v45 = vpop.f32.mrb[41].mxu1  ;;  %2864 = vmatmul.mubr.msk.bf16.gmra.mrb[172].mxu0 %vm1260_vm1, %v3287_v59 }
 0x16b   : > { %v1525_v48 = vpop.f32.mrb[42].mxu1  ;;  %2867 = vmatprep.mubr.msk.bf16.mxu0 %vm3320_vm0, %v3319_v3 }
 0x16c   : > { %v1948_v43 = vadd.f32 %v3724_v20, %v1523_v44  ;;  %v1526_v51 = vadd.f32 %v3637_v0, %v1525_v48  ;;  %v1527_v17 = vpop.f32.mrb[43].mxu1  ;;  %v2757_v20 = vpop.f32.mrb[65].mxu0  ;;  %v3299_v44 = vld [vmem:[%s3384_s5 + $0x458] ss:$12 sps:$4 sm:$0xff]  }
 0x16d   : > { %v3824_v46 = vpop.f32.mrb[66].mxu0 }
 0x16e   : > { %2278 = vst [vmem:[%s3650_s9 + $0xa0] sm:$0xff] %v1948_v43  ;;  %v1951_v55 = vadd.f32 %v3728_v24, %v1526_v51  ;;  %1737 = vmatmul.mubr.bf16.gmra.mrb[148].mxu1 %v3264_v6  ;;  %v2758_v2 = vpop.f32.mrb[67].mxu0  ;;  %v3269_v24 = vld [vmem:[%s3384_s5 + $0x3ac] ss:$12 sps:$4 sm:$0xff]  }
 0x16f   : > { %1744 = vmatprep.mubr.bf16.mxu1 %v3265_v9  ;;  %v3836_v11 = vpop.f32.mrb[68].mxu0  ;;  %v3280_v9 = vld [vmem:[%s3384_s5 + $0x3d8] ss:$12 sps:$4 sm:$0xff]  }
 0x170   : > { %2279 = vst [vmem:[%s3650_s9 + $0xa8] sm:$0xff] %v1951_v55 }
 0x171   : > { %v1530_v61 = vpop.f32.mrb[44].mxu1 }
 0x172   : > { %v1531_v62 = vadd.f32 %v3637_v0, %v1530_v61  ;;  %v1532_v63 = vpop.f32.mrb[45].mxu1  ;;  %2868 = vmatmul.mubr.msk.bf16.gmra.mrb[176].mxu0 %vm1260_vm1, %v3291_v13 }
 0x173   : > { %v1533_v4 = vpop.f32.mrb[46].mxu1  ;;  %2871 = vmatprep.mubr.msk.bf16.mxu0 %vm3320_vm0, %v3319_v3 }
 0x174   : > { %v1956_v50 = vadd.f32 %v3740_v35, %v1531_v62  ;;  %v1534_v7 = vadd.f32 %v3637_v0, %v1533_v4  ;;  %v1535_v32 = vpop.f32.mrb[47].mxu1  ;;  %v2761_v35 = vpop.f32.mrb[69].mxu0  ;;  %v3303_v62 = vld [vmem:[%s3384_s5 + $0x470] ss:$12 sps:$4 sm:$0xff]  }
 0x175   : > { %v3840_v53 = vpop.f32.mrb[70].mxu0 }
 0x176   : > { %2280 = vst [vmem:[%s3650_s9 + $0xb0] sm:$0xff] %v1956_v50  ;;  %v1959_v10 = vadd.f32 %v3744_v40, %v1534_v7  ;;  %1745 = vmatmul.mubr.bf16.gmra.mrb[152].mxu1 %v3268_v21  ;;  %v2762_v18 = vpop.f32.mrb[71].mxu0  ;;  %v3273_v40 = vld [vmem:[%s3384_s5 + $0x3c4] ss:$12 sps:$4 sm:$0xff]  }
 0x177   : > { %1752 = vmatprep.mubr.bf16.mxu1 %v3269_v24  ;;  %v3852_v26 = vpop.f32.mrb[72].mxu0  ;;  %v3284_v24 = vld [vmem:[%s3384_s5 + $0x3f0] ss:$12 sps:$4 sm:$0xff]  }
 0x178   : > { %2281 = vst [vmem:[%s3650_s9 + $0xb8] sm:$0xff] %v1959_v10 }
 0x179   : > { %v1538_v14 = vpop.f32.mrb[48].mxu1 }
 0x17a   : > { %v1539_v15 = vadd.f32 %v3637_v0, %v1538_v14  ;;  %v1540_v16 = vpop.f32.mrb[49].mxu1  ;;  %2872 = vmatmul.mubr.msk.bf16.gmra.mrb[180].mxu0 %vm1260_vm1, %v3295_v28 }
 0x17b   : > { %v1541_v19 = vpop.f32.mrb[50].mxu1  ;;  %2875 = vmatprep.mubr.msk.bf16.mxu0 %vm3320_vm0, %v3319_v3 }
 0x17c   : > { %v1964_v57 = vadd.f32 %v3756_v52, %v1539_v15  ;;  %v1542_v22 = vadd.f32 %v3637_v0, %v1541_v19  ;;  %v1543_v49 = vpop.f32.mrb[51].mxu1  ;;  %v2765_v52 = vpop.f32.mrb[73].mxu0  ;;  %v3307_v15 = vld [vmem:[%s3384_s5 + $0x488] ss:$12 sps:$4 sm:$0xff]  }
 0x17d   : > { %v3856_v60 = vpop.f32.mrb[74].mxu0 }
 0x17e   : > { %2282 = vst [vmem:[%s3650_s9 + $0xc0] sm:$0xff] %v1964_v57  ;;  %v1967_v25 = vadd.f32 %v3760_v58, %v1542_v22  ;;  %1753 = vmatmul.mubr.bf16.gmra.mrb[156].mxu1 %v3272_v36  ;;  %v2766_v33 = vpop.f32.mrb[75].mxu0  ;;  %v3277_v58 = vld [vmem:[%s3384_s5 + $0x3dc] ss:$12 sps:$4 sm:$0xff]   ;;  %v3289_v22 = vld [vmem:[%s3384_s5 + $0x424] ss:$12 sps:$4 sm:$0xff]  }
 0x17f   : > { %1760 = vmatprep.mubr.bf16.mxu1 %v3273_v40  ;;  %v3868_v42 = vpop.f32.mrb[76].mxu0  ;;  %v3292_v33 = vld [vmem:[%s3384_s5 + $0x420] ss:$12 sps:$4 sm:$0xff]  }
 0x180   : > { %2283 = vst [vmem:[%s3650_s9 + $0xc8] sm:$0xff] %v1967_v25 }
 0x181   : > { %v1546_v29 = vpop.f32.mrb[52].mxu1 }
 0x182   : > { %v1547_v30 = vadd.f32 %v3637_v0, %v1546_v29  ;;  %v1548_v31 = vpop.f32.mrb[53].mxu1  ;;  %2876 = vmatmul.mubr.msk.bf16.gmra.mrb[184].mxu0 %vm1260_vm1, %v3299_v44 }
 0x183   : > { %v1549_v34 = vpop.f32.mrb[54].mxu1  ;;  %2879 = vmatprep.mubr.msk.bf16.mxu0 %vm3320_vm0, %v3319_v3 }
 0x184   : > { %v1972_v1 = vadd.f32 %v3772_v8, %v1547_v30  ;;  %v1550_v37 = vadd.f32 %v3637_v0, %v1549_v34  ;;  %v1551_v5 = vpop.f32.mrb[55].mxu1  ;;  %v2769_v8 = vpop.f32.mrb[77].mxu0 }
 0x185   : > { %v3872_v6 = vpop.f32.mrb[78].mxu0 }
 0x186   : > { %2284 = vst [vmem:[%s3650_s9 + $0xd0] sm:$0xff] %v1972_v1  ;;  %v1975_v41 = vadd.f32 %v3776_v12, %v1550_v37  ;;  %1761 = vmatmul.mubr.bf16.gmra.mrb[160].mxu1 %v3276_v54  ;;  %v2770_v43 = vpop.f32.mrb[79].mxu0  ;;  %v3281_v12 = vld [vmem:[%s3384_s5 + $0x3f4] ss:$12 sps:$4 sm:$0xff]   ;;  %v3293_v1 = vld [vmem:[%s3384_s5 + $0x43c] ss:$12 sps:$4 sm:$0xff]  }
 0x187   : > { %1768 = vmatprep.mubr.bf16.mxu1 %v3277_v58  ;;  %v3884_v61 = vpop.f32.mrb[80].mxu0 }
 0x188   : > { %2285 = vst [vmem:[%s3650_s9 + $0xd8] sm:$0xff] %v1975_v41 }
 0x189   : > { %v1554_v45 = vpop.f32.mrb[56].mxu1 }
 0x18a   : > { %v1555_v47 = vadd.f32 %v3637_v0, %v1554_v45  ;;  %v1556_v48 = vpop.f32.mrb[57].mxu1  ;;  %2880 = vmatmul.mubr.msk.bf16.gmra.mrb[188].mxu0 %vm1260_vm1, %v3303_v62 }
 0x18b   : > { %v1557_v51 = vpop.f32.mrb[58].mxu1  ;;  %2883 = vmatprep.mubr.msk.bf16.mxu0 %vm3320_vm0, %v3319_v3  ;;  %v3288_v3 = vld [vmem:[%s3384_s5 + $0x408] ss:$12 sps:$4 sm:$0xff]  }
 0x18c   : > { %v1980_v17 = vadd.f32 %v3788_v23, %v1555_v47  ;;  %v1558_v55 = vadd.f32 %v3637_v0, %v1557_v51  ;;  %v1559_v20 = vpop.f32.mrb[59].mxu1  ;;  %v2773_v23 = vpop.f32.mrb[81].mxu0 }
 0x18d   : > { %v3888_v21 = vpop.f32.mrb[82].mxu0 }
 0x18e   : > { %2286 = vst [vmem:[%s3650_s9 + $0xe0] sm:$0xff] %v1980_v17  ;;  %v1983_v59 = vadd.f32 %v3792_v27, %v1558_v55  ;;  %1769 = vmatmul.mubr.bf16.gmra.mrb[164].mxu1 %v3280_v9  ;;  %v2774_v50 = vpop.f32.mrb[83].mxu0  ;;  %v3285_v27 = vld [vmem:[%s3384_s5 + $0x40c] ss:$12 sps:$4 sm:$0xff]  }
 0x18f   : > { %1776 = vmatprep.mubr.bf16.mxu1 %v3281_v12  ;;  %v3900_v14 = vpop.f32.mrb[84].mxu0  ;;  %v3296_v9 = vld [vmem:[%s3384_s5 + $0x438] ss:$12 sps:$4 sm:$0xff]   ;;  %v3297_v12 = vld [vmem:[%s3384_s5 + $0x454] ss:$12 sps:$4 sm:$0xff]  }
 0x190   : > { %2287 = vst [vmem:[%s3650_s9 + $0xe8] sm:$0xff] %v1983_v59 }
 0x191   : > { %v1562_v63 = vpop.f32.mrb[60].mxu1 }
 0x192   : > { %v1563_v2 = vadd.f32 %v3637_v0, %v1562_v63  ;;  %v1564_v4 = vpop.f32.mrb[61].mxu1  ;;  %2884 = vmatmul.mubr.msk.bf16.gmra.mrb[192].mxu0 %vm1260_vm1, %v3307_v15 }
 0x193   : > { %v1565_v7 = vpop.f32.mrb[62].mxu1  ;;  %v3300_v4 = vld [vmem:[%s3384_s5 + $0x450] ss:$12 sps:$4 sm:$0xff]  }
 0x194   : > { %v1988_v32 = vadd.f32 %v3804_v38, %v1563_v2  ;;  %v1566_v10 = vadd.f32 %v3637_v0, %v1565_v7  ;;  %v1567_v35 = vpop.f32.mrb[63].mxu1  ;;  %v2777_v38 = vpop.f32.mrb[85].mxu0  ;;  %v3301_v7 = vld [vmem:[%s3384_s5 + $0x46c] ss:$12 sps:$4 sm:$0xff]  }
 0x195   : > { %v3904_v36 = vpop.f32.mrb[86].mxu0 }
 0x196   : > { %2288 = vst [vmem:[%s3650_s9 + $0xf0] sm:$0xff] %v1988_v32  ;;  %v1991_v13 = vadd.f32 %v3808_v39, %v1566_v10  ;;  %1777 = vmatmul.mubr.bf16.gmra.mrb[168].mxu1 %v3284_v24  ;;  %v2778_v40 = vpop.f32.mrb[87].mxu0 }
 0x197   : > { %1784 = vmatprep.mubr.bf16.mxu1 %v3285_v27  ;;  %v3914_v28 = vpop.f32.mrb[88].mxu0  ;;  %v3305_v40 = vld [vmem:[%s3384_s5 + $0x484] ss:$12 sps:$4 sm:$0xff]  }
 0x198   : > { %2289 = vst [vmem:[%s3650_s9 + $0xf8] sm:$0xff] %v1991_v13  ;;  %v2781_v29 = vpop.f32.mrb[89].mxu0 }
 0x199   : > { %v1570_v16 = vpop.f32.mrb[64].mxu1  ;;  %v3917_v31 = vpop.f32.mrb[90].mxu0 }
 0x19a   : > { %v1571_v18 = vadd.f32 %v3637_v0, %v1570_v16  ;;  %v1572_v19 = vpop.f32.mrb[65].mxu1  ;;  %v2782_v34 = vpop.f32.mrb[91].mxu0 }
 0x19b   : > { %v1573_v57 = vpop.f32.mrb[66].mxu1 }
 0x19c   : > { %v1996_v39 = vadd.f32 %v3820_v56, %v1571_v18  ;;  %v1574_v49 = vadd.f32 %v3637_v0, %v1573_v57  ;;  %v1575_v25 = vpop.f32.mrb[67].mxu1  ;;  %v3304_v18 = vld [vmem:[%s3384_s5 + $0x468] ss:$12 sps:$4 sm:$0xff]  }
 0x19d   : > { %v3926_v8 = vpop.f32.mrb[92].mxu0 }
 0x19e   : > { %2290 = vst [vmem:[%s3650_s9 + $0x100] sm:$0xff] %v1996_v39  ;;  %v1999_v52 = vadd.f32 %v3824_v46, %v1574_v49  ;;  %1785 = vmatmul.mubr.bf16.gmra.mrb[172].mxu1 %v3288_v3  ;;  %v2785_v44 = vpop.f32.mrb[93].mxu0 }
 0x19f   : > { %1792 = vmatprep.mubr.bf16.mxu1 %v3289_v22  ;;  %v3929_v47 = vpop.f32.mrb[94].mxu0 }
 0x1a0   : > { %2291 = vst [vmem:[%s3650_s9 + $0x108] sm:$0xff] %v1999_v52  ;;  %v2786_v43 = vpop.f32.mrb[95].mxu0 }
 0x1a1   : > { %v1578_v30 = vpop.f32.mrb[68].mxu1 }
 0x1a2   : > { %v1579_v56 = vadd.f32 %v3637_v0, %v1578_v30  ;;  %v1580_v54 = vpop.f32.mrb[69].mxu1 }
 0x1a3   : > { %v1581_v58 = vpop.f32.mrb[70].mxu1 }
 0x1a4   : > { %v2004_v46 = vadd.f32 %v3836_v11, %v1579_v56  ;;  %v1582_v37 = vadd.f32 %v3637_v0, %v1581_v58  ;;  %v1583_v5 = vpop.f32.mrb[71].mxu1  ;;  %v3308_v56 = vld [vmem:[%s3384_s5 + $0x480] ss:$12 sps:$4 sm:$0xff]  }
 0x1a5   : > { %v3938_v59 = vpop.f32.mrb[96].mxu0 }
 0x1a6   : > { %2292 = vst [vmem:[%s3650_s9 + $0x110] sm:$0xff] %v2004_v46  ;;  %v2007_v41 = vadd.f32 %v3840_v53, %v1582_v37  ;;  %1793 = vmatmul.mubr.bf16.gmra.mrb[176].mxu1 %v3292_v33  ;;  %v2789_v23 = vpop.f32.mrb[97].mxu0 }
 0x1a7   : > { %1800 = vmatprep.mubr.bf16.mxu1 %v3293_v1  ;;  %v3941_v63 = vpop.f32.mrb[98].mxu0 }
 0x1a8   : > { %2293 = vst [vmem:[%s3650_s9 + $0x118] sm:$0xff] %v2007_v41  ;;  %v2790_v24 = vpop.f32.mrb[99].mxu0 }
 0x1a9   : > { %v1586_v45 = vpop.f32.mrb[72].mxu1 }
 0x1aa   : > { %v1587_v11 = vadd.f32 %v3637_v0, %v1586_v45  ;;  %v1588_v48 = vpop.f32.mrb[73].mxu1 }
 0x1ab   : > { %v1589_v51 = vpop.f32.mrb[74].mxu1 }
 0x1ac   : > { %v2012_v53 = vadd.f32 %v3852_v26, %v1587_v11  ;;  %v1590_v17 = vadd.f32 %v3637_v0, %v1589_v51  ;;  %v1591_v55 = vpop.f32.mrb[75].mxu1 }
 0x1ad   : > { %v3950_v35 = vpop.f32.mrb[100].mxu0 }
 0x1ae   : > { %2294 = vst [vmem:[%s3650_s9 + $0x120] sm:$0xff] %v2012_v53  ;;  %v2015_v20 = vadd.f32 %v3856_v60, %v1590_v17  ;;  %1801 = vmatmul.mubr.bf16.gmra.mrb[180].mxu1 %v3296_v9  ;;  %v2793_v13 = vpop.f32.mrb[101].mxu0 }
 0x1af   : > { %1808 = vmatprep.mubr.bf16.mxu1 %v3297_v12  ;;  %v3953_v15 = vpop.f32.mrb[102].mxu0 }
 0x1b0   : > { %2295 = vst [vmem:[%s3650_s9 + $0x128] sm:$0xff] %v2015_v20  ;;  %v2794_v19 = vpop.f32.mrb[103].mxu0 }
 0x1b1   : > { %v1594_v62 = vpop.f32.mrb[76].mxu1 }
 0x1b2   : > { %v1595_v26 = vadd.f32 %v3637_v0, %v1594_v62  ;;  %v1596_v2 = vpop.f32.mrb[77].mxu1 }
 0x1b3   : > { %v1597_v50 = vpop.f32.mrb[78].mxu1 }
 0x1b4   : > { %v2020_v60 = vadd.f32 %v3868_v42, %v1595_v26  ;;  %v1598_v27 = vadd.f32 %v3637_v0, %v1597_v50  ;;  %v1599_v32 = vpop.f32.mrb[79].mxu1 }
 0x1b5   : > { %v3962_v49 = vpop.f32.mrb[104].mxu0 }
 0x1b6   : > { %2296 = vst [vmem:[%s3650_s9 + $0x130] sm:$0xff] %v2020_v60  ;;  %v2023_v10 = vadd.f32 %v3872_v6, %v1598_v27  ;;  %1809 = vmatmul.mubr.bf16.gmra.mrb[184].mxu1 %v3300_v4  ;;  %v2797_v25 = vpop.f32.mrb[105].mxu0 }
 0x1b7   : > { %1816 = vmatprep.mubr.bf16.mxu1 %v3301_v7  ;;  %v3965_v29 = vpop.f32.mrb[106].mxu0 }
 0x1b8   : > { %2297 = vst [vmem:[%s3650_s9 + $0x138] sm:$0xff] %v2023_v10  ;;  %v2798_v54 = vpop.f32.mrb[107].mxu0 }
 0x1b9   : > { %v1602_v38 = vpop.f32.mrb[80].mxu1 }
 0x1ba   : > { %v1603_v42 = vadd.f32 %v3637_v0, %v1602_v38  ;;  %v1604_v16 = vpop.f32.mrb[81].mxu1 }
 0x1bb   : > { %v1605_v3 = vpop.f32.mrb[82].mxu1 }
 0x1bc   : > { %v2028_v6 = vadd.f32 %v3884_v61, %v1603_v42  ;;  %v1606_v57 = vadd.f32 %v3637_v0, %v1605_v3  ;;  %v1607_v22 = vpop.f32.mrb[83].mxu1 }
 0x1bd   : > { %v3973_v46 = vpop.f32.mrb[108].mxu0 }
 0x1be   : > { %2298 = vst [vmem:[%s3650_s9 + $0x140] sm:$0xff] %v2028_v6  ;;  %v2031_v39 = vadd.f32 %v3888_v21, %v1606_v57  ;;  %1817 = vmatmul.mubr.bf16.gmra.mrb[188].mxu1 %v3304_v18  ;;  %v2801_v37 = vpop.f32.mrb[109].mxu0 }
 0x1bf   : > { %1824 = vmatprep.mubr.bf16.mxu1 %v3305_v40  ;;  %v3976_v41 = vpop.f32.mrb[110].mxu0 }
 0x1c0   : > { %2299 = vst [vmem:[%s3650_s9 + $0x148] sm:$0xff] %v2031_v39 }
 0x1c1   : > { %v1610_v52 = vpop.f32.mrb[84].mxu1 }
 0x1c2   : > { %v1611_v30 = vadd.f32 %v3637_v0, %v1610_v52  ;;  %v1612_v61 = vpop.f32.mrb[85].mxu1 }
 0x1c3   : > { %v1613_v33 = vpop.f32.mrb[86].mxu1 }
 0x1c4   : > { %v2036_v34 = vadd.f32 %v3900_v14, %v1611_v30  ;;  %v1614_v21 = vadd.f32 %v3637_v0, %v1613_v33  ;;  %v1615_v58 = vpop.f32.mrb[87].mxu1  ;;  %v2802_v14 = vpop.f32.mrb[111].mxu0 }
 0x1c5   : > { %v3983_v51 = vpop.f32.mrb[112].mxu0 }
 0x1c6   : > { %2300 = vst [vmem:[%s3650_s9 + $0x150] sm:$0xff] %v2036_v34  ;;  %v2039_v1 = vadd.f32 %v3904_v36, %v1614_v21  ;;  %1825 = vmatmul.mubr.bf16.gmra.mrb[192].mxu1 %v3308_v56  ;;  %v2805_v12 = vpop.f32.mrb[113].mxu0  ;;  %v4023_v21 = vld [vmem:[%s4228_s2] ss:$0 sm:$0xff] }
 0x1c7   : > { %v3986_v17 = vpop.f32.mrb[114].mxu0 }
 0x1c8   : > { %2301 = vst [vmem:[%s3650_s9 + $0x158] sm:$0xff] %v2039_v1  ;;  %v2806_v23 = vpop.f32.mrb[115].mxu0 }
 0x1c9   : > { %v1618_v5 = vpop.f32.mrb[88].mxu1 }
 0x1ca   : > { %v1619_v44 = vadd.f32 %v3637_v0, %v1618_v5  ;;  %v1620_v45 = vpop.f32.mrb[89].mxu1 }
 0x1cb   : > { %v1621_v11 = vpop.f32.mrb[90].mxu1 }
 0x1cc   : > { %v2044_v48 = vadd.f32 %v3914_v28, %v1619_v44  ;;  %v1622_v9 = vadd.f32 %v3637_v0, %v1621_v11  ;;  %v1623_v36 = vpop.f32.mrb[91].mxu1 }
 0x1cd   : > { %v3993_v4 = vpop.f32.mrb[116].mxu0 }
 0x1ce   : > { %2302 = vst [vmem:[%s3650_s9 + $0x160] sm:$0xff] %v2044_v48  ;;  %v2047_v43 = vadd.f32 %v3917_v31, %v1622_v9  ;;  %v2809_v24 = vpop.f32.mrb[117].mxu0 }
 0x1cf   : > { %v3996_v7 = vpop.f32.mrb[118].mxu0 }
 0x1d0   : > { %2303 = vst [vmem:[%s3650_s9 + $0x168] sm:$0xff] %v2047_v43  ;;  %v2810_v32 = vpop.f32.mrb[119].mxu0 }
 0x1d1   : > { %v1626_v53 = vpop.f32.mrb[92].mxu1 }
 0x1d2   : > { %v1627_v55 = vadd.f32 %v3637_v0, %v1626_v53  ;;  %v1628_v20 = vpop.f32.mrb[93].mxu1 }
 0x1d3   : > { %v1629_v28 = vpop.f32.mrb[94].mxu1 }
 0x1d4   : > { %v2052_v62 = vadd.f32 %v3926_v8, %v1627_v55  ;;  %v1630_v26 = vadd.f32 %v3637_v0, %v1629_v28  ;;  %v1631_v2 = vpop.f32.mrb[95].mxu1 }
 0x1d5   : > { %v4003_v42 = vpop.f32.mrb[120].mxu0 }
 0x1d6   : > { %2304 = vst [vmem:[%s3650_s9 + $0x170] sm:$0xff] %v2052_v62  ;;  %v2055_v31 = vadd.f32 %v3929_v47, %v1630_v26  ;;  %v2813_v16 = vpop.f32.mrb[121].mxu0 }
 0x1d7   : > { %v4006_v19 = vpop.f32.mrb[122].mxu0 }
 0x1d8   : > { %2305 = vst [vmem:[%s3650_s9 + $0x178] sm:$0xff] %v2055_v31  ;;  %v2814_v6 = vpop.f32.mrb[123].mxu0 }
 0x1d9   : > { %v1634_v50 = vpop.f32.mrb[96].mxu1 }
 0x1da   : > { %v1635_v60 = vadd.f32 %v3637_v0, %v1634_v50  ;;  %v1636_v27 = vpop.f32.mrb[97].mxu1 }
 0x1db   : > { %v1637_v8 = vpop.f32.mrb[98].mxu1 }
 0x1dc   : > { %v2060_v10 = vadd.f32 %v3938_v59, %v1635_v60  ;;  %v1638_v13 = vadd.f32 %v3637_v0, %v1637_v8  ;;  %v1639_v38 = vpop.f32.mrb[99].mxu1 }
 0x1dd   : > { %v4013_v25 = vpop.f32.mrb[124].mxu0 }
 0x1de   : > { %2306 = vst [vmem:[%s3650_s9 + $0x180] sm:$0xff] %v2060_v10  ;;  %v2063_v47 = vadd.f32 %v3941_v63, %v1638_v13  ;;  %v2817_v52 = vpop.f32.mrb[125].mxu0 }
 0x1df   : > { %v4016_v61 = vpop.f32.mrb[126].mxu0 }
 0x1e0   : > { %2307 = vst [vmem:[%s3650_s9 + $0x188] sm:$0xff] %v2063_v47  ;;  %v2818_v33 = vpop.f32.mrb[127].mxu0 }
 0x1e1   : > { %v1642_v18 = vpop.f32.mrb[100].mxu1 }
 0x1e2   : > { %v1643_v3 = vadd.f32 %v3637_v0, %v1642_v18  ;;  %v1644_v40 = vpop.f32.mrb[101].mxu1 }
 0x1e3   : > { %v1645_v59 = vpop.f32.mrb[102].mxu1 }
 0x1e4   : > { %v2068_v57 = vadd.f32 %v3950_v35, %v1643_v3  ;;  %v1646_v22 = vadd.f32 %v3637_v0, %v1645_v59  ;;  %v1647_v39 = vpop.f32.mrb[103].mxu1 }
 0x1e5   : > { %v4028_v37 = vpop.f32.mrb[128].mxu0 }
 0x1e6   : > { %2308 = vst [vmem:[%s3650_s9 + $0x190] sm:$0xff] %v2068_v57  ;;  %v2071_v63 = vadd.f32 %v3953_v15, %v1646_v22 }
 0x1e8   : > { %2309 = vst [vmem:[%s3650_s9 + $0x198] sm:$0xff] %v2071_v63 }
 0x1e9   : > { %v1650_v30 = vpop.f32.mrb[104].mxu1 }
 0x1ea   : > { %v1651_v56 = vadd.f32 %v3637_v0, %v1650_v30  ;;  %v1652_v54 = vpop.f32.mrb[105].mxu1  ;;  %v2821_v0 = vpop.f32.mrb[129].mxu0 }
 0x1eb   : > { %v1653_v35 = vpop.f32.mrb[106].mxu1  ;;  %v4031_v44 = vpop.f32.mrb[130].mxu0 }
 0x1ec   : > { %v2076_v34 = vadd.f32 %v3962_v49, %v1651_v56  ;;  %v1654_v15 = vadd.f32 %v4023_v21, %v1653_v35  ;;  %v1655_v58 = vpop.f32.mrb[107].mxu1  ;;  %v2822_v14 = vpop.f32.mrb[131].mxu0 }
 0x1ed   : > { %v4038_v43 = vpop.f32.mrb[132].mxu0 }
 0x1ee   : > { %2310 = vst [vmem:[%s3650_s9 + $0x1a0] sm:$0xff] %v2076_v34  ;;  %v2079_v1 = vadd.f32 %v3965_v29, %v1654_v15  ;;  %v2825_v12 = vpop.f32.mrb[133].mxu0 }
 0x1ef   : > { %v4041_v55 = vpop.f32.mrb[134].mxu0 }
 0x1f0   : > { %2311 = vst [vmem:[%s3650_s9 + $0x1a8] sm:$0xff] %v2079_v1  ;;  %v2826_v28 = vpop.f32.mrb[135].mxu0 }
 0x1f1   : > { %v1658_v5 = vpop.f32.mrb[108].mxu1 }
 0x1f2   : > { %v1659_v49 = vadd.f32 %v4023_v21, %v1658_v5  ;;  %v1660_v45 = vpop.f32.mrb[109].mxu1 }
 0x1f3   : > { %v1661_v11 = vpop.f32.mrb[110].mxu1 }
 0x1f4   : > { %v2084_v48 = vadd.f32 %v3973_v46, %v1659_v49  ;;  %v1662_v9 = vadd.f32 %v4023_v21, %v1661_v11  ;;  %v1663_v36 = vpop.f32.mrb[111].mxu1 }
 0x1f5   : > { %v4048_v31 = vpop.f32.mrb[136].mxu0 }
 0x1f6   : > { %2312 = vst [vmem:[%s3650_s9 + $0x1b0] sm:$0xff] %v2084_v48  ;;  %v2087_v29 = vadd.f32 %v3976_v41, %v1662_v9  ;;  %v2829_v24 = vpop.f32.mrb[137].mxu0 }
 0x1f7   : > { %v4051_v60 = vpop.f32.mrb[138].mxu0 }
 0x1f8   : > { %2313 = vst [vmem:[%s3650_s9 + $0x1b8] sm:$0xff] %v2087_v29  ;;  %v2830_v8 = vpop.f32.mrb[139].mxu0 }
 0x1f9   : > { %v1666_v53 = vpop.f32.mrb[112].mxu1 }
 0x1fa   : > { %v1667_v20 = vadd.f32 %v4023_v21, %v1666_v53  ;;  %v1668_v23 = vpop.f32.mrb[113].mxu1 }
 0x1fb   : > { %v1669_v46 = vpop.f32.mrb[114].mxu1 }
 0x1fc   : > { %v2092_v62 = vadd.f32 %v3983_v51, %v1667_v20  ;;  %v1670_v26 = vadd.f32 %v4023_v21, %v1669_v46  ;;  %v1671_v2 = vpop.f32.mrb[115].mxu1 }
 0x1fd   : > { %v4058_v47 = vpop.f32.mrb[140].mxu0 }
 0x1fe   : > { %2314 = vst [vmem:[%s3650_s9 + $0x1c0] sm:$0xff] %v2092_v62  ;;  %v2095_v41 = vadd.f32 %v3986_v17, %v1670_v26  ;;  %v2833_v16 = vpop.f32.mrb[141].mxu0 }
 0x1ff   : > { %v4061_v3 = vpop.f32.mrb[142].mxu0 }
 0x200   : > { %2315 = vst [vmem:[%s3650_s9 + $0x1c8] sm:$0xff] %v2095_v41  ;;  %v2834_v59 = vpop.f32.mrb[143].mxu0 }
 0x201   : > { %v1674_v50 = vpop.f32.mrb[116].mxu1 }
 0x202   : > { %v1675_v27 = vadd.f32 %v4023_v21, %v1674_v50  ;;  %v1676_v32 = vpop.f32.mrb[117].mxu1 }
 0x203   : > { %v1677_v51 = vpop.f32.mrb[118].mxu1 }
 0x204   : > { %v2100_v10 = vadd.f32 %v3993_v4, %v1675_v27  ;;  %v1678_v13 = vadd.f32 %v4023_v21, %v1677_v51  ;;  %v1679_v38 = vpop.f32.mrb[119].mxu1 }
 0x205   : > { %v4068_v63 = vpop.f32.mrb[144].mxu0 }
 0x206   : > { %2316 = vst [vmem:[%s3650_s9 + $0x1d0] sm:$0xff] %v2100_v10  ;;  %v2103_v17 = vadd.f32 %v3996_v7, %v1678_v13  ;;  %v2837_v52 = vpop.f32.mrb[145].mxu0 }
 0x207   : > { %v4071_v56 = vpop.f32.mrb[146].mxu0 }
 0x208   : > { %2317 = vst [vmem:[%s3650_s9 + $0x1d8] sm:$0xff] %v2103_v17  ;;  %v2838_v35 = vpop.f32.mrb[147].mxu0 }
 0x209   : > { %v1682_v18 = vpop.f32.mrb[120].mxu1 }
 0x20a   : > { %v1683_v40 = vadd.f32 %v4023_v21, %v1682_v18  ;;  %v1684_v6 = vpop.f32.mrb[121].mxu1 }
 0x20b   : > { %v1685_v4 = vpop.f32.mrb[122].mxu1 }
 0x20c   : > { %v2108_v57 = vadd.f32 %v4003_v42, %v1683_v40  ;;  %v1686_v22 = vadd.f32 %v4023_v21, %v1685_v4  ;;  %v1687_v39 = vpop.f32.mrb[123].mxu1 }
 0x20d   : > { %v4078_v1 = vpop.f32.mrb[148].mxu0 }
 0x20e   : > { %2318 = vst [vmem:[%s3650_s9 + $0x1e0] sm:$0xff] %v2108_v57  ;;  %v2111_v7 = vadd.f32 %v4006_v19, %v1686_v22  ;;  %v2841_v0 = vpop.f32.mrb[149].mxu0 }
 0x20f   : > { %v4081_v49 = vpop.f32.mrb[150].mxu0 }
 0x210   : > { %2319 = vst [vmem:[%s3650_s9 + $0x1e8] sm:$0xff] %v2111_v7  ;;  %v2842_v11 = vpop.f32.mrb[151].mxu0 }
 0x211   : > { %v1690_v30 = vpop.f32.mrb[124].mxu1 }
 0x212   : > { %v1691_v54 = vadd.f32 %v4023_v21, %v1690_v30  ;;  %v1692_v33 = vpop.f32.mrb[125].mxu1 }
 0x213   : > { %v1693_v42 = vpop.f32.mrb[126].mxu1 }
 0x214   : > { %v2116_v34 = vadd.f32 %v4013_v25, %v1691_v54  ;;  %v1694_v15 = vadd.f32 %v4023_v21, %v1693_v42  ;;  %v1695_v58 = vpop.f32.mrb[127].mxu1 }
 0x215   : > { %v4088_v29 = vpop.f32.mrb[152].mxu0 }
 0x216   : > { %2320 = vst [vmem:[%s3650_s9 + $0x1f0] sm:$0xff] %v2116_v34  ;;  %v2119_v19 = vadd.f32 %v4016_v61, %v1694_v15  ;;  %v2845_v12 = vpop.f32.mrb[153].mxu0 }
 0x217   : > { %v4091_v20 = vpop.f32.mrb[154].mxu0 }
 0x218   : > { %2321 = vst [vmem:[%s3650_s9 + $0x1f8] sm:$0xff] %v2119_v19  ;;  %v2846_v46 = vpop.f32.mrb[155].mxu0 }
 0x219   : > { %v1698_v5 = vpop.f32.mrb[128].mxu1 }
 0x21a   : > { %v1699_v45 = vadd.f32 %v4023_v21, %v1698_v5  ;;  %v1700_v14 = vpop.f32.mrb[129].mxu1 }
 0x21b   : > { %v1701_v25 = vpop.f32.mrb[130].mxu1 }
 0x21c   : > { %v2124_v48 = vadd.f32 %v4028_v37, %v1699_v45  ;;  %v1702_v9 = vadd.f32 %v4023_v21, %v1701_v25  ;;  %v1703_v36 = vpop.f32.mrb[131].mxu1 }
 0x21d   : > { %v4098_v41 = vpop.f32.mrb[156].mxu0 }
 0x21e   : > { %2322 = vst [vmem:[%s3650_s9 + $0x200] sm:$0xff] %v2124_v48  ;;  %v2127_v61 = vadd.f32 %v4031_v44, %v1702_v9  ;;  %v2849_v24 = vpop.f32.mrb[157].mxu0 }
 0x21f   : > { %v4101_v27 = vpop.f32.mrb[158].mxu0 }
 0x220   : > { %2323 = vst [vmem:[%s3650_s9 + $0x208] sm:$0xff] %v2127_v61  ;;  %v2850_v51 = vpop.f32.mrb[159].mxu0 }
 0x221   : > { %v1706_v53 = vpop.f32.mrb[132].mxu1 }
 0x222   : > { %v1707_v23 = vadd.f32 %v4023_v21, %v1706_v53  ;;  %v1708_v28 = vpop.f32.mrb[133].mxu1 }
 0x223   : > { %v1709_v37 = vpop.f32.mrb[134].mxu1 }
 0x224   : > { %v2132_v62 = vadd.f32 %v4038_v43, %v1707_v23  ;;  %v1710_v26 = vadd.f32 %v4023_v21, %v1709_v37  ;;  %v1711_v2 = vpop.f32.mrb[135].mxu1 }
 0x225   : > { %v4108_v17 = vpop.f32.mrb[160].mxu0 }
 0x226   : > { %2324 = vst [vmem:[%s3650_s9 + $0x210] sm:$0xff] %v2132_v62  ;;  %v2135_v44 = vadd.f32 %v4041_v55, %v1710_v26  ;;  %v2853_v16 = vpop.f32.mrb[161].mxu0 }
 0x227   : > { %v4111_v40 = vpop.f32.mrb[162].mxu0 }
 0x228   : > { %2325 = vst [vmem:[%s3650_s9 + $0x218] sm:$0xff] %v2135_v44  ;;  %v2854_v4 = vpop.f32.mrb[163].mxu0 }
 0x229   : > { %v1714_v50 = vpop.f32.mrb[136].mxu1 }
 0x22a   : > { %v1715_v32 = vadd.f32 %v4023_v21, %v1714_v50  ;;  %v1716_v8 = vpop.f32.mrb[137].mxu1 }
 0x22b   : > { %v1717_v43 = vpop.f32.mrb[138].mxu1 }
 0x22c   : > { %v2140_v10 = vadd.f32 %v4048_v31, %v1715_v32  ;;  %v1718_v13 = vadd.f32 %v4023_v21, %v1717_v43  ;;  %v1719_v38 = vpop.f32.mrb[139].mxu1 }
 0x22d   : > { %v4118_v7 = vpop.f32.mrb[164].mxu0 }
 0x22e   : > { %2326 = vst [vmem:[%s3650_s9 + $0x220] sm:$0xff] %v2140_v10  ;;  %v2143_v55 = vadd.f32 %v4051_v60, %v1718_v13  ;;  %v2857_v52 = vpop.f32.mrb[165].mxu0 }
 0x22f   : > { %v4121_v54 = vpop.f32.mrb[166].mxu0 }
 0x230   : > { %2327 = vst [vmem:[%s3650_s9 + $0x228] sm:$0xff] %v2143_v55  ;;  %v2858_v42 = vpop.f32.mrb[167].mxu0 }
 0x231   : > { %v1722_v18 = vpop.f32.mrb[140].mxu1 }
 0x232   : > { %v1723_v6 = vadd.f32 %v4023_v21, %v1722_v18  ;;  %v1724_v59 = vpop.f32.mrb[141].mxu1 }
 0x233   : > { %v1725_v31 = vpop.f32.mrb[142].mxu1 }
 0x234   : > { %v2148_v57 = vadd.f32 %v4058_v47, %v1723_v6  ;;  %v1726_v22 = vadd.f32 %v4023_v21, %v1725_v31  ;;  %v1727_v39 = vpop.f32.mrb[143].mxu1 }
 0x235   : > { %v4128_v19 = vpop.f32.mrb[168].mxu0 }
 0x236   : > { %2328 = vst [vmem:[%s3650_s9 + $0x230] sm:$0xff] %v2148_v57  ;;  %v2151_v60 = vadd.f32 %v4061_v3, %v1726_v22  ;;  %v2861_v0 = vpop.f32.mrb[169].mxu0 }
 0x237   : > { %v4131_v45 = vpop.f32.mrb[170].mxu0 }
 0x238   : > { %2329 = vst [vmem:[%s3650_s9 + $0x238] sm:$0xff] %v2151_v60  ;;  %v2862_v25 = vpop.f32.mrb[171].mxu0 }
 0x239   : > { %v1730_v30 = vpop.f32.mrb[144].mxu1 }
 0x23a   : > { %v1731_v33 = vadd.f32 %v4023_v21, %v1730_v30  ;;  %v1732_v35 = vpop.f32.mrb[145].mxu1 }
 0x23b   : > { %v1733_v47 = vpop.f32.mrb[146].mxu1 }
 0x23c   : > { %v2156_v34 = vadd.f32 %v4068_v63, %v1731_v33  ;;  %v1734_v15 = vadd.f32 %v4023_v21, %v1733_v47  ;;  %v1735_v58 = vpop.f32.mrb[147].mxu1 }
 0x23d   : > { %v4138_v61 = vpop.f32.mrb[172].mxu0 }
 0x23e   : > { %2330 = vst [vmem:[%s3650_s9 + $0x240] sm:$0xff] %v2156_v34  ;;  %v2159_v3 = vadd.f32 %v4071_v56, %v1734_v15  ;;  %v2865_v12 = vpop.f32.mrb[173].mxu0 }
 0x23f   : > { %v4141_v23 = vpop.f32.mrb[174].mxu0 }
 0x240   : > { %2331 = vst [vmem:[%s3650_s9 + $0x248] sm:$0xff] %v2159_v3  ;;  %v2866_v37 = vpop.f32.mrb[175].mxu0 }
 0x241   : > { %v1738_v5 = vpop.f32.mrb[148].mxu1 }
 0x242   : > { %v1739_v14 = vadd.f32 %v4023_v21, %v1738_v5  ;;  %v1740_v11 = vpop.f32.mrb[149].mxu1 }
 0x243   : > { %v1741_v63 = vpop.f32.mrb[150].mxu1 }
 0x244   : > { %v2164_v48 = vadd.f32 %v4078_v1, %v1739_v14  ;;  %v1742_v9 = vadd.f32 %v4023_v21, %v1741_v63  ;;  %v1743_v36 = vpop.f32.mrb[151].mxu1 }
 0x245   : > { %v4148_v44 = vpop.f32.mrb[176].mxu0 }
 0x246   : > { %2332 = vst [vmem:[%s3650_s9 + $0x250] sm:$0xff] %v2164_v48  ;;  %v2167_v56 = vadd.f32 %v4081_v49, %v1742_v9  ;;  %v2869_v24 = vpop.f32.mrb[177].mxu0 }
 0x247   : > { %v4151_v32 = vpop.f32.mrb[178].mxu0 }
 0x248   : > { %2333 = vst [vmem:[%s3650_s9 + $0x258] sm:$0xff] %v2167_v56  ;;  %v2870_v43 = vpop.f32.mrb[179].mxu0 }
 0x249   : > { %v1746_v53 = vpop.f32.mrb[152].mxu1 }
 0x24a   : > { %v1747_v28 = vadd.f32 %v4023_v21, %v1746_v53  ;;  %v1748_v46 = vpop.f32.mrb[153].mxu1 }
 0x24b   : > { %v1749_v1 = vpop.f32.mrb[154].mxu1 }
 0x24c   : > { %v2172_v62 = vadd.f32 %v4088_v29, %v1747_v28  ;;  %v1750_v26 = vadd.f32 %v4023_v21, %v1749_v1  ;;  %v1751_v2 = vpop.f32.mrb[155].mxu1 }
 0x24d   : > { %v4158_v55 = vpop.f32.mrb[180].mxu0 }
 0x24e   : > { %2334 = vst [vmem:[%s3650_s9 + $0x260] sm:$0xff] %v2172_v62  ;;  %v2175_v49 = vadd.f32 %v4091_v20, %v1750_v26  ;;  %v2873_v16 = vpop.f32.mrb[181].mxu0 }
 0x24f   : > { %v4161_v6 = vpop.f32.mrb[182].mxu0 }
 0x250   : > { %2335 = vst [vmem:[%s3650_s9 + $0x268] sm:$0xff] %v2175_v49  ;;  %v2874_v31 = vpop.f32.mrb[183].mxu0 }
 0x251   : > { %v1754_v50 = vpop.f32.mrb[156].mxu1 }
 0x252   : > { %v1755_v8 = vadd.f32 %v4023_v21, %v1754_v50  ;;  %v1756_v51 = vpop.f32.mrb[157].mxu1 }
 0x253   : > { %v1757_v29 = vpop.f32.mrb[158].mxu1 }
 0x254   : > { %v2180_v10 = vadd.f32 %v4098_v41, %v1755_v8  ;;  %v1758_v13 = vadd.f32 %v4023_v21, %v1757_v29  ;;  %v1759_v38 = vpop.f32.mrb[159].mxu1 }
 0x255   : > { %v4168_v60 = vpop.f32.mrb[184].mxu0 }
 0x256   : > { %2336 = vst [vmem:[%s3650_s9 + $0x270] sm:$0xff] %v2180_v10  ;;  %v2183_v20 = vadd.f32 %v4101_v27, %v1758_v13  ;;  %v2877_v52 = vpop.f32.mrb[185].mxu0 }
 0x257   : > { %v4171_v33 = vpop.f32.mrb[186].mxu0 }
 0x258   : > { %2337 = vst [vmem:[%s3650_s9 + $0x278] sm:$0xff] %v2183_v20  ;;  %v2878_v47 = vpop.f32.mrb[187].mxu0 }
 0x259   : > { %v1762_v18 = vpop.f32.mrb[160].mxu1 }
 0x25a   : > { %v1763_v59 = vadd.f32 %v4023_v21, %v1762_v18  ;;  %v1764_v4 = vpop.f32.mrb[161].mxu1 }
 0x25b   : > { %v1765_v41 = vpop.f32.mrb[162].mxu1 }
 0x25c   : > { %v2188_v57 = vadd.f32 %v4108_v17, %v1763_v59  ;;  %v1766_v22 = vadd.f32 %v4023_v21, %v1765_v41  ;;  %v1767_v39 = vpop.f32.mrb[163].mxu1 }
 0x25d   : > { %v4178_v3 = vpop.f32.mrb[188].mxu0 }
 0x25e   : > { %2338 = vst [vmem:[%s3650_s9 + $0x280] sm:$0xff] %v2188_v57  ;;  %v2191_v27 = vadd.f32 %v4111_v40, %v1766_v22  ;;  %v2881_v0 = vpop.f32.mrb[189].mxu0 }
 0x25f   : > { %v4181_v14 = vpop.f32.mrb[190].mxu0 }
 0x260   : > { %2339 = vst [vmem:[%s3650_s9 + $0x288] sm:$0xff] %v2191_v27  ;;  %v2882_v63 = vpop.f32.mrb[191].mxu0 }
 0x261   : > { %v1770_v30 = vpop.f32.mrb[164].mxu1 }
 0x262   : > { %v1771_v35 = vadd.f32 %v4023_v21, %v1770_v30  ;;  %v1772_v42 = vpop.f32.mrb[165].mxu1 }
 0x263   : > { %v1773_v17 = vpop.f32.mrb[166].mxu1 }
 0x264   : > { %v2196_v34 = vadd.f32 %v4118_v7, %v1771_v35  ;;  %v1774_v15 = vadd.f32 %v4023_v21, %v1773_v17  ;;  %v1775_v58 = vpop.f32.mrb[167].mxu1 }
 0x265   : > { %v2251_v56 = vpop.f32.mrb[192].mxu0 }
 0x266   : > { %2340 = vst [vmem:[%s3650_s9 + $0x290] sm:$0xff] %v2196_v34  ;;  %v2199_v40 = vadd.f32 %v4121_v54, %v1774_v15  ;;  %v2885_v12 = vpop.f32.mrb[193].mxu0 }
 0x267   : > { %v2254_v28 = vpop.f32.mrb[194].mxu0 }
 0x268   : > { %2341 = vst [vmem:[%s3650_s9 + $0x298] sm:$0xff] %v2199_v40  ;;  %v2886_v1 = vpop.f32.mrb[195].mxu0 }
 0x269   : > { %v1778_v5 = vpop.f32.mrb[168].mxu1 }
 0x26a   : > { %v1779_v11 = vadd.f32 %v4023_v21, %v1778_v5  ;;  %v1780_v25 = vpop.f32.mrb[169].mxu1 }
 0x26b   : > { %v1781_v7 = vpop.f32.mrb[170].mxu1 }
 0x26c   : > { %v2204_v48 = vadd.f32 %v4128_v19, %v1779_v11  ;;  %v1782_v9 = vadd.f32 %v4023_v21, %v1781_v7  ;;  %v1783_v36 = vpop.f32.mrb[171].mxu1 }
 0x26e   : > { %2342 = vst [vmem:[%s3650_s9 + $0x2a0] sm:$0xff] %v2204_v48  ;;  %v2207_v54 = vadd.f32 %v4131_v45, %v1782_v9 }
 0x270   : > { %2343 = vst [vmem:[%s3650_s9 + $0x2a8] sm:$0xff] %v2207_v54 }
 0x271   : > { %v1786_v53 = vpop.f32.mrb[172].mxu1 }
 0x272   : > { %v1787_v46 = vadd.f32 %v4023_v21, %v1786_v53  ;;  %v1788_v37 = vpop.f32.mrb[173].mxu1 }
 0x273   : > { %v1789_v62 = vpop.f32.mrb[174].mxu1 }
 0x274   : > { %v2212_v19 = vadd.f32 %v4138_v61, %v1787_v46  ;;  %v1790_v26 = vadd.f32 %v4023_v21, %v1789_v62  ;;  %v1791_v2 = vpop.f32.mrb[175].mxu1 }
 0x276   : > { %2344 = vst [vmem:[%s3650_s9 + $0x2b0] sm:$0xff] %v2212_v19  ;;  %v2215_v45 = vadd.f32 %v4141_v23, %v1790_v26 }
 0x278   : > { %2345 = vst [vmem:[%s3650_s9 + $0x2b8] sm:$0xff] %v2215_v45 }
 0x279   : > { %v1794_v49 = vpop.f32.mrb[176].mxu1 }
 0x27a   : > { %v1795_v24 = vadd.f32 %v4023_v21, %v1794_v49  ;;  %v1796_v50 = vpop.f32.mrb[177].mxu1 }
 0x27b   : > { %v1797_v8 = vpop.f32.mrb[178].mxu1 }
 0x27c   : > { %v2220_v51 = vadd.f32 %v4148_v44, %v1795_v24  ;;  %v1798_v43 = vadd.f32 %v4023_v21, %v1797_v8  ;;  %v1799_v29 = vpop.f32.mrb[179].mxu1 }
 0x27e   : > { %2346 = vst [vmem:[%s3650_s9 + $0x2c0] sm:$0xff] %v2220_v51  ;;  %v2223_v61 = vadd.f32 %v4151_v32, %v1798_v43 }
 0x280   : > { %2347 = vst [vmem:[%s3650_s9 + $0x2c8] sm:$0xff] %v2223_v61 }
 0x281   : > { %v1802_v10 = vpop.f32.mrb[180].mxu1 }
 0x282   : > { %v1803_v23 = vadd.f32 %v4023_v21, %v1802_v10  ;;  %v1804_v13 = vpop.f32.mrb[181].mxu1 }
 0x283   : > { %v1805_v38 = vpop.f32.mrb[182].mxu1 }
 0x284   : > { %v2228_v20 = vadd.f32 %v4158_v55, %v1803_v23  ;;  %v1806_v16 = vadd.f32 %v4023_v21, %v1805_v38  ;;  %v1807_v18 = vpop.f32.mrb[183].mxu1 }
 0x286   : > { %2348 = vst [vmem:[%s3650_s9 + $0x2d0] sm:$0xff] %v2228_v20  ;;  %v2231_v44 = vadd.f32 %v4161_v6, %v1806_v16 }
 0x288   : > { %2349 = vst [vmem:[%s3650_s9 + $0x2d8] sm:$0xff] %v2231_v44 }
 0x289   : > { %v1810_v59 = vpop.f32.mrb[184].mxu1 }
 0x28a   : > { %v1811_v32 = vadd.f32 %v4023_v21, %v1810_v59  ;;  %v1812_v4 = vpop.f32.mrb[185].mxu1 }
 0x28b   : > { %v1813_v31 = vpop.f32.mrb[186].mxu1 }
 0x28c   : > { %v2236_v41 = vadd.f32 %v4168_v60, %v1811_v32  ;;  %v1814_v57 = vadd.f32 %v4023_v21, %v1813_v31  ;;  %v1815_v22 = vpop.f32.mrb[187].mxu1 }
 0x28e   : > { %2350 = vst [vmem:[%s3650_s9 + $0x2e0] sm:$0xff] %v2236_v41  ;;  %v2239_v55 = vadd.f32 %v4171_v33, %v1814_v57 }
 0x290   : > { %2351 = vst [vmem:[%s3650_s9 + $0x2e8] sm:$0xff] %v2239_v55 }
 0x291   : > { %v1818_v39 = vpop.f32.mrb[188].mxu1 }
 0x292   : > { %v1819_v6 = vadd.f32 %v4023_v21, %v1818_v39  ;;  %v1820_v27 = vpop.f32.mrb[189].mxu1 }
 0x293   : > { %v1821_v52 = vpop.f32.mrb[190].mxu1 }
 0x294   : > { %v2244_v30 = vadd.f32 %v4178_v3, %v1819_v6  ;;  %v1822_v35 = vadd.f32 %v4023_v21, %v1821_v52  ;;  %v1823_v42 = vpop.f32.mrb[191].mxu1 }
 0x296   : > { %2352 = vst [vmem:[%s3650_s9 + $0x2f0] sm:$0xff] %v2244_v30  ;;  %v2247_v60 = vadd.f32 %v4181_v14, %v1822_v35 }
 0x298   : > { %2353 = vst [vmem:[%s3650_s9 + $0x2f8] sm:$0xff] %v2247_v60 }
 0x299   : > { %v1826_v47 = vpop.f32.mrb[192].mxu1 }
 0x29a   : > { %v1827_v33 = vadd.f32 %v4023_v21, %v1826_v47  ;;  %v1828_v17 = vpop.f32.mrb[193].mxu1 }
 0x29b   : > { %v1829_v34 = vpop.f32.mrb[194].mxu1 }
 0x29c   : > { %v2252_v15 = vadd.f32 %v2251_v56, %v1827_v33  ;;  %v1830_v58 = vadd.f32 %v4023_v21, %v1829_v34  ;;  %v1831_v40 = vpop.f32.mrb[195].mxu1 }
 0x29e   : > { %2354 = vst [vmem:[%s3650_s9 + $0x300] sm:$0xff] %v2252_v15  ;;  %v2255_v0 = vadd.f32 %v2254_v28, %v1830_v58 }
 0x2a0   : > { %2355 = vst [vmem:[%s3650_s9 + $0x308] sm:$0xff] %v2255_v0 }
 0x2a1 PF: > { %s13_s12 = sadd.s32 1, %s3316_s12  }
 0x2a2   : > { %p10_p4 = scmp.ge.s32.totalorder %s13_s12, 4  }
 0x2a4   :  { %12 = sbr.rel (!%p10_p4) target bundleno = 1 (0x1), region = 62 }

// kernel: mnist_diffusion_forward.33
= control target key start
LH: loop header
LB: loop body
LE: loop exit
PB: predicated region body
PF: predicated region fallthrough
CT: control target
= control target key end

     0   :  { %vm28_vm0 = vcmask 1043456   ;;  %v89_v0 = vmov 0.0   ;;  %vm90_vm1 = vmmov 0   ;;  %vm24_vm2 = vcmask 64512   ;;  %s123_s1 = inlined_call_operand.vmem [shape: bf16[8,128], index: 1, kind: input, shape index: {}]   ;;  %s124_s0 = inlined_call_operand.vmem [shape: bf16[8,8], index: 0, kind: input, shape index: {}]   ;;  %s125_s2 = inlined_call_operand.vmem [shape: f32[1,128], index: 2, kind: input, shape index: {}]   ;;  %s126_s3 = inlined_call_operand.vmem [shape: f32[8,128], index: 3, kind: output, shape index: {}]  }
   0x1   :  { %81 = vmatprep.subr.bf16.mxu0 %v89_v0  ;;  %v16_v1 = vld [vmem:[%s123_s1] sm:$0xf]  ;;  %83 = vmatprep.mubr.msk.bf16.mxu0 %vm90_vm1, %v89_v0 }
   0x2   :  { %v30_v2 = vsel %vm28_vm0, %v16_v1, 0  ;;  %v15_v3 = vld [vmem:[%s124_s0] sm:$0xf] }
   0x3   :  { %82 = vmatpush3.bf16.msra.mxu0 %v30_v2  ;;  %v77_v4 = vld [vmem:[%s125_s2] ss:$0 sm:$0xff] }
   0x6   :  { %84 = vmatmul.mubr.msk.bf16.vlgmr.msra.gmra.mrb[0].mxu0 %vm24_vm2, %v15_v3 }
  0xd9   :  { %v66_v5 = vpop.f32.mrb[0].mxu0 }
  0xda   :  { %v67_v6 = vadd.f32 %v77_v4, %v66_v5  ;;  %v85_v7 = vpop.f32.mrb[1].mxu0 }
  0xdb   :  { %v69_v8 = vpop.f32.mrb[2].mxu0 }
  0xdc   :  { %72 = vst [vmem:[%s126_s3] sm:$0xff] %v67_v6  ;;  %v86_v9 = vpop.f32.mrb[3].mxu0 }

// kernel: mnist_diffusion_forward.34
= control target key start
LH: loop header
LB: loop body
LE: loop exit
PB: predicated region body
PF: predicated region fallthrough
CT: control target
= control target key end

     0   :  { %v107_v0 = vmov 0.0   ;;  %vm108_vm0 = vmmov 0   ;;  %vm39_vm1 = vcmask 261120   ;;  %s144_s1 = inlined_call_operand.vmem [shape: bf16[32,128], index: 1, kind: input, shape index: {}]   ;;  %s145_s0 = inlined_call_operand.vmem [shape: bf16[8,32], index: 0, kind: input, shape index: {}]   ;;  %s146_s2 = inlined_call_operand.vmem [shape: f32[1,128], index: 2, kind: input, shape index: {}]   ;;  %s147_s3 = inlined_call_operand.vmem [shape: f32[8,128], index: 3, kind: output, shape index: {}]  }
   0x1   :  { %95 = vmatprep.subr.bf16.mxu0 %v107_v0  ;;  %v105_v1 = vld [vmem:[%s144_s1] sm:$0xff]   ;;  %99 = vmatprep.mubr.msk.bf16.mxu0 %vm108_vm0, %v107_v0  ;;  %v106_v2 = vld [vmem:[%s144_s1 + $0x8] sm:$0xff]  }
   0x2   :  { %96 = vmatpush3.bf16.msra.mxu0 %v105_v1  ;;  %v15_v3 = vld [vmem:[%s145_s0] sm:$0xf] }
   0x3   :  { %97 = vmatprep.subr.bf16.mxu0 %v107_v0  ;;  %v88_v4 = vld [vmem:[%s146_s2] ss:$0 sm:$0xff] }
   0x6   :  { %98 = vmatpush3.bf16.msra.mxu0 %v106_v2 }
   0x9   :  { %100 = vmatmul.mubr.msk.bf16.vlgmr.msra.gmra.mrb[0].mxu0 %vm39_vm1, %v15_v3 }
  0xdc   :  { %v77_v5 = vpop.f32.mrb[0].mxu0 }
  0xdd   :  { %v78_v6 = vadd.f32 %v88_v4, %v77_v5  ;;  %v101_v7 = vpop.f32.mrb[1].mxu0 }
  0xde   :  { %v80_v8 = vpop.f32.mrb[2].mxu0 }
  0xdf   :  { %83 = vst [vmem:[%s147_s3] sm:$0xff] %v78_v6  ;;  %v102_v9 = vpop.f32.mrb[3].mxu0 }

// kernel: mnist_diffusion_forward.29
= control target key start
LH: loop header
LB: loop body
LE: loop exit
PB: predicated region body
PF: predicated region fallthrough
CT: control target
= control target key end

     0   :  { %v1695_v0 = vmov 0   ;;  %v1696_v2 = vmov 0.0   ;;  %vm1697_vm0 = vmmov 0   ;;  %vm634_vm1 = vcmask 261120   ;;  %s2411_s1 = inlined_call_operand.vmem [shape: bf16[288,128], index: 1, kind: input, shape index: {}]   ;;  %s2412_s0 = inlined_call_operand.vmem [shape: bf16[392,288], index: 0, kind: input, shape index: {}]   ;;  %s2413_s2 = inlined_call_operand.vmem [shape: f32[1,128], index: 2, kind: input, shape index: {}]   ;;  %s2414_s3 = inlined_call_operand.vmem [shape: f32[392,128], index: 3, kind: output, shape index: {}]  }
   0x1   :  { %710 = vmatprep.subr.bf16.mxu1 %v1695_v0  ;;  %v1578_v1 = vld [vmem:[%s2411_s1] sm:$0xff]   ;;  %1373 = vmatprep.subr.bf16.mxu0 %v1696_v2  ;;  %v1579_v3 = vld [vmem:[%s2411_s1 + $0x8] sm:$0xff]   ;;  %v1580_v4 = vld [vmem:[%s2411_s1 + $0x10] sm:$0xff]  }
   0x2   :  { %1377 = vmatprep.mubr.msk.bf16.mxu0 %vm1697_vm0, %v1696_v2  ;;  %711 = vmatpush1.bf16.msra.mxu1 %v1578_v1  ;;  %v1581_v5 = vld [vmem:[%s2411_s1 + $0x18] sm:$0xff]   ;;  %v1582_v6 = vld [vmem:[%s2411_s1 + $0x20] sm:$0xff]   ;;  %v1594_v8 = vld [vmem:[%s2411_s1 + $0x88] sm:$0xff]  }
   0x3   :  { %712 = vmatprep.subr.bf16.mxu1 %v1695_v0  ;;  %v1592_v7 = vld [vmem:[%s2411_s1 + $0x80] sm:$0xff]   ;;  %v1583_v9 = vld [vmem:[%s2411_s1 + $0x28] sm:$0xff]   ;;  %v1584_v12 = vld [vmem:[%s2411_s1 + $0x30] sm:$0xff]  }
   0x4   :  { %1374 = vmatpush3.bf16.msra.mxu0 %v1592_v7  ;;  %v1598_v10 = vld [vmem:[%s2412_s0 + $0x4] ss:$12 sps:$4 sm:$0xff]   ;;  %v1599_v11 = vld [vmem:[%s2412_s0 + $0x8] ss:$12 sps:$4 sm:$0xff]   ;;  %v1585_v13 = vld [vmem:[%s2411_s1 + $0x38] sm:$0xff]  }
   0x5   :  { %1375 = vmatprep.subr.bf16.mxu0 %v1696_v2  ;;  %742 = vmatprep.mubr.bf16.mxu1 %v1598_v10  ;;  %v1602_v14 = vld [vmem:[%s2412_s0 + $0x20] ss:$12 sps:$4 sm:$0xff]   ;;  %v1606_v17 = vld [vmem:[%s2412_s0 + $0x38] ss:$12 sps:$4 sm:$0xff]   ;;  %v1588_v18 = vld [vmem:[%s2411_s1 + $0x50] sm:$0xff]  }
   0x6   :  { %713 = vmatpush1.bf16.msra.mxu1 %v1579_v3  ;;  %v1586_v15 = vld [vmem:[%s2411_s1 + $0x40] sm:$0xff]   ;;  %v1587_v16 = vld [vmem:[%s2411_s1 + $0x48] sm:$0xff]   ;;  %v1589_v19 = vld [vmem:[%s2411_s1 + $0x58] sm:$0xff]  }
   0x7   :  { %714 = vmatprep.subr.bf16.mxu1 %v1695_v0  ;;  %v1610_v20 = vld [vmem:[%s2412_s0 + $0x50] ss:$12 sps:$4 sm:$0xff]   ;;  %v1590_v21 = vld [vmem:[%s2411_s1 + $0x60] sm:$0xff]   ;;  %v1591_v22 = vld [vmem:[%s2411_s1 + $0x68] sm:$0xff]  }
   0x8   :  { %1376 = vmatpush3.bf16.msra.mxu0 %v1594_v8  ;;  %v1614_v23 = vld [vmem:[%s2412_s0 + $0x68] ss:$12 sps:$4 sm:$0xff]   ;;  %v1595_v25 = vld [vmem:[%s2411_s1 + $0x78] sm:$0xff]   ;;  %v1618_v26 = vld [vmem:[%s2412_s0 + $0x80] ss:$12 sps:$4 sm:$0xff]  }
   0x9   :  { %v1593_v24 = vld [vmem:[%s2411_s1 + $0x70] sm:$0xff]   ;;  %v1596_v27 = vld [vmem:[%s2412_s0] ss:$12 sps:$4 sm:$0xff]   ;;  %v1600_v28 = vld [vmem:[%s2412_s0 + $0x1c] ss:$12 sps:$4 sm:$0xff]  }
   0xa   :  { %715 = vmatpush1.bf16.msra.mxu1 %v1580_v4  ;;  %v1622_v29 = vld [vmem:[%s2412_s0 + $0x98] ss:$12 sps:$4 sm:$0xff]   ;;  %v1604_v31 = vld [vmem:[%s2412_s0 + $0x34] ss:$12 sps:$4 sm:$0xff]   ;;  %v1626_v32 = vld [vmem:[%s2412_s0 + $0xb0] ss:$12 sps:$4 sm:$0xff]  }
   0xb   :  { %716 = vmatprep.subr.bf16.mxu1 %v1695_v0  ;;  %1378 = vmatmul.mubr.msk.bf16.vlgmr.msra.gmra.mrb[0].mxu0 %vm634_vm1, %v1599_v11  ;;  %v1603_v30 = vld [vmem:[%s2412_s0 + $0x18] ss:$12 sps:$4 sm:$0xff]   ;;  %v1607_v33 = vld [vmem:[%s2412_s0 + $0x30] ss:$12 sps:$4 sm:$0xff]   ;;  %v1630_v35 = vld [vmem:[%s2412_s0 + $0xc8] ss:$12 sps:$4 sm:$0xff]  }
   0xc   :  { %1381 = vmatprep.mubr.msk.bf16.mxu0 %vm1697_vm0, %v1696_v2  ;;  %v1608_v34 = vld [vmem:[%s2412_s0 + $0x4c] ss:$12 sps:$4 sm:$0xff]   ;;  %v1611_v36 = vld [vmem:[%s2412_s0 + $0x48] ss:$12 sps:$4 sm:$0xff]   ;;  %v1612_v37 = vld [vmem:[%s2412_s0 + $0x64] ss:$12 sps:$4 sm:$0xff]  }
   0xd   :  { %v1634_v38 = vld [vmem:[%s2412_s0 + $0xe0] ss:$12 sps:$4 sm:$0xff]   ;;  %v1616_v40 = vld [vmem:[%s2412_s0 + $0x7c] ss:$12 sps:$4 sm:$0xff]   ;;  %v1638_v41 = vld [vmem:[%s2412_s0 + $0xf8] ss:$12 sps:$4 sm:$0xff]  }
   0xe   :  { %717 = vmatpush1.bf16.msra.mxu1 %v1581_v5  ;;  %v1615_v39 = vld [vmem:[%s2412_s0 + $0x60] ss:$12 sps:$4 sm:$0xff]   ;;  %v1619_v42 = vld [vmem:[%s2412_s0 + $0x78] ss:$12 sps:$4 sm:$0xff]   ;;  %v1642_v44 = vld [vmem:[%s2412_s0 + $0x110] ss:$12 sps:$4 sm:$0xff]  }
   0xf   :  { %718 = vmatprep.subr.bf16.mxu1 %v1695_v0  ;;  %v1620_v43 = vld [vmem:[%s2412_s0 + $0x94] ss:$12 sps:$4 sm:$0xff]   ;;  %v1623_v45 = vld [vmem:[%s2412_s0 + $0x90] ss:$12 sps:$4 sm:$0xff]   ;;  %v1624_v46 = vld [vmem:[%s2412_s0 + $0xac] ss:$12 sps:$4 sm:$0xff]  }
  0x10   :  { %v1646_v47 = vld [vmem:[%s2412_s0 + $0x128] ss:$12 sps:$4 sm:$0xff]   ;;  %v1628_v49 = vld [vmem:[%s2412_s0 + $0xc4] ss:$12 sps:$4 sm:$0xff]   ;;  %v1650_v50 = vld [vmem:[%s2412_s0 + $0x140] ss:$12 sps:$4 sm:$0xff]  }
  0x11   :  { %v1627_v48 = vld [vmem:[%s2412_s0 + $0xa8] ss:$12 sps:$4 sm:$0xff]   ;;  %v1631_v51 = vld [vmem:[%s2412_s0 + $0xc0] ss:$12 sps:$4 sm:$0xff]   ;;  %v1654_v53 = vld [vmem:[%s2412_s0 + $0x158] ss:$12 sps:$4 sm:$0xff]  }
  0x12   :  { %719 = vmatpush1.bf16.msra.mxu1 %v1582_v6  ;;  %v1632_v52 = vld [vmem:[%s2412_s0 + $0xdc] ss:$12 sps:$4 sm:$0xff]   ;;  %v1635_v54 = vld [vmem:[%s2412_s0 + $0xd8] ss:$12 sps:$4 sm:$0xff]   ;;  %v1636_v55 = vld [vmem:[%s2412_s0 + $0xf4] ss:$12 sps:$4 sm:$0xff]  }
  0x13   :  { %720 = vmatprep.subr.bf16.mxu1 %v1695_v0  ;;  %1382 = vmatmul.mubr.msk.bf16.gmra.mrb[4].mxu0 %vm634_vm1, %v1602_v14  ;;  %v1658_v56 = vld [vmem:[%s2412_s0 + $0x170] ss:$12 sps:$4 sm:$0xff]   ;;  %v1640_v58 = vld [vmem:[%s2412_s0 + $0x10c] ss:$12 sps:$4 sm:$0xff]   ;;  %v1662_v59 = vld [vmem:[%s2412_s0 + $0x188] ss:$12 sps:$4 sm:$0xff]  }
  0x14   :  { %1385 = vmatprep.mubr.msk.bf16.mxu0 %vm1697_vm0, %v1696_v2  ;;  %v1639_v57 = vld [vmem:[%s2412_s0 + $0xf0] ss:$12 sps:$4 sm:$0xff]   ;;  %v1643_v60 = vld [vmem:[%s2412_s0 + $0x108] ss:$12 sps:$4 sm:$0xff]   ;;  %v1666_v62 = vld [vmem:[%s2412_s0 + $0x1a0] ss:$12 sps:$4 sm:$0xff]  }
  0x15   :  { %v1644_v61 = vld [vmem:[%s2412_s0 + $0x124] ss:$12 sps:$4 sm:$0xff]   ;;  %v1647_v63 = vld [vmem:[%s2412_s0 + $0x120] ss:$12 sps:$4 sm:$0xff]   ;;  %v1678_v8 = vld [vmem:[%s2412_s0 + $0x1e8] ss:$12 sps:$4 sm:$0xff]  }
  0x16   :  { %721 = vmatpush1.bf16.msra.mxu1 %v1583_v9  ;;  %v1670_v1 = vld [vmem:[%s2412_s0 + $0x1b8] ss:$12 sps:$4 sm:$0xff]   ;;  %v1652_v4 = vld [vmem:[%s2412_s0 + $0x154] ss:$12 sps:$4 sm:$0xff]   ;;  %v1674_v5 = vld [vmem:[%s2412_s0 + $0x1d0] ss:$12 sps:$4 sm:$0xff]  }
  0x17   :  { %722 = vmatprep.subr.bf16.mxu1 %v1695_v0  ;;  %v1651_v3 = vld [vmem:[%s2412_s0 + $0x138] ss:$12 sps:$4 sm:$0xff]   ;;  %v1655_v6 = vld [vmem:[%s2412_s0 + $0x150] ss:$12 sps:$4 sm:$0xff]   ;;  %v1659_v9 = vld [vmem:[%s2412_s0 + $0x168] ss:$12 sps:$4 sm:$0xff]  }
  0x18   :  { %v1656_v7 = vld [vmem:[%s2412_s0 + $0x16c] ss:$12 sps:$4 sm:$0xff]   ;;  %v1660_v10 = vld [vmem:[%s2412_s0 + $0x184] ss:$12 sps:$4 sm:$0xff]  }
  0x19   :  { %v1682_v11 = vld [vmem:[%s2412_s0 + $0x200] ss:$12 sps:$4 sm:$0xff]   ;;  %v1686_v14 = vld [vmem:[%s2412_s0 + $0x218] ss:$12 sps:$4 sm:$0xff]  }
  0x1a   :  { %723 = vmatpush1.bf16.msra.mxu1 %v1584_v12  ;;  %v1663_v12 = vld [vmem:[%s2412_s0 + $0x180] ss:$12 sps:$4 sm:$0xff]  }
  0x1b   :  { %724 = vmatprep.subr.bf16.mxu1 %v1695_v0  ;;  %1386 = vmatmul.mubr.msk.bf16.gmra.mrb[8].mxu0 %vm634_vm1, %v1606_v17  ;;  %v1690_v17 = vld [vmem:[%s2412_s0 + $0x230] ss:$12 sps:$4 sm:$0xff]  }
  0x1c   :  { %1389 = vmatprep.mubr.msk.bf16.mxu0 %vm1697_vm0, %v1696_v2 }
  0x1e   :  { %725 = vmatpush1.bf16.msra.mxu1 %v1585_v13  ;;  %v1664_v13 = vld [vmem:[%s2412_s0 + $0x19c] ss:$12 sps:$4 sm:$0xff]  }
  0x1f   :  { %726 = vmatprep.subr.bf16.mxu1 %v1695_v0 }
  0x22   :  { %727 = vmatpush1.bf16.msra.mxu1 %v1586_v15  ;;  %v1667_v15 = vld [vmem:[%s2412_s0 + $0x198] ss:$12 sps:$4 sm:$0xff]  }
  0x23   :  { %728 = vmatprep.subr.bf16.mxu1 %v1695_v0  ;;  %1390 = vmatmul.mubr.msk.bf16.gmra.mrb[12].mxu0 %vm634_vm1, %v1610_v20  ;;  %v1693_v20 = vld [vmem:[%s2412_s0 + $0x248] ss:$0 sps:$4 sm:$0xff]  }
  0x24   :  { %1393 = vmatprep.mubr.msk.bf16.mxu0 %vm1697_vm0, %v1696_v2 }
  0x26   :  { %729 = vmatpush1.bf16.msra.mxu1 %v1587_v16  ;;  %v1668_v16 = vld [vmem:[%s2412_s0 + $0x1b4] ss:$12 sps:$4 sm:$0xff]  }
  0x27   :  { %730 = vmatprep.subr.bf16.mxu1 %v1695_v0 }
  0x2a   :  { %731 = vmatpush1.bf16.msra.mxu1 %v1588_v18  ;;  %v1671_v18 = vld [vmem:[%s2412_s0 + $0x1b0] ss:$12 sps:$4 sm:$0xff]  }
  0x2b   :  { %732 = vmatprep.subr.bf16.mxu1 %v1695_v0  ;;  %1394 = vmatmul.mubr.msk.bf16.gmra.mrb[16].mxu0 %vm634_vm1, %v1614_v23  ;;  %v1680_v23 = vld [vmem:[%s2412_s0 + $0x1fc] ss:$12 sps:$4 sm:$0xff]  }
  0x2c   :  { %1397 = vmatprep.mubr.msk.bf16.mxu0 %vm1697_vm0, %v1696_v2 }
  0x2e   :  { %733 = vmatpush1.bf16.msra.mxu1 %v1589_v19  ;;  %v1672_v19 = vld [vmem:[%s2412_s0 + $0x1cc] ss:$12 sps:$4 sm:$0xff]  }
  0x2f   :  { %734 = vmatprep.subr.bf16.mxu1 %v1695_v0 }
  0x32   :  { %735 = vmatpush1.bf16.msra.mxu1 %v1590_v21  ;;  %v1675_v21 = vld [vmem:[%s2412_s0 + $0x1c8] ss:$12 sps:$4 sm:$0xff]  }
  0x33   :  { %736 = vmatprep.subr.bf16.mxu1 %v1695_v0  ;;  %1398 = vmatmul.mubr.msk.bf16.gmra.mrb[20].mxu0 %vm634_vm1, %v1618_v26 }
  0x34   :  { %1401 = vmatprep.mubr.msk.bf16.mxu0 %vm1697_vm0, %v1696_v2 }
  0x36   :  { %737 = vmatpush1.bf16.msra.mxu1 %v1591_v22  ;;  %v1676_v22 = vld [vmem:[%s2412_s0 + $0x1e4] ss:$12 sps:$4 sm:$0xff]  }
  0x37   :  { %738 = vmatprep.subr.bf16.mxu1 %v1695_v0 }
  0x3a   :  { %739 = vmatpush1.bf16.msra.mxu1 %v1593_v24  ;;  %v1683_v24 = vld [vmem:[%s2412_s0 + $0x1f8] ss:$12 sps:$4 sm:$0xff]  }
  0x3b   :  { %740 = vmatprep.subr.bf16.mxu1 %v1695_v0  ;;  %1402 = vmatmul.mubr.msk.bf16.gmra.mrb[24].mxu0 %vm634_vm1, %v1622_v29  ;;  %v1648_v0 = vld [vmem:[%s2412_s0 + $0x13c] ss:$12 sps:$4 sm:$0xff]  }
  0x3c   :  { %1405 = vmatprep.mubr.msk.bf16.mxu0 %vm1697_vm0, %v1696_v2  ;;  %v1687_v29 = vld [vmem:[%s2412_s0 + $0x210] ss:$12 sps:$4 sm:$0xff]  }
  0x3e   :  { %741 = vmatpush1.bf16.msra.mxu1 %v1595_v25  ;;  %v1684_v25 = vld [vmem:[%s2412_s0 + $0x214] ss:$12 sps:$4 sm:$0xff]  }
  0x41   :  { %743 = vmatmul.mubr.bf16.vlgmr.msra.gmra.mrb[0].mxu1 %v1596_v27 }
  0x42   :  { %750 = vmatprep.mubr.bf16.mxu1 %v1600_v28 }
  0x43   :  { %1406 = vmatmul.mubr.msk.bf16.gmra.mrb[28].mxu0 %vm634_vm1, %v1626_v32 }
  0x44   :  { %1409 = vmatprep.mubr.msk.bf16.mxu0 %vm1697_vm0, %v1696_v2 }
  0x49   :  { %751 = vmatmul.mubr.bf16.gmra.mrb[4].mxu1 %v1603_v30 }
  0x4a   :  { %758 = vmatprep.mubr.bf16.mxu1 %v1604_v31  ;;  %v1688_v31 = vld [vmem:[%s2412_s0 + $0x22c] ss:$12 sps:$4 sm:$0xff]  }
  0x4b   :  { %1410 = vmatmul.mubr.msk.bf16.gmra.mrb[32].mxu0 %vm634_vm1, %v1630_v35 }
  0x4c   :  { %1413 = vmatprep.mubr.msk.bf16.mxu0 %vm1697_vm0, %v1696_v2 }
  0x51   :  { %759 = vmatmul.mubr.bf16.gmra.mrb[8].mxu1 %v1607_v33  ;;  %v111_v33 = vld [vmem:[%s2412_s0 + $0x240] sm:$0xff] }
  0x52   :  { %766 = vmatprep.mubr.bf16.mxu1 %v1608_v34 }
  0x53   :  { %1414 = vmatmul.mubr.msk.bf16.gmra.mrb[36].mxu0 %vm634_vm1, %v1634_v38  ;;  %v1301_v38 = vcombine.high %v111_v33, %v111_v33 }
  0x54   :  { %1417 = vmatprep.mubr.msk.bf16.mxu0 %vm1697_vm0, %v1696_v2 }
  0x59   :  { %767 = vmatmul.mubr.bf16.gmra.mrb[12].mxu1 %v1611_v36  ;;  %v1691_v36 = vld [vmem:[%s2412_s0 + $0x228] ss:$12 sps:$4 sm:$0xff]  }
  0x5a   :  { %774 = vmatprep.mubr.bf16.mxu1 %v1612_v37 }
  0x5b   :  { %1418 = vmatmul.mubr.msk.bf16.gmra.mrb[40].mxu0 %vm634_vm1, %v1638_v41 }
  0x5c   :  { %1421 = vmatprep.mubr.msk.bf16.mxu0 %vm1697_vm0, %v1696_v2 }
  0x61   :  { %775 = vmatmul.mubr.bf16.gmra.mrb[16].mxu1 %v1615_v39 }
  0x62   :  { %782 = vmatprep.mubr.bf16.mxu1 %v1616_v40 }
  0x63   :  { %1422 = vmatmul.mubr.msk.bf16.gmra.mrb[44].mxu0 %vm634_vm1, %v1642_v44 }
  0x64   :  { %1425 = vmatprep.mubr.msk.bf16.mxu0 %vm1697_vm0, %v1696_v2 }
  0x69   :  { %783 = vmatmul.mubr.bf16.gmra.mrb[20].mxu1 %v1619_v42  ;;  %v1300_v42 = vcombine.low %v111_v33, %v111_v33 }
  0x6a   :  { %790 = vmatprep.mubr.bf16.mxu1 %v1620_v43 }
  0x6b   :  { %1426 = vmatmul.mubr.msk.bf16.gmra.mrb[48].mxu0 %vm634_vm1, %v1646_v47 }
  0x6c   :  { %1429 = vmatprep.mubr.msk.bf16.mxu0 %vm1697_vm0, %v1696_v2 }
  0x71   :  { %791 = vmatmul.mubr.bf16.gmra.mrb[24].mxu1 %v1623_v45 }
  0x72   :  { %798 = vmatprep.mubr.bf16.mxu1 %v1624_v46 }
  0x73   :  { %1430 = vmatmul.mubr.msk.bf16.gmra.mrb[52].mxu0 %vm634_vm1, %v1650_v50 }
  0x74   :  { %1433 = vmatprep.mubr.msk.bf16.mxu0 %vm1697_vm0, %v1696_v2 }
  0x79   :  { %799 = vmatmul.mubr.bf16.gmra.mrb[28].mxu1 %v1627_v48 }
  0x7a   :  { %806 = vmatprep.mubr.bf16.mxu1 %v1628_v49 }
  0x7b   :  { %1434 = vmatmul.mubr.msk.bf16.gmra.mrb[56].mxu0 %vm634_vm1, %v1654_v53 }
  0x7c   :  { %1437 = vmatprep.mubr.msk.bf16.mxu0 %vm1697_vm0, %v1696_v2 }
  0x81   :  { %807 = vmatmul.mubr.bf16.gmra.mrb[32].mxu1 %v1631_v51 }
  0x82   :  { %814 = vmatprep.mubr.bf16.mxu1 %v1632_v52  ;;  %v2096_v52 = vld [vmem:[%s2413_s2] ss:$0 sm:$0xff] }
  0x83   :  { %1438 = vmatmul.mubr.msk.bf16.gmra.mrb[60].mxu0 %vm634_vm1, %v1658_v56 }
  0x84   :  { %1441 = vmatprep.mubr.msk.bf16.mxu0 %vm1697_vm0, %v1696_v2 }
  0x89   :  { %815 = vmatmul.mubr.bf16.gmra.mrb[36].mxu1 %v1635_v54 }
  0x8a   :  { %822 = vmatprep.mubr.bf16.mxu1 %v1636_v55 }
  0x8b   :  { %1442 = vmatmul.mubr.msk.bf16.gmra.mrb[64].mxu0 %vm634_vm1, %v1662_v59 }
  0x8c   :  { %1445 = vmatprep.mubr.msk.bf16.mxu0 %vm1697_vm0, %v1696_v2 }
  0x91   :  { %823 = vmatmul.mubr.bf16.gmra.mrb[40].mxu1 %v1639_v57 }
  0x92   :  { %830 = vmatprep.mubr.bf16.mxu1 %v1640_v58 }
  0x93   :  { %1446 = vmatmul.mubr.msk.bf16.gmra.mrb[68].mxu0 %vm634_vm1, %v1666_v62 }
  0x94   :  { %1449 = vmatprep.mubr.msk.bf16.mxu0 %vm1697_vm0, %v1696_v2 }
  0x99   :  { %831 = vmatmul.mubr.bf16.gmra.mrb[44].mxu1 %v1643_v60 }
  0x9a   :  { %838 = vmatprep.mubr.bf16.mxu1 %v1644_v61 }
  0x9b   :  { %1450 = vmatmul.mubr.msk.bf16.gmra.mrb[72].mxu0 %vm634_vm1, %v1670_v1 }
  0x9c   :  { %1453 = vmatprep.mubr.msk.bf16.mxu0 %vm1697_vm0, %v1696_v2 }
  0xa1   :  { %839 = vmatmul.mubr.bf16.gmra.mrb[48].mxu1 %v1647_v63 }
  0xa2   :  { %846 = vmatprep.mubr.bf16.mxu1 %v1648_v0 }
  0xa3   :  { %1454 = vmatmul.mubr.msk.bf16.gmra.mrb[76].mxu0 %vm634_vm1, %v1674_v5 }
  0xa4   :  { %1457 = vmatprep.mubr.msk.bf16.mxu0 %vm1697_vm0, %v1696_v2 }
  0xa9   :  { %847 = vmatmul.mubr.bf16.gmra.mrb[52].mxu1 %v1651_v3 }
  0xaa   :  { %854 = vmatprep.mubr.bf16.mxu1 %v1652_v4 }
  0xab   :  { %1458 = vmatmul.mubr.msk.bf16.gmra.mrb[80].mxu0 %vm634_vm1, %v1678_v8 }
  0xac   :  { %1461 = vmatprep.mubr.msk.bf16.mxu0 %vm1697_vm0, %v1696_v2 }
  0xb1   :  { %855 = vmatmul.mubr.bf16.gmra.mrb[56].mxu1 %v1655_v6 }
  0xb2   :  { %862 = vmatprep.mubr.bf16.mxu1 %v1656_v7 }
  0xb3   :  { %1462 = vmatmul.mubr.msk.bf16.gmra.mrb[84].mxu0 %vm634_vm1, %v1682_v11 }
  0xb4   :  { %1465 = vmatprep.mubr.msk.bf16.mxu0 %vm1697_vm0, %v1696_v2 }
  0xb9   :  { %863 = vmatmul.mubr.bf16.gmra.mrb[60].mxu1 %v1659_v9 }
  0xba   :  { %870 = vmatprep.mubr.bf16.mxu1 %v1660_v10 }
  0xbb   :  { %1466 = vmatmul.mubr.msk.bf16.gmra.mrb[88].mxu0 %vm634_vm1, %v1686_v14 }
  0xbc   :  { %1469 = vmatprep.mubr.msk.bf16.mxu0 %vm1697_vm0, %v1696_v2 }
  0xc1   :  { %871 = vmatmul.mubr.bf16.gmra.mrb[64].mxu1 %v1663_v12 }
  0xc2   :  { %878 = vmatprep.mubr.bf16.mxu1 %v1664_v13 }
  0xc3   :  { %1470 = vmatmul.mubr.msk.bf16.gmra.mrb[92].mxu0 %vm634_vm1, %v1690_v17 }
  0xc4   :  { %1473 = vmatprep.mubr.msk.bf16.mxu0 %vm1697_vm0, %v1696_v2  ;;  %v1679_v2 = vld [vmem:[%s2412_s0 + $0x1e0] ss:$12 sps:$4 sm:$0xff]  }
  0xc9   :  { %879 = vmatmul.mubr.bf16.gmra.mrb[68].mxu1 %v1667_v15 }
  0xca   :  { %886 = vmatprep.mubr.bf16.mxu1 %v1668_v16 }
  0xcb   :  { %1474 = vmatmul.mubr.msk.bf16.gmra.mrb[96].mxu0 %vm634_vm1, %v1693_v20 }
  0xd1   :  { %887 = vmatmul.mubr.bf16.gmra.mrb[72].mxu1 %v1671_v18 }
  0xd2   :  { %894 = vmatprep.mubr.bf16.mxu1 %v1672_v19 }
  0xd9   :  { %895 = vmatmul.mubr.bf16.gmra.mrb[76].mxu1 %v1675_v21 }
  0xda   :  { %902 = vmatprep.mubr.bf16.mxu1 %v1676_v22 }
  0xde   :  { %v976_v26 = vpop.f32.mrb[0].mxu0 }
  0xdf   :  { %v1379_v27 = vpop.f32.mrb[1].mxu0 }
  0xe0   :  { %v979_v28 = vpop.f32.mrb[2].mxu0 }
  0xe1   :  { %903 = vmatmul.mubr.bf16.gmra.mrb[80].mxu1 %v1679_v2  ;;  %v1380_v30 = vpop.f32.mrb[3].mxu0 }
  0xe2   :  { %910 = vmatprep.mubr.bf16.mxu1 %v1680_v23 }
  0xe6   :  { %v984_v32 = vpop.f32.mrb[4].mxu0 }
  0xe7   :  { %v1383_v34 = vpop.f32.mrb[5].mxu0 }
  0xe8   :  { %v987_v35 = vpop.f32.mrb[6].mxu0 }
  0xe9   :  { %911 = vmatmul.mubr.bf16.gmra.mrb[84].mxu1 %v1683_v24  ;;  %v1384_v37 = vpop.f32.mrb[7].mxu0 }
  0xea   :  { %918 = vmatprep.mubr.bf16.mxu1 %v1684_v25 }
  0xee   :  { %v992_v39 = vpop.f32.mrb[8].mxu0 }
  0xef   :  { %v1387_v40 = vpop.f32.mrb[9].mxu0 }
  0xf0   :  { %v995_v41 = vpop.f32.mrb[10].mxu0 }
  0xf1   :  { %919 = vmatmul.mubr.bf16.gmra.mrb[88].mxu1 %v1687_v29  ;;  %v1388_v43 = vpop.f32.mrb[11].mxu0 }
  0xf2   :  { %926 = vmatprep.mubr.bf16.mxu1 %v1688_v31 }
  0xf6   :  { %v1000_v44 = vpop.f32.mrb[12].mxu0 }
  0xf7   :  { %v1391_v45 = vpop.f32.mrb[13].mxu0 }
  0xf8   :  { %v2087_v46 = vpop.f32.mrb[14].mxu0 }
  0xf9   :  { %927 = vmatmul.mubr.bf16.gmra.mrb[92].mxu1 %v1691_v36  ;;  %v1392_v47 = vpop.f32.mrb[15].mxu0 }
  0xfa   :  { %934 = vmatprep.mubr.bf16.mxu1 %v1301_v38 }
  0xfe   :  { %v2089_v48 = vpop.f32.mrb[16].mxu0 }
  0xff   :  { %v1395_v49 = vpop.f32.mrb[17].mxu0 }
 0x100   :  { %v2091_v50 = vpop.f32.mrb[18].mxu0 }
 0x101   :  { %935 = vmatmul.mubr.bf16.gmra.mrb[96].mxu1 %v1300_v42  ;;  %v1396_v51 = vpop.f32.mrb[19].mxu0 }
 0x106   :  { %v2098_v53 = vpop.f32.mrb[20].mxu0 }
 0x107   :  { %v1399_v54 = vpop.f32.mrb[21].mxu0 }
 0x108   :  { %v2100_v56 = vpop.f32.mrb[22].mxu0 }
 0x109   :  { %v1400_v59 = vpop.f32.mrb[23].mxu0 }
 0x10e   :  { %v2107_v1 = vpop.f32.mrb[24].mxu0 }
 0x10f   :  { %v1403_v3 = vpop.f32.mrb[25].mxu0 }
 0x110   :  { %v2112_v5 = vpop.f32.mrb[26].mxu0 }
 0x111   :  { %v1404_v8 = vpop.f32.mrb[27].mxu0 }
 0x114   :  { %v744_v55 = vpop.f32.mrb[0].mxu1 }
 0x115   :  { %v745_v57 = vadd.f32 %v2096_v52, %v744_v55  ;;  %v746_v58 = vpop.f32.mrb[1].mxu1 }
 0x116   :  { %v747_v60 = vpop.f32.mrb[2].mxu1  ;;  %v2119_v14 = vpop.f32.mrb[28].mxu0 }
 0x117   :  { %v977_v61 = vadd.f32 %v976_v26, %v745_v57  ;;  %v748_v62 = vadd.f32 %v2096_v52, %v747_v60  ;;  %v749_v63 = vpop.f32.mrb[3].mxu1  ;;  %v1407_v15 = vpop.f32.mrb[29].mxu0 }
 0x118   :  { %v2124_v17 = vpop.f32.mrb[30].mxu0 }
 0x119   :  { %1174 = vst [vmem:[%s2414_s3] sm:$0xff] %v977_v61  ;;  %v980_v0 = vadd.f32 %v979_v28, %v748_v62  ;;  %v1408_v20 = vpop.f32.mrb[31].mxu0 }
 0x11b   :  { %1175 = vst [vmem:[%s2414_s3 + $0x8] sm:$0xff] %v980_v0 }
 0x11c   :  { %v752_v4 = vpop.f32.mrb[4].mxu1 }
 0x11d   :  { %v753_v6 = vadd.f32 %v2096_v52, %v752_v4  ;;  %v754_v7 = vpop.f32.mrb[5].mxu1 }
 0x11e   :  { %v755_v9 = vpop.f32.mrb[6].mxu1  ;;  %v2131_v25 = vpop.f32.mrb[32].mxu0 }
 0x11f   :  { %v985_v10 = vadd.f32 %v984_v32, %v753_v6  ;;  %v756_v11 = vadd.f32 %v2096_v52, %v755_v9  ;;  %v757_v12 = vpop.f32.mrb[7].mxu1  ;;  %v1411_v26 = vpop.f32.mrb[33].mxu0 }
 0x120   :  { %v2136_v28 = vpop.f32.mrb[34].mxu0 }
 0x121   :  { %1176 = vst [vmem:[%s2414_s3 + $0x10] sm:$0xff] %v985_v10  ;;  %v988_v13 = vadd.f32 %v987_v35, %v756_v11  ;;  %v1412_v31 = vpop.f32.mrb[35].mxu0 }
 0x123   :  { %1177 = vst [vmem:[%s2414_s3 + $0x18] sm:$0xff] %v988_v13 }
 0x124   :  { %v760_v16 = vpop.f32.mrb[8].mxu1 }
 0x125   :  { %v761_v18 = vadd.f32 %v2096_v52, %v760_v16  ;;  %v762_v19 = vpop.f32.mrb[9].mxu1 }
 0x126   :  { %v763_v21 = vpop.f32.mrb[10].mxu1  ;;  %v2144_v37 = vpop.f32.mrb[36].mxu0 }
 0x127   :  { %v993_v22 = vadd.f32 %v992_v39, %v761_v18  ;;  %v764_v2 = vadd.f32 %v2096_v52, %v763_v21  ;;  %v765_v23 = vpop.f32.mrb[11].mxu1  ;;  %v1415_v38 = vpop.f32.mrb[37].mxu0 }
 0x128   :  { %v2149_v40 = vpop.f32.mrb[38].mxu0 }
 0x129   :  { %1178 = vst [vmem:[%s2414_s3 + $0x20] sm:$0xff] %v993_v22  ;;  %v996_v24 = vadd.f32 %v995_v41, %v764_v2  ;;  %v1416_v43 = vpop.f32.mrb[39].mxu0 }
 0x12b   :  { %1179 = vst [vmem:[%s2414_s3 + $0x28] sm:$0xff] %v996_v24 }
 0x12c   :  { %v768_v27 = vpop.f32.mrb[12].mxu1 }
 0x12d   :  { %v769_v29 = vadd.f32 %v2096_v52, %v768_v27  ;;  %v770_v30 = vpop.f32.mrb[13].mxu1 }
 0x12e   :  { %v771_v32 = vpop.f32.mrb[14].mxu1  ;;  %v2158_v51 = vpop.f32.mrb[40].mxu0 }
 0x12f   :  { %v1001_v33 = vadd.f32 %v1000_v44, %v769_v29  ;;  %v772_v34 = vadd.f32 %v2096_v52, %v771_v32  ;;  %v773_v35 = vpop.f32.mrb[15].mxu1  ;;  %v1419_v54 = vpop.f32.mrb[41].mxu0 }
 0x130   :  { %v2163_v57 = vpop.f32.mrb[42].mxu0 }
 0x131   :  { %1180 = vst [vmem:[%s2414_s3 + $0x30] sm:$0xff] %v1001_v33  ;;  %v1004_v36 = vadd.f32 %v2087_v46, %v772_v34  ;;  %v1420_v59 = vpop.f32.mrb[43].mxu0 }
 0x133   :  { %1181 = vst [vmem:[%s2414_s3 + $0x38] sm:$0xff] %v1004_v36 }
 0x134   :  { %v776_v39 = vpop.f32.mrb[16].mxu1 }
 0x135   :  { %v777_v41 = vadd.f32 %v2096_v52, %v776_v39  ;;  %v778_v42 = vpop.f32.mrb[17].mxu1 }
 0x136   :  { %v779_v44 = vpop.f32.mrb[18].mxu1  ;;  %v2172_v0 = vpop.f32.mrb[44].mxu0 }
 0x137   :  { %v1009_v45 = vadd.f32 %v2089_v48, %v777_v41  ;;  %v780_v47 = vadd.f32 %v2096_v52, %v779_v44  ;;  %v781_v46 = vpop.f32.mrb[19].mxu1  ;;  %v1423_v3 = vpop.f32.mrb[45].mxu0 }
 0x138   :  { %v2177_v6 = vpop.f32.mrb[46].mxu0 }
 0x139   :  { %1182 = vst [vmem:[%s2414_s3 + $0x40] sm:$0xff] %v1009_v45  ;;  %v1012_v49 = vadd.f32 %v2091_v50, %v780_v47  ;;  %v1424_v8 = vpop.f32.mrb[47].mxu0 }
 0x13b   :  { %1183 = vst [vmem:[%s2414_s3 + $0x48] sm:$0xff] %v1012_v49 }
 0x13c   :  { %v784_v55 = vpop.f32.mrb[20].mxu1 }
 0x13d   :  { %v785_v48 = vadd.f32 %v2096_v52, %v784_v55  ;;  %v786_v58 = vpop.f32.mrb[21].mxu1 }
 0x13e   :  { %v787_v60 = vpop.f32.mrb[22].mxu1  ;;  %v2186_v13 = vpop.f32.mrb[48].mxu0 }
 0x13f   :  { %v1017_v61 = vadd.f32 %v2098_v53, %v785_v48  ;;  %v788_v62 = vadd.f32 %v2096_v52, %v787_v60  ;;  %v789_v50 = vpop.f32.mrb[23].mxu1  ;;  %v1427_v15 = vpop.f32.mrb[49].mxu0 }
 0x140   :  { %v2191_v18 = vpop.f32.mrb[50].mxu0 }
 0x141   :  { %1184 = vst [vmem:[%s2414_s3 + $0x50] sm:$0xff] %v1017_v61  ;;  %v1020_v63 = vadd.f32 %v2100_v56, %v788_v62  ;;  %v1428_v20 = vpop.f32.mrb[51].mxu0 }
 0x143   :  { %1185 = vst [vmem:[%s2414_s3 + $0x58] sm:$0xff] %v1020_v63 }
 0x144   :  { %v792_v4 = vpop.f32.mrb[24].mxu1 }
 0x145   :  { %v793_v53 = vadd.f32 %v2096_v52, %v792_v4  ;;  %v794_v7 = vpop.f32.mrb[25].mxu1 }
 0x146   :  { %v795_v9 = vpop.f32.mrb[26].mxu1  ;;  %v2200_v24 = vpop.f32.mrb[52].mxu0 }
 0x147   :  { %v1025_v10 = vadd.f32 %v2107_v1, %v793_v53  ;;  %v796_v11 = vadd.f32 %v2096_v52, %v795_v9  ;;  %v797_v56 = vpop.f32.mrb[27].mxu1  ;;  %v1431_v26 = vpop.f32.mrb[53].mxu0 }
 0x148   :  { %v2205_v29 = vpop.f32.mrb[54].mxu0 }
 0x149   :  { %1186 = vst [vmem:[%s2414_s3 + $0x60] sm:$0xff] %v1025_v10  ;;  %v1028_v12 = vadd.f32 %v2112_v5, %v796_v11  ;;  %v1432_v31 = vpop.f32.mrb[55].mxu0 }
 0x14b   :  { %1187 = vst [vmem:[%s2414_s3 + $0x68] sm:$0xff] %v1028_v12 }
 0x14c   :  { %v800_v16 = vpop.f32.mrb[28].mxu1 }
 0x14d   :  { %v801_v1 = vadd.f32 %v2096_v52, %v800_v16  ;;  %v802_v19 = vpop.f32.mrb[29].mxu1 }
 0x14e   :  { %v803_v21 = vpop.f32.mrb[30].mxu1  ;;  %v2214_v36 = vpop.f32.mrb[56].mxu0 }
 0x14f   :  { %v1033_v22 = vadd.f32 %v2119_v14, %v801_v1  ;;  %v804_v2 = vadd.f32 %v2096_v52, %v803_v21  ;;  %v805_v5 = vpop.f32.mrb[31].mxu1  ;;  %v1435_v38 = vpop.f32.mrb[57].mxu0 }
 0x150   :  { %v2219_v41 = vpop.f32.mrb[58].mxu0 }
 0x151   :  { %1188 = vst [vmem:[%s2414_s3 + $0x70] sm:$0xff] %v1033_v22  ;;  %v1036_v23 = vadd.f32 %v2124_v17, %v804_v2  ;;  %v1436_v43 = vpop.f32.mrb[59].mxu0 }
 0x153   :  { %1189 = vst [vmem:[%s2414_s3 + $0x78] sm:$0xff] %v1036_v23 }
 0x154   :  { %v808_v27 = vpop.f32.mrb[32].mxu1 }
 0x155   :  { %v809_v14 = vadd.f32 %v2096_v52, %v808_v27  ;;  %v810_v30 = vpop.f32.mrb[33].mxu1 }
 0x156   :  { %v811_v32 = vpop.f32.mrb[34].mxu1  ;;  %v2228_v49 = vpop.f32.mrb[60].mxu0 }
 0x157   :  { %v1041_v33 = vadd.f32 %v2131_v25, %v809_v14  ;;  %v812_v34 = vadd.f32 %v2096_v52, %v811_v32  ;;  %v813_v17 = vpop.f32.mrb[35].mxu1  ;;  %v1439_v54 = vpop.f32.mrb[61].mxu0 }
 0x158   :  { %v2233_v48 = vpop.f32.mrb[62].mxu0 }
 0x159   :  { %1190 = vst [vmem:[%s2414_s3 + $0x80] sm:$0xff] %v1041_v33  ;;  %v1044_v35 = vadd.f32 %v2136_v28, %v812_v34  ;;  %v1440_v59 = vpop.f32.mrb[63].mxu0 }
 0x15b   :  { %1191 = vst [vmem:[%s2414_s3 + $0x88] sm:$0xff] %v1044_v35 }
 0x15c   :  { %v816_v39 = vpop.f32.mrb[36].mxu1 }
 0x15d   :  { %v817_v25 = vadd.f32 %v2096_v52, %v816_v39  ;;  %v818_v42 = vpop.f32.mrb[37].mxu1 }
 0x15e   :  { %v819_v44 = vpop.f32.mrb[38].mxu1  ;;  %v2242_v63 = vpop.f32.mrb[64].mxu0 }
 0x15f   :  { %v1049_v45 = vadd.f32 %v2144_v37, %v817_v25  ;;  %v820_v47 = vadd.f32 %v2096_v52, %v819_v44  ;;  %v821_v28 = vpop.f32.mrb[39].mxu1  ;;  %v1443_v3 = vpop.f32.mrb[65].mxu0 }
 0x160   :  { %v2247_v53 = vpop.f32.mrb[66].mxu0 }
 0x161   :  { %1192 = vst [vmem:[%s2414_s3 + $0x90] sm:$0xff] %v1049_v45  ;;  %v1052_v46 = vadd.f32 %v2149_v40, %v820_v47  ;;  %v1444_v8 = vpop.f32.mrb[67].mxu0 }
 0x163   :  { %1193 = vst [vmem:[%s2414_s3 + $0x98] sm:$0xff] %v1052_v46 }
 0x164   :  { %v824_v55 = vpop.f32.mrb[40].mxu1 }
 0x165   :  { %v825_v37 = vadd.f32 %v2096_v52, %v824_v55  ;;  %v826_v58 = vpop.f32.mrb[41].mxu1 }
 0x166   :  { %v827_v60 = vpop.f32.mrb[42].mxu1  ;;  %v2256_v12 = vpop.f32.mrb[68].mxu0 }
 0x167   :  { %v1057_v61 = vadd.f32 %v2158_v51, %v825_v37  ;;  %v828_v62 = vadd.f32 %v2096_v52, %v827_v60  ;;  %v829_v40 = vpop.f32.mrb[43].mxu1  ;;  %v1447_v15 = vpop.f32.mrb[69].mxu0 }
 0x168   :  { %v2261_v1 = vpop.f32.mrb[70].mxu0 }
 0x169   :  { %1194 = vst [vmem:[%s2414_s3 + $0xa0] sm:$0xff] %v1057_v61  ;;  %v1060_v50 = vadd.f32 %v2163_v57, %v828_v62  ;;  %v1448_v20 = vpop.f32.mrb[71].mxu0 }
 0x16b   :  { %1195 = vst [vmem:[%s2414_s3 + $0xa8] sm:$0xff] %v1060_v50 }
 0x16c   :  { %v832_v4 = vpop.f32.mrb[44].mxu1 }
 0x16d   :  { %v833_v51 = vadd.f32 %v2096_v52, %v832_v4  ;;  %v834_v7 = vpop.f32.mrb[45].mxu1 }
 0x16e   :  { %v835_v9 = vpop.f32.mrb[46].mxu1  ;;  %v2270_v23 = vpop.f32.mrb[72].mxu0 }
 0x16f   :  { %v1065_v10 = vadd.f32 %v2172_v0, %v833_v51  ;;  %v836_v11 = vadd.f32 %v2096_v52, %v835_v9  ;;  %v837_v57 = vpop.f32.mrb[47].mxu1  ;;  %v1451_v26 = vpop.f32.mrb[73].mxu0 }
 0x170   :  { %v2275_v14 = vpop.f32.mrb[74].mxu0 }
 0x171   :  { %1196 = vst [vmem:[%s2414_s3 + $0xb0] sm:$0xff] %v1065_v10  ;;  %v1068_v56 = vadd.f32 %v2177_v6, %v836_v11  ;;  %v1452_v31 = vpop.f32.mrb[75].mxu0 }
 0x173   :  { %1197 = vst [vmem:[%s2414_s3 + $0xb8] sm:$0xff] %v1068_v56 }
 0x174   :  { %v840_v16 = vpop.f32.mrb[48].mxu1 }
 0x175   :  { %v841_v0 = vadd.f32 %v2096_v52, %v840_v16  ;;  %v842_v19 = vpop.f32.mrb[49].mxu1 }
 0x176   :  { %v843_v21 = vpop.f32.mrb[50].mxu1  ;;  %v2284_v35 = vpop.f32.mrb[76].mxu0 }
 0x177   :  { %v1073_v22 = vadd.f32 %v2186_v13, %v841_v0  ;;  %v844_v2 = vadd.f32 %v2096_v52, %v843_v21  ;;  %v845_v6 = vpop.f32.mrb[51].mxu1  ;;  %v1455_v38 = vpop.f32.mrb[77].mxu0 }
 0x178   :  { %v2289_v25 = vpop.f32.mrb[78].mxu0 }
 0x179   :  { %1198 = vst [vmem:[%s2414_s3 + $0xc0] sm:$0xff] %v1073_v22  ;;  %v1076_v5 = vadd.f32 %v2191_v18, %v844_v2  ;;  %v1456_v43 = vpop.f32.mrb[79].mxu0 }
 0x17b   :  { %1199 = vst [vmem:[%s2414_s3 + $0xc8] sm:$0xff] %v1076_v5 }
 0x17c   :  { %v848_v27 = vpop.f32.mrb[52].mxu1 }
 0x17d   :  { %v849_v13 = vadd.f32 %v2096_v52, %v848_v27  ;;  %v850_v30 = vpop.f32.mrb[53].mxu1 }
 0x17e   :  { %v851_v32 = vpop.f32.mrb[54].mxu1  ;;  %v2298_v46 = vpop.f32.mrb[80].mxu0 }
 0x17f   :  { %v1081_v33 = vadd.f32 %v2200_v24, %v849_v13  ;;  %v852_v34 = vadd.f32 %v2096_v52, %v851_v32  ;;  %v853_v18 = vpop.f32.mrb[55].mxu1  ;;  %v1459_v54 = vpop.f32.mrb[81].mxu0 }
 0x180   :  { %v2303_v37 = vpop.f32.mrb[82].mxu0 }
 0x181   :  { %1200 = vst [vmem:[%s2414_s3 + $0xd0] sm:$0xff] %v1081_v33  ;;  %v1084_v17 = vadd.f32 %v2205_v29, %v852_v34  ;;  %v1460_v59 = vpop.f32.mrb[83].mxu0 }
 0x183   :  { %1201 = vst [vmem:[%s2414_s3 + $0xd8] sm:$0xff] %v1084_v17 }
 0x184   :  { %v856_v39 = vpop.f32.mrb[56].mxu1 }
 0x185   :  { %v857_v24 = vadd.f32 %v2096_v52, %v856_v39  ;;  %v858_v42 = vpop.f32.mrb[57].mxu1 }
 0x186   :  { %v859_v44 = vpop.f32.mrb[58].mxu1  ;;  %v2312_v50 = vpop.f32.mrb[84].mxu0 }
 0x187   :  { %v1089_v45 = vadd.f32 %v2214_v36, %v857_v24  ;;  %v860_v47 = vadd.f32 %v2096_v52, %v859_v44  ;;  %v861_v29 = vpop.f32.mrb[59].mxu1  ;;  %v1463_v3 = vpop.f32.mrb[85].mxu0 }
 0x188   :  { %v2317_v51 = vpop.f32.mrb[86].mxu0 }
 0x189   :  { %1202 = vst [vmem:[%s2414_s3 + $0xe0] sm:$0xff] %v1089_v45  ;;  %v1092_v28 = vadd.f32 %v2219_v41, %v860_v47  ;;  %v1464_v8 = vpop.f32.mrb[87].mxu0 }
 0x18b   :  { %1203 = vst [vmem:[%s2414_s3 + $0xe8] sm:$0xff] %v1092_v28 }
 0x18c   :  { %v864_v55 = vpop.f32.mrb[60].mxu1 }
 0x18d   :  { %v865_v36 = vadd.f32 %v2096_v52, %v864_v55  ;;  %v866_v58 = vpop.f32.mrb[61].mxu1 }
 0x18e   :  { %v867_v60 = vpop.f32.mrb[62].mxu1  ;;  %v2326_v56 = vpop.f32.mrb[88].mxu0 }
 0x18f   :  { %v1097_v61 = vadd.f32 %v2228_v49, %v865_v36  ;;  %v868_v62 = vadd.f32 %v2096_v52, %v867_v60  ;;  %v869_v41 = vpop.f32.mrb[63].mxu1  ;;  %v1467_v15 = vpop.f32.mrb[89].mxu0 }
 0x190   :  { %v2331_v0 = vpop.f32.mrb[90].mxu0 }
 0x191   :  { %1204 = vst [vmem:[%s2414_s3 + $0xf0] sm:$0xff] %v1097_v61  ;;  %v1100_v40 = vadd.f32 %v2233_v48, %v868_v62  ;;  %v1468_v20 = vpop.f32.mrb[91].mxu0 }
 0x193   :  { %1205 = vst [vmem:[%s2414_s3 + $0xf8] sm:$0xff] %v1100_v40 }
 0x194   :  { %v872_v4 = vpop.f32.mrb[64].mxu1 }
 0x195   :  { %v873_v49 = vadd.f32 %v2096_v52, %v872_v4  ;;  %v874_v7 = vpop.f32.mrb[65].mxu1 }
 0x196   :  { %v875_v9 = vpop.f32.mrb[66].mxu1  ;;  %v2340_v5 = vpop.f32.mrb[92].mxu0 }
 0x197   :  { %v1105_v10 = vadd.f32 %v2242_v63, %v873_v49  ;;  %v876_v11 = vadd.f32 %v2096_v52, %v875_v9  ;;  %v877_v48 = vpop.f32.mrb[67].mxu1  ;;  %v1471_v26 = vpop.f32.mrb[93].mxu0 }
 0x198   :  { %v2345_v13 = vpop.f32.mrb[94].mxu0 }
 0x199   :  { %1206 = vst [vmem:[%s2414_s3 + $0x100] sm:$0xff] %v1105_v10  ;;  %v1108_v57 = vadd.f32 %v2247_v53, %v876_v11  ;;  %v1472_v31 = vpop.f32.mrb[95].mxu0 }
 0x19b   :  { %1207 = vst [vmem:[%s2414_s3 + $0x108] sm:$0xff] %v1108_v57 }
 0x19c   :  { %v880_v16 = vpop.f32.mrb[68].mxu1 }
 0x19d   :  { %v881_v63 = vadd.f32 %v2096_v52, %v880_v16  ;;  %v882_v19 = vpop.f32.mrb[69].mxu1 }
 0x19e   :  { %v883_v21 = vpop.f32.mrb[70].mxu1  ;;  %v1168_v17 = vpop.f32.mrb[96].mxu0 }
 0x19f   :  { %v1113_v22 = vadd.f32 %v2256_v12, %v881_v63  ;;  %v884_v2 = vadd.f32 %v2096_v52, %v883_v21  ;;  %v885_v53 = vpop.f32.mrb[71].mxu1  ;;  %v1475_v38 = vpop.f32.mrb[97].mxu0 }
 0x1a0   :  { %v1171_v24 = vpop.f32.mrb[98].mxu0 }
 0x1a1   :  { %1208 = vst [vmem:[%s2414_s3 + $0x110] sm:$0xff] %v1113_v22  ;;  %v1116_v6 = vadd.f32 %v2261_v1, %v884_v2  ;;  %v1476_v43 = vpop.f32.mrb[99].mxu0 }
 0x1a3   :  { %1209 = vst [vmem:[%s2414_s3 + $0x118] sm:$0xff] %v1116_v6 }
 0x1a4   :  { %v888_v27 = vpop.f32.mrb[72].mxu1 }
 0x1a5   :  { %v889_v12 = vadd.f32 %v2096_v52, %v888_v27  ;;  %v890_v30 = vpop.f32.mrb[73].mxu1 }
 0x1a6   :  { %v891_v32 = vpop.f32.mrb[74].mxu1 }
 0x1a7   :  { %v1121_v33 = vadd.f32 %v2270_v23, %v889_v12  ;;  %v892_v34 = vadd.f32 %v2096_v52, %v891_v32  ;;  %v893_v1 = vpop.f32.mrb[75].mxu1 }
 0x1a9   :  { %1210 = vst [vmem:[%s2414_s3 + $0x120] sm:$0xff] %v1121_v33  ;;  %v1124_v18 = vadd.f32 %v2275_v14, %v892_v34 }
 0x1ab   :  { %1211 = vst [vmem:[%s2414_s3 + $0x128] sm:$0xff] %v1124_v18 }
 0x1ac   :  { %v896_v39 = vpop.f32.mrb[76].mxu1 }
 0x1ad   :  { %v897_v42 = vadd.f32 %v2096_v52, %v896_v39  ;;  %v898_v23 = vpop.f32.mrb[77].mxu1 }
 0x1ae   :  { %v899_v44 = vpop.f32.mrb[78].mxu1 }
 0x1af   :  { %v1129_v45 = vadd.f32 %v2284_v35, %v897_v42  ;;  %v900_v47 = vadd.f32 %v2096_v52, %v899_v44  ;;  %v901_v29 = vpop.f32.mrb[79].mxu1 }
 0x1b1   :  { %1212 = vst [vmem:[%s2414_s3 + $0x130] sm:$0xff] %v1129_v45  ;;  %v1132_v14 = vadd.f32 %v2289_v25, %v900_v47 }
 0x1b3   :  { %1213 = vst [vmem:[%s2414_s3 + $0x138] sm:$0xff] %v1132_v14 }
 0x1b4   :  { %v904_v28 = vpop.f32.mrb[80].mxu1 }
 0x1b5   :  { %v905_v54 = vadd.f32 %v2096_v52, %v904_v28  ;;  %v906_v55 = vpop.f32.mrb[81].mxu1 }
 0x1b6   :  { %v907_v36 = vpop.f32.mrb[82].mxu1 }
 0x1b7   :  { %v1137_v35 = vadd.f32 %v2298_v46, %v905_v54  ;;  %v908_v58 = vadd.f32 %v2096_v52, %v907_v36  ;;  %v909_v59 = vpop.f32.mrb[83].mxu1 }
 0x1b9   :  { %1214 = vst [vmem:[%s2414_s3 + $0x140] sm:$0xff] %v1137_v35  ;;  %v1140_v25 = vadd.f32 %v2303_v37, %v908_v58 }
 0x1bb   :  { %1215 = vst [vmem:[%s2414_s3 + $0x148] sm:$0xff] %v1140_v25 }
 0x1bc   :  { %v912_v60 = vpop.f32.mrb[84].mxu1 }
 0x1bd   :  { %v913_v61 = vadd.f32 %v2096_v52, %v912_v60  ;;  %v914_v62 = vpop.f32.mrb[85].mxu1 }
 0x1be   :  { %v915_v41 = vpop.f32.mrb[86].mxu1 }
 0x1bf   :  { %v1145_v46 = vadd.f32 %v2312_v50, %v913_v61  ;;  %v916_v40 = vadd.f32 %v2096_v52, %v915_v41  ;;  %v917_v3 = vpop.f32.mrb[87].mxu1 }
 0x1c1   :  { %1216 = vst [vmem:[%s2414_s3 + $0x150] sm:$0xff] %v1145_v46  ;;  %v1148_v37 = vadd.f32 %v2317_v51, %v916_v40 }
 0x1c3   :  { %1217 = vst [vmem:[%s2414_s3 + $0x158] sm:$0xff] %v1148_v37 }
 0x1c4   :  { %v920_v4 = vpop.f32.mrb[88].mxu1 }
 0x1c5   :  { %v921_v49 = vadd.f32 %v2096_v52, %v920_v4  ;;  %v922_v7 = vpop.f32.mrb[89].mxu1 }
 0x1c6   :  { %v923_v8 = vpop.f32.mrb[90].mxu1 }
 0x1c7   :  { %v1153_v50 = vadd.f32 %v2326_v56, %v921_v49  ;;  %v924_v9 = vadd.f32 %v2096_v52, %v923_v8  ;;  %v925_v10 = vpop.f32.mrb[91].mxu1 }
 0x1c9   :  { %1218 = vst [vmem:[%s2414_s3 + $0x160] sm:$0xff] %v1153_v50  ;;  %v1156_v51 = vadd.f32 %v2331_v0, %v924_v9 }
 0x1cb   :  { %1219 = vst [vmem:[%s2414_s3 + $0x168] sm:$0xff] %v1156_v51 }
 0x1cc   :  { %v928_v11 = vpop.f32.mrb[92].mxu1 }
 0x1cd   :  { %v929_v48 = vadd.f32 %v2096_v52, %v928_v11  ;;  %v930_v57 = vpop.f32.mrb[93].mxu1 }
 0x1ce   :  { %v931_v15 = vpop.f32.mrb[94].mxu1 }
 0x1cf   :  { %v1161_v56 = vadd.f32 %v2340_v5, %v929_v48  ;;  %v932_v16 = vadd.f32 %v2096_v52, %v931_v15  ;;  %v933_v63 = vpop.f32.mrb[95].mxu1 }
 0x1d1   :  { %1220 = vst [vmem:[%s2414_s3 + $0x170] sm:$0xff] %v1161_v56  ;;  %v1164_v0 = vadd.f32 %v2345_v13, %v932_v16 }
 0x1d3   :  { %1221 = vst [vmem:[%s2414_s3 + $0x178] sm:$0xff] %v1164_v0 }
 0x1d4   :  { %v936_v19 = vpop.f32.mrb[96].mxu1 }
 0x1d5   :  { %v937_v20 = vadd.f32 %v2096_v52, %v936_v19  ;;  %v938_v21 = vpop.f32.mrb[97].mxu1 }
 0x1d6   :  { %v939_v22 = vpop.f32.mrb[98].mxu1 }
 0x1d7   :  { %v1169_v2 = vadd.f32 %v1168_v17, %v937_v20  ;;  %v940_v53 = vpop.f32.mrb[99].mxu1 }
 0x1d9   :  { %1222 = vst [vmem:[%s2414_s3 + $0x180] sm:$0xff] %v1169_v2 }

// kernel: mnist_diffusion_forward.30
= control target key start
LH: loop header
LB: loop body
LE: loop exit
PB: predicated region body
PF: predicated region fallthrough
CT: control target
= control target key end

     0   :  { %v2665_v0 = vmov 0   ;;  %v2666_v39 = vmov 0.0   ;;  %vm2667_vm0 = vmmov 0   ;;  %vm1074_vm1 = vcmask 523264   ;;  %s3635_s1 = inlined_call_operand.vmem [shape: bf16[576,128], index: 1, kind: input, shape index: {}]   ;;  %s3636_s0 = inlined_call_operand.vmem [shape: bf16[392,576], index: 0, kind: input, shape index: {}]   ;;  %s3637_s2 = inlined_call_operand.vmem [shape: f32[1,128], index: 2, kind: input, shape index: {}]   ;;  %s3638_s3 = inlined_call_operand.vmem [shape: f32[392,128], index: 3, kind: output, shape index: {}]  }
   0x1   :  { %1150 = vmatprep.subr.bf16.mxu1 %v2665_v0  ;;  %1382 = vmatprep.subr.bf16.mxu0 %v2665_v0  ;;  %v2456_v1 = vld [vmem:[%s3635_s1] sm:$0xff]   ;;  %v2458_v3 = vld [vmem:[%s3635_s1 + $0x8] sm:$0xff]   ;;  %v2460_v5 = vld [vmem:[%s3635_s1 + $0x10] sm:$0xff]  }
   0x2   :  { %v2696_v2 = vld [vmem:[%s3635_s1 + $0x80] sm:$0xff]   ;;  %1151 = vmatpush1.bf16.msra.mxu1 %v2456_v1  ;;  %v2706_v4 = vld [vmem:[%s3635_s1 + $0x88] sm:$0xff]   ;;  %v2717_v6 = vld [vmem:[%s3635_s1 + $0x90] sm:$0xff]  }
   0x3   :  { %1383 = vmatpush1.bf16.msra.mxu0 %v2696_v2  ;;  %1152 = vmatprep.subr.bf16.mxu1 %v2665_v0  ;;  %v2462_v7 = vld [vmem:[%s3635_s1 + $0x18] sm:$0xff]   ;;  %v2464_v9 = vld [vmem:[%s3635_s1 + $0x20] sm:$0xff]   ;;  %v2466_v11 = vld [vmem:[%s3635_s1 + $0x28] sm:$0xff]  }
   0x4   :  { %1384 = vmatprep.subr.bf16.mxu0 %v2665_v0  ;;  %v2728_v8 = vld [vmem:[%s3635_s1 + $0x98] sm:$0xff]   ;;  %v2739_v10 = vld [vmem:[%s3635_s1 + $0xa0] sm:$0xff]   ;;  %v2750_v12 = vld [vmem:[%s3635_s1 + $0xa8] sm:$0xff]  }
   0x5   :  { %v2468_v13 = vld [vmem:[%s3635_s1 + $0x30] sm:$0xff]   ;;  %v2470_v15 = vld [vmem:[%s3635_s1 + $0x38] sm:$0xff]   ;;  %v2472_v17 = vld [vmem:[%s3635_s1 + $0x40] sm:$0xff]  }
   0x6   :  { %1153 = vmatpush1.bf16.msra.mxu1 %v2458_v3  ;;  %v2761_v14 = vld [vmem:[%s3635_s1 + $0xb0] sm:$0xff]   ;;  %v2772_v16 = vld [vmem:[%s3635_s1 + $0xb8] sm:$0xff]   ;;  %v2783_v18 = vld [vmem:[%s3635_s1 + $0xc0] sm:$0xff]  }
   0x7   :  { %1385 = vmatpush1.bf16.msra.mxu0 %v2706_v4  ;;  %1154 = vmatprep.subr.bf16.mxu1 %v2665_v0  ;;  %v2490_v19 = vld [vmem:[%s3636_s0 + $0x4] ss:$20 sps:$4 sm:$0xff]   ;;  %v2474_v20 = vld [vmem:[%s3635_s1 + $0x48] sm:$0xff]   ;;  %v2476_v23 = vld [vmem:[%s3635_s1 + $0x50] sm:$0xff]  }
   0x8   :  { %1386 = vmatprep.subr.bf16.mxu0 %v2665_v0  ;;  %v2493_v21 = vld [vmem:[%s3636_s0 + $0xc] ss:$20 sps:$4 sm:$0xff]   ;;  %1182 = vmatprep.mubr.bf16.mxu1 %v2490_v19  ;;  %v2811_v24 = vld [vmem:[%s3635_s1 + $0xd0] sm:$0xff]   ;;  %v2478_v25 = vld [vmem:[%s3635_s1 + $0x58] sm:$0xff]  }
   0x9   :  { %v2800_v22 = vld [vmem:[%s3635_s1 + $0xc8] sm:$0xff]   ;;  %1414 = vmatprep.mubr.bf16.mxu0 %v2493_v21  ;;  %v2822_v26 = vld [vmem:[%s3635_s1 + $0xd8] sm:$0xff]   ;;  %v2480_v27 = vld [vmem:[%s3635_s1 + $0x60] sm:$0xff]  }
   0xa   :  { %1155 = vmatpush1.bf16.msra.mxu1 %v2460_v5  ;;  %v2833_v28 = vld [vmem:[%s3635_s1 + $0xe0] sm:$0xff]   ;;  %v2482_v29 = vld [vmem:[%s3635_s1 + $0x68] sm:$0xff]   ;;  %v2484_v31 = vld [vmem:[%s3635_s1 + $0x70] sm:$0xff]  }
   0xb   :  { %1387 = vmatpush1.bf16.msra.mxu0 %v2717_v6  ;;  %1156 = vmatprep.subr.bf16.mxu1 %v2665_v0  ;;  %v2844_v30 = vld [vmem:[%s3635_s1 + $0xe8] sm:$0xff]   ;;  %v2855_v32 = vld [vmem:[%s3635_s1 + $0xf0] sm:$0xff]   ;;  %v2486_v33 = vld [vmem:[%s3635_s1 + $0x78] sm:$0xff]  }
   0xc   :  { %1388 = vmatprep.subr.bf16.mxu0 %v2665_v0  ;;  %v2866_v34 = vld [vmem:[%s3635_s1 + $0xf8] sm:$0xff]   ;;  %v2488_v35 = vld [vmem:[%s3636_s0] ss:$20 sps:$4 sm:$0xff]   ;;  %v2513_v41 = vld [vmem:[%s3635_s1 + $0x108] sm:$0xff]  }
   0xd   :  { %v2491_v36 = vld [vmem:[%s3636_s0 + $0x8] ss:$20 sps:$4 sm:$0xff]   ;;  %v2495_v37 = vld [vmem:[%s3636_s0 + $0x2c] ss:$20 sps:$4 sm:$0xff]   ;;  %v2500_v43 = vld [vmem:[%s3636_s0 + $0x30] ss:$20 sps:$4 sm:$0xff]  }
   0xe   :  { %1157 = vmatpush1.bf16.msra.mxu1 %v2462_v7  ;;  %v2494_v38 = vld [vmem:[%s3635_s1 + $0x100] sm:$0xff]   ;;  %v2497_v40 = vld [vmem:[%s3636_s0 + $0x34] ss:$20 sps:$4 sm:$0xff]   ;;  %v2503_v45 = vld [vmem:[%s3636_s0 + $0x5c] ss:$20 sps:$4 sm:$0xff]  }
   0xf   :  { %1389 = vmatpush1.bf16.msra.mxu0 %v2728_v8  ;;  %1158 = vmatprep.subr.bf16.mxu1 %v2665_v0  ;;  %v2499_v42 = vld [vmem:[%s3636_s0 + $0x28] ss:$20 sps:$4 sm:$0xff]   ;;  %v2532_v46 = vld [vmem:[%s3635_s1 + $0x110] sm:$0xff]   ;;  %v2506_v49 = vld [vmem:[%s3636_s0 + $0x58] ss:$20 sps:$4 sm:$0xff]  }
  0x10   :  { %1390 = vmatprep.subr.bf16.mxu0 %v2665_v0  ;;  %v2501_v44 = vld [vmem:[%s3636_s0 + $0x54] ss:$20 sps:$4 sm:$0xff]   ;;  %v2555_v47 = vld [vmem:[%s3635_s1 + $0x118] sm:$0xff]   ;;  %v2505_v48 = vld [vmem:[%s3636_s0 + $0x50] ss:$20 sps:$4 sm:$0xff]  }
  0x11   :  { %v2507_v50 = vld [vmem:[%s3636_s0 + $0x7c] ss:$20 sps:$4 sm:$0xff]   ;;  %v2509_v51 = vld [vmem:[%s3636_s0 + $0x84] ss:$20 sps:$4 sm:$0xff]   ;;  %v2512_v53 = vld [vmem:[%s3636_s0 + $0x80] ss:$20 sps:$4 sm:$0xff]  }
  0x12   :  { %1159 = vmatpush1.bf16.msra.mxu1 %v2464_v9  ;;  %v2511_v52 = vld [vmem:[%s3636_s0 + $0x78] ss:$20 sps:$4 sm:$0xff]   ;;  %v2518_v56 = vld [vmem:[%s3636_s0 + $0xa0] ss:$20 sps:$4 sm:$0xff]   ;;  %v2519_v57 = vld [vmem:[%s3636_s0 + $0xa8] ss:$20 sps:$4 sm:$0xff]  }
  0x13   :  { %1391 = vmatpush1.bf16.msra.mxu0 %v2739_v10  ;;  %1160 = vmatprep.subr.bf16.mxu1 %v2665_v0  ;;  %v2514_v54 = vld [vmem:[%s3636_s0 + $0xa4] ss:$20 sps:$4 sm:$0xff]   ;;  %v2516_v55 = vld [vmem:[%s3636_s0 + $0xac] ss:$20 sps:$4 sm:$0xff]   ;;  %v2522_v59 = vld [vmem:[%s3636_s0 + $0xd4] ss:$20 sps:$4 sm:$0xff]  }
  0x14   :  { %1392 = vmatprep.subr.bf16.mxu0 %v2665_v0  ;;  %v2520_v58 = vld [vmem:[%s3636_s0 + $0xcc] ss:$20 sps:$4 sm:$0xff]   ;;  %v2524_v60 = vld [vmem:[%s3636_s0 + $0xc8] ss:$20 sps:$4 sm:$0xff]   ;;  %v2525_v61 = vld [vmem:[%s3636_s0 + $0xd0] ss:$20 sps:$4 sm:$0xff]  }
  0x15   :  { %v2526_v62 = vld [vmem:[%s3636_s0 + $0xf4] ss:$20 sps:$4 sm:$0xff]   ;;  %v2528_v63 = vld [vmem:[%s3636_s0 + $0xfc] ss:$20 sps:$4 sm:$0xff]   ;;  %v2537_v5 = vld [vmem:[%s3636_s0 + $0x118] ss:$20 sps:$4 sm:$0xff]  }
  0x16   :  { %1161 = vmatpush1.bf16.msra.mxu1 %v2466_v11  ;;  %v2530_v1 = vld [vmem:[%s3636_s0 + $0xf0] ss:$20 sps:$4 sm:$0xff]   ;;  %v2543_v9 = vld [vmem:[%s3636_s0 + $0x140] ss:$20 sps:$4 sm:$0xff]  }
  0x17   :  { %1393 = vmatpush1.bf16.msra.mxu0 %v2750_v12  ;;  %1162 = vmatprep.subr.bf16.mxu1 %v2665_v0  ;;  %v2533_v3 = vld [vmem:[%s3636_s0 + $0x11c] ss:$20 sps:$4 sm:$0xff]   ;;  %v2539_v7 = vld [vmem:[%s3636_s0 + $0x144] ss:$20 sps:$4 sm:$0xff]   ;;  %v2545_v11 = vld [vmem:[%s3636_s0 + $0x16c] ss:$20 sps:$4 sm:$0xff]  }
  0x18   :  { %1394 = vmatprep.subr.bf16.mxu0 %v2665_v0  ;;  %v2560_v19 = vld [vmem:[%s3636_s0 + $0x1c4] ss:$20 sps:$4 sm:$0xff]   ;;  %v2563_v21 = vld [vmem:[%s3636_s0 + $0x1c0] ss:$20 sps:$4 sm:$0xff]  }
  0x1a   :  { %1163 = vmatpush1.bf16.msra.mxu1 %v2468_v13  ;;  %v2550_v13 = vld [vmem:[%s3636_s0 + $0x170] ss:$20 sps:$4 sm:$0xff]  }
  0x1b   :  { %1395 = vmatpush1.bf16.msra.mxu0 %v2761_v14  ;;  %1164 = vmatprep.subr.bf16.mxu1 %v2665_v0 }
  0x1c   :  { %1396 = vmatprep.subr.bf16.mxu0 %v2665_v0 }
  0x1e   :  { %1165 = vmatpush1.bf16.msra.mxu1 %v2470_v15  ;;  %v2553_v15 = vld [vmem:[%s3636_s0 + $0x19c] ss:$20 sps:$4 sm:$0xff]  }
  0x1f   :  { %1397 = vmatpush1.bf16.msra.mxu0 %v2772_v16  ;;  %1166 = vmatprep.subr.bf16.mxu1 %v2665_v0 }
  0x20   :  { %1398 = vmatprep.subr.bf16.mxu0 %v2665_v0 }
  0x22   :  { %1167 = vmatpush1.bf16.msra.mxu1 %v2472_v17  ;;  %v2557_v17 = vld [vmem:[%s3636_s0 + $0x198] ss:$20 sps:$4 sm:$0xff]  }
  0x23   :  { %1399 = vmatpush1.bf16.msra.mxu0 %v2783_v18  ;;  %1168 = vmatprep.subr.bf16.mxu1 %v2665_v0 }
  0x24   :  { %1400 = vmatprep.subr.bf16.mxu0 %v2665_v0 }
  0x26   :  { %1169 = vmatpush1.bf16.msra.mxu1 %v2474_v20  ;;  %v2562_v20 = vld [vmem:[%s3636_s0 + $0x1b8] ss:$20 sps:$4 sm:$0xff]  }
  0x27   :  { %1401 = vmatpush1.bf16.msra.mxu0 %v2800_v22  ;;  %1170 = vmatprep.subr.bf16.mxu1 %v2665_v0 }
  0x28   :  { %1402 = vmatprep.subr.bf16.mxu0 %v2665_v0 }
  0x2a   :  { %1171 = vmatpush1.bf16.msra.mxu1 %v2476_v23  ;;  %v2566_v23 = vld [vmem:[%s3636_s0 + $0x1ec] ss:$20 sps:$4 sm:$0xff]  }
  0x2b   :  { %1403 = vmatpush1.bf16.msra.mxu0 %v2811_v24  ;;  %1172 = vmatprep.subr.bf16.mxu1 %v2665_v0 }
  0x2c   :  { %1404 = vmatprep.subr.bf16.mxu0 %v2665_v0 }
  0x2e   :  { %1173 = vmatpush1.bf16.msra.mxu1 %v2478_v25  ;;  %v2569_v25 = vld [vmem:[%s3636_s0 + $0x1e8] ss:$20 sps:$4 sm:$0xff]  }
  0x2f   :  { %1405 = vmatpush1.bf16.msra.mxu0 %v2822_v26  ;;  %1174 = vmatprep.subr.bf16.mxu1 %v2665_v0 }
  0x30   :  { %1406 = vmatprep.subr.bf16.mxu0 %v2665_v0 }
  0x32   :  { %1175 = vmatpush1.bf16.msra.mxu1 %v2480_v27  ;;  %v2572_v27 = vld [vmem:[%s3636_s0 + $0x208] ss:$20 sps:$4 sm:$0xff]  }
  0x33   :  { %1407 = vmatpush1.bf16.msra.mxu0 %v2833_v28  ;;  %1176 = vmatprep.subr.bf16.mxu1 %v2665_v0 }
  0x34   :  { %1408 = vmatprep.subr.bf16.mxu0 %v2665_v0 }
  0x36   :  { %1177 = vmatpush1.bf16.msra.mxu1 %v2482_v29  ;;  %v2574_v29 = vld [vmem:[%s3636_s0 + $0x234] ss:$20 sps:$4 sm:$0xff]  }
  0x37   :  { %1409 = vmatpush1.bf16.msra.mxu0 %v2844_v30  ;;  %1178 = vmatprep.subr.bf16.mxu1 %v2665_v0 }
  0x38   :  { %1410 = vmatprep.subr.bf16.mxu0 %v2665_v0 }
  0x3a   :  { %1179 = vmatpush1.bf16.msra.mxu1 %v2484_v31  ;;  %v2577_v31 = vld [vmem:[%s3636_s0 + $0x38] ss:$20 sps:$4 sm:$0xff]  }
  0x3b   :  { %1411 = vmatpush1.bf16.msra.mxu0 %v2855_v32  ;;  %1180 = vmatprep.subr.bf16.mxu1 %v2665_v0 }
  0x3c   :  { %1412 = vmatprep.subr.bf16.mxu0 %v2665_v0 }
  0x3e   :  { %1181 = vmatpush1.bf16.msra.mxu1 %v2486_v33  ;;  %v2580_v33 = vld [vmem:[%s3636_s0 + $0x258] ss:$20 sps:$4 sm:$0xff]  }
  0x3f   :  { %1413 = vmatpush1.bf16.msra.mxu0 %v2866_v34  ;;  %2223 = vmatprep.subr.bf16.mxu1 %v2665_v0 }
  0x40   :  { %2115 = vmatprep.subr.bf16.mxu0 %v2666_v39 }
  0x41   :  { %1183 = vmatmul.mubr.bf16.vlgmr.msra.gmra.mrb[0].mxu1 %v2488_v35  ;;  %v2582_v35 = vld [vmem:[%s3636_s0 + $0x284] ss:$20 sps:$4 sm:$0xff]  }
  0x42   :  { %1415 = vmatmul.mubr.bf16.vlgmr.msra.gmra.mrb[0].mxu0 %v2491_v36  ;;  %1190 = vmatprep.mubr.bf16.mxu1 %v2495_v37  ;;  %v2584_v36 = vld [vmem:[%s3636_s0 + $0x280] ss:$20 sps:$4 sm:$0xff]   ;;  %v2585_v37 = vld [vmem:[%s3636_s0 + $0x88] ss:$20 sps:$4 sm:$0xff]  }
  0x43   :  { %2116 = vmatpush3.bf16.msra.mxu0 %v2494_v38  ;;  %2239 = vmatpush1.bf16.msra.mxu1 %v2696_v2  ;;  %v2531_v2 = vld [vmem:[%s3636_s0 + $0xf8] ss:$20 sps:$4 sm:$0xff]  }
  0x44   :  { %1422 = vmatprep.mubr.bf16.mxu0 %v2497_v40  ;;  %2224 = vmatprep.subr.bf16.mxu1 %v2665_v0  ;;  %v2586_v38 = vld [vmem:[%s3636_s0 + $0x2ac] ss:$20 sps:$4 sm:$0xff]   ;;  %v2588_v40 = vld [vmem:[%s3636_s0 + $0x2a8] ss:$20 sps:$4 sm:$0xff]  }
  0x45   :  { %2117 = vmatprep.subr.bf16.mxu0 %v2666_v39 }
  0x47   :  { %2240 = vmatpush1.bf16.msra.mxu1 %v2706_v4  ;;  %2118 = vmatpush3.bf16.msra.mxu0 %v2513_v41  ;;  %v2535_v4 = vld [vmem:[%s3636_s0 + $0x124] ss:$20 sps:$4 sm:$0xff]  }
  0x48   :  { %2225 = vmatprep.subr.bf16.mxu1 %v2665_v0  ;;  %2119 = vmatprep.subr.bf16.mxu0 %v2666_v39  ;;  %v2589_v41 = vld [vmem:[%s3636_s0 + $0xb0] ss:$20 sps:$4 sm:$0xff]  }
  0x49   :  { %1191 = vmatmul.mubr.bf16.gmra.mrb[4].mxu1 %v2499_v42  ;;  %v2590_v42 = vld [vmem:[%s3636_s0 + $0x2d4] ss:$20 sps:$4 sm:$0xff]  }
  0x4a   :  { %1423 = vmatmul.mubr.bf16.gmra.mrb[4].mxu0 %v2500_v43  ;;  %1198 = vmatprep.mubr.bf16.mxu1 %v2501_v44  ;;  %v2592_v43 = vld [vmem:[%s3636_s0 + $0x2d0] ss:$20 sps:$4 sm:$0xff]   ;;  %v2593_v44 = vld [vmem:[%s3636_s0 + $0xd8] ss:$20 sps:$4 sm:$0xff]  }
  0x4b   :  { %1430 = vmatprep.mubr.bf16.mxu0 %v2503_v45  ;;  %2241 = vmatpush1.bf16.msra.mxu1 %v2717_v6  ;;  %v2538_v6 = vld [vmem:[%s3636_s0 + $0x120] ss:$20 sps:$4 sm:$0xff]   ;;  %v2594_v45 = vld [vmem:[%s3636_s0 + $0x2fc] ss:$20 sps:$4 sm:$0xff]  }
  0x4c   :  { %2226 = vmatprep.subr.bf16.mxu1 %v2665_v0  ;;  %2120 = vmatpush3.bf16.msra.mxu0 %v2532_v46  ;;  %v2596_v46 = vld [vmem:[%s3636_s0 + $0x2f8] ss:$20 sps:$4 sm:$0xff]  }
  0x4d   :  { %2121 = vmatprep.subr.bf16.mxu0 %v2666_v39 }
  0x4f   :  { %2242 = vmatpush1.bf16.msra.mxu1 %v2728_v8  ;;  %v2541_v8 = vld [vmem:[%s3636_s0 + $0x14c] ss:$20 sps:$4 sm:$0xff]  }
  0x50   :  { %2227 = vmatprep.subr.bf16.mxu1 %v2665_v0  ;;  %2122 = vmatpush3.bf16.msra.mxu0 %v2555_v47  ;;  %v2597_v47 = vld [vmem:[%s3636_s0 + $0x100] ss:$20 sps:$4 sm:$0xff]  }
  0x51   :  { %1199 = vmatmul.mubr.bf16.gmra.mrb[8].mxu1 %v2505_v48  ;;  %v2598_v48 = vld [vmem:[%s3636_s0 + $0x324] ss:$20 sps:$4 sm:$0xff]  }
  0x52   :  { %1431 = vmatmul.mubr.bf16.gmra.mrb[8].mxu0 %v2506_v49  ;;  %1206 = vmatprep.mubr.bf16.mxu1 %v2507_v50  ;;  %v2600_v49 = vld [vmem:[%s3636_s0 + $0x320] ss:$20 sps:$4 sm:$0xff]   ;;  %v2601_v50 = vld [vmem:[%s3636_s0 + $0x128] ss:$20 sps:$4 sm:$0xff]  }
  0x53   :  { %1438 = vmatprep.mubr.bf16.mxu0 %v2509_v51  ;;  %2243 = vmatpush1.bf16.msra.mxu1 %v2739_v10  ;;  %v2544_v10 = vld [vmem:[%s3636_s0 + $0x148] ss:$20 sps:$4 sm:$0xff]   ;;  %v2602_v51 = vld [vmem:[%s3636_s0 + $0x34c] ss:$20 sps:$4 sm:$0xff]  }
  0x54   :  { %2228 = vmatprep.subr.bf16.mxu1 %v2665_v0 }
  0x57   :  { %2244 = vmatpush1.bf16.msra.mxu1 %v2750_v12  ;;  %v2547_v12 = vld [vmem:[%s3636_s0 + $0x174] ss:$20 sps:$4 sm:$0xff]  }
  0x58   :  { %2229 = vmatprep.subr.bf16.mxu1 %v2665_v0 }
  0x59   :  { %1207 = vmatmul.mubr.bf16.gmra.mrb[12].mxu1 %v2511_v52  ;;  %v2604_v52 = vld [vmem:[%s3636_s0 + $0x348] ss:$20 sps:$4 sm:$0xff]  }
  0x5a   :  { %1439 = vmatmul.mubr.bf16.gmra.mrb[12].mxu0 %v2512_v53  ;;  %1214 = vmatprep.mubr.bf16.mxu1 %v2514_v54  ;;  %v2605_v53 = vld [vmem:[%s3636_s0 + $0x150] ss:$20 sps:$4 sm:$0xff]   ;;  %v2606_v54 = vld [vmem:[%s3636_s0 + $0x374] ss:$20 sps:$4 sm:$0xff]  }
  0x5b   :  { %1446 = vmatprep.mubr.bf16.mxu0 %v2516_v55  ;;  %2245 = vmatpush1.bf16.msra.mxu1 %v2761_v14  ;;  %v2551_v14 = vld [vmem:[%s3636_s0 + $0x194] ss:$20 sps:$4 sm:$0xff]   ;;  %v2608_v55 = vld [vmem:[%s3636_s0 + $0x370] ss:$20 sps:$4 sm:$0xff]  }
  0x5c   :  { %2230 = vmatprep.subr.bf16.mxu1 %v2665_v0 }
  0x5f   :  { %2246 = vmatpush1.bf16.msra.mxu1 %v2772_v16  ;;  %v2556_v16 = vld [vmem:[%s3636_s0 + $0x190] ss:$20 sps:$4 sm:$0xff]  }
  0x60   :  { %2231 = vmatprep.subr.bf16.mxu1 %v2665_v0 }
  0x61   :  { %1215 = vmatmul.mubr.bf16.gmra.mrb[16].mxu1 %v2518_v56  ;;  %v2609_v56 = vld [vmem:[%s3636_s0 + $0x178] ss:$20 sps:$4 sm:$0xff]  }
  0x62   :  { %1447 = vmatmul.mubr.bf16.gmra.mrb[16].mxu0 %v2519_v57  ;;  %1222 = vmatprep.mubr.bf16.mxu1 %v2520_v58  ;;  %v2610_v57 = vld [vmem:[%s3636_s0 + $0x39c] ss:$20 sps:$4 sm:$0xff]   ;;  %v159_v58 = vld [vmem:[%s3636_s0 + $0x3c0] sm:$0xff] }
  0x63   :  { %1454 = vmatprep.mubr.bf16.mxu0 %v2522_v59  ;;  %2247 = vmatpush1.bf16.msra.mxu1 %v2783_v18  ;;  %v2558_v18 = vld [vmem:[%s3636_s0 + $0x1bc] ss:$20 sps:$4 sm:$0xff]   ;;  %v2612_v59 = vld [vmem:[%s3636_s0 + $0x398] ss:$20 sps:$4 sm:$0xff]  }
  0x64   :  { %2232 = vmatprep.subr.bf16.mxu1 %v2665_v0 }
  0x67   :  { %2248 = vmatpush1.bf16.msra.mxu1 %v2800_v22  ;;  %v2564_v22 = vld [vmem:[%s3636_s0 + $0x1e4] ss:$20 sps:$4 sm:$0xff]  }
  0x68   :  { %2233 = vmatprep.subr.bf16.mxu1 %v2665_v0 }
  0x69   :  { %1223 = vmatmul.mubr.bf16.gmra.mrb[20].mxu1 %v2524_v60  ;;  %v2613_v60 = vld [vmem:[%s3636_s0 + $0x1a0] ss:$20 sps:$4 sm:$0xff]  }
  0x6a   :  { %1455 = vmatmul.mubr.bf16.gmra.mrb[20].mxu0 %v2525_v61  ;;  %1230 = vmatprep.mubr.bf16.mxu1 %v2526_v62  ;;  %v2021_v61 = vcombine.high %v159_v58, %v159_v58  ;;  %v2020_v62 = vcombine.low %v159_v58, %v159_v58 }
  0x6b   :  { %1462 = vmatprep.mubr.bf16.mxu0 %v2528_v63  ;;  %2249 = vmatpush1.bf16.msra.mxu1 %v2811_v24  ;;  %v2568_v24 = vld [vmem:[%s3636_s0 + $0x1e0] ss:$20 sps:$4 sm:$0xff]   ;;  %v2616_v63 = vld [vmem:[%s3636_s0 + $0x1c8] ss:$20 sps:$4 sm:$0xff]  }
  0x6c   :  { %2234 = vmatprep.subr.bf16.mxu1 %v2665_v0 }
  0x6f   :  { %2250 = vmatpush1.bf16.msra.mxu1 %v2822_v26  ;;  %v2570_v26 = vld [vmem:[%s3636_s0 + $0x20c] ss:$20 sps:$4 sm:$0xff]  }
  0x70   :  { %2235 = vmatprep.subr.bf16.mxu1 %v2665_v0 }
  0x71   :  { %1231 = vmatmul.mubr.bf16.gmra.mrb[24].mxu1 %v2530_v1  ;;  %v2619_v1 = vld [vmem:[%s3636_s0 + $0x214] ss:$20 sps:$4 sm:$0xff]  }
  0x72   :  { %1463 = vmatmul.mubr.bf16.gmra.mrb[24].mxu0 %v2531_v2  ;;  %1238 = vmatprep.mubr.bf16.mxu1 %v2533_v3  ;;  %v2617_v2 = vld [vmem:[%s3636_s0 + $0x210] ss:$20 sps:$4 sm:$0xff]  }
  0x73   :  { %1470 = vmatprep.mubr.bf16.mxu0 %v2535_v4  ;;  %2251 = vmatpush1.bf16.msra.mxu1 %v2833_v28  ;;  %v2573_v28 = vld [vmem:[%s3636_s0 + $0x10] ss:$20 sps:$4 sm:$0xff]  }
  0x74   :  { %2236 = vmatprep.subr.bf16.mxu1 %v2665_v0  ;;  %v2620_v3 = vld [vmem:[%s3636_s0 + $0x1f0] ss:$20 sps:$4 sm:$0xff]  }
  0x75   :  { %v2621_v4 = vld [vmem:[%s3636_s0 + $0x23c] ss:$20 sps:$4 sm:$0xff]  }
  0x77   :  { %2252 = vmatpush1.bf16.msra.mxu1 %v2844_v30  ;;  %v2576_v30 = vld [vmem:[%s3636_s0 + $0x230] ss:$20 sps:$4 sm:$0xff]  }
  0x78   :  { %2237 = vmatprep.subr.bf16.mxu1 %v2665_v0 }
  0x79   :  { %1239 = vmatmul.mubr.bf16.gmra.mrb[28].mxu1 %v2537_v5  ;;  %v2623_v5 = vld [vmem:[%s3636_s0 + $0x238] ss:$20 sps:$4 sm:$0xff]  }
  0x7a   :  { %1471 = vmatmul.mubr.bf16.gmra.mrb[28].mxu0 %v2538_v6  ;;  %1246 = vmatprep.mubr.bf16.mxu1 %v2539_v7  ;;  %v2624_v6 = vld [vmem:[%s3636_s0 + $0x218] ss:$20 sps:$4 sm:$0xff]  }
  0x7b   :  { %1478 = vmatprep.mubr.bf16.mxu0 %v2541_v8  ;;  %2253 = vmatpush1.bf16.msra.mxu1 %v2855_v32  ;;  %v2578_v32 = vld [vmem:[%s3636_s0 + $0x25c] ss:$20 sps:$4 sm:$0xff]   ;;  %v2625_v7 = vld [vmem:[%s3636_s0 + $0x264] ss:$20 sps:$4 sm:$0xff]  }
  0x7c   :  { %2238 = vmatprep.subr.bf16.mxu1 %v2665_v0  ;;  %v2549_v0 = vld [vmem:[%s3636_s0 + $0x168] ss:$20 sps:$4 sm:$0xff]  }
  0x7f   :  { %2254 = vmatpush1.bf16.msra.mxu1 %v2866_v34  ;;  %v2581_v34 = vld [vmem:[%s3636_s0 + $0x60] ss:$20 sps:$4 sm:$0xff]  }
  0x81   :  { %1247 = vmatmul.mubr.bf16.gmra.mrb[32].mxu1 %v2543_v9 }
  0x82   :  { %1479 = vmatmul.mubr.bf16.gmra.mrb[32].mxu0 %v2544_v10  ;;  %1254 = vmatprep.mubr.bf16.mxu1 %v2545_v11  ;;  %v2627_v10 = vld [vmem:[%s3636_s0 + $0x260] ss:$20 sps:$4 sm:$0xff]  }
  0x83   :  { %1486 = vmatprep.mubr.bf16.mxu0 %v2547_v12  ;;  %v2628_v11 = vld [vmem:[%s3636_s0 + $0x240] ss:$20 sps:$4 sm:$0xff]  }
  0x89   :  { %1255 = vmatmul.mubr.bf16.gmra.mrb[36].mxu1 %v2549_v0  ;;  %v2629_v0 = vld [vmem:[%s3636_s0 + $0x28c] ss:$20 sps:$4 sm:$0xff]  }
  0x8a   :  { %1487 = vmatmul.mubr.bf16.gmra.mrb[36].mxu0 %v2550_v13  ;;  %1262 = vmatprep.mubr.bf16.mxu1 %v2551_v14 }
  0x8b   :  { %1494 = vmatprep.mubr.bf16.mxu0 %v2553_v15 }
  0x91   :  { %1263 = vmatmul.mubr.bf16.gmra.mrb[40].mxu1 %v2556_v16  ;;  %v2631_v16 = vld [vmem:[%s3636_s0 + $0x288] ss:$20 sps:$4 sm:$0xff]  }
  0x92   :  { %1495 = vmatmul.mubr.bf16.gmra.mrb[40].mxu0 %v2557_v17  ;;  %1270 = vmatprep.mubr.bf16.mxu1 %v2558_v18  ;;  %v2632_v17 = vld [vmem:[%s3636_s0 + $0x268] ss:$20 sps:$4 sm:$0xff]  }
  0x93   :  { %1502 = vmatprep.mubr.bf16.mxu0 %v2560_v19  ;;  %v2633_v19 = vld [vmem:[%s3636_s0 + $0x2b4] ss:$20 sps:$4 sm:$0xff]  }
  0x99   :  { %1271 = vmatmul.mubr.bf16.gmra.mrb[44].mxu1 %v2562_v20 }
  0x9a   :  { %1503 = vmatmul.mubr.bf16.gmra.mrb[44].mxu0 %v2563_v21  ;;  %1278 = vmatprep.mubr.bf16.mxu1 %v2564_v22 }
  0x9b   :  { %1510 = vmatprep.mubr.bf16.mxu0 %v2566_v23  ;;  %v2635_v23 = vld [vmem:[%s3636_s0 + $0x2b0] ss:$20 sps:$4 sm:$0xff]  }
  0xa1   :  { %1279 = vmatmul.mubr.bf16.gmra.mrb[48].mxu1 %v2568_v24  ;;  %v2636_v24 = vld [vmem:[%s3636_s0 + $0x290] ss:$20 sps:$4 sm:$0xff]  }
  0xa2   :  { %1511 = vmatmul.mubr.bf16.gmra.mrb[48].mxu0 %v2569_v25  ;;  %1286 = vmatprep.mubr.bf16.mxu1 %v2570_v26  ;;  %v2637_v26 = vld [vmem:[%s3636_s0 + $0x2dc] ss:$20 sps:$4 sm:$0xff]  }
  0xa3   :  { %2123 = vmatprep.mubr.msk.bf16.mxu0 %vm2667_vm0, %v2666_v39 }
  0xa9   :  { %1287 = vmatmul.mubr.bf16.gmra.mrb[52].mxu1 %v2572_v27 }
  0xaa   :  { %2124 = vmatmul.mubr.msk.bf16.vlgmr.msra.gmra.mrb[0].mxu0 %vm1074_vm1, %v2573_v28  ;;  %1294 = vmatprep.mubr.bf16.mxu1 %v2574_v29 }
  0xab   :  { %2127 = vmatprep.mubr.msk.bf16.mxu0 %vm2667_vm0, %v2666_v39 }
  0xb1   :  { %1295 = vmatmul.mubr.bf16.gmra.mrb[56].mxu1 %v2576_v30  ;;  %v2639_v30 = vld [vmem:[%s3636_s0 + $0x2d8] ss:$20 sps:$4 sm:$0xff]  }
  0xb2   :  { %2128 = vmatmul.mubr.msk.bf16.gmra.mrb[4].mxu0 %vm1074_vm1, %v2577_v31  ;;  %1302 = vmatprep.mubr.bf16.mxu1 %v2578_v32  ;;  %v2640_v31 = vld [vmem:[%s3636_s0 + $0x2b8] ss:$20 sps:$4 sm:$0xff]  }
  0xb3   :  { %2131 = vmatprep.mubr.msk.bf16.mxu0 %vm2667_vm0, %v2666_v39 }
  0xb9   :  { %1303 = vmatmul.mubr.bf16.gmra.mrb[60].mxu1 %v2580_v33  ;;  %v2641_v33 = vld [vmem:[%s3636_s0 + $0x304] ss:$20 sps:$4 sm:$0xff]  }
  0xba   :  { %2132 = vmatmul.mubr.msk.bf16.gmra.mrb[8].mxu0 %vm1074_vm1, %v2581_v34  ;;  %1310 = vmatprep.mubr.bf16.mxu1 %v2582_v35 }
  0xbb   :  { %2135 = vmatprep.mubr.msk.bf16.mxu0 %vm2667_vm0, %v2666_v39 }
  0xc1   :  { %1311 = vmatmul.mubr.bf16.gmra.mrb[64].mxu1 %v2584_v36 }
  0xc2   :  { %2136 = vmatmul.mubr.msk.bf16.gmra.mrb[12].mxu0 %vm1074_vm1, %v2585_v37  ;;  %1318 = vmatprep.mubr.bf16.mxu1 %v2586_v38  ;;  %v2643_v37 = vld [vmem:[%s3636_s0 + $0x300] ss:$20 sps:$4 sm:$0xff]  }
  0xc3   :  { %2139 = vmatprep.mubr.msk.bf16.mxu0 %vm2667_vm0, %v2666_v39  ;;  %v2644_v38 = vld [vmem:[%s3636_s0 + $0x2e0] ss:$20 sps:$4 sm:$0xff]  }
  0xc9   :  { %1319 = vmatmul.mubr.bf16.gmra.mrb[68].mxu1 %v2588_v40 }
  0xca   :  { %2140 = vmatmul.mubr.msk.bf16.gmra.mrb[16].mxu0 %vm1074_vm1, %v2589_v41  ;;  %1326 = vmatprep.mubr.bf16.mxu1 %v2590_v42  ;;  %v2645_v41 = vld [vmem:[%s3636_s0 + $0x32c] ss:$20 sps:$4 sm:$0xff]  }
  0xcb   :  { %2143 = vmatprep.mubr.msk.bf16.mxu0 %vm2667_vm0, %v2666_v39 }
  0xd1   :  { %1327 = vmatmul.mubr.bf16.gmra.mrb[72].mxu1 %v2592_v43 }
  0xd2   :  { %2144 = vmatmul.mubr.msk.bf16.gmra.mrb[20].mxu0 %vm1074_vm1, %v2593_v44  ;;  %1334 = vmatprep.mubr.bf16.mxu1 %v2594_v45  ;;  %v2647_v45 = vld [vmem:[%s3636_s0 + $0x328] ss:$20 sps:$4 sm:$0xff]  }
  0xd3   :  { %2147 = vmatprep.mubr.msk.bf16.mxu0 %vm2667_vm0, %v2666_v39 }
  0xd9   :  { %1335 = vmatmul.mubr.bf16.gmra.mrb[76].mxu1 %v2596_v46  ;;  %v2648_v46 = vld [vmem:[%s3636_s0 + $0x308] ss:$20 sps:$4 sm:$0xff]  }
  0xda   :  { %2148 = vmatmul.mubr.msk.bf16.gmra.mrb[24].mxu0 %vm1074_vm1, %v2597_v47  ;;  %1342 = vmatprep.mubr.bf16.mxu1 %v2598_v48  ;;  %v2649_v48 = vld [vmem:[%s3636_s0 + $0x354] ss:$20 sps:$4 sm:$0xff]  }
  0xdb   :  { %2151 = vmatprep.mubr.msk.bf16.mxu0 %vm2667_vm0, %v2666_v39 }
  0xe1   :  { %1343 = vmatmul.mubr.bf16.gmra.mrb[80].mxu1 %v2600_v49 }
  0xe2   :  { %2152 = vmatmul.mubr.msk.bf16.gmra.mrb[28].mxu0 %vm1074_vm1, %v2601_v50  ;;  %1350 = vmatprep.mubr.bf16.mxu1 %v2602_v51 }
  0xe3   :  { %2155 = vmatprep.mubr.msk.bf16.mxu0 %vm2667_vm0, %v2666_v39 }
  0xe9   :  { %1351 = vmatmul.mubr.bf16.gmra.mrb[84].mxu1 %v2604_v52  ;;  %v2651_v52 = vld [vmem:[%s3636_s0 + $0x350] ss:$20 sps:$4 sm:$0xff]  }
  0xea   :  { %2156 = vmatmul.mubr.msk.bf16.gmra.mrb[32].mxu0 %vm1074_vm1, %v2605_v53  ;;  %1358 = vmatprep.mubr.bf16.mxu1 %v2606_v54  ;;  %v2652_v53 = vld [vmem:[%s3636_s0 + $0x330] ss:$20 sps:$4 sm:$0xff]  }
  0xeb   :  { %2159 = vmatprep.mubr.msk.bf16.mxu0 %vm2667_vm0, %v2666_v39 }
  0xf1   :  { %1359 = vmatmul.mubr.bf16.gmra.mrb[88].mxu1 %v2608_v55  ;;  %v2653_v55 = vld [vmem:[%s3636_s0 + $0x37c] ss:$20 sps:$4 sm:$0xff]  }
  0xf2   :  { %2160 = vmatmul.mubr.msk.bf16.gmra.mrb[36].mxu0 %vm1074_vm1, %v2609_v56  ;;  %1366 = vmatprep.mubr.bf16.mxu1 %v2610_v57 }
  0xf3   :  { %2163 = vmatprep.mubr.msk.bf16.mxu0 %vm2667_vm0, %v2666_v39 }
  0xf9   :  { %1367 = vmatmul.mubr.bf16.gmra.mrb[92].mxu1 %v2612_v59  ;;  %v2655_v59 = vld [vmem:[%s3636_s0 + $0x378] ss:$20 sps:$4 sm:$0xff]  }
  0xfa   :  { %2164 = vmatmul.mubr.msk.bf16.gmra.mrb[40].mxu0 %vm1074_vm1, %v2613_v60  ;;  %1374 = vmatprep.mubr.bf16.mxu1 %v2021_v61  ;;  %v2656_v60 = vld [vmem:[%s3636_s0 + $0x358] ss:$20 sps:$4 sm:$0xff]  }
  0xfb   :  { %2167 = vmatprep.mubr.msk.bf16.mxu0 %vm2667_vm0, %v2666_v39 }
 0x101   :  { %1375 = vmatmul.mubr.bf16.gmra.mrb[96].mxu1 %v2020_v62  ;;  %v2657_v62 = vld [vmem:[%s3636_s0 + $0x3a4] ss:$20 sps:$4 sm:$0xff]  }
 0x102   :  { %2168 = vmatmul.mubr.msk.bf16.gmra.mrb[44].mxu0 %vm1074_vm1, %v2616_v63  ;;  %1518 = vmatprep.mubr.bf16.mxu1 %v2619_v1  ;;  %v160_v1 = vld [vmem:[%s3636_s0 + $0x3c8] sm:$0xff] }
 0x103   :  { %2171 = vmatprep.mubr.msk.bf16.mxu0 %vm2667_vm0, %v2666_v39 }
 0x109   :  { %1519 = vmatmul.mubr.bf16.vlgmr.msra.gmra.mrb[52].mxu1 %v2617_v2 }
 0x10a   :  { %2172 = vmatmul.mubr.msk.bf16.gmra.mrb[48].mxu0 %vm1074_vm1, %v2620_v3  ;;  %1526 = vmatprep.mubr.bf16.mxu1 %v2621_v4  ;;  %v2659_v4 = vld [vmem:[%s3636_s0 + $0x3a0] ss:$20 sps:$4 sm:$0xff]  }
 0x10b   :  { %2175 = vmatprep.mubr.msk.bf16.mxu0 %vm2667_vm0, %v2666_v39 }
 0x111   :  { %1527 = vmatmul.mubr.bf16.gmra.mrb[56].mxu1 %v2623_v5  ;;  %v2660_v5 = vld [vmem:[%s3636_s0 + $0x380] ss:$20 sps:$4 sm:$0xff]  }
 0x112   :  { %2176 = vmatmul.mubr.msk.bf16.gmra.mrb[52].mxu0 %vm1074_vm1, %v2624_v6  ;;  %1534 = vmatprep.mubr.bf16.mxu1 %v2625_v7  ;;  %v2023_v7 = vcombine.high %v160_v1, %v160_v1 }
 0x113   :  { %2179 = vmatprep.mubr.msk.bf16.mxu0 %vm2667_vm0, %v2666_v39 }
 0x114   :  { %v3238_v8 = vpop.f32.mrb[0].mxu1 }
 0x115   :  { %v1186_v9 = vpop.f32.mrb[1].mxu1 }
 0x116   :  { %v3246_v12 = vpop.f32.mrb[2].mxu1 }
 0x117   :  { %v1189_v13 = vpop.f32.mrb[3].mxu1 }
 0x118   :  { %v2663_v13 = vld [vmem:[%s3636_s0 + $0x3a8] ss:$20 sps:$4 sm:$0xff]  }
 0x119   :  { %1535 = vmatmul.mubr.bf16.gmra.mrb[60].mxu1 %v2627_v10 }
 0x11a   :  { %2180 = vmatmul.mubr.msk.bf16.gmra.mrb[56].mxu0 %vm1074_vm1, %v2628_v11  ;;  %1542 = vmatprep.mubr.bf16.mxu1 %v2629_v0  ;;  %v2022_v0 = vcombine.low %v160_v1, %v160_v1 }
 0x11b   :  { %2183 = vmatprep.mubr.msk.bf16.mxu0 %vm2667_vm0, %v2666_v39 }
 0x11c   :  { %v3254_v14 = vpop.f32.mrb[4].mxu1 }
 0x11d   :  { %v1194_v15 = vpop.f32.mrb[5].mxu1 }
 0x11e   :  { %v3262_v18 = vpop.f32.mrb[6].mxu1 }
 0x11f   :  { %v1197_v20 = vpop.f32.mrb[7].mxu1 }
 0x120   :  { %v2664_v20 = vld [vmem:[%s3636_s0 + $0x3d0] ss:$0 sps:$4 sm:$0xff]  }
 0x121   :  { %1543 = vmatmul.mubr.bf16.gmra.mrb[64].mxu1 %v2631_v16 }
 0x122   :  { %2184 = vmatmul.mubr.msk.bf16.gmra.mrb[60].mxu0 %vm1074_vm1, %v2632_v17  ;;  %1550 = vmatprep.mubr.bf16.mxu1 %v2633_v19 }
 0x123   :  { %2187 = vmatprep.mubr.msk.bf16.mxu0 %vm2667_vm0, %v2666_v39 }
 0x124   :  { %v3270_v21 = vpop.f32.mrb[8].mxu1 }
 0x125   :  { %v1202_v22 = vpop.f32.mrb[9].mxu1 }
 0x126   :  { %v3278_v25 = vpop.f32.mrb[10].mxu1 }
 0x127   :  { %v1205_v27 = vpop.f32.mrb[11].mxu1 }
 0x129   :  { %1551 = vmatmul.mubr.bf16.gmra.mrb[68].mxu1 %v2635_v23 }
 0x12a   :  { %2188 = vmatmul.mubr.msk.bf16.gmra.mrb[64].mxu0 %vm1074_vm1, %v2636_v24  ;;  %1558 = vmatprep.mubr.bf16.mxu1 %v2637_v26 }
 0x12b   :  { %2191 = vmatprep.mubr.msk.bf16.mxu0 %vm2667_vm0, %v2666_v39 }
 0x12c   :  { %v3286_v28 = vpop.f32.mrb[12].mxu1 }
 0x12d   :  { %v1210_v29 = vpop.f32.mrb[13].mxu1 }
 0x12e   :  { %v3294_v32 = vpop.f32.mrb[14].mxu1 }
 0x12f   :  { %v1213_v34 = vpop.f32.mrb[15].mxu1 }
 0x130   :  { %v3411_v34 = vld [vmem:[%s3637_s2] ss:$0 sm:$0xff] }
 0x131   :  { %1559 = vmatmul.mubr.bf16.gmra.mrb[72].mxu1 %v2639_v30 }
 0x132   :  { %2192 = vmatmul.mubr.msk.bf16.gmra.mrb[68].mxu0 %vm1074_vm1, %v2640_v31  ;;  %1566 = vmatprep.mubr.bf16.mxu1 %v2641_v33 }
 0x133   :  { %2195 = vmatprep.mubr.msk.bf16.mxu0 %vm2667_vm0, %v2666_v39 }
 0x134   :  { %v3302_v35 = vpop.f32.mrb[16].mxu1 }
 0x135   :  { %v1218_v36 = vpop.f32.mrb[17].mxu1 }
 0x136   :  { %v3310_v40 = vpop.f32.mrb[18].mxu1  ;;  %v1185_v36 = vadd.f32 %v3411_v34, %v3238_v8  ;;  %v1193_v8 = vadd.f32 %v3411_v34, %v3254_v14  ;;  %v1201_v14 = vadd.f32 %v3411_v34, %v3270_v21  ;;  %v1209_v21 = vadd.f32 %v3411_v34, %v3286_v28 }
 0x137   :  { %v1221_v42 = vpop.f32.mrb[19].mxu1  ;;  %v1217_v28 = vadd.f32 %v3411_v34, %v3302_v35 }
 0x139   :  { %1567 = vmatmul.mubr.bf16.gmra.mrb[76].mxu1 %v2643_v37 }
 0x13a   :  { %2196 = vmatmul.mubr.msk.bf16.gmra.mrb[72].mxu0 %vm1074_vm1, %v2644_v38  ;;  %1574 = vmatprep.mubr.bf16.mxu1 %v2645_v41  ;;  %v1188_v38 = vadd.f32 %v3411_v34, %v3246_v12  ;;  %v1196_v12 = vadd.f32 %v3411_v34, %v3262_v18  ;;  %v1204_v18 = vadd.f32 %v3411_v34, %v3278_v25 }
 0x13b   :  { %2199 = vmatprep.mubr.msk.bf16.mxu0 %vm2667_vm0, %v2666_v39  ;;  %v1212_v25 = vadd.f32 %v3411_v34, %v3294_v32  ;;  %v1220_v32 = vadd.f32 %v3411_v34, %v3310_v40 }
 0x13c   :  { %v3318_v43 = vpop.f32.mrb[20].mxu1 }
 0x13d   :  { %v1226_v44 = vpop.f32.mrb[21].mxu1  ;;  %v1225_v35 = vadd.f32 %v3411_v34, %v3318_v43 }
 0x13e   :  { %v3326_v47 = vpop.f32.mrb[22].mxu1 }
 0x13f   :  { %v1229_v49 = vpop.f32.mrb[23].mxu1  ;;  %v1228_v40 = vadd.f32 %v3411_v34, %v3326_v47 }
 0x141   :  { %1575 = vmatmul.mubr.bf16.gmra.mrb[80].mxu1 %v2647_v45 }
 0x142   :  { %2200 = vmatmul.mubr.msk.bf16.gmra.mrb[76].mxu0 %vm1074_vm1, %v2648_v46  ;;  %1582 = vmatprep.mubr.bf16.mxu1 %v2649_v48 }
 0x143   :  { %2203 = vmatprep.mubr.msk.bf16.mxu0 %vm2667_vm0, %v2666_v39 }
 0x144   :  { %v3334_v50 = vpop.f32.mrb[24].mxu1 }
 0x145   :  { %v1234_v51 = vpop.f32.mrb[25].mxu1  ;;  %v1233_v43 = vadd.f32 %v3411_v34, %v3334_v50 }
 0x146   :  { %v3342_v54 = vpop.f32.mrb[26].mxu1 }
 0x147   :  { %v1237_v56 = vpop.f32.mrb[27].mxu1  ;;  %v1236_v47 = vadd.f32 %v3411_v34, %v3342_v54 }
 0x149   :  { %1583 = vmatmul.mubr.bf16.gmra.mrb[84].mxu1 %v2651_v52 }
 0x14a   :  { %2204 = vmatmul.mubr.msk.bf16.gmra.mrb[80].mxu0 %vm1074_vm1, %v2652_v53  ;;  %1590 = vmatprep.mubr.bf16.mxu1 %v2653_v55 }
 0x14b   :  { %2207 = vmatprep.mubr.msk.bf16.mxu0 %vm2667_vm0, %v2666_v39 }
 0x14c   :  { %v3350_v57 = vpop.f32.mrb[28].mxu1 }
 0x14d   :  { %v1242_v58 = vpop.f32.mrb[29].mxu1  ;;  %v1241_v50 = vadd.f32 %v3411_v34, %v3350_v57 }
 0x14e   :  { %v3358_v61 = vpop.f32.mrb[30].mxu1 }
 0x14f   :  { %v1245_v63 = vpop.f32.mrb[31].mxu1  ;;  %v1244_v54 = vadd.f32 %v3411_v34, %v3358_v61 }
 0x151   :  { %1591 = vmatmul.mubr.bf16.gmra.mrb[88].mxu1 %v2655_v59 }
 0x152   :  { %2208 = vmatmul.mubr.msk.bf16.gmra.mrb[84].mxu0 %vm1074_vm1, %v2656_v60  ;;  %1598 = vmatprep.mubr.bf16.mxu1 %v2657_v62 }
 0x153   :  { %2211 = vmatprep.mubr.msk.bf16.mxu0 %vm2667_vm0, %v2666_v39 }
 0x154   :  { %v3369_v2 = vpop.f32.mrb[32].mxu1 }
 0x155   :  { %v1250_v3 = vpop.f32.mrb[33].mxu1  ;;  %v1249_v57 = vadd.f32 %v3411_v34, %v3369_v2 }
 0x156   :  { %v3377_v6 = vpop.f32.mrb[34].mxu1 }
 0x157   :  { %v1253_v9 = vpop.f32.mrb[35].mxu1  ;;  %v1252_v61 = vadd.f32 %v3411_v34, %v3377_v6 }
 0x159   :  { %1599 = vmatmul.mubr.bf16.gmra.mrb[92].mxu1 %v2659_v4 }
 0x15a   :  { %2212 = vmatmul.mubr.msk.bf16.gmra.mrb[88].mxu0 %vm1074_vm1, %v2660_v5  ;;  %1606 = vmatprep.mubr.bf16.mxu1 %v2023_v7 }
 0x15b   :  { %2215 = vmatprep.mubr.msk.bf16.mxu0 %vm2667_vm0, %v2666_v39 }
 0x15c   :  { %v3382_v10 = vpop.f32.mrb[36].mxu1 }
 0x15d   :  { %v1258_v11 = vpop.f32.mrb[37].mxu1  ;;  %v1257_v2 = vadd.f32 %v3411_v34, %v3382_v10 }
 0x15e   :  { %v3387_v15 = vpop.f32.mrb[38].mxu1 }
 0x15f   :  { %v1261_v16 = vpop.f32.mrb[39].mxu1  ;;  %v1260_v6 = vadd.f32 %v3411_v34, %v3387_v15 }
 0x161   :  { %1607 = vmatmul.mubr.bf16.gmra.mrb[96].mxu1 %v2022_v0 }
 0x162   :  { %2216 = vmatmul.mubr.msk.bf16.gmra.mrb[92].mxu0 %vm1074_vm1, %v2663_v13 }
 0x163   :  { %2219 = vmatprep.mubr.msk.bf16.mxu0 %vm2667_vm0, %v2666_v39 }
 0x164   :  { %v3392_v17 = vpop.f32.mrb[40].mxu1 }
 0x165   :  { %v1266_v19 = vpop.f32.mrb[41].mxu1  ;;  %v1265_v10 = vadd.f32 %v3411_v34, %v3392_v17 }
 0x166   :  { %v3397_v22 = vpop.f32.mrb[42].mxu1 }
 0x167   :  { %v1269_v23 = vpop.f32.mrb[43].mxu1  ;;  %v1268_v15 = vadd.f32 %v3411_v34, %v3397_v22 }
 0x16a   :  { %2220 = vmatmul.mubr.msk.bf16.gmra.mrb[96].mxu0 %vm1074_vm1, %v2664_v20 }
 0x16c   :  { %v3400_v24 = vpop.f32.mrb[44].mxu1 }
 0x16d   :  { %v1274_v26 = vpop.f32.mrb[45].mxu1  ;;  %v1273_v17 = vadd.f32 %v3411_v34, %v3400_v24 }
 0x16e   :  { %v3402_v27 = vpop.f32.mrb[46].mxu1 }
 0x16f   :  { %v1277_v29 = vpop.f32.mrb[47].mxu1  ;;  %v1276_v22 = vadd.f32 %v3411_v34, %v3402_v27 }
 0x174   :  { %v3404_v30 = vpop.f32.mrb[48].mxu1 }
 0x175   :  { %v1282_v39 = vpop.f32.mrb[49].mxu1  ;;  %v1281_v24 = vadd.f32 %v3411_v34, %v3404_v30 }
 0x176   :  { %v3406_v31 = vpop.f32.mrb[50].mxu1 }
 0x177   :  { %v1285_v33 = vpop.f32.mrb[51].mxu1  ;;  %v1284_v27 = vadd.f32 %v3411_v34, %v3406_v31 }
 0x17d   :  { %v1648_v37 = vpop.f32.mrb[0].mxu0 }
 0x17e   :  { %v2256_v41 = vadd.f32 %v1648_v37, %v1185_v36  ;;  %v2125_v42 = vpop.f32.mrb[1].mxu0 }
 0x17f   :  { %v1651_v44 = vpop.f32.mrb[2].mxu0 }
 0x180   :  { %1846 = vst [vmem:[%s3638_s3] sm:$0xff] %v2256_v41  ;;  %v2258_v45 = vadd.f32 %v1651_v44, %v1188_v38  ;;  %v2126_v46 = vpop.f32.mrb[3].mxu0 }
 0x182   :  { %1847 = vst [vmem:[%s3638_s3 + $0x8] sm:$0xff] %v2258_v45 }
 0x185   :  { %v1656_v48 = vpop.f32.mrb[4].mxu0 }
 0x186   :  { %v2260_v49 = vadd.f32 %v1656_v48, %v1193_v8  ;;  %v2129_v51 = vpop.f32.mrb[5].mxu0 }
 0x187   :  { %v1659_v52 = vpop.f32.mrb[6].mxu0 }
 0x188   :  { %1848 = vst [vmem:[%s3638_s3 + $0x10] sm:$0xff] %v2260_v49  ;;  %v2262_v53 = vadd.f32 %v1659_v52, %v1196_v12  ;;  %v2130_v55 = vpop.f32.mrb[7].mxu0 }
 0x18a   :  { %1849 = vst [vmem:[%s3638_s3 + $0x18] sm:$0xff] %v2262_v53 }
 0x18d   :  { %v1664_v56 = vpop.f32.mrb[8].mxu0 }
 0x18e   :  { %v2264_v58 = vadd.f32 %v1664_v56, %v1201_v14  ;;  %v2133_v59 = vpop.f32.mrb[9].mxu0 }
 0x18f   :  { %v1667_v60 = vpop.f32.mrb[10].mxu0 }
 0x190   :  { %1850 = vst [vmem:[%s3638_s3 + $0x20] sm:$0xff] %v2264_v58  ;;  %v2266_v62 = vadd.f32 %v1667_v60, %v1204_v18  ;;  %v2134_v63 = vpop.f32.mrb[11].mxu0 }
 0x192   :  { %1851 = vst [vmem:[%s3638_s3 + $0x28] sm:$0xff] %v2266_v62 }
 0x195   :  { %v1672_v1 = vpop.f32.mrb[12].mxu0 }
 0x196   :  { %v2268_v3 = vadd.f32 %v1672_v1, %v1209_v21  ;;  %v2137_v4 = vpop.f32.mrb[13].mxu0 }
 0x197   :  { %v1675_v5 = vpop.f32.mrb[14].mxu0 }
 0x198   :  { %1852 = vst [vmem:[%s3638_s3 + $0x30] sm:$0xff] %v2268_v3  ;;  %v2270_v7 = vadd.f32 %v1675_v5, %v1212_v25  ;;  %v2138_v9 = vpop.f32.mrb[15].mxu0 }
 0x19a   :  { %1853 = vst [vmem:[%s3638_s3 + $0x38] sm:$0xff] %v2270_v7 }
 0x19d   :  { %v1680_v11 = vpop.f32.mrb[16].mxu0 }
 0x19e   :  { %v2272_v0 = vadd.f32 %v1680_v11, %v1217_v28  ;;  %v2141_v13 = vpop.f32.mrb[17].mxu0 }
 0x19f   :  { %v1683_v16 = vpop.f32.mrb[18].mxu0 }
 0x1a0   :  { %1854 = vst [vmem:[%s3638_s3 + $0x40] sm:$0xff] %v2272_v0  ;;  %v2274_v19 = vadd.f32 %v1683_v16, %v1220_v32  ;;  %v2142_v20 = vpop.f32.mrb[19].mxu0 }
 0x1a2   :  { %1855 = vst [vmem:[%s3638_s3 + $0x48] sm:$0xff] %v2274_v19 }
 0x1a5   :  { %v1688_v23 = vpop.f32.mrb[20].mxu0 }
 0x1a6   :  { %v2276_v26 = vadd.f32 %v1688_v23, %v1225_v35  ;;  %v2145_v29 = vpop.f32.mrb[21].mxu0 }
 0x1a7   :  { %v1691_v39 = vpop.f32.mrb[22].mxu0 }
 0x1a8   :  { %1856 = vst [vmem:[%s3638_s3 + $0x50] sm:$0xff] %v2276_v26  ;;  %v2278_v33 = vadd.f32 %v1691_v39, %v1228_v40  ;;  %v2146_v36 = vpop.f32.mrb[23].mxu0 }
 0x1aa   :  { %1857 = vst [vmem:[%s3638_s3 + $0x58] sm:$0xff] %v2278_v33 }
 0x1ad   :  { %v1696_v37 = vpop.f32.mrb[24].mxu0 }
 0x1ae   :  { %v2280_v38 = vadd.f32 %v1696_v37, %v1233_v43  ;;  %v2149_v41 = vpop.f32.mrb[25].mxu0 }
 0x1af   :  { %v1699_v42 = vpop.f32.mrb[26].mxu0 }
 0x1b0   :  { %1858 = vst [vmem:[%s3638_s3 + $0x60] sm:$0xff] %v2280_v38  ;;  %v2282_v44 = vadd.f32 %v1699_v42, %v1236_v47  ;;  %v2150_v45 = vpop.f32.mrb[27].mxu0 }
 0x1b2   :  { %1859 = vst [vmem:[%s3638_s3 + $0x68] sm:$0xff] %v2282_v44 }
 0x1b5   :  { %v1704_v46 = vpop.f32.mrb[28].mxu0 }
 0x1b6   :  { %v2284_v8 = vadd.f32 %v1704_v46, %v1241_v50  ;;  %v2153_v48 = vpop.f32.mrb[29].mxu0 }
 0x1b7   :  { %v1707_v12 = vpop.f32.mrb[30].mxu0 }
 0x1b8   :  { %1860 = vst [vmem:[%s3638_s3 + $0x70] sm:$0xff] %v2284_v8  ;;  %v2286_v49 = vadd.f32 %v1707_v12, %v1244_v54  ;;  %v2154_v51 = vpop.f32.mrb[31].mxu0 }
 0x1ba   :  { %1861 = vst [vmem:[%s3638_s3 + $0x78] sm:$0xff] %v2286_v49 }
 0x1bd   :  { %v1712_v52 = vpop.f32.mrb[32].mxu0 }
 0x1be   :  { %v2288_v53 = vadd.f32 %v1712_v52, %v1249_v57  ;;  %v2157_v55 = vpop.f32.mrb[33].mxu0 }
 0x1bf   :  { %v1715_v14 = vpop.f32.mrb[34].mxu0 }
 0x1c0   :  { %1862 = vst [vmem:[%s3638_s3 + $0x80] sm:$0xff] %v2288_v53  ;;  %v2290_v56 = vadd.f32 %v1715_v14, %v1252_v61  ;;  %v2158_v18 = vpop.f32.mrb[35].mxu0 }
 0x1c2   :  { %1863 = vst [vmem:[%s3638_s3 + $0x88] sm:$0xff] %v2290_v56 }
 0x1c5   :  { %v1720_v58 = vpop.f32.mrb[36].mxu0 }
 0x1c6   :  { %v2292_v59 = vadd.f32 %v1720_v58, %v1257_v2  ;;  %v2161_v60 = vpop.f32.mrb[37].mxu0 }
 0x1c7   :  { %v1723_v62 = vpop.f32.mrb[38].mxu0 }
 0x1c8   :  { %1864 = vst [vmem:[%s3638_s3 + $0x90] sm:$0xff] %v2292_v59  ;;  %v2294_v63 = vadd.f32 %v1723_v62, %v1260_v6  ;;  %v2162_v21 = vpop.f32.mrb[39].mxu0 }
 0x1ca   :  { %1865 = vst [vmem:[%s3638_s3 + $0x98] sm:$0xff] %v2294_v63 }
 0x1cd   :  { %v1728_v1 = vpop.f32.mrb[40].mxu0 }
 0x1ce   :  { %v2296_v25 = vadd.f32 %v1728_v1, %v1265_v10  ;;  %v2165_v3 = vpop.f32.mrb[41].mxu0 }
 0x1cf   :  { %v1731_v4 = vpop.f32.mrb[42].mxu0 }
 0x1d0   :  { %1866 = vst [vmem:[%s3638_s3 + $0xa0] sm:$0xff] %v2296_v25  ;;  %v2298_v5 = vadd.f32 %v1731_v4, %v1268_v15  ;;  %v2166_v7 = vpop.f32.mrb[43].mxu0 }
 0x1d2   :  { %1867 = vst [vmem:[%s3638_s3 + $0xa8] sm:$0xff] %v2298_v5 }
 0x1d5   :  { %v1736_v9 = vpop.f32.mrb[44].mxu0 }
 0x1d6   :  { %v2300_v28 = vadd.f32 %v1736_v9, %v1273_v17  ;;  %v2169_v11 = vpop.f32.mrb[45].mxu0 }
 0x1d7   :  { %v1739_v32 = vpop.f32.mrb[46].mxu0 }
 0x1d8   :  { %1868 = vst [vmem:[%s3638_s3 + $0xb0] sm:$0xff] %v2300_v28  ;;  %v2302_v0 = vadd.f32 %v1739_v32, %v1276_v22  ;;  %v2170_v13 = vpop.f32.mrb[47].mxu0 }
 0x1da   :  { %1869 = vst [vmem:[%s3638_s3 + $0xb8] sm:$0xff] %v2302_v0 }
 0x1dc   :  { %v1520_v16 = vpop.f32.mrb[52].mxu1 }
 0x1dd   :  { %v1744_v19 = vpop.f32.mrb[48].mxu0  ;;  %v1522_v20 = vpop.f32.mrb[53].mxu1  ;;  %v2307_v30 = vadd.f32 %v3411_v34, %v1520_v16 }
 0x1de   :  { %v2304_v35 = vadd.f32 %v1744_v19, %v1281_v24  ;;  %v2173_v23 = vpop.f32.mrb[49].mxu0  ;;  %v1523_v40 = vpop.f32.mrb[54].mxu1 }
 0x1df   :  { %v1747_v26 = vpop.f32.mrb[50].mxu0  ;;  %v1525_v29 = vpop.f32.mrb[55].mxu1  ;;  %v2309_v37 = vadd.f32 %v3411_v34, %v1523_v40 }
 0x1e0   :  { %1870 = vst [vmem:[%s3638_s3 + $0xc0] sm:$0xff] %v2304_v35  ;;  %v2306_v39 = vadd.f32 %v1747_v26, %v1284_v27  ;;  %v2174_v33 = vpop.f32.mrb[51].mxu0 }
 0x1e2   :  { %1871 = vst [vmem:[%s3638_s3 + $0xc8] sm:$0xff] %v2306_v39 }
 0x1e4   :  { %v1528_v36 = vpop.f32.mrb[56].mxu1 }
 0x1e5   :  { %v1752_v43 = vpop.f32.mrb[52].mxu0  ;;  %v1530_v31 = vpop.f32.mrb[57].mxu1  ;;  %v2311_v46 = vadd.f32 %v3411_v34, %v1528_v36 }
 0x1e6   :  { %v2308_v47 = vadd.f32 %v2307_v30, %v1752_v43  ;;  %v2177_v38 = vpop.f32.mrb[53].mxu0  ;;  %v1531_v41 = vpop.f32.mrb[58].mxu1 }
 0x1e7   :  { %v1755_v42 = vpop.f32.mrb[54].mxu0  ;;  %v1533_v44 = vpop.f32.mrb[59].mxu1  ;;  %v2313_v12 = vadd.f32 %v3411_v34, %v1531_v41 }
 0x1e8   :  { %1872 = vst [vmem:[%s3638_s3 + $0xd0] sm:$0xff] %v2308_v47  ;;  %v2310_v45 = vadd.f32 %v2309_v37, %v1755_v42  ;;  %v2178_v50 = vpop.f32.mrb[55].mxu0 }
 0x1ea   :  { %1873 = vst [vmem:[%s3638_s3 + $0xd8] sm:$0xff] %v2310_v45 }
 0x1ec   :  { %v1536_v54 = vpop.f32.mrb[60].mxu1 }
 0x1ed   :  { %v1760_v8 = vpop.f32.mrb[56].mxu0  ;;  %v1538_v48 = vpop.f32.mrb[61].mxu1  ;;  %v2315_v14 = vadd.f32 %v3411_v34, %v1536_v54 }
 0x1ee   :  { %v2312_v49 = vadd.f32 %v2311_v46, %v1760_v8  ;;  %v2181_v51 = vpop.f32.mrb[57].mxu0  ;;  %v1539_v57 = vpop.f32.mrb[62].mxu1 }
 0x1ef   :  { %v1763_v52 = vpop.f32.mrb[58].mxu0  ;;  %v1541_v61 = vpop.f32.mrb[63].mxu1  ;;  %v2317_v58 = vadd.f32 %v3411_v34, %v1539_v57 }
 0x1f0   :  { %1874 = vst [vmem:[%s3638_s3 + $0xe0] sm:$0xff] %v2312_v49  ;;  %v2314_v53 = vadd.f32 %v2313_v12, %v1763_v52  ;;  %v2182_v55 = vpop.f32.mrb[59].mxu0 }
 0x1f2   :  { %1875 = vst [vmem:[%s3638_s3 + $0xe8] sm:$0xff] %v2314_v53 }
 0x1f4   :  { %v1544_v56 = vpop.f32.mrb[64].mxu1 }
 0x1f5   :  { %v1768_v18 = vpop.f32.mrb[60].mxu0  ;;  %v1546_v2 = vpop.f32.mrb[65].mxu1  ;;  %v2319_v1 = vadd.f32 %v3411_v34, %v1544_v56 }
 0x1f6   :  { %v2316_v6 = vadd.f32 %v2315_v14, %v1768_v18  ;;  %v2185_v59 = vpop.f32.mrb[61].mxu0  ;;  %v1547_v60 = vpop.f32.mrb[66].mxu1 }
 0x1f7   :  { %v1771_v62 = vpop.f32.mrb[62].mxu0  ;;  %v1549_v63 = vpop.f32.mrb[67].mxu1  ;;  %v2321_v4 = vadd.f32 %v3411_v34, %v1547_v60 }
 0x1f8   :  { %1876 = vst [vmem:[%s3638_s3 + $0xf0] sm:$0xff] %v2316_v6  ;;  %v2318_v21 = vadd.f32 %v2317_v58, %v1771_v62  ;;  %v2186_v10 = vpop.f32.mrb[63].mxu0 }
 0x1fa   :  { %1877 = vst [vmem:[%s3638_s3 + $0xf8] sm:$0xff] %v2318_v21 }
 0x1fc   :  { %v1552_v15 = vpop.f32.mrb[68].mxu1 }
 0x1fd   :  { %v1776_v25 = vpop.f32.mrb[64].mxu0  ;;  %v1554_v3 = vpop.f32.mrb[69].mxu1  ;;  %v2323_v32 = vadd.f32 %v3411_v34, %v1552_v15 }
 0x1fe   :  { %v2320_v5 = vadd.f32 %v2319_v1, %v1776_v25  ;;  %v2189_v7 = vpop.f32.mrb[65].mxu0  ;;  %v1555_v17 = vpop.f32.mrb[70].mxu1 }
 0x1ff   :  { %v1779_v9 = vpop.f32.mrb[66].mxu0  ;;  %v1557_v22 = vpop.f32.mrb[71].mxu1  ;;  %v2325_v16 = vadd.f32 %v3411_v34, %v1555_v17 }
 0x200   :  { %1878 = vst [vmem:[%s3638_s3 + $0x100] sm:$0xff] %v2320_v5  ;;  %v2322_v28 = vadd.f32 %v2321_v4, %v1779_v9  ;;  %v2190_v11 = vpop.f32.mrb[67].mxu0 }
 0x202   :  { %1879 = vst [vmem:[%s3638_s3 + $0x108] sm:$0xff] %v2322_v28 }
 0x204   :  { %v1560_v0 = vpop.f32.mrb[72].mxu1 }
 0x205   :  { %v1784_v13 = vpop.f32.mrb[68].mxu0  ;;  %v1562_v24 = vpop.f32.mrb[73].mxu1  ;;  %v2327_v29 = vadd.f32 %v3411_v34, %v1560_v0 }
 0x206   :  { %v2324_v19 = vadd.f32 %v2323_v32, %v1784_v13  ;;  %v2193_v20 = vpop.f32.mrb[69].mxu0  ;;  %v1563_v27 = vpop.f32.mrb[74].mxu1 }
 0x207   :  { %v1787_v35 = vpop.f32.mrb[70].mxu0  ;;  %v1565_v23 = vpop.f32.mrb[75].mxu1  ;;  %v2329_v36 = vadd.f32 %v3411_v34, %v1563_v27 }
 0x208   :  { %1880 = vst [vmem:[%s3638_s3 + $0x110] sm:$0xff] %v2324_v19  ;;  %v2326_v40 = vadd.f32 %v2325_v16, %v1787_v35  ;;  %v2194_v26 = vpop.f32.mrb[71].mxu0 }
 0x20a   :  { %1881 = vst [vmem:[%s3638_s3 + $0x118] sm:$0xff] %v2326_v40 }
 0x20c   :  { %v1568_v39 = vpop.f32.mrb[76].mxu1 }
 0x20d   :  { %v1792_v33 = vpop.f32.mrb[72].mxu0  ;;  %v1570_v30 = vpop.f32.mrb[77].mxu1  ;;  %v2331_v44 = vadd.f32 %v3411_v34, %v1568_v39 }
 0x20e   :  { %v2328_v43 = vadd.f32 %v2327_v29, %v1792_v33  ;;  %v2197_v31 = vpop.f32.mrb[73].mxu0  ;;  %v1571_v37 = vpop.f32.mrb[78].mxu1 }
 0x20f   :  { %v1795_v47 = vpop.f32.mrb[74].mxu0  ;;  %v1573_v38 = vpop.f32.mrb[79].mxu1  ;;  %v2333_v54 = vadd.f32 %v3411_v34, %v1571_v37 }
 0x210   :  { %1882 = vst [vmem:[%s3638_s3 + $0x120] sm:$0xff] %v2328_v43  ;;  %v2330_v41 = vadd.f32 %v2329_v36, %v1795_v47  ;;  %v2198_v42 = vpop.f32.mrb[75].mxu0 }
 0x212   :  { %1883 = vst [vmem:[%s3638_s3 + $0x128] sm:$0xff] %v2330_v41 }
 0x214   :  { %v1576_v45 = vpop.f32.mrb[80].mxu1 }
 0x215   :  { %v1800_v50 = vpop.f32.mrb[76].mxu0  ;;  %v1578_v46 = vpop.f32.mrb[81].mxu1  ;;  %v2335_v61 = vadd.f32 %v3411_v34, %v1576_v45 }
 0x216   :  { %v2332_v8 = vadd.f32 %v2331_v44, %v1800_v50  ;;  %v2201_v48 = vpop.f32.mrb[77].mxu0  ;;  %v1579_v12 = vpop.f32.mrb[82].mxu1 }
 0x217   :  { %v1803_v49 = vpop.f32.mrb[78].mxu0  ;;  %v1581_v51 = vpop.f32.mrb[83].mxu1  ;;  %v2337_v56 = vadd.f32 %v3411_v34, %v1579_v12 }
 0x218   :  { %1884 = vst [vmem:[%s3638_s3 + $0x130] sm:$0xff] %v2332_v8  ;;  %v2334_v57 = vadd.f32 %v2333_v54, %v1803_v49  ;;  %v2202_v52 = vpop.f32.mrb[79].mxu0 }
 0x21a   :  { %1885 = vst [vmem:[%s3638_s3 + $0x138] sm:$0xff] %v2334_v57 }
 0x21c   :  { %v1584_v53 = vpop.f32.mrb[84].mxu1 }
 0x21d   :  { %v1808_v55 = vpop.f32.mrb[80].mxu0  ;;  %v1586_v14 = vpop.f32.mrb[85].mxu1  ;;  %v2339_v63 = vadd.f32 %v3411_v34, %v1584_v53 }
 0x21e   :  { %v2336_v18 = vadd.f32 %v2335_v61, %v1808_v55  ;;  %v2205_v2 = vpop.f32.mrb[81].mxu0  ;;  %v1587_v58 = vpop.f32.mrb[86].mxu1 }
 0x21f   :  { %v1811_v6 = vpop.f32.mrb[82].mxu0  ;;  %v1589_v59 = vpop.f32.mrb[87].mxu1  ;;  %v2341_v15 = vadd.f32 %v3411_v34, %v1587_v58 }
 0x220   :  { %1886 = vst [vmem:[%s3638_s3 + $0x140] sm:$0xff] %v2336_v18  ;;  %v2338_v60 = vadd.f32 %v2337_v56, %v1811_v6  ;;  %v2206_v62 = vpop.f32.mrb[83].mxu0 }
 0x222   :  { %1887 = vst [vmem:[%s3638_s3 + $0x148] sm:$0xff] %v2338_v60 }
 0x224   :  { %v1592_v21 = vpop.f32.mrb[88].mxu1 }
 0x225   :  { %v1816_v10 = vpop.f32.mrb[84].mxu0  ;;  %v1594_v1 = vpop.f32.mrb[89].mxu1  ;;  %v2343_v22 = vadd.f32 %v3411_v34, %v1592_v21 }
 0x226   :  { %v2340_v25 = vadd.f32 %v2339_v63, %v1816_v10  ;;  %v2209_v3 = vpop.f32.mrb[85].mxu0  ;;  %v1595_v4 = vpop.f32.mrb[90].mxu1 }
 0x227   :  { %v1819_v5 = vpop.f32.mrb[86].mxu0  ;;  %v1597_v7 = vpop.f32.mrb[91].mxu1  ;;  %v2345_v0 = vadd.f32 %v3411_v34, %v1595_v4 }
 0x228   :  { %1888 = vst [vmem:[%s3638_s3 + $0x150] sm:$0xff] %v2340_v25  ;;  %v2342_v17 = vadd.f32 %v2341_v15, %v1819_v5  ;;  %v2210_v9 = vpop.f32.mrb[87].mxu0 }
 0x22a   :  { %1889 = vst [vmem:[%s3638_s3 + $0x158] sm:$0xff] %v2342_v17 }
 0x22c   :  { %v1600_v28 = vpop.f32.mrb[92].mxu1 }
 0x22d   :  { %v1824_v11 = vpop.f32.mrb[88].mxu0  ;;  %v1602_v32 = vpop.f32.mrb[93].mxu1  ;;  %v2347_v23 = vadd.f32 %v3411_v34, %v1600_v28 }
 0x22e   :  { %v2344_v13 = vadd.f32 %v2343_v22, %v1824_v11  ;;  %v2213_v24 = vpop.f32.mrb[89].mxu0  ;;  %v1603_v16 = vpop.f32.mrb[94].mxu1 }
 0x22f   :  { %v1827_v19 = vpop.f32.mrb[90].mxu0  ;;  %v1605_v20 = vpop.f32.mrb[95].mxu1  ;;  %v2349_v39 = vadd.f32 %v3411_v34, %v1603_v16 }
 0x230   :  { %1890 = vst [vmem:[%s3638_s3 + $0x160] sm:$0xff] %v2344_v13  ;;  %v2346_v27 = vadd.f32 %v2345_v0, %v1827_v19  ;;  %v2214_v35 = vpop.f32.mrb[91].mxu0 }
 0x232   :  { %1891 = vst [vmem:[%s3638_s3 + $0x168] sm:$0xff] %v2346_v27 }
 0x234   :  { %v1608_v40 = vpop.f32.mrb[96].mxu1 }
 0x235   :  { %v1832_v26 = vpop.f32.mrb[92].mxu0  ;;  %v1610_v29 = vpop.f32.mrb[97].mxu1  ;;  %v2351_v38 = vadd.f32 %v3411_v34, %v1608_v40 }
 0x236   :  { %v2348_v33 = vadd.f32 %v2347_v23, %v1832_v26  ;;  %v2217_v30 = vpop.f32.mrb[93].mxu0  ;;  %v1611_v36 = vpop.f32.mrb[98].mxu1 }
 0x237   :  { %v1835_v43 = vpop.f32.mrb[94].mxu0  ;;  %v1612_v31 = vpop.f32.mrb[99].mxu1 }
 0x238   :  { %1892 = vst [vmem:[%s3638_s3 + $0x170] sm:$0xff] %v2348_v33  ;;  %v2350_v37 = vadd.f32 %v2349_v39, %v1835_v43  ;;  %v2218_v47 = vpop.f32.mrb[95].mxu0 }
 0x23a   :  { %1893 = vst [vmem:[%s3638_s3 + $0x178] sm:$0xff] %v2350_v37 }
 0x23d   :  { %v1840_v41 = vpop.f32.mrb[96].mxu0 }
 0x23e   :  { %v2352_v42 = vadd.f32 %v2351_v38, %v1840_v41  ;;  %v2221_v44 = vpop.f32.mrb[97].mxu0 }
 0x23f   :  { %v1843_v45 = vpop.f32.mrb[98].mxu0 }
 0x240   :  { %1894 = vst [vmem:[%s3638_s3 + $0x180] sm:$0xff] %v2352_v42  ;;  %v2222_v50 = vpop.f32.mrb[99].mxu0 }

// kernel: mnist_diffusion_forward.35
= control target key start
LH: loop header
LB: loop body
LE: loop exit
PB: predicated region body
PF: predicated region fallthrough
CT: control target
= control target key end

     0   :  { %v1604_v1 = vmov 0   ;;  %vm757_vm0 = vcmask 523264   ;;  %vm1606_vm1 = vmmov 0   ;;  %s2097_s1 = inlined_call_operand.vmem [shape: bf16[64,3200], index: 1, kind: input, shape index: {}]   ;;  %s2098_s0 = inlined_call_operand.vmem [shape: bf16[8,64], index: 0, kind: input, shape index: {}]   ;;  %s2099_s2 = inlined_call_operand.vmem [shape: f32[1,3200], index: 2, kind: input, shape index: {}]   ;;  %s2100_s3 = inlined_call_operand.vmem [shape: f32[8,3200], index: 3, kind: output, shape index: {}]  }
   0x1   :  { %v1456_v0 = vld [vmem:[%s2097_s1 + $0x4] ss:$100 sps:$4 sm:$0xff]   ;;  %793 = vmatprep.mubr.bf16.mxu0 %v1604_v1  ;;  %834 = vmatprep.mubr.bf16.mxu1 %v1604_v1  ;;  %v1459_v3 = vld [vmem:[%s2097_s1 + $0xcc] ss:$100 sps:$4 sm:$0xff]   ;;  %v1462_v5 = vld [vmem:[%s2097_s1 + $0x194] ss:$100 sps:$4 sm:$0xff]  }
   0x2   :  { %v1458_v2 = vld [vmem:[%s2097_s1] ss:$100 sps:$4 sm:$0xff]   ;;  %761 = vmatprep.subr.bf16.mxu0 %v1456_v0  ;;  %v1461_v4 = vld [vmem:[%s2097_s1 + $0xc8] ss:$100 sps:$4 sm:$0xff]   ;;  %v1464_v7 = vld [vmem:[%s2097_s1 + $0x190] ss:$100 sps:$4 sm:$0xff]  }
   0x3   :  { %762 = vmatpush1.bf16.msra.mxu0 %v1458_v2  ;;  %v1467_v6 = vld [vmem:[%s2097_s1 + $0xc] ss:$100 sps:$4 sm:$0xff]   ;;  %v1471_v9 = vld [vmem:[%s2097_s1 + $0xd4] ss:$100 sps:$4 sm:$0xff]   ;;  %v1465_v10 = vld [vmem:[%s2097_s1 + $0x25c] ss:$100 sps:$4 sm:$0xff]  }
   0x4   :  { %763 = vmatprep.subr.bf16.mxu0 %v1459_v3  ;;  %v1470_v8 = vld [vmem:[%s2097_s1 + $0x8] ss:$100 sps:$4 sm:$0xff]   ;;  %802 = vmatprep.subr.bf16.mxu1 %v1467_v6  ;;  %v1476_v11 = vld [vmem:[%s2097_s1 + $0xd0] ss:$100 sps:$4 sm:$0xff]   ;;  %v1477_v12 = vld [vmem:[%s2097_s1 + $0x19c] ss:$100 sps:$4 sm:$0xff]  }
   0x5   :  { %803 = vmatpush1.bf16.msra.mxu1 %v1470_v8  ;;  %v1469_v13 = vld [vmem:[%s2097_s1 + $0x258] ss:$100 sps:$4 sm:$0xff]   ;;  %v1483_v16 = vld [vmem:[%s2097_s1 + $0x264] ss:$100 sps:$4 sm:$0xff]   ;;  %v1680_v17 = vld [vmem:[%s2098_s0] sm:$0xf] }
   0x6   :  { %804 = vmatprep.subr.bf16.mxu1 %v1471_v9  ;;  %v1475_v14 = vld [vmem:[%s2097_s1 + $0x14] ss:$100 sps:$4 sm:$0xff]   ;;  %v1481_v19 = vld [vmem:[%s2097_s1 + $0xdc] ss:$100 sps:$4 sm:$0xff]   ;;  %v1487_v23 = vld [vmem:[%s2097_s1 + $0x1a4] ss:$100 sps:$4 sm:$0xff]  }
   0x7   :  { %764 = vmatpush1.bf16.msra.mxu0 %v1461_v4  ;;  %v1482_v15 = vld [vmem:[%s2097_s1 + $0x198] ss:$100 sps:$4 sm:$0xff]   ;;  %v1473_v18 = vld [vmem:[%s2097_s1 + $0x10] ss:$100 sps:$4 sm:$0xff]   ;;  %v1488_v20 = vld [vmem:[%s2097_s1 + $0x260] ss:$100 sps:$4 sm:$0xff]  }
   0x8   :  { %765 = vmatprep.subr.bf16.mxu0 %v1462_v5  ;;  %v1494_v21 = vld [vmem:[%s2097_s1 + $0x1c] ss:$100 sps:$4 sm:$0xff]   ;;  %v1497_v25 = vld [vmem:[%s2097_s1 + $0xe4] ss:$100 sps:$4 sm:$0xff]   ;;  %v1491_v27 = vld [vmem:[%s2097_s1 + $0x26c] ss:$100 sps:$4 sm:$0xff]  }
   0x9   :  { %805 = vmatpush1.bf16.msra.mxu1 %v1476_v11  ;;  %v1479_v22 = vld [vmem:[%s2097_s1 + $0xd8] ss:$100 sps:$4 sm:$0xff]   ;;  %v1485_v26 = vld [vmem:[%s2097_s1 + $0x1a0] ss:$100 sps:$4 sm:$0xff]   ;;  %v1503_v29 = vld [vmem:[%s2097_s1 + $0x1ac] ss:$100 sps:$4 sm:$0xff]  }
   0xa   :  { %806 = vmatprep.subr.bf16.mxu1 %v1477_v12  ;;  %v1492_v24 = vld [vmem:[%s2097_s1 + $0x18] ss:$100 sps:$4 sm:$0xff]   ;;  %v1495_v28 = vld [vmem:[%s2097_s1 + $0xe0] ss:$100 sps:$4 sm:$0xff]   ;;  %v1489_v30 = vld [vmem:[%s2097_s1 + $0x268] ss:$100 sps:$4 sm:$0xff]  }
   0xb   :  { %766 = vmatpush1.bf16.msra.mxu0 %v1464_v7  ;;  %v1500_v31 = vld [vmem:[%s2097_s1 + $0x24] ss:$100 sps:$4 sm:$0xff]   ;;  %v1509_v33 = vld [vmem:[%s2097_s1 + $0x274] ss:$100 sps:$4 sm:$0xff]   ;;  %v1506_v35 = vld [vmem:[%s2097_s1 + $0xec] ss:$100 sps:$4 sm:$0xff]  }
   0xc   :  { %767 = vmatprep.subr.bf16.mxu0 %v1465_v10  ;;  %v1501_v32 = vld [vmem:[%s2097_s1 + $0x1a8] ss:$100 sps:$4 sm:$0xff]   ;;  %v1498_v34 = vld [vmem:[%s2097_s1 + $0x20] ss:$100 sps:$4 sm:$0xff]   ;;  %v1507_v36 = vld [vmem:[%s2097_s1 + $0x270] ss:$100 sps:$4 sm:$0xff]  }
   0xd   :  { %807 = vmatpush1.bf16.msra.mxu1 %v1482_v15  ;;  %v1518_v37 = vld [vmem:[%s2097_s1 + $0x2c] ss:$100 sps:$4 sm:$0xff]   ;;  %v1512_v39 = vld [vmem:[%s2097_s1 + $0x1b4] ss:$100 sps:$4 sm:$0xff]   ;;  %v1515_v43 = vld [vmem:[%s2097_s1 + $0x27c] ss:$100 sps:$4 sm:$0xff]  }
   0xe   :  { %808 = vmatprep.subr.bf16.mxu1 %v1483_v16  ;;  %v1504_v38 = vld [vmem:[%s2097_s1 + $0xe8] ss:$100 sps:$4 sm:$0xff]   ;;  %v1521_v41 = vld [vmem:[%s2097_s1 + $0xf4] ss:$100 sps:$4 sm:$0xff]   ;;  %v1527_v45 = vld [vmem:[%s2097_s1 + $0x1bc] ss:$100 sps:$4 sm:$0xff]  }
   0xf   :  { %768 = vmatpush1.bf16.msra.mxu0 %v1469_v13  ;;  %v1516_v40 = vld [vmem:[%s2097_s1 + $0x28] ss:$100 sps:$4 sm:$0xff]   ;;  %v1510_v42 = vld [vmem:[%s2097_s1 + $0x1b0] ss:$100 sps:$4 sm:$0xff]   ;;  %v1513_v46 = vld [vmem:[%s2097_s1 + $0x278] ss:$100 sps:$4 sm:$0xff]  }
  0x10   :  { %843 = vmatprep.subr.bf16.mxu0 %v1475_v14  ;;  %v1519_v44 = vld [vmem:[%s2097_s1 + $0xf0] ss:$100 sps:$4 sm:$0xff]   ;;  %v1525_v48 = vld [vmem:[%s2097_s1 + $0x1b8] ss:$100 sps:$4 sm:$0xff]   ;;  %v1533_v49 = vld [vmem:[%s2097_s1 + $0x284] ss:$100 sps:$4 sm:$0xff]  }
  0x11   :  { %809 = vmatpush1.bf16.msra.mxu1 %v1488_v20  ;;  %v1524_v47 = vld [vmem:[%s2097_s1 + $0x34] ss:$100 sps:$4 sm:$0xff]   ;;  %v1530_v51 = vld [vmem:[%s2097_s1 + $0xfc] ss:$100 sps:$4 sm:$0xff]   ;;  %v1536_v55 = vld [vmem:[%s2097_s1 + $0x1c4] ss:$100 sps:$4 sm:$0xff]  }
  0x12   :  { %1423 = vmatmul.mubr.msk.bf16.vlgmr.msra.gmra.mrb[0].mxu0 %vm757_vm0, %v1680_v17  ;;  %884 = vmatprep.subr.bf16.mxu1 %v1494_v21  ;;  %v1522_v50 = vld [vmem:[%s2097_s1 + $0x30] ss:$100 sps:$4 sm:$0xff]   ;;  %v1531_v52 = vld [vmem:[%s2097_s1 + $0x280] ss:$100 sps:$4 sm:$0xff]   ;;  %v1528_v54 = vld [vmem:[%s2097_s1 + $0xf8] ss:$100 sps:$4 sm:$0xff]  }
  0x13   :  { %844 = vmatpush1.bf16.msra.mxu0 %v1473_v18  ;;  %875 = vmatprep.mubr.bf16.mxu0 %v1604_v1  ;;  %v1542_v53 = vld [vmem:[%s2097_s1 + $0x3c] ss:$100 sps:$4 sm:$0xff]   ;;  %v1545_v57 = vld [vmem:[%s2097_s1 + $0x104] ss:$100 sps:$4 sm:$0xff]   ;;  %v1539_v59 = vld [vmem:[%s2097_s1 + $0x28c] ss:$100 sps:$4 sm:$0xff]  }
  0x14   :  { %845 = vmatprep.subr.bf16.mxu0 %v1481_v19  ;;  %1424 = vmatmul.mubr.msk.bf16.vlgmr.msra.gmra.mrb[0].mxu1 %vm757_vm0, %v1680_v17  ;;  %v1540_v56 = vld [vmem:[%s2097_s1 + $0x38] ss:$100 sps:$4 sm:$0xff]   ;;  %v1534_v58 = vld [vmem:[%s2097_s1 + $0x1c0] ss:$100 sps:$4 sm:$0xff]   ;;  %v1551_v61 = vld [vmem:[%s2097_s1 + $0x1cc] ss:$100 sps:$4 sm:$0xff]  }
  0x15   :  { %885 = vmatpush1.bf16.msra.mxu1 %v1492_v24  ;;  %916 = vmatprep.mubr.bf16.mxu1 %v1604_v1  ;;  %v1543_v60 = vld [vmem:[%s2097_s1 + $0x100] ss:$100 sps:$4 sm:$0xff]   ;;  %v1537_v62 = vld [vmem:[%s2097_s1 + $0x288] ss:$100 sps:$4 sm:$0xff]   ;;  %v1557_v2 = vld [vmem:[%s2097_s1 + $0x294] ss:$100 sps:$4 sm:$0xff]  }
  0x16   :  { %886 = vmatprep.subr.bf16.mxu1 %v1497_v25  ;;  %v1548_v63 = vld [vmem:[%s2097_s1 + $0x44] ss:$100 sps:$4 sm:$0xff]   ;;  %v1554_v4 = vld [vmem:[%s2097_s1 + $0x10c] ss:$100 sps:$4 sm:$0xff]   ;;  %v1560_v8 = vld [vmem:[%s2097_s1 + $0x1d4] ss:$100 sps:$4 sm:$0xff]  }
  0x17   :  { %846 = vmatpush1.bf16.msra.mxu0 %v1479_v22  ;;  %v1549_v0 = vld [vmem:[%s2097_s1 + $0x1c8] ss:$100 sps:$4 sm:$0xff]   ;;  %v1546_v3 = vld [vmem:[%s2097_s1 + $0x40] ss:$100 sps:$4 sm:$0xff]   ;;  %v1555_v5 = vld [vmem:[%s2097_s1 + $0x290] ss:$100 sps:$4 sm:$0xff]  }
  0x18   :  { %847 = vmatprep.subr.bf16.mxu0 %v1487_v23  ;;  %v1566_v6 = vld [vmem:[%s2097_s1 + $0x4c] ss:$100 sps:$4 sm:$0xff]   ;;  %v1569_v10 = vld [vmem:[%s2097_s1 + $0x114] ss:$100 sps:$4 sm:$0xff]   ;;  %v1563_v12 = vld [vmem:[%s2097_s1 + $0x29c] ss:$100 sps:$4 sm:$0xff]  }
  0x19   :  { %887 = vmatpush1.bf16.msra.mxu1 %v1495_v28  ;;  %v1552_v7 = vld [vmem:[%s2097_s1 + $0x108] ss:$100 sps:$4 sm:$0xff]   ;;  %v1558_v11 = vld [vmem:[%s2097_s1 + $0x1d0] ss:$100 sps:$4 sm:$0xff]   ;;  %v1575_v14 = vld [vmem:[%s2097_s1 + $0x1dc] ss:$100 sps:$4 sm:$0xff]  }
  0x1a   :  { %888 = vmatprep.subr.bf16.mxu1 %v1503_v29  ;;  %v1564_v9 = vld [vmem:[%s2097_s1 + $0x48] ss:$100 sps:$4 sm:$0xff]   ;;  %v1567_v13 = vld [vmem:[%s2097_s1 + $0x110] ss:$100 sps:$4 sm:$0xff]   ;;  %v1561_v15 = vld [vmem:[%s2097_s1 + $0x298] ss:$100 sps:$4 sm:$0xff]  }
  0x1b   :  { %848 = vmatpush1.bf16.msra.mxu0 %v1485_v26  ;;  %v1572_v16 = vld [vmem:[%s2097_s1 + $0x54] ss:$100 sps:$4 sm:$0xff]   ;;  %v1581_v19 = vld [vmem:[%s2097_s1 + $0x2a4] ss:$100 sps:$4 sm:$0xff]   ;;  %v1578_v21 = vld [vmem:[%s2097_s1 + $0x11c] ss:$100 sps:$4 sm:$0xff]  }
  0x1c   :  { %849 = vmatprep.subr.bf16.mxu0 %v1491_v27  ;;  %v1573_v18 = vld [vmem:[%s2097_s1 + $0x1d8] ss:$100 sps:$4 sm:$0xff]   ;;  %v1570_v20 = vld [vmem:[%s2097_s1 + $0x50] ss:$100 sps:$4 sm:$0xff]   ;;  %v1579_v22 = vld [vmem:[%s2097_s1 + $0x2a0] ss:$100 sps:$4 sm:$0xff]  }
  0x1d   :  { %889 = vmatpush1.bf16.msra.mxu1 %v1501_v32  ;;  %v1590_v23 = vld [vmem:[%s2097_s1 + $0x5c] ss:$100 sps:$4 sm:$0xff]   ;;  %v1584_v25 = vld [vmem:[%s2097_s1 + $0x1e4] ss:$100 sps:$4 sm:$0xff]   ;;  %v1587_v29 = vld [vmem:[%s2097_s1 + $0x2ac] ss:$100 sps:$4 sm:$0xff]  }
  0x1e   :  { %890 = vmatprep.subr.bf16.mxu1 %v1509_v33  ;;  %v1576_v24 = vld [vmem:[%s2097_s1 + $0x118] ss:$100 sps:$4 sm:$0xff]   ;;  %v1593_v27 = vld [vmem:[%s2097_s1 + $0x124] ss:$100 sps:$4 sm:$0xff]  }
  0x1f   :  { %850 = vmatpush1.bf16.msra.mxu0 %v1489_v30  ;;  %v1588_v26 = vld [vmem:[%s2097_s1 + $0x58] ss:$100 sps:$4 sm:$0xff]   ;;  %v1582_v28 = vld [vmem:[%s2097_s1 + $0x1e0] ss:$100 sps:$4 sm:$0xff]   ;;  %v1585_v32 = vld [vmem:[%s2097_s1 + $0x2a8] ss:$100 sps:$4 sm:$0xff]  }
  0x20   :  { %925 = vmatprep.subr.bf16.mxu0 %v1500_v31  ;;  %v1591_v30 = vld [vmem:[%s2097_s1 + $0x120] ss:$100 sps:$4 sm:$0xff]   ;;  %v1597_v31 = vld [vmem:[%s2097_s1 + $0x1ec] ss:$100 sps:$4 sm:$0xff]  }
  0x21   :  { %891 = vmatpush1.bf16.msra.mxu1 %v1507_v36  ;;  %v1595_v33 = vld [vmem:[%s2097_s1 + $0x1e8] ss:$100 sps:$4 sm:$0xff]   ;;  %v1599_v36 = vld [vmem:[%s2097_s1 + $0x2b0] ss:$100 sps:$4 sm:$0xff]  }
  0x22   :  { %1425 = vmatmul.mubr.msk.bf16.vlgmr.msra.gmra.mrb[4].mxu0 %vm757_vm0, %v1680_v17  ;;  %966 = vmatprep.subr.bf16.mxu1 %v1518_v37  ;;  %v1598_v37 = vld [vmem:[%s2097_s1 + $0x128] ss:$100 sps:$4 sm:$0xff]  }
  0x23   :  { %926 = vmatpush1.bf16.msra.mxu0 %v1498_v34  ;;  %957 = vmatprep.mubr.bf16.mxu0 %v1604_v1  ;;  %v1601_v34 = vld [vmem:[%s2097_s1 + $0x2b4] ss:$100 sps:$4 sm:$0xff]  }
  0x24   :  { %927 = vmatprep.subr.bf16.mxu0 %v1506_v35  ;;  %1426 = vmatmul.mubr.msk.bf16.vlgmr.msra.gmra.mrb[4].mxu1 %vm757_vm0, %v1680_v17  ;;  %v1605_v35 = vmov 0.0  }
  0x25   :  { %967 = vmatpush1.bf16.msra.mxu1 %v1516_v40  ;;  %998 = vmatprep.mubr.bf16.mxu1 %v1604_v1  ;;  %v128_v40 = vlaneseq }
  0x26   :  { %968 = vmatprep.subr.bf16.mxu1 %v1521_v41 }
  0x27   :  { %928 = vmatpush1.bf16.msra.mxu0 %v1504_v38  ;;  %v1602_v38 = vld [vmem:[%s2097_s1 + $0x1f0] ss:$100 sps:$4 sm:$0xff]   ;;  %v129_v41 = vshrl.u32 %v128_v40, 7 }
  0x28   :  { %929 = vmatprep.subr.bf16.mxu0 %v1512_v39  ;;  %v1603_v39 = vld [vmem:[%s2097_s1 + $0x2b8] ss:$100 sps:$4 sm:$0xff]  }
  0x29   :  { %969 = vmatpush1.bf16.msra.mxu1 %v1519_v44  ;;  %v1975_v44 = vsub.s32 1, %v129_v41 }
  0x2a   :  { %970 = vmatprep.subr.bf16.mxu1 %v1527_v45 }
  0x2b   :  { %930 = vmatpush1.bf16.msra.mxu0 %v1510_v42  ;;  %v1970_v42 = vsub.s32 0, %v129_v41 }
  0x2c   :  { %931 = vmatprep.subr.bf16.mxu0 %v1515_v43  ;;  %v120_v43 = vld [vmem:[%s2099_s2] sm:$0xff] }
  0x2d   :  { %971 = vmatpush1.bf16.msra.mxu1 %v1525_v48  ;;  %v131_v45 = vrot.slane %v120_v43, %v1970_v42  ;;  %v1981_v48 = vsub.s32 3, %v129_v41 }
  0x2e   :  { %972 = vmatprep.subr.bf16.mxu1 %v1533_v49 }
  0x2f   :  { %932 = vmatpush1.bf16.msra.mxu0 %v1513_v46  ;;  %v135_v46 = vrot.slane %v120_v43, %v1975_v44 }
  0x30   :  { %1007 = vmatprep.subr.bf16.mxu0 %v1524_v47  ;;  %v1979_v47 = vsub.s32 2, %v129_v41 }
  0x31   :  { %973 = vmatpush1.bf16.msra.mxu1 %v1531_v52 }
  0x32   :  { %1427 = vmatmul.mubr.msk.bf16.vlgmr.msra.gmra.mrb[8].mxu0 %vm757_vm0, %v1680_v17  ;;  %1048 = vmatprep.subr.bf16.mxu1 %v1542_v53  ;;  %v139_v53 = vrot.slane %v120_v43, %v1979_v47 }
  0x33   :  { %1008 = vmatpush1.bf16.msra.mxu0 %v1522_v50  ;;  %1039 = vmatprep.mubr.bf16.mxu0 %v1604_v1 }
  0x34   :  { %1009 = vmatprep.subr.bf16.mxu0 %v1530_v51  ;;  %1428 = vmatmul.mubr.msk.bf16.vlgmr.msra.gmra.mrb[8].mxu1 %vm757_vm0, %v1680_v17 }
  0x35   :  { %1049 = vmatpush1.bf16.msra.mxu1 %v1540_v56  ;;  %1080 = vmatprep.mubr.bf16.mxu1 %v1604_v1 }
  0x36   :  { %1050 = vmatprep.subr.bf16.mxu1 %v1545_v57 }
  0x37   :  { %1010 = vmatpush1.bf16.msra.mxu0 %v1528_v54 }
  0x38   :  { %1011 = vmatprep.subr.bf16.mxu0 %v1536_v55  ;;  %v143_v55 = vrot.slane %v120_v43, %v1981_v48 }
  0x39   :  { %1051 = vmatpush1.bf16.msra.mxu1 %v1543_v60 }
  0x3a   :  { %1052 = vmatprep.subr.bf16.mxu1 %v1551_v61 }
  0x3b   :  { %1012 = vmatpush1.bf16.msra.mxu0 %v1534_v58 }
  0x3c   :  { %1013 = vmatprep.subr.bf16.mxu0 %v1539_v59 }
  0x3d   :  { %1053 = vmatpush1.bf16.msra.mxu1 %v1549_v0 }
  0x3e   :  { %1054 = vmatprep.subr.bf16.mxu1 %v1557_v2 }
  0x3f   :  { %1014 = vmatpush1.bf16.msra.mxu0 %v1537_v62  ;;  %v1997_v62 = vsub.s32 4, %v129_v41 }
  0x40   :  { %1089 = vmatprep.subr.bf16.mxu0 %v1548_v63  ;;  %v1999_v63 = vsub.s32 5, %v129_v41 }
  0x41   :  { %1055 = vmatpush1.bf16.msra.mxu1 %v1555_v5  ;;  %v147_v0 = vrot.slane %v120_v43, %v1997_v62 }
  0x42   :  { %1429 = vmatmul.mubr.msk.bf16.vlgmr.msra.gmra.mrb[12].mxu0 %vm757_vm0, %v1680_v17  ;;  %1130 = vmatprep.subr.bf16.mxu1 %v1566_v6  ;;  %v151_v2 = vrot.slane %v120_v43, %v1999_v63 }
  0x43   :  { %1090 = vmatpush1.bf16.msra.mxu0 %v1546_v3  ;;  %1121 = vmatprep.mubr.bf16.mxu0 %v1604_v1  ;;  %v2003_v3 = vsub.s32 6, %v129_v41 }
  0x44   :  { %1091 = vmatprep.subr.bf16.mxu0 %v1554_v4  ;;  %1430 = vmatmul.mubr.msk.bf16.vlgmr.msra.gmra.mrb[12].mxu1 %vm757_vm0, %v1680_v17  ;;  %v2005_v4 = vsub.s32 7, %v129_v41 }
  0x45   :  { %1131 = vmatpush1.bf16.msra.mxu1 %v1564_v9  ;;  %1162 = vmatprep.mubr.bf16.mxu1 %v1604_v1 }
  0x46   :  { %1132 = vmatprep.subr.bf16.mxu1 %v1569_v10  ;;  %v155_v10 = vrot.slane %v120_v43, %v2003_v3 }
  0x47   :  { %1092 = vmatpush1.bf16.msra.mxu0 %v1552_v7 }
  0x48   :  { %1093 = vmatprep.subr.bf16.mxu0 %v1560_v8 }
  0x49   :  { %1133 = vmatpush1.bf16.msra.mxu1 %v1567_v13 }
  0x4a   :  { %1134 = vmatprep.subr.bf16.mxu1 %v1575_v14 }
  0x4b   :  { %1094 = vmatpush1.bf16.msra.mxu0 %v1558_v11 }
  0x4c   :  { %1095 = vmatprep.subr.bf16.mxu0 %v1563_v12  ;;  %v159_v12 = vrot.slane %v120_v43, %v2005_v4 }
  0x4d   :  { %1135 = vmatpush1.bf16.msra.mxu1 %v1573_v18 }
  0x4e   :  { %1136 = vmatprep.subr.bf16.mxu1 %v1581_v19 }
  0x4f   :  { %1096 = vmatpush1.bf16.msra.mxu0 %v1561_v15 }
  0x50   :  { %1171 = vmatprep.subr.bf16.mxu0 %v1572_v16 }
  0x51   :  { %1137 = vmatpush1.bf16.msra.mxu1 %v1579_v22 }
  0x52   :  { %1431 = vmatmul.mubr.msk.bf16.vlgmr.msra.gmra.mrb[16].mxu0 %vm757_vm0, %v1680_v17  ;;  %1212 = vmatprep.subr.bf16.mxu1 %v1590_v23 }
  0x53   :  { %1172 = vmatpush1.bf16.msra.mxu0 %v1570_v20  ;;  %1203 = vmatprep.mubr.bf16.mxu0 %v1604_v1  ;;  %v121_v20 = vld [vmem:[%s2099_s2 + $0x8] sm:$0xff] }
  0x54   :  { %1173 = vmatprep.subr.bf16.mxu0 %v1578_v21  ;;  %1432 = vmatmul.mubr.msk.bf16.vlgmr.msra.gmra.mrb[16].mxu1 %vm757_vm0, %v1680_v17  ;;  %v163_v21 = vrot.slane %v121_v20, %v1970_v42  ;;  %v167_v22 = vrot.slane %v121_v20, %v1975_v44 }
  0x55   :  { %1213 = vmatpush1.bf16.msra.mxu1 %v1588_v26  ;;  %1244 = vmatprep.mubr.bf16.mxu1 %v1604_v1  ;;  %v1594_v1 = vld [vmem:[%s2097_s1 + $0x60] ss:$100 sps:$4 sm:$0xff]  }
  0x56   :  { %1214 = vmatprep.subr.bf16.mxu1 %v1593_v27 }
  0x57   :  { %1174 = vmatpush1.bf16.msra.mxu0 %v1576_v24 }
  0x58   :  { %1175 = vmatprep.subr.bf16.mxu0 %v1584_v25 }
  0x59   :  { %1215 = vmatpush1.bf16.msra.mxu1 %v1591_v30  ;;  %v175_v30 = vrot.slane %v121_v20, %v1981_v48 }
  0x5a   :  { %1216 = vmatprep.subr.bf16.mxu1 %v1597_v31 }
  0x5b   :  { %1176 = vmatpush1.bf16.msra.mxu0 %v1582_v28  ;;  %v171_v28 = vrot.slane %v121_v20, %v1979_v47 }
  0x5c   :  { %1177 = vmatprep.subr.bf16.mxu0 %v1587_v29 }
  0x5d   :  { %1217 = vmatpush1.bf16.msra.mxu1 %v1595_v33 }
  0x5e   :  { %1218 = vmatprep.subr.bf16.mxu1 %v1601_v34 }
  0x5f   :  { %1178 = vmatpush1.bf16.msra.mxu0 %v1585_v32 }
  0x60   :  { %1441 = vmatprep.subr.bf16.mxu0 %v1605_v35 }
  0x61   :  { %1219 = vmatpush1.bf16.msra.mxu1 %v1599_v36  ;;  %v179_v36 = vrot.slane %v121_v20, %v1997_v62 }
  0x62   :  { %1433 = vmatmul.mubr.msk.bf16.vlgmr.msra.gmra.mrb[20].mxu0 %vm757_vm0, %v1680_v17 }
  0x63   :  { %1442 = vmatpush3.bf16.msra.mxu0 %v1594_v1  ;;  %1449 = vmatprep.mubr.msk.bf16.mxu0 %vm1606_vm1, %v1605_v35 }
  0x64   :  { %1443 = vmatprep.subr.bf16.mxu0 %v1605_v35  ;;  %1434 = vmatmul.mubr.msk.bf16.vlgmr.msra.gmra.mrb[20].mxu1 %vm757_vm0, %v1680_v17 }
  0x67   :  { %1444 = vmatpush3.bf16.msra.mxu0 %v1598_v37  ;;  %v183_v37 = vrot.slane %v121_v20, %v1999_v63 }
  0x68   :  { %1445 = vmatprep.subr.bf16.mxu0 %v1605_v35 }
  0x6b   :  { %1446 = vmatpush3.bf16.msra.mxu0 %v1602_v38 }
  0x6c   :  { %1447 = vmatprep.subr.bf16.mxu0 %v1605_v35 }
  0x6f   :  { %1448 = vmatpush3.bf16.msra.mxu0 %v1603_v39 }
  0x72   :  { %1450 = vmatmul.mubr.msk.bf16.vlgmr.msra.gmra.mrb[24].mxu0 %vm757_vm0, %v1680_v17 }
  0xe5   :  { %v795_v49 = vpop.f32.mrb[0].mxu0 }
  0xe6   :  { %v796_v17 = vadd.f32 %v795_v49, %v131_v45  ;;  %v797_v50 = vpop.f32.mrb[1].mxu0  ;;  %v187_v45 = vrot.slane %v121_v20, %v2003_v3  ;;  %v191_v49 = vrot.slane %v121_v20, %v2005_v4 }
  0xe7   :  { %v798_v51 = vadd.f32 %v797_v50, %v135_v46  ;;  %v799_v52 = vpop.f32.mrb[2].mxu0  ;;  %v836_v56 = vpop.f32.mrb[0].mxu1 }
  0xe8   :  { %1293 = vst [vmem:[%s2100_s3] sm:$0xff] %v796_v17  ;;  %v800_v54 = vpop.f32.mrb[3].mxu0  ;;  %v837_v57 = vadd.f32 %v836_v56, %v139_v53  ;;  %v838_v58 = vpop.f32.mrb[1].mxu1 }
  0xe9   :  { %1294 = vst [vmem:[%s2100_s3 + $0x8] sm:$0xff] %v798_v51  ;;  %v839_v59 = vadd.f32 %v838_v58, %v143_v55  ;;  %v840_v60 = vpop.f32.mrb[2].mxu1  ;;  %v122_v55 = vld [vmem:[%s2099_s2 + $0x10] sm:$0xff] }
  0xea   :  { %1295 = vst [vmem:[%s2100_s3 + $0x10] sm:$0xff] %v837_v57  ;;  %v841_v61 = vpop.f32.mrb[3].mxu1  ;;  %v195_v56 = vrot.slane %v122_v55, %v1970_v42  ;;  %v199_v57 = vrot.slane %v122_v55, %v1975_v44 }
  0xeb   :  { %1296 = vst [vmem:[%s2100_s3 + $0x18] sm:$0xff] %v839_v59 }
  0xf5   :  { %v877_v5 = vpop.f32.mrb[4].mxu0 }
  0xf6   :  { %v878_v6 = vadd.f32 %v877_v5, %v147_v0  ;;  %v879_v7 = vpop.f32.mrb[5].mxu0 }
  0xf7   :  { %v880_v8 = vadd.f32 %v879_v7, %v151_v2  ;;  %v881_v9 = vpop.f32.mrb[6].mxu0  ;;  %v918_v13 = vpop.f32.mrb[4].mxu1  ;;  %v203_v2 = vrot.slane %v122_v55, %v1979_v47 }
  0xf8   :  { %1297 = vst [vmem:[%s2100_s3 + $0x20] sm:$0xff] %v878_v6  ;;  %v882_v11 = vpop.f32.mrb[7].mxu0  ;;  %v919_v14 = vadd.f32 %v918_v13, %v155_v10  ;;  %v920_v15 = vpop.f32.mrb[5].mxu1  ;;  %v207_v6 = vrot.slane %v122_v55, %v1981_v48  ;;  %v211_v48 = vrot.slane %v122_v55, %v1997_v62  ;;  %v215_v10 = vrot.slane %v122_v55, %v1999_v63 }
  0xf9   :  { %1298 = vst [vmem:[%s2100_s3 + $0x28] sm:$0xff] %v880_v8  ;;  %v921_v16 = vadd.f32 %v920_v15, %v159_v12  ;;  %v922_v18 = vpop.f32.mrb[6].mxu1 }
  0xfa   :  { %1299 = vst [vmem:[%s2100_s3 + $0x30] sm:$0xff] %v919_v14  ;;  %v923_v19 = vpop.f32.mrb[7].mxu1 }
  0xfb   :  { %1300 = vst [vmem:[%s2100_s3 + $0x38] sm:$0xff] %v921_v16  ;;  %v219_v16 = vrot.slane %v122_v55, %v2003_v3  ;;  %v223_v19 = vrot.slane %v122_v55, %v2005_v4  ;;  %v1322_v4 = vld [vmem:[%s2099_s2 + $0x18] ss:$0 sm:$0xff] }
 0x105   :  { %v959_v23 = vpop.f32.mrb[8].mxu0 }
 0x106   :  { %v960_v24 = vadd.f32 %v959_v23, %v163_v21  ;;  %v961_v25 = vpop.f32.mrb[9].mxu0 }
 0x107   :  { %v962_v26 = vadd.f32 %v961_v25, %v167_v22  ;;  %v963_v27 = vpop.f32.mrb[10].mxu0  ;;  %v1000_v31 = vpop.f32.mrb[8].mxu1 }
 0x108   :  { %1301 = vst [vmem:[%s2100_s3 + $0x40] sm:$0xff] %v960_v24  ;;  %v964_v29 = vpop.f32.mrb[11].mxu0  ;;  %v1001_v32 = vadd.f32 %v1000_v31, %v171_v28  ;;  %v1002_v33 = vpop.f32.mrb[9].mxu1 }
 0x109   :  { %1302 = vst [vmem:[%s2100_s3 + $0x48] sm:$0xff] %v962_v26  ;;  %v1003_v34 = vadd.f32 %v1002_v33, %v175_v30  ;;  %v1004_v1 = vpop.f32.mrb[10].mxu1 }
 0x10a   :  { %1303 = vst [vmem:[%s2100_s3 + $0x50] sm:$0xff] %v1001_v32  ;;  %v1005_v35 = vpop.f32.mrb[11].mxu1 }
 0x10b   :  { %1304 = vst [vmem:[%s2100_s3 + $0x58] sm:$0xff] %v1003_v34 }
 0x115   :  { %v1041_v38 = vpop.f32.mrb[12].mxu0 }
 0x116   :  { %v1042_v39 = vadd.f32 %v1041_v38, %v179_v36  ;;  %v1043_v40 = vpop.f32.mrb[13].mxu0 }
 0x117   :  { %v1044_v41 = vadd.f32 %v1043_v40, %v183_v37  ;;  %v1045_v43 = vpop.f32.mrb[14].mxu0  ;;  %v1082_v17 = vpop.f32.mrb[12].mxu1 }
 0x118   :  { %1305 = vst [vmem:[%s2100_s3 + $0x60] sm:$0xff] %v1042_v39  ;;  %v1046_v46 = vpop.f32.mrb[15].mxu0  ;;  %v1083_v50 = vadd.f32 %v1082_v17, %v187_v45  ;;  %v1084_v51 = vpop.f32.mrb[13].mxu1 }
 0x119   :  { %1306 = vst [vmem:[%s2100_s3 + $0x68] sm:$0xff] %v1044_v41  ;;  %v1085_v52 = vadd.f32 %v1084_v51, %v191_v49  ;;  %v1086_v53 = vpop.f32.mrb[14].mxu1 }
 0x11a   :  { %1307 = vst [vmem:[%s2100_s3 + $0x70] sm:$0xff] %v1083_v50  ;;  %v1087_v54 = vpop.f32.mrb[15].mxu1 }
 0x11b   :  { %1308 = vst [vmem:[%s2100_s3 + $0x78] sm:$0xff] %v1085_v52 }
 0x125   :  { %v1123_v58 = vpop.f32.mrb[16].mxu0 }
 0x126   :  { %v1124_v59 = vadd.f32 %v1123_v58, %v195_v56  ;;  %v1125_v60 = vpop.f32.mrb[17].mxu0 }
 0x127   :  { %v1126_v61 = vadd.f32 %v1125_v60, %v199_v57  ;;  %v1127_v0 = vpop.f32.mrb[18].mxu0  ;;  %v1164_v42 = vpop.f32.mrb[16].mxu1 }
 0x128   :  { %1309 = vst [vmem:[%s2100_s3 + $0x80] sm:$0xff] %v1124_v59  ;;  %v1128_v5 = vpop.f32.mrb[19].mxu0  ;;  %v1165_v44 = vadd.f32 %v1164_v42, %v203_v2  ;;  %v1166_v7 = vpop.f32.mrb[17].mxu1 }
 0x129   :  { %1310 = vst [vmem:[%s2100_s3 + $0x88] sm:$0xff] %v1126_v61  ;;  %v1167_v8 = vadd.f32 %v1166_v7, %v207_v6  ;;  %v1168_v9 = vpop.f32.mrb[18].mxu1 }
 0x12a   :  { %1311 = vst [vmem:[%s2100_s3 + $0x90] sm:$0xff] %v1165_v44  ;;  %v1169_v47 = vpop.f32.mrb[19].mxu1 }
 0x12b   :  { %1312 = vst [vmem:[%s2100_s3 + $0x98] sm:$0xff] %v1167_v8 }
 0x135   :  { %v1205_v11 = vpop.f32.mrb[20].mxu0 }
 0x136   :  { %v1206_v12 = vadd.f32 %v1205_v11, %v211_v48  ;;  %v1207_v13 = vpop.f32.mrb[21].mxu0 }
 0x137   :  { %v1208_v14 = vadd.f32 %v1207_v13, %v215_v10  ;;  %v1209_v15 = vpop.f32.mrb[22].mxu0  ;;  %v1246_v62 = vpop.f32.mrb[20].mxu1 }
 0x138   :  { %1313 = vst [vmem:[%s2100_s3 + $0xa0] sm:$0xff] %v1206_v12  ;;  %v1210_v18 = vpop.f32.mrb[23].mxu0  ;;  %v1247_v63 = vadd.f32 %v1246_v62, %v219_v16  ;;  %v1248_v20 = vpop.f32.mrb[21].mxu1 }
 0x139   :  { %1314 = vst [vmem:[%s2100_s3 + $0xa8] sm:$0xff] %v1208_v14  ;;  %v1249_v21 = vadd.f32 %v1248_v20, %v223_v19  ;;  %v1250_v22 = vpop.f32.mrb[22].mxu1 }
 0x13a   :  { %1315 = vst [vmem:[%s2100_s3 + $0xb0] sm:$0xff] %v1247_v63  ;;  %v1251_v3 = vpop.f32.mrb[23].mxu1 }
 0x13b   :  { %1316 = vst [vmem:[%s2100_s3 + $0xb8] sm:$0xff] %v1249_v21 }
 0x145   :  { %v1287_v23 = vpop.f32.mrb[24].mxu0 }
 0x146   :  { %v1288_v24 = vadd.f32 %v1322_v4, %v1287_v23  ;;  %v1451_v25 = vpop.f32.mrb[25].mxu0 }
 0x147   :  { %v1290_v26 = vpop.f32.mrb[26].mxu0 }
 0x148   :  { %1317 = vst [vmem:[%s2100_s3 + $0xc0] sm:$0xff] %v1288_v24  ;;  %v1452_v27 = vpop.f32.mrb[27].mxu0 }

// kernel: mnist_diffusion_forward.32
= control target key start
LH: loop header
LB: loop body
LE: loop exit
PB: predicated region body
PF: predicated region fallthrough
CT: control target
= control target key end

     0   :  { %v133_v0 = vmov 0.0   ;;  %vm134_vm0 = vmmov 0   ;;  %vm55_vm1 = vcmask 523264   ;;  %s176_s1 = inlined_call_operand.vmem [shape: bf16[64,128], index: 1, kind: input, shape index: {}]   ;;  %s177_s0 = inlined_call_operand.vmem [shape: bf16[8,64], index: 0, kind: input, shape index: {}]   ;;  %s178_s2 = inlined_call_operand.vmem [shape: f32[1,128], index: 2, kind: input, shape index: {}]   ;;  %s179_s3 = inlined_call_operand.vmem [shape: f32[8,128], index: 3, kind: output, shape index: {}]  }
   0x1   :  { %115 = vmatprep.subr.bf16.mxu0 %v133_v0  ;;  %v129_v1 = vld [vmem:[%s176_s1] sm:$0xff]   ;;  %123 = vmatprep.mubr.msk.bf16.mxu0 %vm134_vm0, %v133_v0  ;;  %v130_v2 = vld [vmem:[%s176_s1 + $0x8] sm:$0xff]   ;;  %v131_v3 = vld [vmem:[%s176_s1 + $0x10] sm:$0xff]  }
   0x2   :  { %116 = vmatpush3.bf16.msra.mxu0 %v129_v1  ;;  %v132_v4 = vld [vmem:[%s176_s1 + $0x18] sm:$0xff]   ;;  %v15_v5 = vld [vmem:[%s177_s0] sm:$0xf] }
   0x3   :  { %117 = vmatprep.subr.bf16.mxu0 %v133_v0  ;;  %v104_v6 = vld [vmem:[%s178_s2] ss:$0 sm:$0xff] }
   0x6   :  { %118 = vmatpush3.bf16.msra.mxu0 %v130_v2 }
   0x7   :  { %119 = vmatprep.subr.bf16.mxu0 %v133_v0 }
   0xa   :  { %120 = vmatpush3.bf16.msra.mxu0 %v131_v3 }
   0xb   :  { %121 = vmatprep.subr.bf16.mxu0 %v133_v0 }
   0xe   :  { %122 = vmatpush3.bf16.msra.mxu0 %v132_v4 }
  0x11   :  { %124 = vmatmul.mubr.msk.bf16.vlgmr.msra.gmra.mrb[0].mxu0 %vm55_vm1, %v15_v5 }
  0xe4   :  { %v93_v7 = vpop.f32.mrb[0].mxu0 }
  0xe5   :  { %v94_v8 = vadd.f32 %v104_v6, %v93_v7  ;;  %v125_v9 = vpop.f32.mrb[1].mxu0 }
  0xe6   :  { %v96_v10 = vpop.f32.mrb[2].mxu0 }
  0xe7   :  { %99 = vst [vmem:[%s179_s3] sm:$0xff] %v94_v8  ;;  %v126_v11 = vpop.f32.mrb[3].mxu0 }

// kernel: mnist_diffusion_forward.36
= control target key start
LH: loop header
LB: loop body
LE: loop exit
PB: predicated region body
PF: predicated region fallthrough
CT: control target
= control target key end

     0   :  { %v352_v0 = vmov 0.0   ;;  %vm353_vm0 = vmmov 0   ;;  %s468_s1 = inlined_call_operand.vmem [shape: bf16[128,128], index: 1, kind: input, shape index: {}]   ;;  %s469_s0 = inlined_call_operand.vmem [shape: bf16[104,128], index: 0, kind: input, shape index: {}]   ;;  %s470_s2 = inlined_call_operand.vmem [shape: f32[1,128], index: 2, kind: input, shape index: {}]   ;;  %s471_s3 = inlined_call_operand.vmem [shape: f32[104,128], index: 3, kind: output, shape index: {}]  }
   0x1   :  { %275 = vmatprep.subr.bf16.mxu0 %v352_v0  ;;  %v337_v1 = vld [vmem:[%s468_s1] sm:$0xff]   ;;  %319 = vmatprep.subr.bf16.mxu1 %v352_v0  ;;  %v338_v2 = vld [vmem:[%s468_s1 + $0x8] sm:$0xff]   ;;  %v339_v3 = vld [vmem:[%s468_s1 + $0x10] sm:$0xff]  }
   0x2   :  { %291 = vmatprep.mubr.msk.bf16.mxu0 %vm353_vm0, %v352_v0  ;;  %307 = vmatprep.mubr.msk.bf16.mxu1 %vm353_vm0, %v352_v0  ;;  %v340_v4 = vld [vmem:[%s468_s1 + $0x18] sm:$0xff]   ;;  %v341_v5 = vld [vmem:[%s468_s1 + $0x20] sm:$0xff]   ;;  %v342_v6 = vld [vmem:[%s468_s1 + $0x28] sm:$0xff]  }
   0x3   :  { %276 = vmatpush3.bf16.msra.mxu0 %v337_v1  ;;  %327 = vmatpush3.bf16.msra.mxu1 %v337_v1  ;;  %v343_v7 = vld [vmem:[%s468_s1 + $0x30] sm:$0xff]   ;;  %v344_v8 = vld [vmem:[%s468_s1 + $0x38] sm:$0xff]   ;;  %v345_v9 = vld [vmem:[%s469_s0] sm:$0xff]  }
   0x4   :  { %277 = vmatprep.subr.bf16.mxu0 %v352_v0  ;;  %320 = vmatprep.subr.bf16.mxu1 %v352_v0  ;;  %v346_v10 = vld [vmem:[%s469_s0 + $0x20] sm:$0xff]   ;;  %v347_v11 = vld [vmem:[%s469_s0 + $0x8] sm:$0xff]   ;;  %v349_v13 = vld [vmem:[%s469_s0 + $0x10] sm:$0xff]  }
   0x5   :  { %v348_v12 = vld [vmem:[%s469_s0 + $0x28] sm:$0xff]   ;;  %v350_v14 = vld [vmem:[%s469_s0 + $0x30] ss:$0 sps:$4 sm:$0xff]   ;;  %v351_v15 = vld [vmem:[%s469_s0 + $0x18] sm:$0xff]  }
   0x6   :  { %v244_v16 = vld [vmem:[%s470_s2] ss:$0 sm:$0xff] }
   0x7   :  { %278 = vmatpush3.bf16.msra.mxu0 %v338_v2  ;;  %328 = vmatpush3.bf16.msra.mxu1 %v338_v2 }
   0x8   :  { %279 = vmatprep.subr.bf16.mxu0 %v352_v0  ;;  %321 = vmatprep.subr.bf16.mxu1 %v352_v0 }
   0xb   :  { %280 = vmatpush3.bf16.msra.mxu0 %v339_v3  ;;  %329 = vmatpush3.bf16.msra.mxu1 %v339_v3 }
   0xc   :  { %281 = vmatprep.subr.bf16.mxu0 %v352_v0  ;;  %322 = vmatprep.subr.bf16.mxu1 %v352_v0 }
   0xf   :  { %282 = vmatpush3.bf16.msra.mxu0 %v340_v4  ;;  %330 = vmatpush3.bf16.msra.mxu1 %v340_v4 }
  0x10   :  { %283 = vmatprep.subr.bf16.mxu0 %v352_v0  ;;  %323 = vmatprep.subr.bf16.mxu1 %v352_v0 }
  0x13   :  { %284 = vmatpush3.bf16.msra.mxu0 %v341_v5  ;;  %331 = vmatpush3.bf16.msra.mxu1 %v341_v5 }
  0x14   :  { %285 = vmatprep.subr.bf16.mxu0 %v352_v0  ;;  %324 = vmatprep.subr.bf16.mxu1 %v352_v0 }
  0x17   :  { %286 = vmatpush3.bf16.msra.mxu0 %v342_v6  ;;  %332 = vmatpush3.bf16.msra.mxu1 %v342_v6 }
  0x18   :  { %287 = vmatprep.subr.bf16.mxu0 %v352_v0  ;;  %325 = vmatprep.subr.bf16.mxu1 %v352_v0 }
  0x1b   :  { %288 = vmatpush3.bf16.msra.mxu0 %v343_v7  ;;  %333 = vmatpush3.bf16.msra.mxu1 %v343_v7 }
  0x1c   :  { %289 = vmatprep.subr.bf16.mxu0 %v352_v0  ;;  %326 = vmatprep.subr.bf16.mxu1 %v352_v0 }
  0x1f   :  { %290 = vmatpush3.bf16.msra.mxu0 %v344_v8  ;;  %334 = vmatpush3.bf16.msra.mxu1 %v344_v8 }
  0x22   :  { %292 = vmatmul.mubr.bf16.vlgmr.msra.gmra.mrb[0].mxu0 %v345_v9  ;;  %308 = vmatmul.mubr.bf16.vlgmr.msra.gmra.mrb[0].mxu1 %v346_v10 }
  0x23   :  { %295 = vmatprep.mubr.msk.bf16.mxu0 %vm353_vm0, %v352_v0  ;;  %311 = vmatprep.mubr.msk.bf16.mxu1 %vm353_vm0, %v352_v0 }
  0x2a   :  { %296 = vmatmul.mubr.bf16.gmra.mrb[4].mxu0 %v347_v11  ;;  %312 = vmatmul.mubr.bf16.gmra.mrb[4].mxu1 %v348_v12 }
  0x2b   :  { %299 = vmatprep.mubr.msk.bf16.mxu0 %vm353_vm0, %v352_v0  ;;  %315 = vmatprep.mubr.msk.bf16.mxu1 %vm353_vm0, %v352_v0 }
  0x32   :  { %300 = vmatmul.mubr.bf16.gmra.mrb[8].mxu0 %v349_v13  ;;  %316 = vmatmul.mubr.bf16.gmra.mrb[8].mxu1 %v350_v14 }
  0x33   :  { %303 = vmatprep.mubr.msk.bf16.mxu0 %vm353_vm0, %v352_v0 }
  0x3a   :  { %304 = vmatmul.mubr.bf16.gmra.mrb[12].mxu0 %v351_v15 }
  0xf5   :  { %v173_v17 = vpop.f32.mrb[0].mxu0  ;;  %v205_v18 = vpop.f32.mrb[0].mxu1 }
  0xf6   :  { %v174_v19 = vadd.f32 %v244_v16, %v173_v17  ;;  %v293_v20 = vpop.f32.mrb[1].mxu0  ;;  %v206_v21 = vadd.f32 %v244_v16, %v205_v18  ;;  %v309_v22 = vpop.f32.mrb[1].mxu1 }
  0xf7   :  { %v176_v23 = vpop.f32.mrb[2].mxu0  ;;  %v208_v24 = vpop.f32.mrb[2].mxu1 }
  0xf8   :  { %227 = vst [vmem:[%s471_s3] sm:$0xff] %v174_v19  ;;  %v177_v25 = vadd.f32 %v244_v16, %v176_v23  ;;  %v294_v26 = vpop.f32.mrb[3].mxu0  ;;  %235 = vst [vmem:[%s471_s3 + $0x40] sm:$0xff] %v206_v21  ;;  %v209_v27 = vadd.f32 %v244_v16, %v208_v24  ;;  %v310_v28 = vpop.f32.mrb[3].mxu1 }
  0xfa   :  { %228 = vst [vmem:[%s471_s3 + $0x8] sm:$0xff] %v177_v25  ;;  %236 = vst [vmem:[%s471_s3 + $0x48] sm:$0xff] %v209_v27 }
  0xfd   :  { %v181_v29 = vpop.f32.mrb[4].mxu0  ;;  %v213_v30 = vpop.f32.mrb[4].mxu1 }
  0xfe   :  { %v182_v31 = vadd.f32 %v244_v16, %v181_v29  ;;  %v297_v32 = vpop.f32.mrb[5].mxu0  ;;  %v214_v33 = vadd.f32 %v244_v16, %v213_v30  ;;  %v313_v34 = vpop.f32.mrb[5].mxu1 }
  0xff   :  { %v184_v35 = vpop.f32.mrb[6].mxu0  ;;  %v216_v36 = vpop.f32.mrb[6].mxu1 }
 0x100   :  { %229 = vst [vmem:[%s471_s3 + $0x10] sm:$0xff] %v182_v31  ;;  %v185_v37 = vadd.f32 %v244_v16, %v184_v35  ;;  %v298_v38 = vpop.f32.mrb[7].mxu0  ;;  %237 = vst [vmem:[%s471_s3 + $0x50] sm:$0xff] %v214_v33  ;;  %v217_v39 = vadd.f32 %v244_v16, %v216_v36  ;;  %v314_v40 = vpop.f32.mrb[7].mxu1 }
 0x102   :  { %230 = vst [vmem:[%s471_s3 + $0x18] sm:$0xff] %v185_v37  ;;  %238 = vst [vmem:[%s471_s3 + $0x58] sm:$0xff] %v217_v39 }
 0x105   :  { %v189_v41 = vpop.f32.mrb[8].mxu0  ;;  %v221_v42 = vpop.f32.mrb[8].mxu1 }
 0x106   :  { %v190_v43 = vadd.f32 %v244_v16, %v189_v41  ;;  %v301_v44 = vpop.f32.mrb[9].mxu0  ;;  %v222_v45 = vadd.f32 %v244_v16, %v221_v42  ;;  %v317_v46 = vpop.f32.mrb[9].mxu1 }
 0x107   :  { %v192_v47 = vpop.f32.mrb[10].mxu0  ;;  %v224_v48 = vpop.f32.mrb[10].mxu1 }
 0x108   :  { %231 = vst [vmem:[%s471_s3 + $0x20] sm:$0xff] %v190_v43  ;;  %v193_v49 = vadd.f32 %v244_v16, %v192_v47  ;;  %v302_v50 = vpop.f32.mrb[11].mxu0  ;;  %239 = vst [vmem:[%s471_s3 + $0x60] sm:$0xff] %v222_v45  ;;  %v318_v51 = vpop.f32.mrb[11].mxu1 }
 0x10a   :  { %232 = vst [vmem:[%s471_s3 + $0x28] sm:$0xff] %v193_v49 }
 0x10d   :  { %v197_v52 = vpop.f32.mrb[12].mxu0 }
 0x10e   :  { %v198_v53 = vadd.f32 %v244_v16, %v197_v52  ;;  %v305_v54 = vpop.f32.mrb[13].mxu0 }
 0x10f   :  { %v200_v55 = vpop.f32.mrb[14].mxu0 }
 0x110   :  { %233 = vst [vmem:[%s471_s3 + $0x30] sm:$0xff] %v198_v53  ;;  %v201_v56 = vadd.f32 %v244_v16, %v200_v55  ;;  %v306_v57 = vpop.f32.mrb[15].mxu0 }
 0x112   :  { %234 = vst [vmem:[%s471_s3 + $0x38] sm:$0xff] %v201_v56 }

// kernel: mnist_diffusion_forward.41
= control target key start
LH: loop header
LB: loop body
LE: loop exit
PB: predicated region body
PF: predicated region fallthrough
CT: control target
= control target key end

     0   :  { %v818_v0 = vmov 0.0   ;;  %vm819_vm0 = vmmov 0   ;;  %vm226_vm1 = vcmask 523264   ;;  %s1211_s1 = inlined_call_operand.vmem [shape: bf16[64,128], index: 1, kind: input, shape index: {}]   ;;  %s1212_s0 = inlined_call_operand.vmem [shape: bf16[392,64], index: 0, kind: input, shape index: {}]   ;;  %s1213_s2 = inlined_call_operand.vmem [shape: f32[1,128], index: 2, kind: input, shape index: {}]   ;;  %s1214_s3 = inlined_call_operand.vmem [shape: f32[392,128], index: 3, kind: output, shape index: {}]  }
   0x1   :  { %671 = vmatprep.subr.bf16.mxu0 %v818_v0  ;;  %v789_v1 = vld [vmem:[%s1211_s1] sm:$0xff]   ;;  %779 = vmatprep.subr.bf16.mxu1 %v818_v0  ;;  %v790_v2 = vld [vmem:[%s1211_s1 + $0x8] sm:$0xff]   ;;  %v791_v3 = vld [vmem:[%s1211_s1 + $0x10] sm:$0xff]  }
   0x2   :  { %679 = vmatprep.mubr.msk.bf16.mxu0 %vm819_vm0, %v818_v0  ;;  %731 = vmatprep.mubr.msk.bf16.mxu1 %vm819_vm0, %v818_v0  ;;  %v792_v4 = vld [vmem:[%s1211_s1 + $0x18] sm:$0xff]   ;;  %v793_v5 = vld [vmem:[%s1212_s0] sm:$0xff]   ;;  %v794_v6 = vld [vmem:[%s1212_s0 + $0x68] sm:$0xff]  }
   0x3   :  { %672 = vmatpush3.bf16.msra.mxu0 %v789_v1  ;;  %783 = vmatpush3.bf16.msra.mxu1 %v789_v1  ;;  %v795_v7 = vld [vmem:[%s1212_s0 + $0x8] sm:$0xff]   ;;  %v796_v8 = vld [vmem:[%s1212_s0 + $0x70] sm:$0xff]   ;;  %v798_v10 = vld [vmem:[%s1212_s0 + $0x78] sm:$0xff]  }
   0x4   :  { %673 = vmatprep.subr.bf16.mxu0 %v818_v0  ;;  %780 = vmatprep.subr.bf16.mxu1 %v818_v0  ;;  %v797_v9 = vld [vmem:[%s1212_s0 + $0x10] sm:$0xff]   ;;  %v799_v11 = vld [vmem:[%s1212_s0 + $0x18] sm:$0xff]   ;;  %v800_v12 = vld [vmem:[%s1212_s0 + $0x80] sm:$0xff]  }
   0x5   :  { %v801_v13 = vld [vmem:[%s1212_s0 + $0x20] sm:$0xff]   ;;  %v802_v14 = vld [vmem:[%s1212_s0 + $0x88] sm:$0xff]   ;;  %v804_v16 = vld [vmem:[%s1212_s0 + $0x90] sm:$0xff]  }
   0x6   :  { %v803_v15 = vld [vmem:[%s1212_s0 + $0x28] sm:$0xff]   ;;  %v805_v17 = vld [vmem:[%s1212_s0 + $0x30] sm:$0xff]   ;;  %v806_v18 = vld [vmem:[%s1212_s0 + $0x98] sm:$0xff]  }
   0x7   :  { %674 = vmatpush3.bf16.msra.mxu0 %v790_v2  ;;  %784 = vmatpush3.bf16.msra.mxu1 %v790_v2  ;;  %v807_v19 = vld [vmem:[%s1212_s0 + $0x38] sm:$0xff]   ;;  %v808_v20 = vld [vmem:[%s1212_s0 + $0xa0] sm:$0xff]   ;;  %v810_v22 = vld [vmem:[%s1212_s0 + $0xa8] sm:$0xff]  }
   0x8   :  { %675 = vmatprep.subr.bf16.mxu0 %v818_v0  ;;  %781 = vmatprep.subr.bf16.mxu1 %v818_v0  ;;  %v809_v21 = vld [vmem:[%s1212_s0 + $0x40] sm:$0xff]   ;;  %v811_v23 = vld [vmem:[%s1212_s0 + $0x48] sm:$0xff]   ;;  %v812_v24 = vld [vmem:[%s1212_s0 + $0xb0] sm:$0xff]  }
   0x9   :  { %v813_v25 = vld [vmem:[%s1212_s0 + $0x50] sm:$0xff]   ;;  %v814_v26 = vld [vmem:[%s1212_s0 + $0xb8] sm:$0xff]   ;;  %v816_v28 = vld [vmem:[%s1212_s0 + $0xc0] ss:$0 sps:$4 sm:$0xff]  }
   0xa   :  { %v815_v27 = vld [vmem:[%s1212_s0 + $0x58] sm:$0xff]   ;;  %v817_v29 = vld [vmem:[%s1212_s0 + $0x60] sm:$0xff]  }
   0xb   :  { %676 = vmatpush3.bf16.msra.mxu0 %v791_v3  ;;  %785 = vmatpush3.bf16.msra.mxu1 %v791_v3  ;;  %v1013_v30 = vld [vmem:[%s1213_s2] ss:$0 sm:$0xff] }
   0xc   :  { %677 = vmatprep.subr.bf16.mxu0 %v818_v0  ;;  %782 = vmatprep.subr.bf16.mxu1 %v818_v0 }
   0xf   :  { %678 = vmatpush3.bf16.msra.mxu0 %v792_v4  ;;  %786 = vmatpush3.bf16.msra.mxu1 %v792_v4 }
  0x12   :  { %680 = vmatmul.mubr.msk.bf16.vlgmr.msra.gmra.mrb[0].mxu0 %vm226_vm1, %v793_v5  ;;  %732 = vmatmul.mubr.msk.bf16.vlgmr.msra.gmra.mrb[0].mxu1 %vm226_vm1, %v794_v6 }
  0x13   :  { %683 = vmatprep.mubr.msk.bf16.mxu0 %vm819_vm0, %v818_v0  ;;  %735 = vmatprep.mubr.msk.bf16.mxu1 %vm819_vm0, %v818_v0 }
  0x1a   :  { %684 = vmatmul.mubr.msk.bf16.gmra.mrb[4].mxu0 %vm226_vm1, %v795_v7  ;;  %736 = vmatmul.mubr.msk.bf16.gmra.mrb[4].mxu1 %vm226_vm1, %v796_v8 }
  0x1b   :  { %687 = vmatprep.mubr.msk.bf16.mxu0 %vm819_vm0, %v818_v0  ;;  %739 = vmatprep.mubr.msk.bf16.mxu1 %vm819_vm0, %v818_v0 }
  0x22   :  { %688 = vmatmul.mubr.msk.bf16.gmra.mrb[8].mxu0 %vm226_vm1, %v797_v9  ;;  %740 = vmatmul.mubr.msk.bf16.gmra.mrb[8].mxu1 %vm226_vm1, %v798_v10 }
  0x23   :  { %691 = vmatprep.mubr.msk.bf16.mxu0 %vm819_vm0, %v818_v0  ;;  %743 = vmatprep.mubr.msk.bf16.mxu1 %vm819_vm0, %v818_v0 }
  0x2a   :  { %692 = vmatmul.mubr.msk.bf16.gmra.mrb[12].mxu0 %vm226_vm1, %v799_v11  ;;  %744 = vmatmul.mubr.msk.bf16.gmra.mrb[12].mxu1 %vm226_vm1, %v800_v12 }
  0x2b   :  { %695 = vmatprep.mubr.msk.bf16.mxu0 %vm819_vm0, %v818_v0  ;;  %747 = vmatprep.mubr.msk.bf16.mxu1 %vm819_vm0, %v818_v0 }
  0x32   :  { %696 = vmatmul.mubr.msk.bf16.gmra.mrb[16].mxu0 %vm226_vm1, %v801_v13  ;;  %748 = vmatmul.mubr.msk.bf16.gmra.mrb[16].mxu1 %vm226_vm1, %v802_v14 }
  0x33   :  { %699 = vmatprep.mubr.msk.bf16.mxu0 %vm819_vm0, %v818_v0  ;;  %751 = vmatprep.mubr.msk.bf16.mxu1 %vm819_vm0, %v818_v0 }
  0x3a   :  { %700 = vmatmul.mubr.msk.bf16.gmra.mrb[20].mxu0 %vm226_vm1, %v803_v15  ;;  %752 = vmatmul.mubr.msk.bf16.gmra.mrb[20].mxu1 %vm226_vm1, %v804_v16 }
  0x3b   :  { %703 = vmatprep.mubr.msk.bf16.mxu0 %vm819_vm0, %v818_v0  ;;  %755 = vmatprep.mubr.msk.bf16.mxu1 %vm819_vm0, %v818_v0 }
  0x42   :  { %704 = vmatmul.mubr.msk.bf16.gmra.mrb[24].mxu0 %vm226_vm1, %v805_v17  ;;  %756 = vmatmul.mubr.msk.bf16.gmra.mrb[24].mxu1 %vm226_vm1, %v806_v18 }
  0x43   :  { %707 = vmatprep.mubr.msk.bf16.mxu0 %vm819_vm0, %v818_v0  ;;  %759 = vmatprep.mubr.msk.bf16.mxu1 %vm819_vm0, %v818_v0 }
  0x4a   :  { %708 = vmatmul.mubr.msk.bf16.gmra.mrb[28].mxu0 %vm226_vm1, %v807_v19  ;;  %760 = vmatmul.mubr.msk.bf16.gmra.mrb[28].mxu1 %vm226_vm1, %v808_v20 }
  0x4b   :  { %711 = vmatprep.mubr.msk.bf16.mxu0 %vm819_vm0, %v818_v0  ;;  %763 = vmatprep.mubr.msk.bf16.mxu1 %vm819_vm0, %v818_v0 }
  0x52   :  { %712 = vmatmul.mubr.msk.bf16.gmra.mrb[32].mxu0 %vm226_vm1, %v809_v21  ;;  %764 = vmatmul.mubr.msk.bf16.gmra.mrb[32].mxu1 %vm226_vm1, %v810_v22 }
  0x53   :  { %715 = vmatprep.mubr.msk.bf16.mxu0 %vm819_vm0, %v818_v0  ;;  %767 = vmatprep.mubr.msk.bf16.mxu1 %vm819_vm0, %v818_v0 }
  0x5a   :  { %716 = vmatmul.mubr.msk.bf16.gmra.mrb[36].mxu0 %vm226_vm1, %v811_v23  ;;  %768 = vmatmul.mubr.msk.bf16.gmra.mrb[36].mxu1 %vm226_vm1, %v812_v24 }
  0x5b   :  { %719 = vmatprep.mubr.msk.bf16.mxu0 %vm819_vm0, %v818_v0  ;;  %771 = vmatprep.mubr.msk.bf16.mxu1 %vm819_vm0, %v818_v0 }
  0x62   :  { %720 = vmatmul.mubr.msk.bf16.gmra.mrb[40].mxu0 %vm226_vm1, %v813_v25  ;;  %772 = vmatmul.mubr.msk.bf16.gmra.mrb[40].mxu1 %vm226_vm1, %v814_v26 }
  0x63   :  { %723 = vmatprep.mubr.msk.bf16.mxu0 %vm819_vm0, %v818_v0  ;;  %775 = vmatprep.mubr.msk.bf16.mxu1 %vm819_vm0, %v818_v0 }
  0x6a   :  { %724 = vmatmul.mubr.msk.bf16.gmra.mrb[44].mxu0 %vm226_vm1, %v815_v27  ;;  %776 = vmatmul.mubr.msk.bf16.gmra.mrb[44].mxu1 %vm226_vm1, %v816_v28 }
  0x6b   :  { %727 = vmatprep.mubr.msk.bf16.mxu0 %vm819_vm0, %v818_v0 }
  0x72   :  { %728 = vmatmul.mubr.msk.bf16.gmra.mrb[48].mxu0 %vm226_vm1, %v817_v29 }
  0xe5   :  { %v336_v31 = vpop.f32.mrb[0].mxu0  ;;  %v440_v32 = vpop.f32.mrb[0].mxu1 }
  0xe6   :  { %v337_v33 = vadd.f32 %v1013_v30, %v336_v31  ;;  %v681_v34 = vpop.f32.mrb[1].mxu0  ;;  %v441_v35 = vadd.f32 %v1013_v30, %v440_v32  ;;  %v733_v36 = vpop.f32.mrb[1].mxu1 }
  0xe7   :  { %v339_v37 = vpop.f32.mrb[2].mxu0  ;;  %v443_v38 = vpop.f32.mrb[2].mxu1 }
  0xe8   :  { %534 = vst [vmem:[%s1214_s3] sm:$0xff] %v337_v33  ;;  %v340_v39 = vadd.f32 %v1013_v30, %v339_v37  ;;  %v682_v40 = vpop.f32.mrb[3].mxu0  ;;  %560 = vst [vmem:[%s1214_s3 + $0xd0] sm:$0xff] %v441_v35  ;;  %v444_v41 = vadd.f32 %v1013_v30, %v443_v38  ;;  %v734_v42 = vpop.f32.mrb[3].mxu1 }
  0xea   :  { %535 = vst [vmem:[%s1214_s3 + $0x8] sm:$0xff] %v340_v39  ;;  %561 = vst [vmem:[%s1214_s3 + $0xd8] sm:$0xff] %v444_v41 }
  0xed   :  { %v344_v43 = vpop.f32.mrb[4].mxu0  ;;  %v448_v44 = vpop.f32.mrb[4].mxu1 }
  0xee   :  { %v345_v45 = vadd.f32 %v1013_v30, %v344_v43  ;;  %v685_v46 = vpop.f32.mrb[5].mxu0  ;;  %v449_v47 = vadd.f32 %v1013_v30, %v448_v44  ;;  %v737_v48 = vpop.f32.mrb[5].mxu1 }
  0xef   :  { %v347_v49 = vpop.f32.mrb[6].mxu0  ;;  %v451_v50 = vpop.f32.mrb[6].mxu1 }
  0xf0   :  { %536 = vst [vmem:[%s1214_s3 + $0x10] sm:$0xff] %v345_v45  ;;  %v348_v51 = vadd.f32 %v1013_v30, %v347_v49  ;;  %v686_v52 = vpop.f32.mrb[7].mxu0  ;;  %562 = vst [vmem:[%s1214_s3 + $0xe0] sm:$0xff] %v449_v47  ;;  %v452_v53 = vadd.f32 %v1013_v30, %v451_v50  ;;  %v738_v54 = vpop.f32.mrb[7].mxu1 }
  0xf2   :  { %537 = vst [vmem:[%s1214_s3 + $0x18] sm:$0xff] %v348_v51  ;;  %563 = vst [vmem:[%s1214_s3 + $0xe8] sm:$0xff] %v452_v53 }
  0xf5   :  { %v352_v55 = vpop.f32.mrb[8].mxu0  ;;  %v456_v56 = vpop.f32.mrb[8].mxu1 }
  0xf6   :  { %v353_v57 = vadd.f32 %v1013_v30, %v352_v55  ;;  %v689_v58 = vpop.f32.mrb[9].mxu0  ;;  %v457_v59 = vadd.f32 %v1013_v30, %v456_v56  ;;  %v741_v60 = vpop.f32.mrb[9].mxu1 }
  0xf7   :  { %v355_v61 = vpop.f32.mrb[10].mxu0  ;;  %v459_v62 = vpop.f32.mrb[10].mxu1 }
  0xf8   :  { %538 = vst [vmem:[%s1214_s3 + $0x20] sm:$0xff] %v353_v57  ;;  %v356_v63 = vadd.f32 %v1013_v30, %v355_v61  ;;  %v690_v0 = vpop.f32.mrb[11].mxu0  ;;  %564 = vst [vmem:[%s1214_s3 + $0xf0] sm:$0xff] %v457_v59  ;;  %v460_v1 = vadd.f32 %v1013_v30, %v459_v62  ;;  %v742_v2 = vpop.f32.mrb[11].mxu1 }
  0xfa   :  { %539 = vst [vmem:[%s1214_s3 + $0x28] sm:$0xff] %v356_v63  ;;  %565 = vst [vmem:[%s1214_s3 + $0xf8] sm:$0xff] %v460_v1 }
  0xfd   :  { %v360_v3 = vpop.f32.mrb[12].mxu0  ;;  %v464_v4 = vpop.f32.mrb[12].mxu1 }
  0xfe   :  { %v361_v5 = vadd.f32 %v1013_v30, %v360_v3  ;;  %v693_v6 = vpop.f32.mrb[13].mxu0  ;;  %v465_v7 = vadd.f32 %v1013_v30, %v464_v4  ;;  %v745_v8 = vpop.f32.mrb[13].mxu1 }
  0xff   :  { %v363_v9 = vpop.f32.mrb[14].mxu0  ;;  %v467_v10 = vpop.f32.mrb[14].mxu1 }
 0x100   :  { %540 = vst [vmem:[%s1214_s3 + $0x30] sm:$0xff] %v361_v5  ;;  %v364_v11 = vadd.f32 %v1013_v30, %v363_v9  ;;  %v694_v12 = vpop.f32.mrb[15].mxu0  ;;  %566 = vst [vmem:[%s1214_s3 + $0x100] sm:$0xff] %v465_v7  ;;  %v468_v13 = vadd.f32 %v1013_v30, %v467_v10  ;;  %v746_v14 = vpop.f32.mrb[15].mxu1 }
 0x102   :  { %541 = vst [vmem:[%s1214_s3 + $0x38] sm:$0xff] %v364_v11  ;;  %567 = vst [vmem:[%s1214_s3 + $0x108] sm:$0xff] %v468_v13 }
 0x105   :  { %v368_v15 = vpop.f32.mrb[16].mxu0  ;;  %v472_v16 = vpop.f32.mrb[16].mxu1 }
 0x106   :  { %v369_v17 = vadd.f32 %v1013_v30, %v368_v15  ;;  %v697_v18 = vpop.f32.mrb[17].mxu0  ;;  %v473_v19 = vadd.f32 %v1013_v30, %v472_v16  ;;  %v749_v20 = vpop.f32.mrb[17].mxu1 }
 0x107   :  { %v371_v21 = vpop.f32.mrb[18].mxu0  ;;  %v475_v22 = vpop.f32.mrb[18].mxu1 }
 0x108   :  { %542 = vst [vmem:[%s1214_s3 + $0x40] sm:$0xff] %v369_v17  ;;  %v372_v23 = vadd.f32 %v1013_v30, %v371_v21  ;;  %v698_v24 = vpop.f32.mrb[19].mxu0  ;;  %568 = vst [vmem:[%s1214_s3 + $0x110] sm:$0xff] %v473_v19  ;;  %v476_v25 = vadd.f32 %v1013_v30, %v475_v22  ;;  %v750_v26 = vpop.f32.mrb[19].mxu1 }
 0x10a   :  { %543 = vst [vmem:[%s1214_s3 + $0x48] sm:$0xff] %v372_v23  ;;  %569 = vst [vmem:[%s1214_s3 + $0x118] sm:$0xff] %v476_v25 }
 0x10d   :  { %v376_v27 = vpop.f32.mrb[20].mxu0  ;;  %v480_v28 = vpop.f32.mrb[20].mxu1 }
 0x10e   :  { %v377_v29 = vadd.f32 %v1013_v30, %v376_v27  ;;  %v701_v31 = vpop.f32.mrb[21].mxu0  ;;  %v481_v32 = vadd.f32 %v1013_v30, %v480_v28  ;;  %v753_v33 = vpop.f32.mrb[21].mxu1 }
 0x10f   :  { %v379_v34 = vpop.f32.mrb[22].mxu0  ;;  %v483_v35 = vpop.f32.mrb[22].mxu1 }
 0x110   :  { %544 = vst [vmem:[%s1214_s3 + $0x50] sm:$0xff] %v377_v29  ;;  %v380_v36 = vadd.f32 %v1013_v30, %v379_v34  ;;  %v702_v37 = vpop.f32.mrb[23].mxu0  ;;  %570 = vst [vmem:[%s1214_s3 + $0x120] sm:$0xff] %v481_v32  ;;  %v484_v38 = vadd.f32 %v1013_v30, %v483_v35  ;;  %v754_v39 = vpop.f32.mrb[23].mxu1 }
 0x112   :  { %545 = vst [vmem:[%s1214_s3 + $0x58] sm:$0xff] %v380_v36  ;;  %571 = vst [vmem:[%s1214_s3 + $0x128] sm:$0xff] %v484_v38 }
 0x115   :  { %v384_v40 = vpop.f32.mrb[24].mxu0  ;;  %v488_v41 = vpop.f32.mrb[24].mxu1 }
 0x116   :  { %v385_v42 = vadd.f32 %v1013_v30, %v384_v40  ;;  %v705_v43 = vpop.f32.mrb[25].mxu0  ;;  %v489_v44 = vadd.f32 %v1013_v30, %v488_v41  ;;  %v757_v45 = vpop.f32.mrb[25].mxu1 }
 0x117   :  { %v387_v46 = vpop.f32.mrb[26].mxu0  ;;  %v491_v47 = vpop.f32.mrb[26].mxu1 }
 0x118   :  { %546 = vst [vmem:[%s1214_s3 + $0x60] sm:$0xff] %v385_v42  ;;  %v388_v48 = vadd.f32 %v1013_v30, %v387_v46  ;;  %v706_v49 = vpop.f32.mrb[27].mxu0  ;;  %572 = vst [vmem:[%s1214_s3 + $0x130] sm:$0xff] %v489_v44  ;;  %v492_v50 = vadd.f32 %v1013_v30, %v491_v47  ;;  %v758_v51 = vpop.f32.mrb[27].mxu1 }
 0x11a   :  { %547 = vst [vmem:[%s1214_s3 + $0x68] sm:$0xff] %v388_v48  ;;  %573 = vst [vmem:[%s1214_s3 + $0x138] sm:$0xff] %v492_v50 }
 0x11d   :  { %v392_v52 = vpop.f32.mrb[28].mxu0  ;;  %v496_v53 = vpop.f32.mrb[28].mxu1 }
 0x11e   :  { %v393_v54 = vadd.f32 %v1013_v30, %v392_v52  ;;  %v709_v55 = vpop.f32.mrb[29].mxu0  ;;  %v497_v56 = vadd.f32 %v1013_v30, %v496_v53  ;;  %v761_v57 = vpop.f32.mrb[29].mxu1 }
 0x11f   :  { %v395_v58 = vpop.f32.mrb[30].mxu0  ;;  %v499_v59 = vpop.f32.mrb[30].mxu1 }
 0x120   :  { %548 = vst [vmem:[%s1214_s3 + $0x70] sm:$0xff] %v393_v54  ;;  %v396_v60 = vadd.f32 %v1013_v30, %v395_v58  ;;  %v710_v61 = vpop.f32.mrb[31].mxu0  ;;  %574 = vst [vmem:[%s1214_s3 + $0x140] sm:$0xff] %v497_v56  ;;  %v500_v62 = vadd.f32 %v1013_v30, %v499_v59  ;;  %v762_v63 = vpop.f32.mrb[31].mxu1 }
 0x122   :  { %549 = vst [vmem:[%s1214_s3 + $0x78] sm:$0xff] %v396_v60  ;;  %575 = vst [vmem:[%s1214_s3 + $0x148] sm:$0xff] %v500_v62 }
 0x125   :  { %v400_v0 = vpop.f32.mrb[32].mxu0  ;;  %v504_v1 = vpop.f32.mrb[32].mxu1 }
 0x126   :  { %v401_v2 = vadd.f32 %v1013_v30, %v400_v0  ;;  %v713_v3 = vpop.f32.mrb[33].mxu0  ;;  %v505_v4 = vadd.f32 %v1013_v30, %v504_v1  ;;  %v765_v5 = vpop.f32.mrb[33].mxu1 }
 0x127   :  { %v403_v6 = vpop.f32.mrb[34].mxu0  ;;  %v507_v7 = vpop.f32.mrb[34].mxu1 }
 0x128   :  { %550 = vst [vmem:[%s1214_s3 + $0x80] sm:$0xff] %v401_v2  ;;  %v404_v8 = vadd.f32 %v1013_v30, %v403_v6  ;;  %v714_v9 = vpop.f32.mrb[35].mxu0  ;;  %576 = vst [vmem:[%s1214_s3 + $0x150] sm:$0xff] %v505_v4  ;;  %v508_v10 = vadd.f32 %v1013_v30, %v507_v7  ;;  %v766_v11 = vpop.f32.mrb[35].mxu1 }
 0x12a   :  { %551 = vst [vmem:[%s1214_s3 + $0x88] sm:$0xff] %v404_v8  ;;  %577 = vst [vmem:[%s1214_s3 + $0x158] sm:$0xff] %v508_v10 }
 0x12d   :  { %v408_v12 = vpop.f32.mrb[36].mxu0  ;;  %v512_v13 = vpop.f32.mrb[36].mxu1 }
 0x12e   :  { %v409_v14 = vadd.f32 %v1013_v30, %v408_v12  ;;  %v717_v15 = vpop.f32.mrb[37].mxu0  ;;  %v513_v16 = vadd.f32 %v1013_v30, %v512_v13  ;;  %v769_v17 = vpop.f32.mrb[37].mxu1 }
 0x12f   :  { %v411_v18 = vpop.f32.mrb[38].mxu0  ;;  %v515_v19 = vpop.f32.mrb[38].mxu1 }
 0x130   :  { %552 = vst [vmem:[%s1214_s3 + $0x90] sm:$0xff] %v409_v14  ;;  %v412_v20 = vadd.f32 %v1013_v30, %v411_v18  ;;  %v718_v21 = vpop.f32.mrb[39].mxu0  ;;  %578 = vst [vmem:[%s1214_s3 + $0x160] sm:$0xff] %v513_v16  ;;  %v516_v22 = vadd.f32 %v1013_v30, %v515_v19  ;;  %v770_v23 = vpop.f32.mrb[39].mxu1 }
 0x132   :  { %553 = vst [vmem:[%s1214_s3 + $0x98] sm:$0xff] %v412_v20  ;;  %579 = vst [vmem:[%s1214_s3 + $0x168] sm:$0xff] %v516_v22 }
 0x135   :  { %v416_v24 = vpop.f32.mrb[40].mxu0  ;;  %v520_v25 = vpop.f32.mrb[40].mxu1 }
 0x136   :  { %v417_v26 = vadd.f32 %v1013_v30, %v416_v24  ;;  %v721_v27 = vpop.f32.mrb[41].mxu0  ;;  %v521_v28 = vadd.f32 %v1013_v30, %v520_v25  ;;  %v773_v29 = vpop.f32.mrb[41].mxu1 }
 0x137   :  { %v419_v31 = vpop.f32.mrb[42].mxu0  ;;  %v523_v32 = vpop.f32.mrb[42].mxu1 }
 0x138   :  { %554 = vst [vmem:[%s1214_s3 + $0xa0] sm:$0xff] %v417_v26  ;;  %v420_v33 = vadd.f32 %v1013_v30, %v419_v31  ;;  %v722_v34 = vpop.f32.mrb[43].mxu0  ;;  %580 = vst [vmem:[%s1214_s3 + $0x170] sm:$0xff] %v521_v28  ;;  %v524_v35 = vadd.f32 %v1013_v30, %v523_v32  ;;  %v774_v36 = vpop.f32.mrb[43].mxu1 }
 0x13a   :  { %555 = vst [vmem:[%s1214_s3 + $0xa8] sm:$0xff] %v420_v33  ;;  %581 = vst [vmem:[%s1214_s3 + $0x178] sm:$0xff] %v524_v35 }
 0x13d   :  { %v424_v37 = vpop.f32.mrb[44].mxu0  ;;  %v528_v38 = vpop.f32.mrb[44].mxu1 }
 0x13e   :  { %v425_v39 = vadd.f32 %v1013_v30, %v424_v37  ;;  %v725_v40 = vpop.f32.mrb[45].mxu0  ;;  %v529_v41 = vadd.f32 %v1013_v30, %v528_v38  ;;  %v777_v42 = vpop.f32.mrb[45].mxu1 }
 0x13f   :  { %v427_v43 = vpop.f32.mrb[46].mxu0  ;;  %v531_v44 = vpop.f32.mrb[46].mxu1 }
 0x140   :  { %556 = vst [vmem:[%s1214_s3 + $0xb0] sm:$0xff] %v425_v39  ;;  %v428_v45 = vadd.f32 %v1013_v30, %v427_v43  ;;  %v726_v46 = vpop.f32.mrb[47].mxu0  ;;  %582 = vst [vmem:[%s1214_s3 + $0x180] sm:$0xff] %v529_v41  ;;  %v778_v47 = vpop.f32.mrb[47].mxu1 }
 0x142   :  { %557 = vst [vmem:[%s1214_s3 + $0xb8] sm:$0xff] %v428_v45 }
 0x145   :  { %v432_v48 = vpop.f32.mrb[48].mxu0 }
 0x146   :  { %v433_v49 = vadd.f32 %v1013_v30, %v432_v48  ;;  %v729_v50 = vpop.f32.mrb[49].mxu0 }
 0x147   :  { %v435_v51 = vpop.f32.mrb[50].mxu0 }
 0x148   :  { %558 = vst [vmem:[%s1214_s3 + $0xc0] sm:$0xff] %v433_v49  ;;  %v436_v52 = vadd.f32 %v1013_v30, %v435_v51  ;;  %v730_v53 = vpop.f32.mrb[51].mxu0 }
 0x14a   :  { %559 = vst [vmem:[%s1214_s3 + $0xc8] sm:$0xff] %v436_v52 }

// kernel: mnist_diffusion_forward.46
= control target key start
LH: loop header
LB: loop body
LE: loop exit
PB: predicated region body
PF: predicated region fallthrough
CT: control target
= control target key end

     0   :  { %s5013_s12 = smov 0   ;;  %s6012_s0 = inlined_call_operand.vmem [shape: bf16[1568,576], index: 0, kind: input, shape index: {}]   ;;  %s6013_s1 = inlined_call_operand.vmem [shape: bf16[576,128], index: 1, kind: input, shape index: {}]   ;;  %s6014_s2 = inlined_call_operand.vmem [shape: f32[1,128], index: 2, kind: input, shape index: {}]   ;;  %s6015_s3 = inlined_call_operand.vmem [shape: f32[1568,128], index: 3, kind: output, shape index: {}]  }
   0x1 LB: > { %s3569_s13 = sadd.s32 4294967295, %s4988_s12   ;;  %p3573_p0 = scmp.ge.s32.totalorder %s4988_s12, 1  ;;  %s4988_s12 = sphi %s5013_s12, %s13_s12  }
   0x2   : > { %p139_p1 = scmp.lt.s32.totalorder %s4988_s12, 3 }
   0x4   : > { %p140_p2 = pnand %p3573_p0, %p139_p1 }
   0x5   : > { %v4602_v0 = vld [vmem:[%s6013_s1] sm:$0xff] (!%p140_p2)   ;;  %v4990_v1 = vmov (!%p140_p2), 0   ;;  %v4604_v3 = vld [vmem:[%s6013_s1 + $0x8] sm:$0xff] (!%p140_p2)   ;;  %v4606_v5 = vld [vmem:[%s6013_s1 + $0x10] sm:$0xff] (!%p140_p2)   ;;  %s164_s5 = smul.u32 (!%p140_p2), 98, %s3569_s13  ;;  %v4991_v39 = vmov (!%p140_p2), 0.0  }
   0x6   : > { %143 = sbr.rel (%p140_p2) target bundleno = 871 (0x367), region = 32  ;;  %2140 = vmatprep.subr.bf16.mxu1 (!%p140_p2), %v4990_v1  ;;  %2565 = vmatprep.subr.bf16.mxu0 (!%p140_p2), %v4990_v1  ;;  %v5029_v2 = vld [vmem:[%s6013_s1 + $0x80] sm:$0xff] (!%p140_p2)   ;;  %v5039_v4 = vld [vmem:[%s6013_s1 + $0x88] sm:$0xff] (!%p140_p2)   ;;  %v5050_v6 = vld [vmem:[%s6013_s1 + $0x90] sm:$0xff] (!%p140_p2)   ;;  %vm4992_vm0 = vmmov (!%p140_p2), 0   ;;  %vm1992_vm1 = vcmask (!%p140_p2), 523264  }
   0x7   : > { %2141 = vmatpush1.bf16.msra.mxu1 (!%p140_p2), %v4602_v0  ;;  %2566 = vmatpush1.bf16.msra.mxu0 (!%p140_p2), %v5029_v2  ;;  %v4608_v7 = vld [vmem:[%s6013_s1 + $0x18] sm:$0xff] (!%p140_p2)   ;;  %v4610_v9 = vld [vmem:[%s6013_s1 + $0x20] sm:$0xff] (!%p140_p2)   ;;  %v4612_v11 = vld [vmem:[%s6013_s1 + $0x28] sm:$0xff] (!%p140_p2)   ;;  %p165_p3 = scmp.lt.s32.totalorder (!%p140_p2), %s164_s5, 195 }
   0x8   : > { %2142 = vmatprep.subr.bf16.mxu1 (!%p140_p2), %v4990_v1  ;;  %2567 = vmatprep.subr.bf16.mxu0 (!%p140_p2), %v4990_v1  ;;  %v5061_v8 = vld [vmem:[%s6013_s1 + $0x98] sm:$0xff] (!%p140_p2)   ;;  %v5074_v10 = vld [vmem:[%s6013_s1 + $0xa0] sm:$0xff] (!%p140_p2)   ;;  %v5085_v12 = vld [vmem:[%s6013_s1 + $0xa8] sm:$0xff] (!%p140_p2)  }
   0x9   : > { %v4614_v13 = vld [vmem:[%s6013_s1 + $0x30] sm:$0xff] (!%p140_p2)   ;;  %v4616_v15 = vld [vmem:[%s6013_s1 + $0x38] sm:$0xff] (!%p140_p2)   ;;  %v4618_v17 = vld [vmem:[%s6013_s1 + $0x40] sm:$0xff] (!%p140_p2)  }
   0xa   : > { %v5098_v14 = vld [vmem:[%s6013_s1 + $0xb0] sm:$0xff] (!%p140_p2)   ;;  %v5110_v16 = vld [vmem:[%s6013_s1 + $0xb8] sm:$0xff] (!%p140_p2)   ;;  %v5126_v18 = vld [vmem:[%s6013_s1 + $0xc0] sm:$0xff] (!%p140_p2)  }
   0xb   : > { %2143 = vmatpush1.bf16.msra.mxu1 (!%p140_p2), %v4604_v3  ;;  %2568 = vmatpush1.bf16.msra.mxu0 (!%p140_p2), %v5039_v4  ;;  %v4620_v20 = vld [vmem:[%s6013_s1 + $0x48] sm:$0xff] (!%p140_p2)   ;;  %v4622_v23 = vld [vmem:[%s6013_s1 + $0x50] sm:$0xff] (!%p140_p2)   ;;  %v4624_v25 = vld [vmem:[%s6013_s1 + $0x58] sm:$0xff] (!%p140_p2)  }
   0xc   : > { %2144 = vmatprep.subr.bf16.mxu1 (!%p140_p2), %v4990_v1  ;;  %2569 = vmatprep.subr.bf16.mxu0 (!%p140_p2), %v4990_v1  ;;  %v5139_v22 = vld [vmem:[%s6013_s1 + $0xc8] sm:$0xff] (!%p140_p2)   ;;  %v5150_v24 = vld [vmem:[%s6013_s1 + $0xd0] sm:$0xff] (!%p140_p2)   ;;  %v5161_v26 = vld [vmem:[%s6013_s1 + $0xd8] sm:$0xff] (!%p140_p2)  }
   0xd   : > { %s6017_s5 = smov (!%p165_p3, %s164_s5), 195  ;;  %v4626_v27 = vld [vmem:[%s6013_s1 + $0x60] sm:$0xff]   ;;  %v4628_v29 = vld [vmem:[%s6013_s1 + $0x68] sm:$0xff]   ;;  %v4630_v31 = vld [vmem:[%s6013_s1 + $0x70] sm:$0xff]  }
   0xe   : > { %s4590_s19 = smul.u32 20, %s6017_s5  ;;  %v5172_v28 = vld [vmem:[%s6013_s1 + $0xe0] sm:$0xff]   ;;  %v5183_v30 = vld [vmem:[%s6013_s1 + $0xe8] sm:$0xff]   ;;  %v5194_v32 = vld [vmem:[%s6013_s1 + $0xf0] sm:$0xff]   ;;  %s3575_s18 = sshll.u32 %s6017_s5, 3 }
   0xf   : > { %2145 = vmatpush1.bf16.msra.mxu1 %v4606_v5  ;;  %2570 = vmatpush1.bf16.msra.mxu0 %v5050_v6  ;;  %v4632_v33 = vld [vmem:[%s6013_s1 + $0x78] sm:$0xff]   ;;  %v4640_v38 = vld [vmem:[%s6013_s1 + $0x100] sm:$0xff]   ;;  %v4677_v41 = vld [vmem:[%s6013_s1 + $0x108] sm:$0xff]   ;;  %s5631_s21 = scalar_lea.vmem %s6015_s3, %s3575_s18 }
  0x10   : > { %2146 = vmatprep.subr.bf16.mxu1 %v4990_v1  ;;  %2571 = vmatprep.subr.bf16.mxu0 %v4990_v1  ;;  %s5119_s26 = scalar_lea.vmem %s6012_s0, %s4590_s19  ;;  %v5205_v34 = vld [vmem:[%s6013_s1 + $0xf8] sm:$0xff]   ;;  %v4714_v46 = vld [vmem:[%s6013_s1 + $0x110] sm:$0xff]  }
  0x11   : > { %v4636_v19 = vld [vmem:[%s5119_s26 + $0x4] ss:$20 sps:$4 sm:$0xff]   ;;  %v4639_v21 = vld [vmem:[%s5119_s26 + $0xc] ss:$20 sps:$4 sm:$0xff]   ;;  %v4637_v36 = vld [vmem:[%s5119_s26 + $0x8] ss:$20 sps:$4 sm:$0xff]  }
  0x12   : > { %2172 = vmatprep.mubr.bf16.mxu1 %v4636_v19  ;;  %2597 = vmatprep.mubr.bf16.mxu0 %v4639_v21  ;;  %v4634_v35 = vld [vmem:[%s5119_s26] ss:$20 sps:$4 sm:$0xff]   ;;  %v4645_v42 = vld [vmem:[%s5119_s26 + $0x28] ss:$20 sps:$4 sm:$0xff]   ;;  %v4646_v43 = vld [vmem:[%s5119_s26 + $0x30] ss:$20 sps:$4 sm:$0xff]  }
  0x13   : > { %2147 = vmatpush1.bf16.msra.mxu1 %v4608_v7  ;;  %2572 = vmatpush1.bf16.msra.mxu0 %v5061_v8  ;;  %v4641_v37 = vld [vmem:[%s5119_s26 + $0x2c] ss:$20 sps:$4 sm:$0xff]   ;;  %v4643_v40 = vld [vmem:[%s5119_s26 + $0x34] ss:$20 sps:$4 sm:$0xff]   ;;  %v4649_v45 = vld [vmem:[%s5119_s26 + $0x5c] ss:$20 sps:$4 sm:$0xff]  }
  0x14   : > { %2148 = vmatprep.subr.bf16.mxu1 %v4990_v1  ;;  %2573 = vmatprep.subr.bf16.mxu0 %v4990_v1  ;;  %v4647_v44 = vld [vmem:[%s5119_s26 + $0x54] ss:$20 sps:$4 sm:$0xff]   ;;  %v4651_v47 = vld [vmem:[%s5119_s26 + $0x50] ss:$20 sps:$4 sm:$0xff]   ;;  %v4652_v48 = vld [vmem:[%s5119_s26 + $0x58] ss:$20 sps:$4 sm:$0xff]  }
  0x15   : > { %v4653_v49 = vld [vmem:[%s5119_s26 + $0x7c] ss:$20 sps:$4 sm:$0xff]   ;;  %v4655_v50 = vld [vmem:[%s5119_s26 + $0x84] ss:$20 sps:$4 sm:$0xff]   ;;  %v4658_v52 = vld [vmem:[%s5119_s26 + $0x80] ss:$20 sps:$4 sm:$0xff]  }
  0x16   : > { %v4657_v51 = vld [vmem:[%s5119_s26 + $0x78] ss:$20 sps:$4 sm:$0xff]   ;;  %v4663_v56 = vld [vmem:[%s5119_s26 + $0xa0] ss:$20 sps:$4 sm:$0xff]   ;;  %v4664_v57 = vld [vmem:[%s5119_s26 + $0xa8] ss:$20 sps:$4 sm:$0xff]  }
  0x17   : > { %2149 = vmatpush1.bf16.msra.mxu1 %v4610_v9  ;;  %2574 = vmatpush1.bf16.msra.mxu0 %v5074_v10  ;;  %v4659_v53 = vld [vmem:[%s5119_s26 + $0xa4] ss:$20 sps:$4 sm:$0xff]   ;;  %v4661_v54 = vld [vmem:[%s5119_s26 + $0xac] ss:$20 sps:$4 sm:$0xff]   ;;  %v4667_v59 = vld [vmem:[%s5119_s26 + $0xd4] ss:$20 sps:$4 sm:$0xff]  }
  0x18   : > { %2150 = vmatprep.subr.bf16.mxu1 %v4990_v1  ;;  %2575 = vmatprep.subr.bf16.mxu0 %v4990_v1  ;;  %v4755_v55 = vld [vmem:[%s6013_s1 + $0x118] sm:$0xff]   ;;  %v4665_v58 = vld [vmem:[%s5119_s26 + $0xcc] ss:$20 sps:$4 sm:$0xff]   ;;  %v4670_v61 = vld [vmem:[%s5119_s26 + $0xd0] ss:$20 sps:$4 sm:$0xff]  }
  0x19   : > { %v4669_v60 = vld [vmem:[%s5119_s26 + $0xc8] ss:$20 sps:$4 sm:$0xff]   ;;  %v4675_v0 = vld [vmem:[%s5119_s26 + $0xf0] ss:$20 sps:$4 sm:$0xff]   ;;  %v4682_v5 = vld [vmem:[%s5119_s26 + $0x118] ss:$20 sps:$4 sm:$0xff]  }
  0x1a   : > { %v4671_v62 = vld [vmem:[%s5119_s26 + $0xf4] ss:$20 sps:$4 sm:$0xff]   ;;  %v4673_v63 = vld [vmem:[%s5119_s26 + $0xfc] ss:$20 sps:$4 sm:$0xff]   ;;  %v4684_v7 = vld [vmem:[%s5119_s26 + $0x144] ss:$20 sps:$4 sm:$0xff]  }
  0x1b   : > { %2151 = vmatpush1.bf16.msra.mxu1 %v4612_v11  ;;  %2576 = vmatpush1.bf16.msra.mxu0 %v5085_v12  ;;  %v4678_v3 = vld [vmem:[%s5119_s26 + $0x11c] ss:$20 sps:$4 sm:$0xff]   ;;  %v4688_v9 = vld [vmem:[%s5119_s26 + $0x140] ss:$20 sps:$4 sm:$0xff]   ;;  %v4704_v19 = vld [vmem:[%s5119_s26 + $0x1c4] ss:$20 sps:$4 sm:$0xff]  }
  0x1c   : > { %2152 = vmatprep.subr.bf16.mxu1 %v4990_v1  ;;  %2577 = vmatprep.subr.bf16.mxu0 %v4990_v1  ;;  %v4690_v11 = vld [vmem:[%s5119_s26 + $0x16c] ss:$20 sps:$4 sm:$0xff]  }
  0x1d   : > { %v4707_v21 = vld [vmem:[%s5119_s26 + $0x1c0] ss:$20 sps:$4 sm:$0xff]  }
  0x1f   : > { %2153 = vmatpush1.bf16.msra.mxu1 %v4614_v13  ;;  %2578 = vmatpush1.bf16.msra.mxu0 %v5098_v14  ;;  %v4694_v13 = vld [vmem:[%s5119_s26 + $0x168] ss:$20 sps:$4 sm:$0xff]  }
  0x20   : > { %2154 = vmatprep.subr.bf16.mxu1 %v4990_v1  ;;  %2579 = vmatprep.subr.bf16.mxu0 %v4990_v1 }
  0x23   : > { %2155 = vmatpush1.bf16.msra.mxu1 %v4616_v15  ;;  %2580 = vmatpush1.bf16.msra.mxu0 %v5110_v16  ;;  %v4696_v15 = vld [vmem:[%s5119_s26 + $0x194] ss:$20 sps:$4 sm:$0xff]  }
  0x24   : > { %2156 = vmatprep.subr.bf16.mxu1 %v4990_v1  ;;  %2581 = vmatprep.subr.bf16.mxu0 %v4990_v1 }
  0x27   : > { %2157 = vmatpush1.bf16.msra.mxu1 %v4618_v17  ;;  %2582 = vmatpush1.bf16.msra.mxu0 %v5126_v18  ;;  %v4701_v17 = vld [vmem:[%s5119_s26 + $0x198] ss:$20 sps:$4 sm:$0xff]  }
  0x28   : > { %2158 = vmatprep.subr.bf16.mxu1 %v4990_v1  ;;  %2583 = vmatprep.subr.bf16.mxu0 %v4990_v1 }
  0x2b   : > { %2159 = vmatpush1.bf16.msra.mxu1 %v4620_v20  ;;  %2584 = vmatpush1.bf16.msra.mxu0 %v5139_v22  ;;  %v4706_v20 = vld [vmem:[%s5119_s26 + $0x1b8] ss:$20 sps:$4 sm:$0xff]  }
  0x2c   : > { %2160 = vmatprep.subr.bf16.mxu1 %v4990_v1  ;;  %2585 = vmatprep.subr.bf16.mxu0 %v4990_v1 }
  0x2f   : > { %2161 = vmatpush1.bf16.msra.mxu1 %v4622_v23  ;;  %2586 = vmatpush1.bf16.msra.mxu0 %v5150_v24  ;;  %v4710_v23 = vld [vmem:[%s5119_s26 + $0x1ec] ss:$20 sps:$4 sm:$0xff]  }
  0x30   : > { %2162 = vmatprep.subr.bf16.mxu1 %v4990_v1  ;;  %2587 = vmatprep.subr.bf16.mxu0 %v4990_v1 }
  0x33   : > { %2163 = vmatpush1.bf16.msra.mxu1 %v4624_v25  ;;  %2588 = vmatpush1.bf16.msra.mxu0 %v5161_v26  ;;  %v4713_v25 = vld [vmem:[%s5119_s26 + $0x1e8] ss:$20 sps:$4 sm:$0xff]  }
  0x34   : > { %2164 = vmatprep.subr.bf16.mxu1 %v4990_v1  ;;  %2589 = vmatprep.subr.bf16.mxu0 %v4990_v1 }
  0x37   : > { %2165 = vmatpush1.bf16.msra.mxu1 %v4626_v27  ;;  %2590 = vmatpush1.bf16.msra.mxu0 %v5172_v28  ;;  %v4717_v27 = vld [vmem:[%s5119_s26 + $0x214] ss:$20 sps:$4 sm:$0xff]  }
  0x38   : > { %2166 = vmatprep.subr.bf16.mxu1 %v4990_v1  ;;  %2591 = vmatprep.subr.bf16.mxu0 %v4990_v1 }
  0x3b   : > { %2167 = vmatpush1.bf16.msra.mxu1 %v4628_v29  ;;  %2592 = vmatpush1.bf16.msra.mxu0 %v5183_v30  ;;  %v4720_v29 = vld [vmem:[%s5119_s26 + $0x210] ss:$20 sps:$4 sm:$0xff]  }
  0x3c   : > { %2168 = vmatprep.subr.bf16.mxu1 %v4990_v1  ;;  %2593 = vmatprep.subr.bf16.mxu0 %v4990_v1 }
  0x3f   : > { %2169 = vmatpush1.bf16.msra.mxu1 %v4630_v31  ;;  %2594 = vmatpush1.bf16.msra.mxu0 %v5194_v32  ;;  %v4723_v31 = vld [vmem:[%s5119_s26 + $0x23c] ss:$20 sps:$4 sm:$0xff]  }
  0x40   : > { %2170 = vmatprep.subr.bf16.mxu1 %v4990_v1  ;;  %2595 = vmatprep.subr.bf16.mxu0 %v4990_v1 }
  0x43   : > { %2171 = vmatpush1.bf16.msra.mxu1 %v4632_v33  ;;  %2596 = vmatpush1.bf16.msra.mxu0 %v5205_v34  ;;  %v4726_v33 = vld [vmem:[%s5119_s26 + $0x238] ss:$20 sps:$4 sm:$0xff]  }
  0x44   : > { %4166 = vmatprep.subr.bf16.mxu1 %v4990_v1  ;;  %3962 = vmatprep.subr.bf16.mxu0 %v4991_v39 }
  0x46   : > { %2173 = vmatmul.mubr.bf16.vlgmr.msra.gmra.mrb[0].mxu1 %v4634_v35  ;;  %2598 = vmatmul.mubr.bf16.vlgmr.msra.gmra.mrb[0].mxu0 %v4637_v36  ;;  %v4729_v35 = vld [vmem:[%s5119_s26 + $0x264] ss:$20 sps:$4 sm:$0xff]  }
  0x47   : > { %2180 = vmatprep.mubr.bf16.mxu1 %v4641_v37  ;;  %3963 = vmatpush3.bf16.msra.mxu0 %v4640_v38  ;;  %v4731_v36 = vld [vmem:[%s5119_s26 + $0x258] ss:$20 sps:$4 sm:$0xff]   ;;  %v4732_v37 = vld [vmem:[%s5119_s26 + $0x260] ss:$20 sps:$4 sm:$0xff]  }
  0x48   : > { %4182 = vmatpush1.bf16.msra.mxu1 %v5029_v2  ;;  %2605 = vmatprep.mubr.bf16.mxu0 %v4643_v40  ;;  %v4676_v2 = vld [vmem:[%s5119_s26 + $0xf8] ss:$20 sps:$4 sm:$0xff]  }
  0x49   : > { %4167 = vmatprep.subr.bf16.mxu1 %v4990_v1  ;;  %3964 = vmatprep.subr.bf16.mxu0 %v4991_v39  ;;  %v4733_v38 = vld [vmem:[%s5119_s26 + $0x284] ss:$20 sps:$4 sm:$0xff]   ;;  %v4735_v40 = vld [vmem:[%s5119_s26 + $0x28c] ss:$20 sps:$4 sm:$0xff]  }
  0x4b   : > { %3965 = vmatpush3.bf16.msra.mxu0 %v4677_v41  ;;  %v4737_v41 = vld [vmem:[%s5119_s26 + $0x280] ss:$20 sps:$4 sm:$0xff]  }
  0x4c   : > { %4183 = vmatpush1.bf16.msra.mxu1 %v5039_v4  ;;  %3966 = vmatprep.subr.bf16.mxu0 %v4991_v39  ;;  %v4680_v4 = vld [vmem:[%s5119_s26 + $0x124] ss:$20 sps:$4 sm:$0xff]  }
  0x4d   : > { %4168 = vmatprep.subr.bf16.mxu1 %v4990_v1 }
  0x4e   : > { %2181 = vmatmul.mubr.bf16.gmra.mrb[4].mxu1 %v4645_v42  ;;  %2606 = vmatmul.mubr.bf16.gmra.mrb[4].mxu0 %v4646_v43  ;;  %v4738_v42 = vld [vmem:[%s5119_s26 + $0x288] ss:$20 sps:$4 sm:$0xff]   ;;  %v4739_v43 = vld [vmem:[%s5119_s26 + $0x2ac] ss:$20 sps:$4 sm:$0xff]  }
  0x4f   : > { %2188 = vmatprep.mubr.bf16.mxu1 %v4647_v44  ;;  %2613 = vmatprep.mubr.bf16.mxu0 %v4649_v45  ;;  %v4741_v44 = vld [vmem:[%s5119_s26 + $0x2b4] ss:$20 sps:$4 sm:$0xff]  }
  0x50   : > { %4184 = vmatpush1.bf16.msra.mxu1 %v5050_v6  ;;  %3967 = vmatpush3.bf16.msra.mxu0 %v4714_v46  ;;  %v4683_v6 = vld [vmem:[%s5119_s26 + $0x120] ss:$20 sps:$4 sm:$0xff]   ;;  %v4743_v45 = vld [vmem:[%s5119_s26 + $0x2a8] ss:$20 sps:$4 sm:$0xff]   ;;  %v4744_v46 = vld [vmem:[%s5119_s26 + $0x2b0] ss:$20 sps:$4 sm:$0xff]  }
  0x51   : > { %4169 = vmatprep.subr.bf16.mxu1 %v4990_v1  ;;  %3968 = vmatprep.subr.bf16.mxu0 %v4991_v39 }
  0x54   : > { %4185 = vmatpush1.bf16.msra.mxu1 %v5061_v8  ;;  %3969 = vmatpush3.bf16.msra.mxu0 %v4755_v55  ;;  %v4686_v8 = vld [vmem:[%s5119_s26 + $0x14c] ss:$20 sps:$4 sm:$0xff]   ;;  %v4758_v55 = vld [vmem:[%s5119_s26 + $0x324] ss:$20 sps:$4 sm:$0xff]  }
  0x55   : > { %4170 = vmatprep.subr.bf16.mxu1 %v4990_v1 }
  0x56   : > { %2189 = vmatmul.mubr.bf16.gmra.mrb[8].mxu1 %v4651_v47  ;;  %2614 = vmatmul.mubr.bf16.gmra.mrb[8].mxu0 %v4652_v48  ;;  %v4745_v47 = vld [vmem:[%s5119_s26 + $0x2d4] ss:$20 sps:$4 sm:$0xff]   ;;  %v4747_v48 = vld [vmem:[%s5119_s26 + $0x2dc] ss:$20 sps:$4 sm:$0xff]  }
  0x57   : > { %2196 = vmatprep.mubr.bf16.mxu1 %v4653_v49  ;;  %2621 = vmatprep.mubr.bf16.mxu0 %v4655_v50  ;;  %v4749_v49 = vld [vmem:[%s5119_s26 + $0x2d0] ss:$20 sps:$4 sm:$0xff]   ;;  %v4750_v50 = vld [vmem:[%s5119_s26 + $0x2d8] ss:$20 sps:$4 sm:$0xff]  }
  0x58   : > { %4186 = vmatpush1.bf16.msra.mxu1 %v5074_v10  ;;  %v4689_v10 = vld [vmem:[%s5119_s26 + $0x148] ss:$20 sps:$4 sm:$0xff]  }
  0x59   : > { %4171 = vmatprep.subr.bf16.mxu1 %v4990_v1 }
  0x5c   : > { %4187 = vmatpush1.bf16.msra.mxu1 %v5085_v12  ;;  %v4692_v12 = vld [vmem:[%s5119_s26 + $0x174] ss:$20 sps:$4 sm:$0xff]  }
  0x5d   : > { %4172 = vmatprep.subr.bf16.mxu1 %v4990_v1 }
  0x5e   : > { %2197 = vmatmul.mubr.bf16.gmra.mrb[12].mxu1 %v4657_v51  ;;  %2622 = vmatmul.mubr.bf16.gmra.mrb[12].mxu0 %v4658_v52  ;;  %v4751_v51 = vld [vmem:[%s5119_s26 + $0x2fc] ss:$20 sps:$4 sm:$0xff]   ;;  %v4753_v52 = vld [vmem:[%s5119_s26 + $0x304] ss:$20 sps:$4 sm:$0xff]  }
  0x5f   : > { %2204 = vmatprep.mubr.bf16.mxu1 %v4659_v53  ;;  %2629 = vmatprep.mubr.bf16.mxu0 %v4661_v54  ;;  %v4756_v53 = vld [vmem:[%s5119_s26 + $0x2f8] ss:$20 sps:$4 sm:$0xff]   ;;  %v4757_v54 = vld [vmem:[%s5119_s26 + $0x300] ss:$20 sps:$4 sm:$0xff]  }
  0x60   : > { %4188 = vmatpush1.bf16.msra.mxu1 %v5098_v14  ;;  %v4695_v14 = vld [vmem:[%s5119_s26 + $0x170] ss:$20 sps:$4 sm:$0xff]  }
  0x61   : > { %4173 = vmatprep.subr.bf16.mxu1 %v4990_v1 }
  0x64   : > { %4189 = vmatpush1.bf16.msra.mxu1 %v5110_v16  ;;  %v4698_v16 = vld [vmem:[%s5119_s26 + $0x19c] ss:$20 sps:$4 sm:$0xff]  }
  0x65   : > { %4174 = vmatprep.subr.bf16.mxu1 %v4990_v1 }
  0x66   : > { %2205 = vmatmul.mubr.bf16.gmra.mrb[16].mxu1 %v4663_v56  ;;  %2630 = vmatmul.mubr.bf16.gmra.mrb[16].mxu0 %v4664_v57  ;;  %v4760_v56 = vld [vmem:[%s5119_s26 + $0x32c] ss:$20 sps:$4 sm:$0xff]  }
  0x67   : > { %2212 = vmatprep.mubr.bf16.mxu1 %v4665_v58  ;;  %2637 = vmatprep.mubr.bf16.mxu0 %v4667_v59  ;;  %v4762_v57 = vld [vmem:[%s5119_s26 + $0x320] ss:$20 sps:$4 sm:$0xff]   ;;  %v4763_v58 = vld [vmem:[%s5119_s26 + $0x328] ss:$20 sps:$4 sm:$0xff]  }
  0x68   : > { %4190 = vmatpush1.bf16.msra.mxu1 %v5126_v18  ;;  %v4702_v18 = vld [vmem:[%s5119_s26 + $0x1bc] ss:$20 sps:$4 sm:$0xff]   ;;  %v4764_v59 = vld [vmem:[%s5119_s26 + $0x34c] ss:$20 sps:$4 sm:$0xff]  }
  0x69   : > { %4175 = vmatprep.subr.bf16.mxu1 %v4990_v1 }
  0x6c   : > { %4191 = vmatpush1.bf16.msra.mxu1 %v5139_v22  ;;  %v4708_v22 = vld [vmem:[%s5119_s26 + $0x1e4] ss:$20 sps:$4 sm:$0xff]  }
  0x6d   : > { %4176 = vmatprep.subr.bf16.mxu1 %v4990_v1 }
  0x6e   : > { %2213 = vmatmul.mubr.bf16.gmra.mrb[20].mxu1 %v4669_v60  ;;  %2638 = vmatmul.mubr.bf16.gmra.mrb[20].mxu0 %v4670_v61  ;;  %v4766_v60 = vld [vmem:[%s5119_s26 + $0x354] ss:$20 sps:$4 sm:$0xff]  }
  0x6f   : > { %2220 = vmatprep.mubr.bf16.mxu1 %v4671_v62  ;;  %2645 = vmatprep.mubr.bf16.mxu0 %v4673_v63  ;;  %v4768_v61 = vld [vmem:[%s5119_s26 + $0x348] ss:$20 sps:$4 sm:$0xff]   ;;  %v4769_v62 = vld [vmem:[%s5119_s26 + $0x350] ss:$20 sps:$4 sm:$0xff]  }
  0x70   : > { %4192 = vmatpush1.bf16.msra.mxu1 %v5150_v24  ;;  %v4712_v24 = vld [vmem:[%s5119_s26 + $0x1e0] ss:$20 sps:$4 sm:$0xff]  }
  0x71   : > { %4177 = vmatprep.subr.bf16.mxu1 %v4990_v1  ;;  %v4770_v63 = vld [vmem:[%s5119_s26 + $0x374] ss:$20 sps:$4 sm:$0xff]  }
  0x74   : > { %4193 = vmatpush1.bf16.msra.mxu1 %v5161_v26  ;;  %v4715_v26 = vld [vmem:[%s5119_s26 + $0x20c] ss:$20 sps:$4 sm:$0xff]  }
  0x75   : > { %4178 = vmatprep.subr.bf16.mxu1 %v4990_v1 }
  0x76   : > { %2221 = vmatmul.mubr.bf16.gmra.mrb[24].mxu1 %v4675_v0  ;;  %2646 = vmatmul.mubr.bf16.gmra.mrb[24].mxu0 %v4676_v2  ;;  %v4772_v0 = vld [vmem:[%s5119_s26 + $0x37c] ss:$20 sps:$4 sm:$0xff]  }
  0x77   : > { %2228 = vmatprep.mubr.bf16.mxu1 %v4678_v3  ;;  %2653 = vmatprep.mubr.bf16.mxu0 %v4680_v4  ;;  %v4774_v2 = vld [vmem:[%s5119_s26 + $0x370] ss:$20 sps:$4 sm:$0xff]   ;;  %v4775_v3 = vld [vmem:[%s5119_s26 + $0x378] ss:$20 sps:$4 sm:$0xff]  }
  0x78   : > { %4194 = vmatpush1.bf16.msra.mxu1 %v5172_v28  ;;  %v4719_v28 = vld [vmem:[%s5119_s26 + $0x208] ss:$20 sps:$4 sm:$0xff]  }
  0x79   : > { %4179 = vmatprep.subr.bf16.mxu1 %v4990_v1  ;;  %v4776_v4 = vld [vmem:[%s5119_s26 + $0x39c] ss:$20 sps:$4 sm:$0xff]  }
  0x7c   : > { %4195 = vmatpush1.bf16.msra.mxu1 %v5183_v30  ;;  %v4721_v30 = vld [vmem:[%s5119_s26 + $0x234] ss:$20 sps:$4 sm:$0xff]  }
  0x7d   : > { %4180 = vmatprep.subr.bf16.mxu1 %v4990_v1 }
  0x7e   : > { %2229 = vmatmul.mubr.bf16.gmra.mrb[28].mxu1 %v4682_v5  ;;  %2654 = vmatmul.mubr.bf16.gmra.mrb[28].mxu0 %v4683_v6  ;;  %v4778_v5 = vld [vmem:[%s5119_s26 + $0x3a4] ss:$20 sps:$4 sm:$0xff]  }
  0x7f   : > { %2236 = vmatprep.mubr.bf16.mxu1 %v4684_v7  ;;  %2661 = vmatprep.mubr.bf16.mxu0 %v4686_v8  ;;  %v4780_v6 = vld [vmem:[%s5119_s26 + $0x398] ss:$20 sps:$4 sm:$0xff]   ;;  %v4781_v7 = vld [vmem:[%s5119_s26 + $0x3a0] ss:$20 sps:$4 sm:$0xff]  }
  0x80   : > { %4196 = vmatpush1.bf16.msra.mxu1 %v5194_v32  ;;  %v4725_v32 = vld [vmem:[%s5119_s26 + $0x230] ss:$20 sps:$4 sm:$0xff]  }
  0x81   : > { %4181 = vmatprep.subr.bf16.mxu1 %v4990_v1  ;;  %v4700_v1 = vld [vmem:[%s5119_s26 + $0x190] ss:$20 sps:$4 sm:$0xff]  }
  0x82   : > { %v4782_v8 = vld [vmem:[%s5119_s26 + $0x3c4] ss:$20 sps:$4 sm:$0xff]  }
  0x84   : > { %4197 = vmatpush1.bf16.msra.mxu1 %v5205_v34  ;;  %v4727_v34 = vld [vmem:[%s5119_s26 + $0x25c] ss:$20 sps:$4 sm:$0xff]  }
  0x86   : > { %2237 = vmatmul.mubr.bf16.gmra.mrb[32].mxu1 %v4688_v9  ;;  %2662 = vmatmul.mubr.bf16.gmra.mrb[32].mxu0 %v4689_v10  ;;  %v4784_v9 = vld [vmem:[%s5119_s26 + $0x3cc] ss:$20 sps:$4 sm:$0xff]  }
  0x87   : > { %2244 = vmatprep.mubr.bf16.mxu1 %v4690_v11  ;;  %2669 = vmatprep.mubr.bf16.mxu0 %v4692_v12  ;;  %v4786_v10 = vld [vmem:[%s5119_s26 + $0x3c0] ss:$20 sps:$4 sm:$0xff]   ;;  %v4787_v11 = vld [vmem:[%s5119_s26 + $0x3c8] ss:$20 sps:$4 sm:$0xff]  }
  0x88   : > { %v4788_v12 = vld [vmem:[%s5119_s26 + $0x3ec] ss:$20 sps:$4 sm:$0xff]  }
  0x8e   : > { %2245 = vmatmul.mubr.bf16.gmra.mrb[36].mxu1 %v4694_v13  ;;  %2670 = vmatmul.mubr.bf16.gmra.mrb[36].mxu0 %v4695_v14  ;;  %v4790_v13 = vld [vmem:[%s5119_s26 + $0x3e8] ss:$20 sps:$4 sm:$0xff]   ;;  %v4791_v14 = vld [vmem:[%s5119_s26 + $0x10] ss:$20 sps:$4 sm:$0xff]  }
  0x8f   : > { %2252 = vmatprep.mubr.bf16.mxu1 %v4696_v15  ;;  %2677 = vmatprep.mubr.bf16.mxu0 %v4698_v16  ;;  %v4792_v15 = vld [vmem:[%s5119_s26 + $0x414] ss:$20 sps:$4 sm:$0xff]   ;;  %v4794_v16 = vld [vmem:[%s5119_s26 + $0x410] ss:$20 sps:$4 sm:$0xff]  }
  0x96   : > { %2253 = vmatmul.mubr.bf16.gmra.mrb[40].mxu1 %v4700_v1  ;;  %2678 = vmatmul.mubr.bf16.gmra.mrb[40].mxu0 %v4701_v17  ;;  %v4795_v1 = vld [vmem:[%s5119_s26 + $0x38] ss:$20 sps:$4 sm:$0xff]   ;;  %v4796_v17 = vld [vmem:[%s5119_s26 + $0x43c] ss:$20 sps:$4 sm:$0xff]  }
  0x97   : > { %2260 = vmatprep.mubr.bf16.mxu1 %v4702_v18  ;;  %2685 = vmatprep.mubr.bf16.mxu0 %v4704_v19 }
  0x9e   : > { %2261 = vmatmul.mubr.bf16.gmra.mrb[44].mxu1 %v4706_v20  ;;  %2686 = vmatmul.mubr.bf16.gmra.mrb[44].mxu0 %v4707_v21  ;;  %v4798_v20 = vld [vmem:[%s5119_s26 + $0x438] ss:$20 sps:$4 sm:$0xff]   ;;  %v4799_v21 = vld [vmem:[%s5119_s26 + $0x60] ss:$20 sps:$4 sm:$0xff]  }
  0x9f   : > { %2268 = vmatprep.mubr.bf16.mxu1 %v4708_v22  ;;  %2693 = vmatprep.mubr.bf16.mxu0 %v4710_v23  ;;  %v4800_v23 = vld [vmem:[%s5119_s26 + $0x464] ss:$20 sps:$4 sm:$0xff]  }
  0xa6   : > { %2269 = vmatmul.mubr.bf16.gmra.mrb[48].mxu1 %v4712_v24  ;;  %2694 = vmatmul.mubr.bf16.gmra.mrb[48].mxu0 %v4713_v25 }
  0xa7   : > { %2276 = vmatprep.mubr.bf16.mxu1 %v4715_v26  ;;  %2701 = vmatprep.mubr.bf16.mxu0 %v4717_v27  ;;  %v4802_v27 = vld [vmem:[%s5119_s26 + $0x460] ss:$20 sps:$4 sm:$0xff]  }
  0xae   : > { %2277 = vmatmul.mubr.bf16.gmra.mrb[52].mxu1 %v4719_v28  ;;  %2702 = vmatmul.mubr.bf16.gmra.mrb[52].mxu0 %v4720_v29  ;;  %v4803_v28 = vld [vmem:[%s5119_s26 + $0x88] ss:$20 sps:$4 sm:$0xff]  }
  0xaf   : > { %2284 = vmatprep.mubr.bf16.mxu1 %v4721_v30  ;;  %2709 = vmatprep.mubr.bf16.mxu0 %v4723_v31  ;;  %v4804_v30 = vld [vmem:[%s5119_s26 + $0x48c] ss:$20 sps:$4 sm:$0xff]  }
  0xb6   : > { %2285 = vmatmul.mubr.bf16.gmra.mrb[56].mxu1 %v4725_v32  ;;  %2710 = vmatmul.mubr.bf16.gmra.mrb[56].mxu0 %v4726_v33 }
  0xb7   : > { %2292 = vmatprep.mubr.bf16.mxu1 %v4727_v34  ;;  %2717 = vmatprep.mubr.bf16.mxu0 %v4729_v35  ;;  %v4806_v34 = vld [vmem:[%s5119_s26 + $0x488] ss:$20 sps:$4 sm:$0xff]   ;;  %v4807_v35 = vld [vmem:[%s5119_s26 + $0xb0] ss:$20 sps:$4 sm:$0xff]  }
  0xbe   : > { %2293 = vmatmul.mubr.bf16.gmra.mrb[60].mxu1 %v4731_v36  ;;  %2718 = vmatmul.mubr.bf16.gmra.mrb[60].mxu0 %v4732_v37  ;;  %v4808_v37 = vld [vmem:[%s5119_s26 + $0x4b4] ss:$20 sps:$4 sm:$0xff]  }
  0xbf   : > { %2300 = vmatprep.mubr.bf16.mxu1 %v4733_v38  ;;  %2725 = vmatprep.mubr.bf16.mxu0 %v4735_v40 }
  0xc6   : > { %2301 = vmatmul.mubr.bf16.gmra.mrb[64].mxu1 %v4737_v41  ;;  %2726 = vmatmul.mubr.bf16.gmra.mrb[64].mxu0 %v4738_v42  ;;  %v4810_v42 = vld [vmem:[%s5119_s26 + $0x4b0] ss:$20 sps:$4 sm:$0xff]  }
  0xc7   : > { %2308 = vmatprep.mubr.bf16.mxu1 %v4739_v43  ;;  %2733 = vmatprep.mubr.bf16.mxu0 %v4741_v44  ;;  %v4811_v43 = vld [vmem:[%s5119_s26 + $0xd8] ss:$20 sps:$4 sm:$0xff]  }
  0xce   : > { %2309 = vmatmul.mubr.bf16.gmra.mrb[68].mxu1 %v4743_v45  ;;  %2734 = vmatmul.mubr.bf16.gmra.mrb[68].mxu0 %v4744_v46  ;;  %v4812_v45 = vld [vmem:[%s5119_s26 + $0x4dc] ss:$20 sps:$4 sm:$0xff]  }
  0xcf   : > { %2316 = vmatprep.mubr.bf16.mxu1 %v4745_v47  ;;  %2741 = vmatprep.mubr.bf16.mxu0 %v4747_v48 }
  0xd6   : > { %2317 = vmatmul.mubr.bf16.gmra.mrb[72].mxu1 %v4749_v49  ;;  %2742 = vmatmul.mubr.bf16.gmra.mrb[72].mxu0 %v4750_v50  ;;  %v4814_v49 = vld [vmem:[%s5119_s26 + $0x4d8] ss:$20 sps:$4 sm:$0xff]   ;;  %v4815_v50 = vld [vmem:[%s5119_s26 + $0x100] ss:$20 sps:$4 sm:$0xff]  }
  0xd7   : > { %2324 = vmatprep.mubr.bf16.mxu1 %v4751_v51  ;;  %2749 = vmatprep.mubr.bf16.mxu0 %v4753_v52  ;;  %v4816_v52 = vld [vmem:[%s5119_s26 + $0x504] ss:$20 sps:$4 sm:$0xff]  }
  0xde   : > { %2325 = vmatmul.mubr.bf16.gmra.mrb[76].mxu1 %v4756_v53  ;;  %2750 = vmatmul.mubr.bf16.gmra.mrb[76].mxu0 %v4757_v54 }
  0xdf   : > { %2332 = vmatprep.mubr.bf16.mxu1 %v4758_v55  ;;  %2757 = vmatprep.mubr.bf16.mxu0 %v4760_v56  ;;  %v4818_v56 = vld [vmem:[%s5119_s26 + $0x500] ss:$20 sps:$4 sm:$0xff]  }
  0xe6   : > { %2333 = vmatmul.mubr.bf16.gmra.mrb[80].mxu1 %v4762_v57  ;;  %2758 = vmatmul.mubr.bf16.gmra.mrb[80].mxu0 %v4763_v58  ;;  %v4819_v57 = vld [vmem:[%s5119_s26 + $0x128] ss:$20 sps:$4 sm:$0xff]  }
  0xe7   : > { %2340 = vmatprep.mubr.bf16.mxu1 %v4764_v59  ;;  %2765 = vmatprep.mubr.bf16.mxu0 %v4766_v60  ;;  %v4820_v59 = vld [vmem:[%s5119_s26 + $0x52c] ss:$20 sps:$4 sm:$0xff]  }
  0xee   : > { %2341 = vmatmul.mubr.bf16.gmra.mrb[84].mxu1 %v4768_v61  ;;  %2766 = vmatmul.mubr.bf16.gmra.mrb[84].mxu0 %v4769_v62 }
  0xef   : > { %2348 = vmatprep.mubr.bf16.mxu1 %v4770_v63  ;;  %2773 = vmatprep.mubr.bf16.mxu0 %v4772_v0  ;;  %v4822_v63 = vld [vmem:[%s5119_s26 + $0x528] ss:$20 sps:$4 sm:$0xff]   ;;  %v4823_v0 = vld [vmem:[%s5119_s26 + $0x150] ss:$20 sps:$4 sm:$0xff]  }
  0xf6   : > { %2349 = vmatmul.mubr.bf16.gmra.mrb[88].mxu1 %v4774_v2  ;;  %2774 = vmatmul.mubr.bf16.gmra.mrb[88].mxu0 %v4775_v3  ;;  %v4824_v3 = vld [vmem:[%s5119_s26 + $0x554] ss:$20 sps:$4 sm:$0xff]  }
  0xf7   : > { %2356 = vmatprep.mubr.bf16.mxu1 %v4776_v4  ;;  %2781 = vmatprep.mubr.bf16.mxu0 %v4778_v5 }
  0xfe   : > { %2357 = vmatmul.mubr.bf16.gmra.mrb[92].mxu1 %v4780_v6  ;;  %2782 = vmatmul.mubr.bf16.gmra.mrb[92].mxu0 %v4781_v7  ;;  %v4826_v7 = vld [vmem:[%s5119_s26 + $0x550] ss:$20 sps:$4 sm:$0xff]  }
  0xff   : > { %2364 = vmatprep.mubr.bf16.mxu1 %v4782_v8  ;;  %2789 = vmatprep.mubr.bf16.mxu0 %v4784_v9  ;;  %v4827_v8 = vld [vmem:[%s5119_s26 + $0x178] ss:$20 sps:$4 sm:$0xff]  }
 0x106   : > { %2365 = vmatmul.mubr.bf16.gmra.mrb[96].mxu1 %v4786_v10  ;;  %2790 = vmatmul.mubr.bf16.gmra.mrb[96].mxu0 %v4787_v11  ;;  %v4828_v10 = vld [vmem:[%s5119_s26 + $0x57c] ss:$20 sps:$4 sm:$0xff]  }
 0x107   : > { %2372 = vmatprep.mubr.bf16.mxu1 %v4788_v12  ;;  %3970 = vmatprep.mubr.msk.bf16.mxu0 %vm4992_vm0, %v4991_v39 }
 0x10e   : > { %2373 = vmatmul.mubr.bf16.gmra.mrb[100].mxu1 %v4790_v13  ;;  %3971 = vmatmul.mubr.msk.bf16.vlgmr.msra.gmra.mrb[0].mxu0 %vm1992_vm1, %v4791_v14  ;;  %v4830_v14 = vld [vmem:[%s5119_s26 + $0x578] ss:$20 sps:$4 sm:$0xff]  }
 0x10f   : > { %2380 = vmatprep.mubr.bf16.mxu1 %v4792_v15  ;;  %3974 = vmatprep.mubr.msk.bf16.mxu0 %vm4992_vm0, %v4991_v39  ;;  %v4831_v15 = vld [vmem:[%s5119_s26 + $0x1a0] ss:$20 sps:$4 sm:$0xff]  }
 0x116   : > { %2381 = vmatmul.mubr.bf16.gmra.mrb[104].mxu1 %v4794_v16  ;;  %3975 = vmatmul.mubr.msk.bf16.gmra.mrb[4].mxu0 %vm1992_vm1, %v4795_v1  ;;  %v4832_v1 = vld [vmem:[%s5119_s26 + $0x5a4] ss:$20 sps:$4 sm:$0xff]  }
 0x117   : > { %2388 = vmatprep.mubr.bf16.mxu1 %v4796_v17  ;;  %3978 = vmatprep.mubr.msk.bf16.mxu0 %vm4992_vm0, %v4991_v39 }
 0x119   : > { %v5370_v18 = vpop.f32.mrb[0].mxu1 }
 0x11a   : > { %v2176_v19 = vpop.f32.mrb[1].mxu1 }
 0x11b   : > { %v5374_v22 = vpop.f32.mrb[2].mxu1 }
 0x11c   : > { %v2179_v24 = vpop.f32.mrb[3].mxu1 }
 0x11e   : > { %2389 = vmatmul.mubr.bf16.gmra.mrb[108].mxu1 %v4798_v20  ;;  %3979 = vmatmul.mubr.msk.bf16.gmra.mrb[8].mxu0 %vm1992_vm1, %v4799_v21  ;;  %v4834_v21 = vld [vmem:[%s5119_s26 + $0x5a0] ss:$20 sps:$4 sm:$0xff]  }
 0x11f   : > { %2396 = vmatprep.mubr.bf16.mxu1 %v4800_v23  ;;  %3982 = vmatprep.mubr.msk.bf16.mxu0 %vm4992_vm0, %v4991_v39  ;;  %v4835_v23 = vld [vmem:[%s5119_s26 + $0x1c8] ss:$20 sps:$4 sm:$0xff]  }
 0x121   : > { %v5380_v25 = vpop.f32.mrb[4].mxu1 }
 0x122   : > { %v2184_v26 = vpop.f32.mrb[5].mxu1 }
 0x123   : > { %v5384_v29 = vpop.f32.mrb[6].mxu1  ;;  %v4836_v26 = vld [vmem:[%s5119_s26 + $0x5cc] ss:$20 sps:$4 sm:$0xff]  }
 0x124   : > { %v2187_v31 = vpop.f32.mrb[7].mxu1 }
 0x125   : > { %v4838_v31 = vld [vmem:[%s5119_s26 + $0x5c8] ss:$20 sps:$4 sm:$0xff]  }
 0x126   : > { %2397 = vmatmul.mubr.bf16.gmra.mrb[112].mxu1 %v4802_v27  ;;  %3983 = vmatmul.mubr.msk.bf16.gmra.mrb[12].mxu0 %vm1992_vm1, %v4803_v28 }
 0x127   : > { %2404 = vmatprep.mubr.bf16.mxu1 %v4804_v30  ;;  %3986 = vmatprep.mubr.msk.bf16.mxu0 %vm4992_vm0, %v4991_v39 }
 0x129   : > { %v5390_v32 = vpop.f32.mrb[8].mxu1 }
 0x12a   : > { %v2192_v33 = vpop.f32.mrb[9].mxu1 }
 0x12b   : > { %v5394_v36 = vpop.f32.mrb[10].mxu1  ;;  %v4839_v33 = vld [vmem:[%s5119_s26 + $0x1f0] ss:$20 sps:$4 sm:$0xff]  }
 0x12c   : > { %v2195_v38 = vpop.f32.mrb[11].mxu1 }
 0x12e   : > { %2405 = vmatmul.mubr.bf16.gmra.mrb[116].mxu1 %v4806_v34  ;;  %3987 = vmatmul.mubr.msk.bf16.gmra.mrb[16].mxu0 %vm1992_vm1, %v4807_v35  ;;  %v4840_v35 = vld [vmem:[%s5119_s26 + $0x5f4] ss:$20 sps:$4 sm:$0xff]  }
 0x12f   : > { %2412 = vmatprep.mubr.bf16.mxu1 %v4808_v37  ;;  %3990 = vmatprep.mubr.msk.bf16.mxu0 %vm4992_vm0, %v4991_v39 }
 0x131   : > { %v5400_v40 = vpop.f32.mrb[12].mxu1 }
 0x132   : > { %v2200_v41 = vpop.f32.mrb[13].mxu1 }
 0x133   : > { %v5404_v44 = vpop.f32.mrb[14].mxu1 }
 0x134   : > { %v2203_v46 = vpop.f32.mrb[15].mxu1 }
 0x135   : > { %v4844_v46 = vld [vmem:[%s5119_s26 + $0x61c] ss:$20 sps:$4 sm:$0xff]  }
 0x136   : > { %2413 = vmatmul.mubr.bf16.gmra.mrb[120].mxu1 %v4810_v42  ;;  %3991 = vmatmul.mubr.msk.bf16.gmra.mrb[20].mxu0 %vm1992_vm1, %v4811_v43  ;;  %v4842_v42 = vld [vmem:[%s5119_s26 + $0x5f0] ss:$20 sps:$4 sm:$0xff]   ;;  %v4843_v43 = vld [vmem:[%s5119_s26 + $0x218] ss:$20 sps:$4 sm:$0xff]  }
 0x137   : > { %2420 = vmatprep.mubr.bf16.mxu1 %v4812_v45  ;;  %3994 = vmatprep.mubr.msk.bf16.mxu0 %vm4992_vm0, %v4991_v39 }
 0x139   : > { %v5410_v47 = vpop.f32.mrb[16].mxu1 }
 0x13a   : > { %v2208_v48 = vpop.f32.mrb[17].mxu1 }
 0x13b   : > { %v5414_v51 = vpop.f32.mrb[18].mxu1 }
 0x13c   : > { %v2211_v53 = vpop.f32.mrb[19].mxu1 }
 0x13d   : > { %v4847_v53 = vld [vmem:[%s5119_s26 + $0x240] ss:$20 sps:$4 sm:$0xff]  }
 0x13e   : > { %2421 = vmatmul.mubr.bf16.gmra.mrb[124].mxu1 %v4814_v49  ;;  %3995 = vmatmul.mubr.msk.bf16.gmra.mrb[24].mxu0 %vm1992_vm1, %v4815_v50 }
 0x13f   : > { %2428 = vmatprep.mubr.bf16.mxu1 %v4816_v52  ;;  %3998 = vmatprep.mubr.msk.bf16.mxu0 %vm4992_vm0, %v4991_v39  ;;  %v4846_v52 = vld [vmem:[%s5119_s26 + $0x618] ss:$20 sps:$4 sm:$0xff]  }
 0x141   : > { %v5420_v54 = vpop.f32.mrb[20].mxu1 }
 0x142   : > { %v2216_v55 = vpop.f32.mrb[21].mxu1 }
 0x143   : > { %v5424_v58 = vpop.f32.mrb[22].mxu1 }
 0x144   : > { %v2219_v60 = vpop.f32.mrb[23].mxu1 }
 0x146   : > { %2429 = vmatmul.mubr.bf16.gmra.mrb[128].mxu1 %v4818_v56  ;;  %3999 = vmatmul.mubr.msk.bf16.gmra.mrb[28].mxu0 %vm1992_vm1, %v4819_v57  ;;  %v4848_v56 = vld [vmem:[%s5119_s26 + $0x644] ss:$20 sps:$4 sm:$0xff]  }
 0x147   : > { %2436 = vmatprep.mubr.bf16.mxu1 %v4820_v59  ;;  %4002 = vmatprep.mubr.msk.bf16.mxu0 %vm4992_vm0, %v4991_v39 }
 0x149   : > { %v5430_v61 = vpop.f32.mrb[24].mxu1 }
 0x14a   : > { %v2224_v62 = vpop.f32.mrb[25].mxu1 }
 0x14b   : > { %v5434_v2 = vpop.f32.mrb[26].mxu1  ;;  %v4850_v62 = vld [vmem:[%s5119_s26 + $0x640] ss:$20 sps:$4 sm:$0xff]  }
 0x14c   : > { %v2227_v4 = vpop.f32.mrb[27].mxu1 }
 0x14e   : > { %2437 = vmatmul.mubr.bf16.gmra.mrb[132].mxu1 %v4822_v63  ;;  %4003 = vmatmul.mubr.msk.bf16.gmra.mrb[32].mxu0 %vm1992_vm1, %v4823_v0  ;;  %v4851_v63 = vld [vmem:[%s5119_s26 + $0x268] ss:$20 sps:$4 sm:$0xff]  }
 0x14f   : > { %2444 = vmatprep.mubr.bf16.mxu1 %v4824_v3  ;;  %4006 = vmatprep.mubr.msk.bf16.mxu0 %vm4992_vm0, %v4991_v39  ;;  %v4852_v3 = vld [vmem:[%s5119_s26 + $0x66c] ss:$20 sps:$4 sm:$0xff]  }
 0x151   : > { %v5440_v5 = vpop.f32.mrb[28].mxu1 }
 0x152   : > { %v2232_v6 = vpop.f32.mrb[29].mxu1 }
 0x153   : > { %v5444_v9 = vpop.f32.mrb[30].mxu1 }
 0x154   : > { %v2235_v11 = vpop.f32.mrb[31].mxu1 }
 0x156   : > { %2445 = vmatmul.mubr.bf16.gmra.mrb[136].mxu1 %v4826_v7  ;;  %4007 = vmatmul.mubr.msk.bf16.gmra.mrb[36].mxu0 %vm1992_vm1, %v4827_v8  ;;  %v4854_v8 = vld [vmem:[%s5119_s26 + $0x668] ss:$20 sps:$4 sm:$0xff]  }
 0x157   : > { %2452 = vmatprep.mubr.bf16.mxu1 %v4828_v10  ;;  %4010 = vmatprep.mubr.msk.bf16.mxu0 %vm4992_vm0, %v4991_v39  ;;  %v4855_v10 = vld [vmem:[%s5119_s26 + $0x290] ss:$20 sps:$4 sm:$0xff]  }
 0x159   : > { %v5450_v12 = vpop.f32.mrb[32].mxu1 }
 0x15a   : > { %v2240_v13 = vpop.f32.mrb[33].mxu1 }
 0x15b   : > { %v5454_v16 = vpop.f32.mrb[34].mxu1  ;;  %v4856_v13 = vld [vmem:[%s5119_s26 + $0x694] ss:$20 sps:$4 sm:$0xff]  }
 0x15c   : > { %v2243_v17 = vpop.f32.mrb[35].mxu1 }
 0x15d   : > { %v4858_v17 = vld [vmem:[%s5119_s26 + $0x690] ss:$20 sps:$4 sm:$0xff]  }
 0x15e   : > { %2453 = vmatmul.mubr.bf16.gmra.mrb[140].mxu1 %v4830_v14  ;;  %4011 = vmatmul.mubr.msk.bf16.gmra.mrb[40].mxu0 %vm1992_vm1, %v4831_v15 }
 0x15f   : > { %2460 = vmatprep.mubr.bf16.mxu1 %v4832_v1  ;;  %4014 = vmatprep.mubr.msk.bf16.mxu0 %vm4992_vm0, %v4991_v39 }
 0x161   : > { %v5460_v19 = vpop.f32.mrb[36].mxu1 }
 0x162   : > { %v2248_v20 = vpop.f32.mrb[37].mxu1 }
 0x163   : > { %v5464_v24 = vpop.f32.mrb[38].mxu1  ;;  %v4859_v20 = vld [vmem:[%s5119_s26 + $0x2b8] ss:$20 sps:$4 sm:$0xff]  }
 0x164   : > { %v2251_v27 = vpop.f32.mrb[39].mxu1 }
 0x166   : > { %2461 = vmatmul.mubr.bf16.gmra.mrb[144].mxu1 %v4834_v21  ;;  %4015 = vmatmul.mubr.msk.bf16.gmra.mrb[44].mxu0 %vm1992_vm1, %v4835_v23  ;;  %v4860_v23 = vld [vmem:[%s5119_s26 + $0x6bc] ss:$20 sps:$4 sm:$0xff]  }
 0x167   : > { %2468 = vmatprep.mubr.bf16.mxu1 %v4836_v26  ;;  %4018 = vmatprep.mubr.msk.bf16.mxu0 %vm4992_vm0, %v4991_v39 }
 0x169   : > { %v5470_v28 = vpop.f32.mrb[40].mxu1 }
 0x16a   : > { %v2256_v30 = vpop.f32.mrb[41].mxu1 }
 0x16b   : > { %v5474_v34 = vpop.f32.mrb[42].mxu1 }
 0x16c   : > { %v2259_v37 = vpop.f32.mrb[43].mxu1 }
 0x16d   : > { %v4864_v37 = vld [vmem:[%s5119_s26 + $0x6e4] ss:$20 sps:$4 sm:$0xff]  }
 0x16e   : > { %2469 = vmatmul.mubr.bf16.gmra.mrb[148].mxu1 %v4838_v31  ;;  %4019 = vmatmul.mubr.msk.bf16.gmra.mrb[48].mxu0 %vm1992_vm1, %v4839_v33  ;;  %v4862_v31 = vld [vmem:[%s5119_s26 + $0x6b8] ss:$20 sps:$4 sm:$0xff]   ;;  %v4863_v33 = vld [vmem:[%s5119_s26 + $0x2e0] ss:$20 sps:$4 sm:$0xff]  }
 0x16f   : > { %2476 = vmatprep.mubr.bf16.mxu1 %v4840_v35  ;;  %4022 = vmatprep.mubr.msk.bf16.mxu0 %vm4992_vm0, %v4991_v39 }
 0x171   : > { %v5480_v38 = vpop.f32.mrb[44].mxu1 }
 0x172   : > { %v2264_v41 = vpop.f32.mrb[45].mxu1 }
 0x173   : > { %v5484_v45 = vpop.f32.mrb[46].mxu1 }
 0x174   : > { %v2267_v48 = vpop.f32.mrb[47].mxu1 }
 0x175   : > { %v4867_v48 = vld [vmem:[%s5119_s26 + $0x308] ss:$20 sps:$4 sm:$0xff]  }
 0x176   : > { %2477 = vmatmul.mubr.bf16.gmra.mrb[152].mxu1 %v4842_v42  ;;  %4023 = vmatmul.mubr.msk.bf16.gmra.mrb[52].mxu0 %vm1992_vm1, %v4843_v43 }
 0x177   : > { %2484 = vmatprep.mubr.bf16.mxu1 %v4844_v46  ;;  %4026 = vmatprep.mubr.msk.bf16.mxu0 %vm4992_vm0, %v4991_v39  ;;  %v4866_v46 = vld [vmem:[%s5119_s26 + $0x6e0] ss:$20 sps:$4 sm:$0xff]  }
 0x179   : > { %v5490_v49 = vpop.f32.mrb[48].mxu1 }
 0x17a   : > { %v2272_v50 = vpop.f32.mrb[49].mxu1 }
 0x17b   : > { %v5494_v55 = vpop.f32.mrb[50].mxu1 }
 0x17c   : > { %v2275_v57 = vpop.f32.mrb[51].mxu1 }
 0x17e   : > { %2485 = vmatmul.mubr.bf16.gmra.mrb[156].mxu1 %v4846_v52  ;;  %4027 = vmatmul.mubr.msk.bf16.gmra.mrb[56].mxu0 %vm1992_vm1, %v4847_v53  ;;  %v4868_v52 = vld [vmem:[%s5119_s26 + $0x70c] ss:$20 sps:$4 sm:$0xff]  }
 0x17f   : > { %2492 = vmatprep.mubr.bf16.mxu1 %v4848_v56  ;;  %4030 = vmatprep.mubr.msk.bf16.mxu0 %vm4992_vm0, %v4991_v39 }
 0x181   : > { %v5500_v59 = vpop.f32.mrb[52].mxu1 }
 0x182   : > { %v2280_v60 = vpop.f32.mrb[53].mxu1 }
 0x183   : > { %v5504_v0 = vpop.f32.mrb[54].mxu1  ;;  %v4870_v60 = vld [vmem:[%s5119_s26 + $0x708] ss:$20 sps:$4 sm:$0xff]  }
 0x184   : > { %v2283_v4 = vpop.f32.mrb[55].mxu1 }
 0x186   : > { %2493 = vmatmul.mubr.bf16.gmra.mrb[160].mxu1 %v4850_v62  ;;  %4031 = vmatmul.mubr.msk.bf16.gmra.mrb[60].mxu0 %vm1992_vm1, %v4851_v63  ;;  %v4871_v62 = vld [vmem:[%s5119_s26 + $0x330] ss:$20 sps:$4 sm:$0xff]  }
 0x187   : > { %2500 = vmatprep.mubr.bf16.mxu1 %v4852_v3  ;;  %4034 = vmatprep.mubr.msk.bf16.mxu0 %vm4992_vm0, %v4991_v39  ;;  %v4872_v3 = vld [vmem:[%s5119_s26 + $0x734] ss:$20 sps:$4 sm:$0xff]  }
 0x189   : > { %v5510_v6 = vpop.f32.mrb[56].mxu1 }
 0x18a   : > { %v2288_v7 = vpop.f32.mrb[57].mxu1 }
 0x18b   : > { %v5514_v11 = vpop.f32.mrb[58].mxu1 }
 0x18c   : > { %v2291_v14 = vpop.f32.mrb[59].mxu1 }
 0x18e   : > { %2501 = vmatmul.mubr.bf16.gmra.mrb[164].mxu1 %v4854_v8  ;;  %4035 = vmatmul.mubr.msk.bf16.gmra.mrb[64].mxu0 %vm1992_vm1, %v4855_v10  ;;  %v4874_v10 = vld [vmem:[%s5119_s26 + $0x730] ss:$20 sps:$4 sm:$0xff]  }
 0x18f   : > { %2508 = vmatprep.mubr.bf16.mxu1 %v4856_v13  ;;  %4038 = vmatprep.mubr.msk.bf16.mxu0 %vm4992_vm0, %v4991_v39  ;;  %v4875_v13 = vld [vmem:[%s5119_s26 + $0x358] ss:$20 sps:$4 sm:$0xff]  }
 0x191   : > { %v5520_v15 = vpop.f32.mrb[60].mxu1 }
 0x192   : > { %v2296_v1 = vpop.f32.mrb[61].mxu1 }
 0x193   : > { %v5524_v21 = vpop.f32.mrb[62].mxu1  ;;  %v4876_v1 = vld [vmem:[%s5119_s26 + $0x75c] ss:$20 sps:$4 sm:$0xff]  }
 0x194   : > { %v2299_v26 = vpop.f32.mrb[63].mxu1 }
 0x195   : > { %v4878_v26 = vld [vmem:[%s5119_s26 + $0x758] ss:$20 sps:$4 sm:$0xff]  }
 0x196   : > { %2509 = vmatmul.mubr.bf16.gmra.mrb[168].mxu1 %v4858_v17  ;;  %4039 = vmatmul.mubr.msk.bf16.gmra.mrb[68].mxu0 %vm1992_vm1, %v4859_v20 }
 0x197   : > { %2516 = vmatprep.mubr.bf16.mxu1 %v4860_v23  ;;  %4042 = vmatprep.mubr.msk.bf16.mxu0 %vm4992_vm0, %v4991_v39 }
 0x199   : > { %v5530_v27 = vpop.f32.mrb[64].mxu1 }
 0x19a   : > { %v2304_v30 = vpop.f32.mrb[65].mxu1 }
 0x19b   : > { %v5534_v35 = vpop.f32.mrb[66].mxu1  ;;  %v4879_v30 = vld [vmem:[%s5119_s26 + $0x380] ss:$20 sps:$4 sm:$0xff]  }
 0x19c   : > { %v2307_v41 = vpop.f32.mrb[67].mxu1 }
 0x19e   : > { %2517 = vmatmul.mubr.bf16.gmra.mrb[172].mxu1 %v4862_v31  ;;  %4043 = vmatmul.mubr.msk.bf16.gmra.mrb[72].mxu0 %vm1992_vm1, %v4863_v33  ;;  %v4880_v33 = vld [vmem:[%s5119_s26 + $0x784] ss:$20 sps:$4 sm:$0xff]  }
 0x19f   : > { %2524 = vmatprep.mubr.bf16.mxu1 %v4864_v37  ;;  %4046 = vmatprep.mubr.msk.bf16.mxu0 %vm4992_vm0, %v4991_v39 }
 0x1a1   : > { %v5540_v42 = vpop.f32.mrb[68].mxu1 }
 0x1a2   : > { %v2312_v43 = vpop.f32.mrb[69].mxu1 }
 0x1a3   : > { %v5544_v50 = vpop.f32.mrb[70].mxu1 }
 0x1a4   : > { %v2315_v53 = vpop.f32.mrb[71].mxu1 }
 0x1a5   : > { %v4886_v53 = vld [vmem:[%s5119_s26 + $0x3f4] ss:$20 sps:$4 sm:$0xff]  }
 0x1a6   : > { %2525 = vmatmul.mubr.bf16.gmra.mrb[176].mxu1 %v4866_v46  ;;  %4047 = vmatmul.mubr.msk.bf16.gmra.mrb[76].mxu0 %vm1992_vm1, %v4867_v48  ;;  %v4882_v46 = vld [vmem:[%s5119_s26 + $0x780] ss:$20 sps:$4 sm:$0xff]   ;;  %v4883_v48 = vld [vmem:[%s5119_s26 + $0x3a8] ss:$20 sps:$4 sm:$0xff]  }
 0x1a7   : > { %2532 = vmatprep.mubr.bf16.mxu1 %v4868_v52  ;;  %4050 = vmatprep.mubr.msk.bf16.mxu0 %vm4992_vm0, %v4991_v39 }
 0x1a9   : > { %v5550_v56 = vpop.f32.mrb[72].mxu1 }
 0x1aa   : > { %v2320_v57 = vpop.f32.mrb[73].mxu1 }
 0x1ab   : > { %v5554_v63 = vpop.f32.mrb[74].mxu1 }
 0x1ac   : > { %v2323_v4 = vpop.f32.mrb[75].mxu1 }
 0x1ad   : > { %v4887_v4 = vld [vmem:[%s5119_s26 + $0x3d0] ss:$20 sps:$4 sm:$0xff]  }
 0x1ae   : > { %2533 = vmatmul.mubr.bf16.gmra.mrb[180].mxu1 %v4870_v60  ;;  %4051 = vmatmul.mubr.msk.bf16.gmra.mrb[80].mxu0 %vm1992_vm1, %v4871_v62  ;;  %v4884_v62 = vld [vmem:[%s5119_s26 + $0x3f0] ss:$20 sps:$4 sm:$0xff]  }
 0x1af   : > { %2540 = vmatprep.mubr.bf16.mxu1 %v4872_v3  ;;  %4054 = vmatprep.mubr.msk.bf16.mxu0 %vm4992_vm0, %v4991_v39 }
 0x1b1   : > { %v5560_v7 = vpop.f32.mrb[76].mxu1 }
 0x1b2   : > { %v2328_v8 = vpop.f32.mrb[77].mxu1 }
 0x1b3   : > { %v5564_v14 = vpop.f32.mrb[78].mxu1 }
 0x1b4   : > { %v2331_v17 = vpop.f32.mrb[79].mxu1 }
 0x1b6   : > { %2541 = vmatmul.mubr.bf16.gmra.mrb[184].mxu1 %v4874_v10  ;;  %4055 = vmatmul.mubr.msk.bf16.gmra.mrb[84].mxu0 %vm1992_vm1, %v4875_v13  ;;  %v4888_v10 = vld [vmem:[%s5119_s26 + $0x41c] ss:$20 sps:$4 sm:$0xff]  }
 0x1b7   : > { %2548 = vmatprep.mubr.bf16.mxu1 %v4876_v1  ;;  %4058 = vmatprep.mubr.msk.bf16.mxu0 %vm4992_vm0, %v4991_v39 }
 0x1b9   : > { %v5570_v20 = vpop.f32.mrb[80].mxu1 }
 0x1ba   : > { %v2336_v23 = vpop.f32.mrb[81].mxu1 }
 0x1bb   : > { %v5574_v31 = vpop.f32.mrb[82].mxu1  ;;  %v4890_v23 = vld [vmem:[%s5119_s26 + $0x418] ss:$20 sps:$4 sm:$0xff]  }
 0x1bc   : > { %v2339_v37 = vpop.f32.mrb[83].mxu1 }
 0x1be   : > { %2549 = vmatmul.mubr.bf16.gmra.mrb[188].mxu1 %v4878_v26  ;;  %4059 = vmatmul.mubr.msk.bf16.gmra.mrb[88].mxu0 %vm1992_vm1, %v4879_v30  ;;  %v4891_v26 = vld [vmem:[%s5119_s26 + $0x3f8] ss:$20 sps:$4 sm:$0xff]  }
 0x1bf   : > { %2556 = vmatprep.mubr.bf16.mxu1 %v4880_v33  ;;  %4062 = vmatprep.mubr.msk.bf16.mxu0 %vm4992_vm0, %v4991_v39  ;;  %v4892_v33 = vld [vmem:[%s5119_s26 + $0x444] ss:$20 sps:$4 sm:$0xff]  }
 0x1c1   : > { %v5580_v41 = vpop.f32.mrb[84].mxu1 }
 0x1c2   : > { %v2344_v43 = vpop.f32.mrb[85].mxu1 }
 0x1c3   : > { %v5584_v52 = vpop.f32.mrb[86].mxu1 }
 0x1c4   : > { %v2347_v57 = vpop.f32.mrb[87].mxu1 }
 0x1c6   : > { %2557 = vmatmul.mubr.bf16.gmra.mrb[192].mxu1 %v4882_v46  ;;  %4063 = vmatmul.mubr.msk.bf16.gmra.mrb[92].mxu0 %vm1992_vm1, %v4883_v48  ;;  %v4894_v48 = vld [vmem:[%s5119_s26 + $0x440] ss:$20 sps:$4 sm:$0xff]  }
 0x1c7   : > { %2797 = vmatprep.mubr.bf16.mxu1 %v4886_v53  ;;  %4066 = vmatprep.mubr.msk.bf16.mxu0 %vm4992_vm0, %v4991_v39  ;;  %v4895_v53 = vld [vmem:[%s5119_s26 + $0x420] ss:$20 sps:$4 sm:$0xff]  }
 0x1c9   : > { %v5590_v60 = vpop.f32.mrb[88].mxu1 }
 0x1ca   : > { %v2352_v3 = vpop.f32.mrb[89].mxu1 }
 0x1cb   : > { %v5594_v8 = vpop.f32.mrb[90].mxu1 }
 0x1cc   : > { %v2355_v13 = vpop.f32.mrb[91].mxu1 }
 0x1ce   : > { %2798 = vmatmul.mubr.bf16.vlgmr.msra.gmra.mrb[100].mxu1 %v4884_v62  ;;  %4067 = vmatmul.mubr.msk.bf16.gmra.mrb[96].mxu0 %vm1992_vm1, %v4887_v4  ;;  %v4896_v62 = vld [vmem:[%s5119_s26 + $0x46c] ss:$20 sps:$4 sm:$0xff]  }
 0x1cf   : > { %2805 = vmatprep.mubr.bf16.mxu1 %v4888_v10  ;;  %4070 = vmatprep.mubr.msk.bf16.mxu0 %vm4992_vm0, %v4991_v39  ;;  %v5620_v4 = vld [vmem:[%s6014_s2] ss:$0 sm:$0xff] }
 0x1d0   : > { %v2175_v10 = vadd.f32 %v5620_v4, %v5370_v18 }
 0x1d1   : > { %v5600_v1 = vpop.f32.mrb[92].mxu1 }
 0x1d2   : > { %v2360_v17 = vpop.f32.mrb[93].mxu1 }
 0x1d3   : > { %v5604_v30 = vpop.f32.mrb[94].mxu1  ;;  %v4898_v17 = vld [vmem:[%s5119_s26 + $0x468] ss:$20 sps:$4 sm:$0xff]  }
 0x1d4   : > { %v2363_v37 = vpop.f32.mrb[95].mxu1 }
 0x1d5   : > { %v4899_v37 = vld [vmem:[%s5119_s26 + $0x448] ss:$20 sps:$4 sm:$0xff]  }
 0x1d6   : > { %2806 = vmatmul.mubr.bf16.gmra.mrb[104].mxu1 %v4890_v23  ;;  %4071 = vmatmul.mubr.msk.bf16.gmra.mrb[100].mxu0 %vm1992_vm1, %v4891_v26  ;;  %v2178_v23 = vadd.f32 %v5620_v4, %v5374_v22  ;;  %v2183_v22 = vadd.f32 %v5620_v4, %v5380_v25  ;;  %v2191_v25 = vadd.f32 %v5620_v4, %v5390_v32 }
 0x1d7   : > { %2813 = vmatprep.mubr.bf16.mxu1 %v4892_v33  ;;  %4074 = vmatprep.mubr.msk.bf16.mxu0 %vm4992_vm0, %v4991_v39  ;;  %v2199_v32 = vadd.f32 %v5620_v4, %v5400_v40  ;;  %v2207_v40 = vadd.f32 %v5620_v4, %v5410_v47  ;;  %v2215_v47 = vadd.f32 %v5620_v4, %v5420_v54 }
 0x1d8   : > { %v2223_v54 = vadd.f32 %v5620_v4, %v5430_v61  ;;  %v2231_v61 = vadd.f32 %v5620_v4, %v5440_v5  ;;  %v2239_v5 = vadd.f32 %v5620_v4, %v5450_v12  ;;  %v2247_v12 = vadd.f32 %v5620_v4, %v5460_v19 }
 0x1d9   : > { %v5610_v43 = vpop.f32.mrb[96].mxu1  ;;  %v2255_v19 = vadd.f32 %v5620_v4, %v5470_v28  ;;  %v2263_v28 = vadd.f32 %v5620_v4, %v5480_v38  ;;  %v2271_v38 = vadd.f32 %v5620_v4, %v5490_v49  ;;  %v2279_v49 = vadd.f32 %v5620_v4, %v5500_v59 }
 0x1da   : > { %v2368_v46 = vpop.f32.mrb[97].mxu1  ;;  %v2287_v59 = vadd.f32 %v5620_v4, %v5510_v6  ;;  %v2295_v6 = vadd.f32 %v5620_v4, %v5520_v15  ;;  %v2303_v15 = vadd.f32 %v5620_v4, %v5530_v27  ;;  %v2311_v27 = vadd.f32 %v5620_v4, %v5540_v42 }
 0x1db   : > { %v5614_v57 = vpop.f32.mrb[98].mxu1  ;;  %v4900_v46 = vld [vmem:[%s5119_s26 + $0x494] ss:$20 sps:$4 sm:$0xff]   ;;  %v2319_v42 = vadd.f32 %v5620_v4, %v5550_v56  ;;  %v2327_v56 = vadd.f32 %v5620_v4, %v5560_v7  ;;  %v2335_v7 = vadd.f32 %v5620_v4, %v5570_v20  ;;  %v2343_v20 = vadd.f32 %v5620_v4, %v5580_v41 }
 0x1dc   : > { %v2371_v3 = vpop.f32.mrb[99].mxu1 }
 0x1dd   : > { %v4902_v3 = vld [vmem:[%s5119_s26 + $0x490] ss:$20 sps:$4 sm:$0xff]  }
 0x1de   : > { %2814 = vmatmul.mubr.bf16.gmra.mrb[108].mxu1 %v4894_v48  ;;  %4075 = vmatmul.mubr.msk.bf16.gmra.mrb[104].mxu0 %vm1992_vm1, %v4895_v53 }
 0x1df   : > { %2821 = vmatprep.mubr.bf16.mxu1 %v4896_v62  ;;  %4078 = vmatprep.mubr.msk.bf16.mxu0 %vm4992_vm0, %v4991_v39 }
 0x1e1   : > { %v3024_v13 = vpop.f32.mrb[0].mxu0 }
 0x1e2   : > { %v4199_v26 = vadd.f32 %v3024_v13, %v2175_v10  ;;  %v3972_v33 = vpop.f32.mrb[1].mxu0  ;;  %v2186_v10 = vadd.f32 %v5620_v4, %v5384_v29 }
 0x1e3   : > { %v3027_v48 = vpop.f32.mrb[2].mxu0 }
 0x1e4   : > { %3415 = vst [vmem:[%s5631_s21] sm:$0xff] %v4199_v26  ;;  %v4201_v18 = vadd.f32 %v3027_v48, %v2178_v23  ;;  %v3973_v53 = vpop.f32.mrb[3].mxu0  ;;  %v4904_v26 = vld [vmem:[%s5119_s26 + $0x4bc] ss:$20 sps:$4 sm:$0xff]   ;;  %v4906_v48 = vld [vmem:[%s5119_s26 + $0x4b8] ss:$20 sps:$4 sm:$0xff]  }
 0x1e6   : > { %2822 = vmatmul.mubr.bf16.gmra.mrb[112].mxu1 %v4898_v17  ;;  %3416 = vst [vmem:[%s5631_s21 + $0x8] sm:$0xff] %v4201_v18  ;;  %4079 = vmatmul.mubr.msk.bf16.gmra.mrb[108].mxu0 %vm1992_vm1, %v4899_v37  ;;  %v4903_v17 = vld [vmem:[%s5119_s26 + $0x470] ss:$20 sps:$4 sm:$0xff]   ;;  %v2194_v18 = vadd.f32 %v5620_v4, %v5394_v36 }
 0x1e7   : > { %2829 = vmatprep.mubr.bf16.mxu1 %v4900_v46  ;;  %4082 = vmatprep.mubr.msk.bf16.mxu0 %vm4992_vm0, %v4991_v39 }
 0x1e9   : > { %v3032_v62 = vpop.f32.mrb[4].mxu0 }
 0x1ea   : > { %v4203_v13 = vadd.f32 %v3032_v62, %v2183_v22  ;;  %v3976_v23 = vpop.f32.mrb[5].mxu0  ;;  %v4907_v62 = vld [vmem:[%s5119_s26 + $0x498] ss:$20 sps:$4 sm:$0xff]  }
 0x1eb   : > { %v3035_v33 = vpop.f32.mrb[6].mxu0 }
 0x1ec   : > { %3417 = vst [vmem:[%s5631_s21 + $0x10] sm:$0xff] %v4203_v13  ;;  %v4205_v37 = vadd.f32 %v3035_v33, %v2186_v10  ;;  %v3977_v46 = vpop.f32.mrb[7].mxu0 }
 0x1ed   : > { %v4911_v46 = vld [vmem:[%s5119_s26 + $0x4c0] ss:$20 sps:$4 sm:$0xff]  }
 0x1ee   : > { %2830 = vmatmul.mubr.bf16.gmra.mrb[116].mxu1 %v4902_v3  ;;  %3418 = vst [vmem:[%s5631_s21 + $0x18] sm:$0xff] %v4205_v37  ;;  %4083 = vmatmul.mubr.msk.bf16.gmra.mrb[112].mxu0 %vm1992_vm1, %v4903_v17  ;;  %v4908_v3 = vld [vmem:[%s5119_s26 + $0x4e4] ss:$20 sps:$4 sm:$0xff]   ;;  %v4910_v17 = vld [vmem:[%s5119_s26 + $0x4e0] ss:$20 sps:$4 sm:$0xff]  }
 0x1ef   : > { %2837 = vmatprep.mubr.bf16.mxu1 %v4904_v26  ;;  %4086 = vmatprep.mubr.msk.bf16.mxu0 %vm4992_vm0, %v4991_v39  ;;  %v2202_v26 = vadd.f32 %v5620_v4, %v5404_v44 }
 0x1f1   : > { %v3040_v29 = vpop.f32.mrb[8].mxu0 }
 0x1f2   : > { %v4207_v53 = vadd.f32 %v3040_v29, %v2191_v25  ;;  %v3980_v22 = vpop.f32.mrb[9].mxu0  ;;  %v4912_v25 = vld [vmem:[%s5119_s26 + $0x50c] ss:$20 sps:$4 sm:$0xff]  }
 0x1f3   : > { %v3043_v10 = vpop.f32.mrb[10].mxu0  ;;  %v2210_v22 = vadd.f32 %v5620_v4, %v5414_v51 }
 0x1f4   : > { %3419 = vst [vmem:[%s5631_s21 + $0x20] sm:$0xff] %v4207_v53  ;;  %v4209_v13 = vadd.f32 %v3043_v10, %v2194_v18  ;;  %v3981_v23 = vpop.f32.mrb[11].mxu0  ;;  %v4914_v53 = vld [vmem:[%s5119_s26 + $0x508] ss:$20 sps:$4 sm:$0xff]  }
 0x1f5   : > { %v4915_v10 = vld [vmem:[%s5119_s26 + $0x4e8] ss:$20 sps:$4 sm:$0xff]  }
 0x1f6   : > { %2838 = vmatmul.mubr.bf16.gmra.mrb[120].mxu1 %v4906_v48  ;;  %3420 = vst [vmem:[%s5631_s21 + $0x28] sm:$0xff] %v4209_v13  ;;  %4087 = vmatmul.mubr.msk.bf16.gmra.mrb[116].mxu0 %vm1992_vm1, %v4907_v62  ;;  %v4916_v13 = vld [vmem:[%s5119_s26 + $0x534] ss:$20 sps:$4 sm:$0xff]  }
 0x1f7   : > { %2845 = vmatprep.mubr.bf16.mxu1 %v4908_v3  ;;  %4090 = vmatprep.mubr.msk.bf16.mxu0 %vm4992_vm0, %v4991_v39 }
 0x1f9   : > { %v3048_v36 = vpop.f32.mrb[12].mxu0 }
 0x1fa   : > { %v4211_v33 = vadd.f32 %v3048_v36, %v2199_v32  ;;  %v3984_v37 = vpop.f32.mrb[13].mxu0 }
 0x1fb   : > { %v3051_v29 = vpop.f32.mrb[14].mxu0 }
 0x1fc   : > { %3421 = vst [vmem:[%s5631_s21 + $0x30] sm:$0xff] %v4211_v33  ;;  %v4213_v48 = vadd.f32 %v3051_v29, %v2202_v26  ;;  %v3985_v18 = vpop.f32.mrb[15].mxu0  ;;  %v2218_v26 = vadd.f32 %v5620_v4, %v5424_v58 }
 0x1fe   : > { %2846 = vmatmul.mubr.bf16.gmra.mrb[124].mxu1 %v4910_v17  ;;  %3422 = vst [vmem:[%s5631_s21 + $0x38] sm:$0xff] %v4213_v48  ;;  %4091 = vmatmul.mubr.msk.bf16.gmra.mrb[120].mxu0 %vm1992_vm1, %v4911_v46  ;;  %v4918_v17 = vld [vmem:[%s5119_s26 + $0x530] ss:$20 sps:$4 sm:$0xff]  }
 0x1ff   : > { %2853 = vmatprep.mubr.bf16.mxu1 %v4912_v25  ;;  %4094 = vmatprep.mubr.msk.bf16.mxu0 %vm4992_vm0, %v4991_v39  ;;  %v4919_v46 = vld [vmem:[%s5119_s26 + $0x510] ss:$20 sps:$4 sm:$0xff]  }
 0x200   : > { %v4920_v25 = vld [vmem:[%s5119_s26 + $0x55c] ss:$20 sps:$4 sm:$0xff]  }
 0x201   : > { %v3056_v44 = vpop.f32.mrb[16].mxu0 }
 0x202   : > { %v4215_v62 = vadd.f32 %v3056_v44, %v2207_v40  ;;  %v3988_v3 = vpop.f32.mrb[17].mxu0  ;;  %v4922_v40 = vld [vmem:[%s5119_s26 + $0x558] ss:$20 sps:$4 sm:$0xff]   ;;  %v2226_v44 = vadd.f32 %v5620_v4, %v5434_v2 }
 0x203   : > { %v3059_v23 = vpop.f32.mrb[18].mxu0  ;;  %v4924_v3 = vld [vmem:[%s5119_s26 + $0x584] ss:$20 sps:$4 sm:$0xff]  }
 0x204   : > { %3423 = vst [vmem:[%s5631_s21 + $0x40] sm:$0xff] %v4215_v62  ;;  %v4217_v32 = vadd.f32 %v3059_v23, %v2210_v22  ;;  %v3989_v36 = vpop.f32.mrb[19].mxu0  ;;  %v4923_v62 = vld [vmem:[%s5119_s26 + $0x538] ss:$20 sps:$4 sm:$0xff]  }
 0x205   : > { %v2234_v36 = vadd.f32 %v5620_v4, %v5444_v9 }
 0x206   : > { %2854 = vmatmul.mubr.bf16.gmra.mrb[128].mxu1 %v4914_v53  ;;  %3424 = vst [vmem:[%s5631_s21 + $0x48] sm:$0xff] %v4217_v32  ;;  %4095 = vmatmul.mubr.msk.bf16.gmra.mrb[124].mxu0 %vm1992_vm1, %v4915_v10  ;;  %v4926_v32 = vld [vmem:[%s5119_s26 + $0x580] ss:$20 sps:$4 sm:$0xff]  }
 0x207   : > { %2861 = vmatprep.mubr.bf16.mxu1 %v4916_v13  ;;  %4098 = vmatprep.mubr.msk.bf16.mxu0 %vm4992_vm0, %v4991_v39 }
 0x209   : > { %v3064_v51 = vpop.f32.mrb[20].mxu0 }
 0x20a   : > { %v4219_v33 = vadd.f32 %v3064_v51, %v2215_v47  ;;  %v3992_v37 = vpop.f32.mrb[21].mxu0 }
 0x20b   : > { %v3067_v29 = vpop.f32.mrb[22].mxu0 }
 0x20c   : > { %3425 = vst [vmem:[%s5631_s21 + $0x50] sm:$0xff] %v4219_v33  ;;  %v4221_v48 = vadd.f32 %v3067_v29, %v2218_v26  ;;  %v3993_v18 = vpop.f32.mrb[23].mxu0  ;;  %v4928_v26 = vld [vmem:[%s5119_s26 + $0x5ac] ss:$20 sps:$4 sm:$0xff]   ;;  %v2242_v29 = vadd.f32 %v5620_v4, %v5454_v16 }
 0x20e   : > { %2862 = vmatmul.mubr.bf16.gmra.mrb[132].mxu1 %v4918_v17  ;;  %3426 = vst [vmem:[%s5631_s21 + $0x58] sm:$0xff] %v4221_v48  ;;  %4099 = vmatmul.mubr.msk.bf16.gmra.mrb[128].mxu0 %vm1992_vm1, %v4919_v46  ;;  %v4927_v17 = vld [vmem:[%s5119_s26 + $0x560] ss:$20 sps:$4 sm:$0xff]  }
 0x20f   : > { %2869 = vmatprep.mubr.bf16.mxu1 %v4920_v25  ;;  %4102 = vmatprep.mubr.msk.bf16.mxu0 %vm4992_vm0, %v4991_v39  ;;  %v4930_v25 = vld [vmem:[%s5119_s26 + $0x5a8] ss:$20 sps:$4 sm:$0xff]  }
 0x211   : > { %v3072_v58 = vpop.f32.mrb[24].mxu0 }
 0x212   : > { %v4223_v53 = vadd.f32 %v3072_v58, %v2223_v54  ;;  %v3996_v22 = vpop.f32.mrb[25].mxu0  ;;  %v4931_v54 = vld [vmem:[%s5119_s26 + $0x588] ss:$20 sps:$4 sm:$0xff]  }
 0x213   : > { %v3075_v10 = vpop.f32.mrb[26].mxu0  ;;  %v4932_v58 = vld [vmem:[%s5119_s26 + $0x5d4] ss:$20 sps:$4 sm:$0xff]   ;;  %v4934_v22 = vld [vmem:[%s5119_s26 + $0x5d0] ss:$20 sps:$4 sm:$0xff]  }
 0x214   : > { %3427 = vst [vmem:[%s5631_s21 + $0x60] sm:$0xff] %v4223_v53  ;;  %v4225_v13 = vadd.f32 %v3075_v10, %v2226_v44  ;;  %v3997_v23 = vpop.f32.mrb[27].mxu0 }
 0x215   : > { %v4936_v23 = vld [vmem:[%s5119_s26 + $0x5fc] ss:$20 sps:$4 sm:$0xff]  }
 0x216   : > { %2870 = vmatmul.mubr.bf16.gmra.mrb[136].mxu1 %v4922_v40  ;;  %3428 = vst [vmem:[%s5631_s21 + $0x68] sm:$0xff] %v4225_v13  ;;  %4103 = vmatmul.mubr.msk.bf16.gmra.mrb[132].mxu0 %vm1992_vm1, %v4923_v62  ;;  %v2250_v62 = vadd.f32 %v5620_v4, %v5464_v24  ;;  %v4935_v13 = vld [vmem:[%s5119_s26 + $0x5b0] ss:$20 sps:$4 sm:$0xff]  }
 0x217   : > { %2877 = vmatprep.mubr.bf16.mxu1 %v4924_v3  ;;  %4106 = vmatprep.mubr.msk.bf16.mxu0 %vm4992_vm0, %v4991_v39 }
 0x219   : > { %v3080_v2 = vpop.f32.mrb[28].mxu0 }
 0x21a   : > { %v4227_v47 = vadd.f32 %v3080_v2, %v2231_v61  ;;  %v4000_v51 = vpop.f32.mrb[29].mxu0 }
 0x21b   : > { %v3083_v33 = vpop.f32.mrb[30].mxu0 }
 0x21c   : > { %3429 = vst [vmem:[%s5631_s21 + $0x70] sm:$0xff] %v4227_v47  ;;  %v4229_v37 = vadd.f32 %v3083_v33, %v2234_v36  ;;  %v4001_v46 = vpop.f32.mrb[31].mxu0  ;;  %v4938_v36 = vld [vmem:[%s5119_s26 + $0x5f8] ss:$20 sps:$4 sm:$0xff]   ;;  %v2258_v47 = vadd.f32 %v5620_v4, %v5474_v34 }
 0x21d   : > { %v4940_v33 = vld [vmem:[%s5119_s26 + $0x624] ss:$20 sps:$4 sm:$0xff]  }
 0x21e   : > { %2878 = vmatmul.mubr.bf16.gmra.mrb[140].mxu1 %v4926_v32  ;;  %3430 = vst [vmem:[%s5631_s21 + $0x78] sm:$0xff] %v4229_v37  ;;  %4107 = vmatmul.mubr.msk.bf16.gmra.mrb[136].mxu0 %vm1992_vm1, %v4927_v17 }
 0x21f   : > { %2885 = vmatprep.mubr.bf16.mxu1 %v4928_v26  ;;  %4110 = vmatprep.mubr.msk.bf16.mxu0 %vm4992_vm0, %v4991_v39  ;;  %v4939_v26 = vld [vmem:[%s5119_s26 + $0x5d8] ss:$20 sps:$4 sm:$0xff]  }
 0x221   : > { %v3088_v9 = vpop.f32.mrb[32].mxu0 }
 0x222   : > { %v4231_v48 = vadd.f32 %v3088_v9, %v2239_v5  ;;  %v4004_v18 = vpop.f32.mrb[33].mxu0  ;;  %v4942_v9 = vld [vmem:[%s5119_s26 + $0x620] ss:$20 sps:$4 sm:$0xff]  }
 0x223   : > { %v3091_v40 = vpop.f32.mrb[34].mxu0  ;;  %v4943_v18 = vld [vmem:[%s5119_s26 + $0x600] ss:$20 sps:$4 sm:$0xff]  }
 0x224   : > { %3431 = vst [vmem:[%s5631_s21 + $0x80] sm:$0xff] %v4231_v48  ;;  %v4233_v44 = vadd.f32 %v3091_v40, %v2242_v29  ;;  %v4005_v53 = vpop.f32.mrb[35].mxu0 }
 0x225   : > { %v4946_v53 = vld [vmem:[%s5119_s26 + $0x648] ss:$20 sps:$4 sm:$0xff]  }
 0x226   : > { %2886 = vmatmul.mubr.bf16.gmra.mrb[144].mxu1 %v4930_v25  ;;  %3432 = vst [vmem:[%s5631_s21 + $0x88] sm:$0xff] %v4233_v44  ;;  %4111 = vmatmul.mubr.msk.bf16.gmra.mrb[140].mxu0 %vm1992_vm1, %v4931_v54  ;;  %v2266_v25 = vadd.f32 %v5620_v4, %v5484_v45  ;;  %v4944_v54 = vld [vmem:[%s5119_s26 + $0x64c] ss:$20 sps:$4 sm:$0xff]  }
 0x227   : > { %2893 = vmatprep.mubr.bf16.mxu1 %v4932_v58  ;;  %4114 = vmatprep.mubr.msk.bf16.mxu0 %vm4992_vm0, %v4991_v39 }
 0x229   : > { %v3096_v16 = vpop.f32.mrb[36].mxu0 }
 0x22a   : > { %v4235_v3 = vadd.f32 %v3096_v16, %v2247_v12  ;;  %v4008_v10 = vpop.f32.mrb[37].mxu0  ;;  %v2274_v12 = vadd.f32 %v5620_v4, %v5494_v55 }
 0x22b   : > { %v3099_v61 = vpop.f32.mrb[38].mxu0 }
 0x22c   : > { %3433 = vst [vmem:[%s5631_s21 + $0x90] sm:$0xff] %v4235_v3  ;;  %v4237_v2 = vadd.f32 %v3099_v61, %v2250_v62  ;;  %v4009_v32 = vpop.f32.mrb[39].mxu0  ;;  %v4947_v62 = vld [vmem:[%s5119_s26 + $0x628] ss:$20 sps:$4 sm:$0xff]   ;;  %v4950_v61 = vld [vmem:[%s5119_s26 + $0x670] ss:$20 sps:$4 sm:$0xff]  }
 0x22d   : > { %v4948_v3 = vld [vmem:[%s5119_s26 + $0x674] ss:$20 sps:$4 sm:$0xff]  }
 0x22e   : > { %2894 = vmatmul.mubr.bf16.gmra.mrb[148].mxu1 %v4934_v22  ;;  %3434 = vst [vmem:[%s5631_s21 + $0x98] sm:$0xff] %v4237_v2  ;;  %4115 = vmatmul.mubr.msk.bf16.gmra.mrb[144].mxu0 %vm1992_vm1, %v4935_v13  ;;  %v2282_v2 = vadd.f32 %v5620_v4, %v5504_v0 }
 0x22f   : > { %2901 = vmatprep.mubr.bf16.mxu1 %v4936_v23  ;;  %4118 = vmatprep.mubr.msk.bf16.mxu0 %vm4992_vm0, %v4991_v39 }
 0x231   : > { %v3104_v24 = vpop.f32.mrb[40].mxu0 }
 0x232   : > { %v4239_v51 = vadd.f32 %v3104_v24, %v2255_v19  ;;  %v4012_v17 = vpop.f32.mrb[41].mxu0  ;;  %v4951_v24 = vld [vmem:[%s5119_s26 + $0x650] ss:$20 sps:$4 sm:$0xff]  }
 0x233   : > { %v3107_v37 = vpop.f32.mrb[42].mxu0 }
 0x234   : > { %3435 = vst [vmem:[%s5631_s21 + $0xa0] sm:$0xff] %v4239_v51  ;;  %v4241_v46 = vadd.f32 %v3107_v37, %v2258_v47  ;;  %v4013_v5 = vpop.f32.mrb[43].mxu0 }
 0x235   : > { %v4955_v5 = vld [vmem:[%s5119_s26 + $0x678] ss:$20 sps:$4 sm:$0xff]  }
 0x236   : > { %2902 = vmatmul.mubr.bf16.gmra.mrb[152].mxu1 %v4938_v36  ;;  %3436 = vst [vmem:[%s5631_s21 + $0xa8] sm:$0xff] %v4241_v46  ;;  %4119 = vmatmul.mubr.msk.bf16.gmra.mrb[148].mxu0 %vm1992_vm1, %v4939_v26  ;;  %v4952_v36 = vld [vmem:[%s5119_s26 + $0x69c] ss:$20 sps:$4 sm:$0xff]   ;;  %v4954_v26 = vld [vmem:[%s5119_s26 + $0x698] ss:$20 sps:$4 sm:$0xff]  }
 0x237   : > { %2909 = vmatprep.mubr.bf16.mxu1 %v4940_v33  ;;  %4122 = vmatprep.mubr.msk.bf16.mxu0 %vm4992_vm0, %v4991_v39  ;;  %v2290_v33 = vadd.f32 %v5620_v4, %v5514_v11 }
 0x239   : > { %v3112_v34 = vpop.f32.mrb[44].mxu0 }
 0x23a   : > { %v4243_v29 = vadd.f32 %v3112_v34, %v2263_v28  ;;  %v4016_v48 = vpop.f32.mrb[45].mxu0  ;;  %v4956_v28 = vld [vmem:[%s5119_s26 + $0x6c4] ss:$20 sps:$4 sm:$0xff]  }
 0x23b   : > { %v3115_v58 = vpop.f32.mrb[46].mxu0  ;;  %v2298_v48 = vadd.f32 %v5620_v4, %v5524_v21 }
 0x23c   : > { %3437 = vst [vmem:[%s5631_s21 + $0xb0] sm:$0xff] %v4243_v29  ;;  %v4245_v40 = vadd.f32 %v3115_v58, %v2266_v25  ;;  %v4017_v44 = vpop.f32.mrb[47].mxu0  ;;  %v4958_v29 = vld [vmem:[%s5119_s26 + $0x6c0] ss:$20 sps:$4 sm:$0xff]  }
 0x23d   : > { %v4959_v58 = vld [vmem:[%s5119_s26 + $0x6a0] ss:$20 sps:$4 sm:$0xff]  }
 0x23e   : > { %2910 = vmatmul.mubr.bf16.gmra.mrb[156].mxu1 %v4942_v9  ;;  %3438 = vst [vmem:[%s5631_s21 + $0xb8] sm:$0xff] %v4245_v40  ;;  %4123 = vmatmul.mubr.msk.bf16.gmra.mrb[152].mxu0 %vm1992_vm1, %v4943_v18  ;;  %v4960_v40 = vld [vmem:[%s5119_s26 + $0x6ec] ss:$20 sps:$4 sm:$0xff]  }
 0x23f   : > { %2917 = vmatprep.mubr.bf16.mxu1 %v4944_v54  ;;  %4126 = vmatprep.mubr.msk.bf16.mxu0 %vm4992_vm0, %v4991_v39 }
 0x241   : > { %v3120_v45 = vpop.f32.mrb[48].mxu0 }
 0x242   : > { %v4247_v16 = vadd.f32 %v3120_v45, %v2271_v38  ;;  %v4020_v22 = vpop.f32.mrb[49].mxu0 }
 0x243   : > { %v3123_v10 = vpop.f32.mrb[50].mxu0 }
 0x244   : > { %3439 = vst [vmem:[%s5631_s21 + $0xc0] sm:$0xff] %v4247_v16  ;;  %v4249_v13 = vadd.f32 %v3123_v10, %v2274_v12  ;;  %v4021_v23 = vpop.f32.mrb[51].mxu0  ;;  %v2306_v12 = vadd.f32 %v5620_v4, %v5534_v35 }
 0x246   : > { %2918 = vmatmul.mubr.bf16.gmra.mrb[160].mxu1 %v4946_v53  ;;  %3440 = vst [vmem:[%s5631_s21 + $0xc8] sm:$0xff] %v4249_v13  ;;  %4127 = vmatmul.mubr.msk.bf16.gmra.mrb[156].mxu0 %vm1992_vm1, %v4947_v62  ;;  %v4962_v53 = vld [vmem:[%s5119_s26 + $0x6e8] ss:$20 sps:$4 sm:$0xff]  }
 0x247   : > { %2925 = vmatprep.mubr.bf16.mxu1 %v4948_v3  ;;  %4130 = vmatprep.mubr.msk.bf16.mxu0 %vm4992_vm0, %v4991_v39  ;;  %v4963_v62 = vld [vmem:[%s5119_s26 + $0x6c8] ss:$20 sps:$4 sm:$0xff]  }
 0x248   : > { %v4964_v3 = vld [vmem:[%s5119_s26 + $0x714] ss:$20 sps:$4 sm:$0xff]  }
 0x249   : > { %v3128_v55 = vpop.f32.mrb[52].mxu0 }
 0x24a   : > { %v4251_v32 = vadd.f32 %v3128_v55, %v2279_v49  ;;  %v4024_v19 = vpop.f32.mrb[53].mxu0  ;;  %v4966_v49 = vld [vmem:[%s5119_s26 + $0x710] ss:$20 sps:$4 sm:$0xff]   ;;  %v2314_v55 = vadd.f32 %v5620_v4, %v5544_v50 }
 0x24b   : > { %v3131_v47 = vpop.f32.mrb[54].mxu0  ;;  %v4968_v19 = vld [vmem:[%s5119_s26 + $0x73c] ss:$20 sps:$4 sm:$0xff]  }
 0x24c   : > { %3441 = vst [vmem:[%s5631_s21 + $0xd0] sm:$0xff] %v4251_v32  ;;  %v4253_v51 = vadd.f32 %v3131_v47, %v2282_v2  ;;  %v4025_v17 = vpop.f32.mrb[55].mxu0  ;;  %v4967_v32 = vld [vmem:[%s5119_s26 + $0x6f0] ss:$20 sps:$4 sm:$0xff]  }
 0x24d   : > { %v2322_v17 = vadd.f32 %v5620_v4, %v5554_v63 }
 0x24e   : > { %2926 = vmatmul.mubr.bf16.gmra.mrb[164].mxu1 %v4950_v61  ;;  %3442 = vst [vmem:[%s5631_s21 + $0xd8] sm:$0xff] %v4253_v51  ;;  %4131 = vmatmul.mubr.msk.bf16.gmra.mrb[160].mxu0 %vm1992_vm1, %v4951_v24  ;;  %v4970_v51 = vld [vmem:[%s5119_s26 + $0x738] ss:$20 sps:$4 sm:$0xff]  }
 0x24f   : > { %2933 = vmatprep.mubr.bf16.mxu1 %v4952_v36  ;;  %4134 = vmatprep.mubr.msk.bf16.mxu0 %vm4992_vm0, %v4991_v39 }
 0x251   : > { %v3136_v0 = vpop.f32.mrb[56].mxu0 }
 0x252   : > { %v4255_v37 = vadd.f32 %v3136_v0, %v2287_v59  ;;  %v4028_v46 = vpop.f32.mrb[57].mxu0 }
 0x253   : > { %v3139_v34 = vpop.f32.mrb[58].mxu0 }
 0x254   : > { %3443 = vst [vmem:[%s5631_s21 + $0xe0] sm:$0xff] %v4255_v37  ;;  %v4257_v9 = vadd.f32 %v3139_v34, %v2290_v33  ;;  %v4029_v25 = vpop.f32.mrb[59].mxu0  ;;  %v4972_v33 = vld [vmem:[%s5119_s26 + $0x764] ss:$20 sps:$4 sm:$0xff]   ;;  %v2330_v34 = vadd.f32 %v5620_v4, %v5564_v14 }
 0x256   : > { %2934 = vmatmul.mubr.bf16.gmra.mrb[168].mxu1 %v4954_v26  ;;  %3444 = vst [vmem:[%s5631_s21 + $0xe8] sm:$0xff] %v4257_v9  ;;  %4135 = vmatmul.mubr.msk.bf16.gmra.mrb[164].mxu0 %vm1992_vm1, %v4955_v5  ;;  %v4971_v26 = vld [vmem:[%s5119_s26 + $0x718] ss:$20 sps:$4 sm:$0xff]  }
 0x257   : > { %2941 = vmatprep.mubr.bf16.mxu1 %v4956_v28  ;;  %4138 = vmatprep.mubr.msk.bf16.mxu0 %vm4992_vm0, %v4991_v39  ;;  %v4974_v28 = vld [vmem:[%s5119_s26 + $0x760] ss:$20 sps:$4 sm:$0xff]  }
 0x259   : > { %v3144_v11 = vpop.f32.mrb[60].mxu0 }
 0x25a   : > { %v4259_v18 = vadd.f32 %v3144_v11, %v2295_v6  ;;  %v4032_v54 = vpop.f32.mrb[61].mxu0  ;;  %v4975_v6 = vld [vmem:[%s5119_s26 + $0x740] ss:$20 sps:$4 sm:$0xff]  }
 0x25b   : > { %v3147_v44 = vpop.f32.mrb[62].mxu0  ;;  %v4976_v11 = vld [vmem:[%s5119_s26 + $0x78c] ss:$20 sps:$4 sm:$0xff]   ;;  %v4978_v54 = vld [vmem:[%s5119_s26 + $0x788] ss:$20 sps:$4 sm:$0xff]  }
 0x25c   : > { %3445 = vst [vmem:[%s5631_s21 + $0xf0] sm:$0xff] %v4259_v18  ;;  %v4261_v38 = vadd.f32 %v3147_v44, %v2298_v48  ;;  %v4033_v45 = vpop.f32.mrb[63].mxu0 }
 0x25e   : > { %2942 = vmatmul.mubr.bf16.gmra.mrb[172].mxu1 %v4958_v29  ;;  %3446 = vst [vmem:[%s5631_s21 + $0xf8] sm:$0xff] %v4261_v38  ;;  %4139 = vmatmul.mubr.msk.bf16.gmra.mrb[168].mxu0 %vm1992_vm1, %v4959_v58  ;;  %v2338_v58 = vadd.f32 %v5620_v4, %v5574_v31  ;;  %v4979_v38 = vld [vmem:[%s5119_s26 + $0x768] ss:$20 sps:$4 sm:$0xff]  }
 0x25f   : > { %2949 = vmatprep.mubr.bf16.mxu1 %v4960_v40  ;;  %4142 = vmatprep.mubr.msk.bf16.mxu0 %vm4992_vm0, %v4991_v39 }
 0x261   : > { %v3152_v21 = vpop.f32.mrb[64].mxu0 }
 0x262   : > { %v4263_v16 = vadd.f32 %v3152_v21, %v2303_v15  ;;  %v4036_v22 = vpop.f32.mrb[65].mxu0 }
 0x263   : > { %v3155_v10 = vpop.f32.mrb[66].mxu0  ;;  %v4980_v22 = vld [vmem:[%s5119_s26 + $0x790] ss:$20 sps:$4 sm:$0xff]  }
 0x264   : > { %3447 = vst [vmem:[%s5631_s21 + $0x100] sm:$0xff] %v4263_v16  ;;  %v4265_v13 = vadd.f32 %v3155_v10, %v2306_v12  ;;  %v4037_v23 = vpop.f32.mrb[67].mxu0 }
 0x266   : > { %2950 = vmatmul.mubr.bf16.gmra.mrb[176].mxu1 %v4962_v53  ;;  %3448 = vst [vmem:[%s5631_s21 + $0x108] sm:$0xff] %v4265_v13  ;;  %4143 = vmatmul.mubr.msk.bf16.gmra.mrb[172].mxu0 %vm1992_vm1, %v4963_v62  ;;  %v2346_v53 = vadd.f32 %v5620_v4, %v5584_v52  ;;  %v2354_v52 = vadd.f32 %v5620_v4, %v5594_v8 }
 0x267   : > { %2957 = vmatprep.mubr.bf16.mxu1 %v4964_v3  ;;  %4146 = vmatprep.mubr.msk.bf16.mxu0 %vm4992_vm0, %v4991_v39 }
 0x269   : > { %v3160_v35 = vpop.f32.mrb[68].mxu0 }
 0x26a   : > { %v4267_v61 = vadd.f32 %v3160_v35, %v2311_v27  ;;  %v4040_v2 = vpop.f32.mrb[69].mxu0 }
 0x26b   : > { %v3163_v24 = vpop.f32.mrb[70].mxu0 }
 0x26c   : > { %3449 = vst [vmem:[%s5631_s21 + $0x110] sm:$0xff] %v4267_v61  ;;  %v4269_v36 = vadd.f32 %v3163_v24, %v2314_v55  ;;  %v4041_v47 = vpop.f32.mrb[71].mxu0  ;;  %v2359_v55 = vadd.f32 %v5620_v4, %v5600_v1  ;;  %v2370_v1 = vadd.f32 %v5620_v4, %v5614_v57 }
 0x26e   : > { %2958 = vmatmul.mubr.bf16.gmra.mrb[180].mxu1 %v4966_v49  ;;  %3450 = vst [vmem:[%s5631_s21 + $0x118] sm:$0xff] %v4269_v36  ;;  %4147 = vmatmul.mubr.msk.bf16.gmra.mrb[176].mxu0 %vm1992_vm1, %v4967_v32  ;;  %v2367_v36 = vadd.f32 %v5620_v4, %v5610_v43 }
 0x26f   : > { %2965 = vmatprep.mubr.bf16.mxu1 %v4968_v19  ;;  %4150 = vmatprep.mubr.msk.bf16.mxu0 %vm4992_vm0, %v4991_v39 }
 0x271   : > { %v3168_v50 = vpop.f32.mrb[72].mxu0 }
 0x272   : > { %v4271_v59 = vadd.f32 %v3168_v50, %v2319_v42  ;;  %v4044_v0 = vpop.f32.mrb[73].mxu0 }
 0x273   : > { %v3171_v37 = vpop.f32.mrb[74].mxu0 }
 0x274   : > { %3451 = vst [vmem:[%s5631_s21 + $0x120] sm:$0xff] %v4271_v59  ;;  %v4273_v46 = vadd.f32 %v3171_v37, %v2322_v17  ;;  %v4045_v5 = vpop.f32.mrb[75].mxu0 }
 0x276   : > { %2966 = vmatmul.mubr.bf16.gmra.mrb[184].mxu1 %v4970_v51  ;;  %3452 = vst [vmem:[%s5631_s21 + $0x128] sm:$0xff] %v4273_v46  ;;  %4151 = vmatmul.mubr.msk.bf16.gmra.mrb[180].mxu0 %vm1992_vm1, %v4971_v26 }
 0x277   : > { %2973 = vmatprep.mubr.bf16.mxu1 %v4972_v33  ;;  %4154 = vmatprep.mubr.msk.bf16.mxu0 %vm4992_vm0, %v4991_v39 }
 0x279   : > { %v3176_v63 = vpop.f32.mrb[76].mxu0 }
 0x27a   : > { %v4275_v9 = vadd.f32 %v3176_v63, %v2327_v56  ;;  %v4048_v25 = vpop.f32.mrb[77].mxu0 }
 0x27b   : > { %v3179_v29 = vpop.f32.mrb[78].mxu0 }
 0x27c   : > { %3453 = vst [vmem:[%s5631_s21 + $0x130] sm:$0xff] %v4275_v9  ;;  %v4277_v48 = vadd.f32 %v3179_v29, %v2330_v34  ;;  %v4049_v18 = vpop.f32.mrb[79].mxu0 }
 0x27e   : > { %2974 = vmatmul.mubr.bf16.gmra.mrb[188].mxu1 %v4974_v28  ;;  %3454 = vst [vmem:[%s5631_s21 + $0x138] sm:$0xff] %v4277_v48  ;;  %4155 = vmatmul.mubr.msk.bf16.gmra.mrb[184].mxu0 %vm1992_vm1, %v4975_v6 }
 0x27f   : > { %2981 = vmatprep.mubr.bf16.mxu1 %v4976_v11  ;;  %4158 = vmatprep.mubr.msk.bf16.mxu0 %vm4992_vm0, %v4991_v39 }
 0x281   : > { %v3184_v14 = vpop.f32.mrb[80].mxu0 }
 0x282   : > { %v4279_v40 = vadd.f32 %v3184_v14, %v2335_v7  ;;  %v4052_v44 = vpop.f32.mrb[81].mxu0 }
 0x283   : > { %v3187_v45 = vpop.f32.mrb[82].mxu0 }
 0x284   : > { %3455 = vst [vmem:[%s5631_s21 + $0x140] sm:$0xff] %v4279_v40  ;;  %v4281_v15 = vadd.f32 %v3187_v45, %v2338_v58  ;;  %v4053_v21 = vpop.f32.mrb[83].mxu0 }
 0x286   : > { %2982 = vmatmul.mubr.bf16.gmra.mrb[192].mxu1 %v4978_v54  ;;  %3456 = vst [vmem:[%s5631_s21 + $0x148] sm:$0xff] %v4281_v15  ;;  %4159 = vmatmul.mubr.msk.bf16.gmra.mrb[188].mxu0 %vm1992_vm1, %v4979_v38 }
 0x287   : > { %4162 = vmatprep.mubr.msk.bf16.mxu0 %vm4992_vm0, %v4991_v39  ;;  %v2351_v39 = vadd.f32 %v5620_v4, %v5590_v60  ;;  %v2362_v60 = vadd.f32 %v5620_v4, %v5604_v30 }
 0x289   : > { %v3192_v31 = vpop.f32.mrb[84].mxu0 }
 0x28a   : > { %v4283_v12 = vadd.f32 %v3192_v31, %v2343_v20  ;;  %v4056_v16 = vpop.f32.mrb[85].mxu0 }
 0x28b   : > { %v3195_v62 = vpop.f32.mrb[86].mxu0 }
 0x28c   : > { %3457 = vst [vmem:[%s5631_s21 + $0x150] sm:$0xff] %v4283_v12  ;;  %v4285_v3 = vadd.f32 %v3195_v62, %v2346_v53  ;;  %v4057_v10 = vpop.f32.mrb[87].mxu0 }
 0x28e   : > { %3458 = vst [vmem:[%s5631_s21 + $0x158] sm:$0xff] %v4285_v3  ;;  %4163 = vmatmul.mubr.msk.bf16.gmra.mrb[192].mxu0 %vm1992_vm1, %v4980_v22 }
 0x291   : > { %v3200_v41 = vpop.f32.mrb[88].mxu0 }
 0x292   : > { %v4287_v13 = vadd.f32 %v3200_v41, %v2351_v39  ;;  %v4060_v23 = vpop.f32.mrb[89].mxu0 }
 0x293   : > { %v3203_v27 = vpop.f32.mrb[90].mxu0 }
 0x294   : > { %3459 = vst [vmem:[%s5631_s21 + $0x160] sm:$0xff] %v4287_v13  ;;  %v4289_v35 = vadd.f32 %v3203_v27, %v2354_v52  ;;  %v4061_v49 = vpop.f32.mrb[91].mxu0 }
 0x296   : > { %3460 = vst [vmem:[%s5631_s21 + $0x168] sm:$0xff] %v4289_v35 }
 0x299   : > { %v3208_v61 = vpop.f32.mrb[92].mxu0 }
 0x29a   : > { %v4291_v2 = vadd.f32 %v3208_v61, %v2359_v55  ;;  %v4064_v32 = vpop.f32.mrb[93].mxu0 }
 0x29b   : > { %v3211_v19 = vpop.f32.mrb[94].mxu0 }
 0x29c   : > { %3461 = vst [vmem:[%s5631_s21 + $0x170] sm:$0xff] %v4291_v2  ;;  %v4293_v8 = vadd.f32 %v3211_v19, %v2362_v60  ;;  %v4065_v24 = vpop.f32.mrb[95].mxu0 }
 0x29e   : > { %3462 = vst [vmem:[%s5631_s21 + $0x178] sm:$0xff] %v4293_v8 }
 0x2a1   : > { %v2799_v47 = vpop.f32.mrb[100].mxu1  ;;  %v3216_v42 = vpop.f32.mrb[96].mxu0 }
 0x2a2   : > { %v2801_v50 = vpop.f32.mrb[101].mxu1  ;;  %v4295_v51 = vadd.f32 %v3216_v42, %v2367_v36  ;;  %v4068_v30 = vpop.f32.mrb[97].mxu0  ;;  %v4298_v37 = vadd.f32 %v5620_v4, %v2799_v47 }
 0x2a3   : > { %v2802_v17 = vpop.f32.mrb[102].mxu1  ;;  %v3219_v59 = vpop.f32.mrb[98].mxu0 }
 0x2a4   : > { %v2804_v0 = vpop.f32.mrb[103].mxu1  ;;  %3463 = vst [vmem:[%s5631_s21 + $0x180] sm:$0xff] %v4295_v51  ;;  %v4297_v26 = vadd.f32 %v3219_v59, %v2370_v1  ;;  %v4069_v33 = vpop.f32.mrb[99].mxu0  ;;  %v4300_v56 = vadd.f32 %v5620_v4, %v2802_v17 }
 0x2a6   : > { %3464 = vst [vmem:[%s5631_s21 + $0x188] sm:$0xff] %v4297_v26 }
 0x2a9   : > { %v2807_v43 = vpop.f32.mrb[104].mxu1  ;;  %v3224_v46 = vpop.f32.mrb[100].mxu0 }
 0x2aa   : > { %v2809_v5 = vpop.f32.mrb[105].mxu1  ;;  %v4299_v63 = vadd.f32 %v4298_v37, %v3224_v46  ;;  %v4072_v57 = vpop.f32.mrb[101].mxu0  ;;  %v4302_v11 = vadd.f32 %v5620_v4, %v2807_v43 }
 0x2ab   : > { %v2810_v28 = vpop.f32.mrb[106].mxu1  ;;  %v3227_v34 = vpop.f32.mrb[102].mxu0 }
 0x2ac   : > { %v2812_v9 = vpop.f32.mrb[107].mxu1  ;;  %3465 = vst [vmem:[%s5631_s21 + $0x190] sm:$0xff] %v4299_v63  ;;  %v4301_v25 = vadd.f32 %v4300_v56, %v3227_v34  ;;  %v4073_v6 = vpop.f32.mrb[103].mxu0  ;;  %v4304_v7 = vadd.f32 %v5620_v4, %v2810_v28 }
 0x2ae   : > { %3466 = vst [vmem:[%s5631_s21 + $0x198] sm:$0xff] %v4301_v25 }
 0x2b1   : > { %v2815_v29 = vpop.f32.mrb[108].mxu1  ;;  %v3232_v48 = vpop.f32.mrb[104].mxu0 }
 0x2b2   : > { %v2817_v18 = vpop.f32.mrb[109].mxu1  ;;  %v4303_v14 = vadd.f32 %v4302_v11, %v3232_v48  ;;  %v4076_v54 = vpop.f32.mrb[105].mxu0  ;;  %v4306_v15 = vadd.f32 %v5620_v4, %v2815_v29 }
 0x2b3   : > { %v2818_v58 = vpop.f32.mrb[110].mxu1  ;;  %v3235_v40 = vpop.f32.mrb[106].mxu0 }
 0x2b4   : > { %v2820_v44 = vpop.f32.mrb[111].mxu1  ;;  %3467 = vst [vmem:[%s5631_s21 + $0x1a0] sm:$0xff] %v4303_v14  ;;  %v4305_v38 = vadd.f32 %v4304_v7, %v3235_v40  ;;  %v4077_v45 = vpop.f32.mrb[107].mxu0  ;;  %v4308_v53 = vadd.f32 %v5620_v4, %v2818_v58 }
 0x2b6   : > { %3468 = vst [vmem:[%s5631_s21 + $0x1a8] sm:$0xff] %v4305_v38 }
 0x2b9   : > { %v2823_v21 = vpop.f32.mrb[112].mxu1  ;;  %v3240_v20 = vpop.f32.mrb[108].mxu0 }
 0x2ba   : > { %v2825_v31 = vpop.f32.mrb[113].mxu1  ;;  %v4307_v12 = vadd.f32 %v4306_v15, %v3240_v20  ;;  %v4080_v16 = vpop.f32.mrb[109].mxu0  ;;  %v4310_v41 = vadd.f32 %v5620_v4, %v2823_v21 }
 0x2bb   : > { %v2826_v22 = vpop.f32.mrb[114].mxu1  ;;  %v3243_v62 = vpop.f32.mrb[110].mxu0 }
 0x2bc   : > { %v2828_v3 = vpop.f32.mrb[115].mxu1  ;;  %3469 = vst [vmem:[%s5631_s21 + $0x1b0] sm:$0xff] %v4307_v12  ;;  %v4309_v10 = vadd.f32 %v4308_v53, %v3243_v62  ;;  %v4081_v39 = vpop.f32.mrb[111].mxu0  ;;  %v4312_v27 = vadd.f32 %v5620_v4, %v2826_v22 }
 0x2bd   : > { %v5943_v3 = vld [vmem:[%s6014_s2] ss:$0 sm:$0xff] }
 0x2be   : > { %3470 = vst [vmem:[%s5631_s21 + $0x1b8] sm:$0xff] %v4309_v10 }
 0x2c1   : > { %v2831_v52 = vpop.f32.mrb[116].mxu1  ;;  %v3248_v13 = vpop.f32.mrb[112].mxu0 }
 0x2c2   : > { %v2833_v23 = vpop.f32.mrb[117].mxu1  ;;  %v4311_v35 = vadd.f32 %v4310_v41, %v3248_v13  ;;  %v4084_v49 = vpop.f32.mrb[113].mxu0  ;;  %v4314_v19 = vadd.f32 %v5620_v4, %v2831_v52 }
 0x2c3   : > { %v2834_v55 = vpop.f32.mrb[118].mxu1  ;;  %v3251_v61 = vpop.f32.mrb[114].mxu0 }
 0x2c4   : > { %v2836_v60 = vpop.f32.mrb[119].mxu1  ;;  %3471 = vst [vmem:[%s5631_s21 + $0x1c0] sm:$0xff] %v4311_v35  ;;  %v4313_v2 = vadd.f32 %v4312_v27, %v3251_v61  ;;  %v4085_v32 = vpop.f32.mrb[115].mxu0  ;;  %v4316_v47 = vadd.f32 %v5620_v4, %v2834_v55 }
 0x2c6   : > { %3472 = vst [vmem:[%s5631_s21 + $0x1c8] sm:$0xff] %v4313_v2 }
 0x2c9   : > { %v2839_v8 = vpop.f32.mrb[120].mxu1  ;;  %v3256_v24 = vpop.f32.mrb[116].mxu0 }
 0x2ca   : > { %v2841_v36 = vpop.f32.mrb[121].mxu1  ;;  %v4315_v42 = vadd.f32 %v4314_v19, %v3256_v24  ;;  %v4088_v50 = vpop.f32.mrb[117].mxu0  ;;  %v4318_v0 = vadd.f32 %v5620_v4, %v2839_v8 }
 0x2cb   : > { %v2842_v1 = vpop.f32.mrb[122].mxu1  ;;  %v3259_v51 = vpop.f32.mrb[118].mxu0 }
 0x2cc   : > { %v2844_v30 = vpop.f32.mrb[123].mxu1  ;;  %3473 = vst [vmem:[%s5631_s21 + $0x1d0] sm:$0xff] %v4315_v42  ;;  %v4317_v17 = vadd.f32 %v4316_v47, %v3259_v51  ;;  %v4089_v59 = vpop.f32.mrb[119].mxu0  ;;  %v4320_v43 = vadd.f32 %v5620_v4, %v2842_v1 }
 0x2ce   : > { %3474 = vst [vmem:[%s5631_s21 + $0x1d8] sm:$0xff] %v4317_v17 }
 0x2d1   : > { %v2847_v26 = vpop.f32.mrb[124].mxu1  ;;  %v3264_v33 = vpop.f32.mrb[120].mxu0 }
 0x2d2   : > { %v2849_v37 = vpop.f32.mrb[125].mxu1  ;;  %v4319_v46 = vadd.f32 %v4318_v0, %v3264_v33  ;;  %v4092_v5 = vpop.f32.mrb[121].mxu0  ;;  %v4322_v9 = vadd.f32 %v5620_v4, %v2847_v26 }
 0x2d3   : > { %v2850_v56 = vpop.f32.mrb[126].mxu1  ;;  %v3267_v63 = vpop.f32.mrb[122].mxu0 }
 0x2d4   : > { %v2852_v57 = vpop.f32.mrb[127].mxu1  ;;  %3475 = vst [vmem:[%s5631_s21 + $0x1e0] sm:$0xff] %v4319_v46  ;;  %v4321_v28 = vadd.f32 %v4320_v43, %v3267_v63  ;;  %v4093_v34 = vpop.f32.mrb[123].mxu0  ;;  %v4324_v29 = vadd.f32 %v5620_v4, %v2850_v56 }
 0x2d6   : > { %3476 = vst [vmem:[%s5631_s21 + $0x1e8] sm:$0xff] %v4321_v28 }
 0x2d9   : > { %v2855_v25 = vpop.f32.mrb[128].mxu1  ;;  %v3272_v6 = vpop.f32.mrb[124].mxu0 }
 0x2da   : > { %v2857_v11 = vpop.f32.mrb[129].mxu1  ;;  %v4323_v48 = vadd.f32 %v4322_v9, %v3272_v6  ;;  %v4096_v18 = vpop.f32.mrb[125].mxu0  ;;  %v4326_v44 = vadd.f32 %v5620_v4, %v2855_v25 }
 0x2db   : > { %v2858_v7 = vpop.f32.mrb[130].mxu1  ;;  %v3275_v14 = vpop.f32.mrb[126].mxu0 }
 0x2dc   : > { %v2860_v54 = vpop.f32.mrb[131].mxu1  ;;  %3477 = vst [vmem:[%s5631_s21 + $0x1f0] sm:$0xff] %v4323_v48  ;;  %v4325_v58 = vadd.f32 %v4324_v29, %v3275_v14  ;;  %v4097_v40 = vpop.f32.mrb[127].mxu0  ;;  %v4328_v21 = vadd.f32 %v5620_v4, %v2858_v7 }
 0x2de   : > { %3478 = vst [vmem:[%s5631_s21 + $0x1f8] sm:$0xff] %v4325_v58 }
 0x2e1   : > { %v2863_v38 = vpop.f32.mrb[132].mxu1  ;;  %v3280_v45 = vpop.f32.mrb[128].mxu0 }
 0x2e2   : > { %v2865_v15 = vpop.f32.mrb[133].mxu1  ;;  %v4327_v20 = vadd.f32 %v4326_v44, %v3280_v45  ;;  %v4100_v31 = vpop.f32.mrb[129].mxu0  ;;  %v4330_v10 = vadd.f32 %v5943_v3, %v2863_v38 }
 0x2e3   : > { %v2866_v53 = vpop.f32.mrb[134].mxu1  ;;  %v3283_v12 = vpop.f32.mrb[130].mxu0 }
 0x2e4   : > { %v2868_v16 = vpop.f32.mrb[135].mxu1  ;;  %3479 = vst [vmem:[%s5631_s21 + $0x200] sm:$0xff] %v4327_v20  ;;  %v4329_v22 = vadd.f32 %v4328_v21, %v3283_v12  ;;  %v4101_v62 = vpop.f32.mrb[131].mxu0  ;;  %v4332_v52 = vadd.f32 %v5943_v3, %v2866_v53 }
 0x2e6   : > { %3480 = vst [vmem:[%s5631_s21 + $0x208] sm:$0xff] %v4329_v22 }
 0x2e9   : > { %v2871_v39 = vpop.f32.mrb[136].mxu1  ;;  %v3288_v4 = vpop.f32.mrb[132].mxu0 }
 0x2ea   : > { %v2873_v41 = vpop.f32.mrb[137].mxu1  ;;  %v4331_v13 = vadd.f32 %v4330_v10, %v3288_v4  ;;  %v4104_v23 = vpop.f32.mrb[133].mxu0  ;;  %v4334_v60 = vadd.f32 %v5943_v3, %v2871_v39 }
 0x2eb   : > { %v2874_v27 = vpop.f32.mrb[138].mxu1  ;;  %v3291_v35 = vpop.f32.mrb[134].mxu0 }
 0x2ec   : > { %v2876_v49 = vpop.f32.mrb[139].mxu1  ;;  %3481 = vst [vmem:[%s5631_s21 + $0x210] sm:$0xff] %v4331_v13  ;;  %v4333_v55 = vadd.f32 %v4332_v52, %v3291_v35  ;;  %v4105_v61 = vpop.f32.mrb[135].mxu0  ;;  %v4336_v8 = vadd.f32 %v5943_v3, %v2874_v27 }
 0x2ee   : > { %3482 = vst [vmem:[%s5631_s21 + $0x218] sm:$0xff] %v4333_v55 }
 0x2f1   : > { %v2879_v2 = vpop.f32.mrb[140].mxu1  ;;  %v3296_v32 = vpop.f32.mrb[136].mxu0 }
 0x2f2   : > { %v2881_v19 = vpop.f32.mrb[141].mxu1  ;;  %v4335_v24 = vadd.f32 %v4334_v60, %v3296_v32  ;;  %v4108_v36 = vpop.f32.mrb[137].mxu0  ;;  %v4338_v30 = vadd.f32 %v5943_v3, %v2879_v2 }
 0x2f3   : > { %v2882_v47 = vpop.f32.mrb[142].mxu1  ;;  %v3299_v42 = vpop.f32.mrb[138].mxu0 }
 0x2f4   : > { %v2884_v50 = vpop.f32.mrb[143].mxu1  ;;  %3483 = vst [vmem:[%s5631_s21 + $0x220] sm:$0xff] %v4335_v24  ;;  %v4337_v1 = vadd.f32 %v4336_v8, %v3299_v42  ;;  %v4109_v51 = vpop.f32.mrb[139].mxu0  ;;  %v4340_v26 = vadd.f32 %v5943_v3, %v2882_v47 }
 0x2f6   : > { %3484 = vst [vmem:[%s5631_s21 + $0x228] sm:$0xff] %v4337_v1 }
 0x2f9   : > { %v2887_v17 = vpop.f32.mrb[144].mxu1  ;;  %v3304_v59 = vpop.f32.mrb[140].mxu0 }
 0x2fa   : > { %v2889_v0 = vpop.f32.mrb[145].mxu1  ;;  %v4339_v33 = vadd.f32 %v4338_v30, %v3304_v59  ;;  %v4112_v37 = vpop.f32.mrb[141].mxu0  ;;  %v4342_v57 = vadd.f32 %v5943_v3, %v2887_v17 }
 0x2fb   : > { %v2890_v43 = vpop.f32.mrb[146].mxu1  ;;  %v3307_v46 = vpop.f32.mrb[142].mxu0 }
 0x2fc   : > { %v2892_v5 = vpop.f32.mrb[147].mxu1  ;;  %3485 = vst [vmem:[%s5631_s21 + $0x230] sm:$0xff] %v4339_v33  ;;  %v4341_v56 = vadd.f32 %v4340_v26, %v3307_v46  ;;  %v4113_v63 = vpop.f32.mrb[143].mxu0  ;;  %v4344_v25 = vadd.f32 %v5943_v3, %v2890_v43 }
 0x2fe   : > { %3486 = vst [vmem:[%s5631_s21 + $0x238] sm:$0xff] %v4341_v56 }
 0x301   : > { %v2895_v28 = vpop.f32.mrb[148].mxu1  ;;  %v3312_v34 = vpop.f32.mrb[144].mxu0 }
 0x302   : > { %v2897_v9 = vpop.f32.mrb[149].mxu1  ;;  %v4343_v6 = vadd.f32 %v4342_v57, %v3312_v34  ;;  %v4116_v11 = vpop.f32.mrb[145].mxu0  ;;  %v4346_v54 = vadd.f32 %v5943_v3, %v2895_v28 }
 0x303   : > { %v2898_v29 = vpop.f32.mrb[150].mxu1  ;;  %v3315_v48 = vpop.f32.mrb[146].mxu0 }
 0x304   : > { %v2900_v18 = vpop.f32.mrb[151].mxu1  ;;  %3487 = vst [vmem:[%s5631_s21 + $0x240] sm:$0xff] %v4343_v6  ;;  %v4345_v7 = vadd.f32 %v4344_v25, %v3315_v48  ;;  %v4117_v14 = vpop.f32.mrb[147].mxu0  ;;  %v4348_v38 = vadd.f32 %v5943_v3, %v2898_v29 }
 0x306   : > { %3488 = vst [vmem:[%s5631_s21 + $0x248] sm:$0xff] %v4345_v7 }
 0x309   : > { %v2903_v58 = vpop.f32.mrb[152].mxu1  ;;  %v3320_v40 = vpop.f32.mrb[148].mxu0 }
 0x30a   : > { %v2905_v44 = vpop.f32.mrb[153].mxu1  ;;  %v4347_v45 = vadd.f32 %v4346_v54, %v3320_v40  ;;  %v4120_v15 = vpop.f32.mrb[149].mxu0  ;;  %v4350_v16 = vadd.f32 %v5943_v3, %v2903_v58 }
 0x30b   : > { %v2906_v21 = vpop.f32.mrb[154].mxu1  ;;  %v3323_v20 = vpop.f32.mrb[150].mxu0 }
 0x30c   : > { %v2908_v31 = vpop.f32.mrb[155].mxu1  ;;  %3489 = vst [vmem:[%s5631_s21 + $0x250] sm:$0xff] %v4347_v45  ;;  %v4349_v53 = vadd.f32 %v4348_v38, %v3323_v20  ;;  %v4121_v12 = vpop.f32.mrb[151].mxu0  ;;  %v4352_v39 = vadd.f32 %v5943_v3, %v2906_v21 }
 0x30e   : > { %3490 = vst [vmem:[%s5631_s21 + $0x258] sm:$0xff] %v4349_v53 }
 0x311   : > { %v2911_v22 = vpop.f32.mrb[156].mxu1  ;;  %v3328_v62 = vpop.f32.mrb[152].mxu0 }
 0x312   : > { %v2913_v10 = vpop.f32.mrb[157].mxu1  ;;  %v4351_v4 = vadd.f32 %v4350_v16, %v3328_v62  ;;  %v4124_v41 = vpop.f32.mrb[153].mxu0  ;;  %v4354_v49 = vadd.f32 %v5943_v3, %v2911_v22 }
 0x313   : > { %v2914_v52 = vpop.f32.mrb[158].mxu1  ;;  %v3331_v13 = vpop.f32.mrb[154].mxu0 }
 0x314   : > { %v2916_v23 = vpop.f32.mrb[159].mxu1  ;;  %3491 = vst [vmem:[%s5631_s21 + $0x260] sm:$0xff] %v4351_v4  ;;  %v4353_v27 = vadd.f32 %v4352_v39, %v3331_v13  ;;  %v4125_v35 = vpop.f32.mrb[155].mxu0  ;;  %v4356_v2 = vadd.f32 %v5943_v3, %v2914_v52 }
 0x316   : > { %3492 = vst [vmem:[%s5631_s21 + $0x268] sm:$0xff] %v4353_v27 }
 0x319   : > { %v2919_v55 = vpop.f32.mrb[160].mxu1  ;;  %v3336_v61 = vpop.f32.mrb[156].mxu0 }
 0x31a   : > { %v2921_v60 = vpop.f32.mrb[161].mxu1  ;;  %v4355_v32 = vadd.f32 %v4354_v49, %v3336_v61  ;;  %v4128_v19 = vpop.f32.mrb[157].mxu0  ;;  %v4358_v50 = vadd.f32 %v5943_v3, %v2919_v55 }
 0x31b   : > { %v2922_v8 = vpop.f32.mrb[162].mxu1  ;;  %v3339_v24 = vpop.f32.mrb[158].mxu0 }
 0x31c   : > { %v2924_v36 = vpop.f32.mrb[163].mxu1  ;;  %3493 = vst [vmem:[%s5631_s21 + $0x270] sm:$0xff] %v4355_v32  ;;  %v4357_v47 = vadd.f32 %v4356_v2, %v3339_v24  ;;  %v4129_v42 = vpop.f32.mrb[159].mxu0  ;;  %v4360_v17 = vadd.f32 %v5943_v3, %v2922_v8 }
 0x31e   : > { %3494 = vst [vmem:[%s5631_s21 + $0x278] sm:$0xff] %v4357_v47 }
 0x321   : > { %v2927_v1 = vpop.f32.mrb[164].mxu1  ;;  %v3344_v51 = vpop.f32.mrb[160].mxu0 }
 0x322   : > { %v2929_v30 = vpop.f32.mrb[165].mxu1  ;;  %v4359_v59 = vadd.f32 %v4358_v50, %v3344_v51  ;;  %v4132_v0 = vpop.f32.mrb[161].mxu0  ;;  %v4362_v5 = vadd.f32 %v5943_v3, %v2927_v1 }
 0x323   : > { %v2930_v26 = vpop.f32.mrb[166].mxu1  ;;  %v3347_v33 = vpop.f32.mrb[162].mxu0 }
 0x324   : > { %v2932_v37 = vpop.f32.mrb[167].mxu1  ;;  %3495 = vst [vmem:[%s5631_s21 + $0x280] sm:$0xff] %v4359_v59  ;;  %v4361_v43 = vadd.f32 %v4360_v17, %v3347_v33  ;;  %v4133_v46 = vpop.f32.mrb[163].mxu0  ;;  %v4364_v28 = vadd.f32 %v5943_v3, %v2930_v26 }
 0x326   : > { %3496 = vst [vmem:[%s5631_s21 + $0x288] sm:$0xff] %v4361_v43 }
 0x329   : > { %v2935_v56 = vpop.f32.mrb[168].mxu1  ;;  %v3352_v63 = vpop.f32.mrb[164].mxu0 }
 0x32a   : > { %v2937_v57 = vpop.f32.mrb[169].mxu1  ;;  %v4363_v34 = vadd.f32 %v4362_v5, %v3352_v63  ;;  %v4136_v9 = vpop.f32.mrb[165].mxu0  ;;  %v4366_v18 = vadd.f32 %v5943_v3, %v2935_v56 }
 0x32b   : > { %v2938_v25 = vpop.f32.mrb[170].mxu1  ;;  %v3355_v6 = vpop.f32.mrb[166].mxu0 }
 0x32c   : > { %v2940_v11 = vpop.f32.mrb[171].mxu1  ;;  %3497 = vst [vmem:[%s5631_s21 + $0x290] sm:$0xff] %v4363_v34  ;;  %v4365_v29 = vadd.f32 %v4364_v28, %v3355_v6  ;;  %v4137_v48 = vpop.f32.mrb[167].mxu0  ;;  %v4368_v58 = vadd.f32 %v5943_v3, %v2938_v25 }
 0x32e   : > { %3498 = vst [vmem:[%s5631_s21 + $0x298] sm:$0xff] %v4365_v29 }
 0x331   : > { %v2943_v7 = vpop.f32.mrb[172].mxu1  ;;  %v3360_v14 = vpop.f32.mrb[168].mxu0 }
 0x332   : > { %v2945_v54 = vpop.f32.mrb[173].mxu1  ;;  %v4367_v40 = vadd.f32 %v4366_v18, %v3360_v14  ;;  %v4140_v44 = vpop.f32.mrb[169].mxu0  ;;  %v4370_v31 = vadd.f32 %v5943_v3, %v2943_v7 }
 0x333   : > { %v2946_v38 = vpop.f32.mrb[174].mxu1  ;;  %v3363_v45 = vpop.f32.mrb[170].mxu0 }
 0x334   : > { %v2948_v15 = vpop.f32.mrb[175].mxu1  ;;  %3499 = vst [vmem:[%s5631_s21 + $0x2a0] sm:$0xff] %v4367_v40  ;;  %v4369_v21 = vadd.f32 %v4368_v58, %v3363_v45  ;;  %v4141_v20 = vpop.f32.mrb[171].mxu0  ;;  %v4372_v22 = vadd.f32 %v5943_v3, %v2946_v38 }
 0x336   : > { %3500 = vst [vmem:[%s5631_s21 + $0x2a8] sm:$0xff] %v4369_v21 }
 0x339   : > { %v2951_v53 = vpop.f32.mrb[176].mxu1  ;;  %v3368_v12 = vpop.f32.mrb[172].mxu0 }
 0x33a   : > { %v2953_v16 = vpop.f32.mrb[177].mxu1  ;;  %v4371_v62 = vadd.f32 %v4370_v31, %v3368_v12  ;;  %v4144_v10 = vpop.f32.mrb[173].mxu0  ;;  %v4374_v23 = vadd.f32 %v5943_v3, %v2951_v53 }
 0x33b   : > { %v2954_v39 = vpop.f32.mrb[178].mxu1  ;;  %v3371_v4 = vpop.f32.mrb[174].mxu0 }
 0x33c   : > { %v2956_v41 = vpop.f32.mrb[179].mxu1  ;;  %3501 = vst [vmem:[%s5631_s21 + $0x2b0] sm:$0xff] %v4371_v62  ;;  %v4373_v52 = vadd.f32 %v4372_v22, %v3371_v4  ;;  %v4145_v13 = vpop.f32.mrb[175].mxu0  ;;  %v4376_v55 = vadd.f32 %v5943_v3, %v2954_v39 }
 0x33e   : > { %3502 = vst [vmem:[%s5631_s21 + $0x2b8] sm:$0xff] %v4373_v52 }
 0x341   : > { %v2959_v27 = vpop.f32.mrb[180].mxu1  ;;  %v3376_v35 = vpop.f32.mrb[176].mxu0 }
 0x342   : > { %v2961_v49 = vpop.f32.mrb[181].mxu1  ;;  %v4375_v61 = vadd.f32 %v4374_v23, %v3376_v35  ;;  %v4148_v60 = vpop.f32.mrb[177].mxu0  ;;  %v4378_v36 = vadd.f32 %v5943_v3, %v2959_v27 }
 0x343   : > { %v2962_v2 = vpop.f32.mrb[182].mxu1  ;;  %v3379_v32 = vpop.f32.mrb[178].mxu0 }
 0x344   : > { %v2964_v19 = vpop.f32.mrb[183].mxu1  ;;  %3503 = vst [vmem:[%s5631_s21 + $0x2c0] sm:$0xff] %v4375_v61  ;;  %v4377_v8 = vadd.f32 %v4376_v55, %v3379_v32  ;;  %v4149_v24 = vpop.f32.mrb[179].mxu0  ;;  %v4380_v1 = vadd.f32 %v5943_v3, %v2962_v2 }
 0x346   : > { %3504 = vst [vmem:[%s5631_s21 + $0x2c8] sm:$0xff] %v4377_v8 }
 0x349   : > { %v2967_v47 = vpop.f32.mrb[184].mxu1  ;;  %v3384_v42 = vpop.f32.mrb[180].mxu0 }
 0x34a   : > { %v2969_v50 = vpop.f32.mrb[185].mxu1  ;;  %v4379_v51 = vadd.f32 %v4378_v36, %v3384_v42  ;;  %v4152_v30 = vpop.f32.mrb[181].mxu0  ;;  %v4382_v37 = vadd.f32 %v5943_v3, %v2967_v47 }
 0x34b   : > { %v2970_v17 = vpop.f32.mrb[186].mxu1  ;;  %v3387_v59 = vpop.f32.mrb[182].mxu0 }
 0x34c   : > { %v2972_v0 = vpop.f32.mrb[187].mxu1  ;;  %3505 = vst [vmem:[%s5631_s21 + $0x2d0] sm:$0xff] %v4379_v51  ;;  %v4381_v26 = vadd.f32 %v4380_v1, %v3387_v59  ;;  %v4153_v33 = vpop.f32.mrb[183].mxu0  ;;  %v4384_v56 = vadd.f32 %v5943_v3, %v2970_v17 }
 0x34e   : > { %3506 = vst [vmem:[%s5631_s21 + $0x2d8] sm:$0xff] %v4381_v26 }
 0x351   : > { %v2975_v43 = vpop.f32.mrb[188].mxu1  ;;  %v3392_v46 = vpop.f32.mrb[184].mxu0 }
 0x352   : > { %v2977_v5 = vpop.f32.mrb[189].mxu1  ;;  %v4383_v63 = vadd.f32 %v4382_v37, %v3392_v46  ;;  %v4156_v57 = vpop.f32.mrb[185].mxu0  ;;  %v4386_v11 = vadd.f32 %v5943_v3, %v2975_v43 }
 0x353   : > { %v2978_v28 = vpop.f32.mrb[190].mxu1  ;;  %v3395_v34 = vpop.f32.mrb[186].mxu0 }
 0x354   : > { %v2980_v9 = vpop.f32.mrb[191].mxu1  ;;  %3507 = vst [vmem:[%s5631_s21 + $0x2e0] sm:$0xff] %v4383_v63  ;;  %v4385_v25 = vadd.f32 %v4384_v56, %v3395_v34  ;;  %v4157_v6 = vpop.f32.mrb[187].mxu0  ;;  %v4388_v7 = vadd.f32 %v5943_v3, %v2978_v28 }
 0x356   : > { %3508 = vst [vmem:[%s5631_s21 + $0x2e8] sm:$0xff] %v4385_v25 }
 0x359   : > { %v2983_v29 = vpop.f32.mrb[192].mxu1  ;;  %v3400_v48 = vpop.f32.mrb[188].mxu0 }
 0x35a   : > { %v2985_v18 = vpop.f32.mrb[193].mxu1  ;;  %v4387_v14 = vadd.f32 %v4386_v11, %v3400_v48  ;;  %v4160_v54 = vpop.f32.mrb[189].mxu0  ;;  %v4390_v15 = vadd.f32 %v5943_v3, %v2983_v29 }
 0x35b   : > { %v2986_v58 = vpop.f32.mrb[194].mxu1  ;;  %v3403_v40 = vpop.f32.mrb[190].mxu0 }
 0x35c   : > { %v2988_v44 = vpop.f32.mrb[195].mxu1  ;;  %3509 = vst [vmem:[%s5631_s21 + $0x2f0] sm:$0xff] %v4387_v14  ;;  %v4389_v38 = vadd.f32 %v4388_v7, %v3403_v40  ;;  %v4161_v45 = vpop.f32.mrb[191].mxu0  ;;  %v4392_v20 = vadd.f32 %v5943_v3, %v2986_v58 }
 0x35e   : > { %3510 = vst [vmem:[%s5631_s21 + $0x2f8] sm:$0xff] %v4389_v38 }
 0x361   : > { %v3408_v21 = vpop.f32.mrb[192].mxu0 }
 0x362   : > { %v4391_v31 = vadd.f32 %v4390_v15, %v3408_v21  ;;  %v4164_v53 = vpop.f32.mrb[193].mxu0 }
 0x363   : > { %v3411_v12 = vpop.f32.mrb[194].mxu0 }
 0x364   : > { %3511 = vst [vmem:[%s5631_s21 + $0x300] sm:$0xff] %v4391_v31  ;;  %v4393_v16 = vadd.f32 %v4392_v20, %v3411_v12  ;;  %v4165_v22 = vpop.f32.mrb[195].mxu0 }
 0x366   : > { %3512 = vst [vmem:[%s5631_s21 + $0x308] sm:$0xff] %v4393_v16 }
 0x367 PF: > { %s13_s12 = sadd.s32 1, %s4988_s12  }
 0x368   : > { %p10_p4 = scmp.ge.s32.totalorder %s13_s12, 4  }
 0x36a   :  { %12 = sbr.rel (!%p10_p4) target bundleno = 1 (0x1), region = 62 }

</bundles_post_ra>
